<compile_context>
chip_gen: v7x
topology: tpu7x:2x2x1
jax: 0.10.0
libtpu: 0.0.40
codegen_flags: <defaults>
</compile_context>

<pallas_src>
import functools
import math

import jax
import jax.numpy as jnp
from jax import lax
from jax.experimental import pallas as pl
from jax.experimental.pallas import tpu as pltpu


K = 5      # conv kernel size
PAD = 2    # conv padding
C1 = 16    # conv1 output channels
C2 = 32    # conv2 output channels


def _max4(a, b, c, d):
    return jnp.maximum(jnp.maximum(a, b), jnp.maximum(c, d))


def _fused_cnn_kernel(smp_ref, qry_ref, w1_ref, b1_ref, w2_ref, b2_ref,
                      wl_ref, bl_ref, out_ref,
                      g1_ref, p1_ref, c1_ref, g2_ref, c2_ref, *, d):
    D = d
    W2 = D // 2            # spatial size after pool1
    W3 = D // 4            # spatial size after pool2
    S1 = D * D             # conv1 spatial positions
    S2 = W2 * W2           # conv2 spatial positions
    f32 = jnp.float32

    # ------------------------------------------------------------------
    # Stage 0: scatter the flattened sample into a zero-padded flat buffer
    #   g1[2 + Y*D + X] = H-padded sample[Y, X]   (W padding handled by masks)
    # ------------------------------------------------------------------
    g1_ref[...] = jnp.zeros_like(g1_ref)
    g1_ref[pl.ds(2 + 2 * D, S1), :] = smp_ref[0, :, :]           # (S1, 1)

    # ------------------------------------------------------------------
    # Stage 1: conv1 (1 -> 16, 5x5, pad 2) as in-kernel im2col + MXU matmul.
    # Column t = kh*K + kw of p1 is one contiguous shifted window of g1.
    # ------------------------------------------------------------------
    for kh in range(K):
        for kw in range(K):
            t = kh * K + kw
            p1_ref[:, t:t + 1] = g1_ref[pl.ds(kh * D + kw, S1), :]

    # Mask that re-creates the horizontal zero padding (wrap killer).
    xcol = lax.broadcasted_iota(jnp.int32, (S1, 1), 0) % D        # x of each row
    kwrow = lax.broadcasted_iota(jnp.int32, (1, K * K), 1) % K    # kw of each col
    pmask = (xcol >= (PAD - kwrow)) & (xcol < (D + PAD - kwrow))  # (S1, K*K)

    half = S1 // 2                       # split M to keep register pressure low
    for part in range(2):
        lo, hi = part * half, (part + 1) * half
        lhs = jnp.where(pmask[lo:hi, :], p1_ref[lo:hi, :], 0.0)
        a1 = jnp.dot(lhs, w1_ref[...], preferred_element_type=f32)
        c1_ref[lo:hi, :] = jnp.maximum(a1 + b1_ref[...], 0.0)     # bias + ReLU

    # ------------------------------------------------------------------
    # Stage 2: 2x2 max-pool of conv1, written straight into conv2's padded
    # flat input buffer g2 (same H-pad / W-wrap convention, C1 lanes).
    # ------------------------------------------------------------------
    g2_ref[...] = jnp.zeros_like(g2_ref)
    for y2 in range(W2):
        blocks = [c1_ref[pl.ds((2 * y2 + dy) * D + dx, W2, stride=2), :]
                  for dy in (0, 1) for dx in (0, 1)]              # 4 x (W2, C1)
        g2_ref[pl.ds(2 + (y2 + 2) * W2, W2), :] = _max4(*blocks)

    # ------------------------------------------------------------------
    # Stage 3: conv2 (16 -> 32, 5x5, pad 2) as 25 tap-decomposed MXU matmuls
    # accumulated in registers (avoids a big patch scratch).
    # ------------------------------------------------------------------
    x2col = lax.broadcasted_iota(jnp.int32, (S2, 1), 0) % W2
    acc2 = jnp.zeros((S2, C2), f32)
    for kw in range(K):
        valid = None
        if kw != PAD:
            valid = (x2col >= (PAD - kw)) & (x2col < (W2 + PAD - kw))
        for kh in range(K):
            t = kh * K + kw
            blk = g2_ref[pl.ds(kh * W2 + kw, S2), :]              # (S2, C1)
            if valid is not None:
                blk = jnp.where(valid, blk, 0.0)
            acc2 = acc2 + jnp.dot(blk, w2_ref[t * C1:(t + 1) * C1, :],
                                  preferred_element_type=f32)     # (S2, C2)
    c2_ref[...] = jnp.maximum(acc2 + b2_ref[...], 0.0)            # bias + ReLU

    # ------------------------------------------------------------------
    # Stage 4: 2x2 max-pool of conv2 fused with the Linear layer:
    # each pooled spatial position contributes one (1, C2) @ (C2, D*D) matmul.
    # ------------------------------------------------------------------
    wvec = bl_ref[...]                                            # (1, D*D)
    for y3 in range(W3):
        blocks = [c2_ref[pl.ds((2 * y3 + dy) * W2 + dx, W3, stride=2), :]
                  for dy in (0, 1) for dx in (0, 1)]              # 4 x (W3, C2)
        m = _max4(*blocks)                                        # (W3, C2)
        for x3 in range(W3):
            s = y3 * W3 + x3
            wvec = wvec + jnp.dot(m[x3:x3 + 1, :],
                                  wl_ref[s * C2:(s + 1) * C2, :],
                                  preferred_element_type=f32)

    # ------------------------------------------------------------------
    # Stage 5: per-query score <query, wvec> and a numerically-stable sigmoid.
    # ------------------------------------------------------------------
    q = qry_ref[0, :, :]                                          # (Q, D*D)
    scores = jnp.sum(q * wvec, axis=1, keepdims=True)             # (Q, 1)
    z = jnp.exp(-jnp.abs(scores))
    sig = jnp.where(scores >= 0.0, 1.0 / (1.0 + z), z / (1.0 + z))
    out_ref[0, :, :] = sig.astype(out_ref.dtype)


def init_params(key, input_dim):
    """Parameters in the PyTorch layouts (Conv2d / Linear defaults)."""
    def u(k, shape, fan_in):
        bound = 1.0 / math.sqrt(fan_in)
        return jax.random.uniform(k, shape, jnp.float32, -bound, bound)

    ks = jax.random.split(key, 6)
    cnn_out = C2 * (input_dim // 4) ** 2
    return {
        "w1": u(ks[0], (C1, 1, K, K), 1 * K * K),
        "b1": u(ks[1], (C1,), 1 * K * K),
        "w2": u(ks[2], (C2, C1, K, K), C1 * K * K),
        "b2": u(ks[3], (C2,), C1 * K * K),
        "wl": u(ks[4], (input_dim * input_dim, cnn_out), cnn_out),
        "bl": u(ks[5], (input_dim * input_dim,), cnn_out),
    }


def prepare_kernel_params(params, input_dim):
    """One-time re-layout of torch-format parameters into kernel layouts."""
    s3 = (input_dim // 4) ** 2
    dd = input_dim * input_dim
    # conv weights: rows ordered (kh, kw, ci) to match the in-kernel im2col.
    w1m = jnp.transpose(params["w1"], (2, 3, 1, 0)).reshape(K * K, C1)
    w2m = jnp.transpose(params["w2"], (2, 3, 1, 0)).reshape(K * K * C1, C2)
    # torch Linear weight wl[o, ci*s3 + s]  ->  wlm[s*C2 + ci, o]
    wlm = jnp.transpose(params["wl"].reshape(dd, C2, s3), (2, 1, 0)).reshape(
        s3 * C2, dd)
    return {
        "w1m": w1m, "b1": params["b1"].reshape(1, C1),
        "w2m": w2m, "b2": params["b2"].reshape(1, C2),
        "wlm": wlm, "bl": params["bl"].reshape(1, dd),
    }


@functools.partial(jax.jit, static_argnames=("input_dim",))
def cnn_module_forward(kparams, sample, query, *, input_dim):
    """sample: (B, 1, D, D), query: (B, Q, D*D)  ->  (B, Q, 1)."""
    D = input_dim
    assert D % 4 == 0, "input_dim must be divisible by 4 (two 2x2 max-pools)"
    B = sample.shape[0]
    Q = query.shape[1]
    S1 = D * D
    G1 = (D + 2) ** 2               # flat padded conv1 input
    G2 = (D // 2 + 2) ** 2          # flat padded conv2 input
    S2 = (D // 2) ** 2
    cnn_out = C2 * (D // 4) ** 2

    smp = sample.reshape(B, S1, 1)  # spatial on sublanes inside the kernel
    qry = query.reshape(B, Q, S1)   # == torch flatten(start_dim=2)

    kernel = functools.partial(_fused_cnn_kernel, d=D)
    return pl.pallas_call(
        kernel,
        out_shape=jax.ShapeDtypeStruct((B, Q, 1), jnp.float32),
        grid=(B,),
        in_specs=[
            pl.BlockSpec((1, S1, 1), lambda b: (b, 0, 0)),        # sample
            pl.BlockSpec((1, Q, S1), lambda b: (b, 0, 0)),        # query
            pl.BlockSpec((K * K, C1), lambda b: (0, 0)),          # conv1 weight
            pl.BlockSpec((1, C1), lambda b: (0, 0)),              # conv1 bias
            pl.BlockSpec((K * K * C1, C2), lambda b: (0, 0)),     # conv2 weight
            pl.BlockSpec((1, C2), lambda b: (0, 0)),              # conv2 bias
            pl.BlockSpec((cnn_out, S1), lambda b: (0, 0)),        # linear weight
            pl.BlockSpec((1, S1), lambda b: (0, 0)),              # linear bias
        ],
        out_specs=pl.BlockSpec((1, Q, 1), lambda b: (b, 0, 0)),
        scratch_shapes=[
            pltpu.VMEM((G1, 1), jnp.float32),        # g1: padded flat sample
            pltpu.VMEM((S1, K * K), jnp.float32),    # p1: conv1 im2col patches
            pltpu.VMEM((S1, C1), jnp.float32),       # c1: conv1 output (pre-pool)
            pltpu.VMEM((G2, C1), jnp.float32),       # g2: padded pooled-1
            pltpu.VMEM((S2, C2), jnp.float32),       # c2: conv2 output (pre-pool)
        ],
        compiler_params=pltpu.CompilerParams(
            dimension_semantics=("parallel",),
        ),
    )(smp, qry, kparams["w1m"], kparams["b1"], kparams["w2m"], kparams["b2"],
      kparams["wlm"], kparams["bl"])


if __name__ == "__main__":
    D = 16   # input_dim (divisible by 4)
    B = 2    # batch size
    Q = 8    # query size

    root = jax.random.PRNGKey(0)
    k_params, k_sample, k_query = jax.random.split(root, 3)

    params = init_params(k_params, D)              # torch-layout parameters
    kparams = prepare_kernel_params(params, D)     # one-time kernel layouts

    sample = jax.random.normal(k_sample, (B, 1, D, D), jnp.float32)
    query = jax.random.normal(k_query, (B, Q, D * D), jnp.float32)

    out = cnn_module_forward(kparams, sample, query, input_dim=D)
    out = jax.block_until_ready(out)

    assert out.shape == (B, Q, 1)
    assert bool(jnp.all(jnp.isfinite(out)))
    assert bool(jnp.all((out >= 0.0) & (out <= 1.0)))
    print("KERNEL_OK")
</pallas_src>

<mosaic_0001>
module attributes {stable_mosaic.version = 11 : i64} {
  func.func @_fused_cnn_kernel(%arg0: i32, %arg1: memref<1x256x1xf32, #tpu.memory_space<vmem>>, %arg2: memref<1x8x256xf32, #tpu.memory_space<vmem>>, %arg3: memref<25x16xf32, #tpu.memory_space<vmem>>, %arg4: memref<1x16xf32, #tpu.memory_space<vmem>>, %arg5: memref<400x32xf32, #tpu.memory_space<vmem>>, %arg6: memref<1x32xf32, #tpu.memory_space<vmem>>, %arg7: memref<512x256xf32, #tpu.memory_space<vmem>>, %arg8: memref<1x256xf32, #tpu.memory_space<vmem>>, %arg9: memref<1x8x1xf32, #tpu.memory_space<vmem>>, %arg10: memref<324x1xf32, #tpu.memory_space<vmem>>, %arg11: memref<256x25xf32, #tpu.memory_space<vmem>>, %arg12: memref<256x16xf32, #tpu.memory_space<vmem>>, %arg13: memref<100x16xf32, #tpu.memory_space<vmem>>, %arg14: memref<64x32xf32, #tpu.memory_space<vmem>>) attributes {dimension_semantics = [#tpu.dimension_semantics<parallel>], iteration_bounds = array<i64: 2>, scalar_prefetch = 0 : i64, scratch_operands = 5 : i64, tpu.core_type = #tpu.core_type<tc>, window_params = [{transform_indices = @transform_0, window_bounds = array<i64: 1, 256, 1>}, {transform_indices = @transform_1, window_bounds = array<i64: 1, 8, 256>}, {pipeline_mode = #tpu.pipeline_mode<synchronous>, transform_indices = @transform_2, window_bounds = array<i64: 25, 16>}, {pipeline_mode = #tpu.pipeline_mode<synchronous>, transform_indices = @transform_3, window_bounds = array<i64: 1, 16>}, {pipeline_mode = #tpu.pipeline_mode<synchronous>, transform_indices = @transform_4, window_bounds = array<i64: 400, 32>}, {pipeline_mode = #tpu.pipeline_mode<synchronous>, transform_indices = @transform_5, window_bounds = array<i64: 1, 32>}, {pipeline_mode = #tpu.pipeline_mode<synchronous>, transform_indices = @transform_6, window_bounds = array<i64: 512, 256>}, {pipeline_mode = #tpu.pipeline_mode<synchronous>, transform_indices = @transform_7, window_bounds = array<i64: 1, 256>}, {transform_indices = @transform_8, window_bounds = array<i64: 1, 8, 1>}]} {
    %cst = arith.constant 0.000000e+00 : f32
    %0 = vector.broadcast %cst : f32 to vector<324x1xf32>
    %c0 = arith.constant 0 : index
    %c0_0 = arith.constant 0 : index
    %1 = vector.load %arg10[%c0, %c0_0] : memref<324x1xf32, #tpu.memory_space<vmem>>, vector<324x1xf32>
    tpu.vector_store %arg10[%c0, %c0_0], %0 {strides = array<i32>} : memref<324x1xf32, #tpu.memory_space<vmem>>, vector<324x1xf32>,
    %c0_1 = arith.constant 0 : index
    %c0_2 = arith.constant 0 : index
    %c0_3 = arith.constant 0 : index
    %2 = vector.load %arg1[%c0_1, %c0_2, %c0_3] : memref<1x256x1xf32, #tpu.memory_space<vmem>>, vector<1x256x1xf32>
    %3 = vector.shape_cast %2 : vector<1x256x1xf32> to vector<256x1xf32>
    %c34 = arith.constant 34 : index
    %c0_4 = arith.constant 0 : index
    %4 = vector.load %arg10[%c34, %c0_4] : memref<324x1xf32, #tpu.memory_space<vmem>>, vector<256x1xf32>
    tpu.vector_store %arg10[%c34, %c0_4], %3 {strides = array<i32>} : memref<324x1xf32, #tpu.memory_space<vmem>>, vector<256x1xf32>,
    %c0_5 = arith.constant 0 : index
    %c0_6 = arith.constant 0 : index
    %5 = vector.load %arg10[%c0_5, %c0_6] : memref<324x1xf32, #tpu.memory_space<vmem>>, vector<256x1xf32>
    %c0_7 = arith.constant 0 : index
    %c0_8 = arith.constant 0 : index
    %6 = vector.load %arg11[%c0_7, %c0_8] : memref<256x25xf32, #tpu.memory_space<vmem>>, vector<256x1xf32>
    tpu.vector_store %arg11[%c0_7, %c0_8], %5 {strides = array<i32>} : memref<256x25xf32, #tpu.memory_space<vmem>>, vector<256x1xf32>,
    %c1 = arith.constant 1 : index
    %c0_9 = arith.constant 0 : index
    %7 = vector.load %arg10[%c1, %c0_9] : memref<324x1xf32, #tpu.memory_space<vmem>>, vector<256x1xf32>
    %c0_10 = arith.constant 0 : index
    %c1_11 = arith.constant 1 : index
    %8 = vector.load %arg11[%c0_10, %c1_11] : memref<256x25xf32, #tpu.memory_space<vmem>>, vector<256x1xf32>
    tpu.vector_store %arg11[%c0_10, %c1_11], %7 {strides = array<i32>} : memref<256x25xf32, #tpu.memory_space<vmem>>, vector<256x1xf32>,
    %c2 = arith.constant 2 : index
    %c0_12 = arith.constant 0 : index
    %9 = vector.load %arg10[%c2, %c0_12] : memref<324x1xf32, #tpu.memory_space<vmem>>, vector<256x1xf32>
    %c0_13 = arith.constant 0 : index
    %c2_14 = arith.constant 2 : index
    %10 = vector.load %arg11[%c0_13, %c2_14] : memref<256x25xf32, #tpu.memory_space<vmem>>, vector<256x1xf32>
    tpu.vector_store %arg11[%c0_13, %c2_14], %9 {strides = array<i32>} : memref<256x25xf32, #tpu.memory_space<vmem>>, vector<256x1xf32>,
    %c3 = arith.constant 3 : index
    %c0_15 = arith.constant 0 : index
    %11 = vector.load %arg10[%c3, %c0_15] : memref<324x1xf32, #tpu.memory_space<vmem>>, vector<256x1xf32>
    %c0_16 = arith.constant 0 : index
    %c3_17 = arith.constant 3 : index
    %12 = vector.load %arg11[%c0_16, %c3_17] : memref<256x25xf32, #tpu.memory_space<vmem>>, vector<256x1xf32>
    tpu.vector_store %arg11[%c0_16, %c3_17], %11 {strides = array<i32>} : memref<256x25xf32, #tpu.memory_space<vmem>>, vector<256x1xf32>,
    %c4 = arith.constant 4 : index
    %c0_18 = arith.constant 0 : index
    %13 = vector.load %arg10[%c4, %c0_18] : memref<324x1xf32, #tpu.memory_space<vmem>>, vector<256x1xf32>
    %c0_19 = arith.constant 0 : index
    %c4_20 = arith.constant 4 : index
    %14 = vector.load %arg11[%c0_19, %c4_20] : memref<256x25xf32, #tpu.memory_space<vmem>>, vector<256x1xf32>
    tpu.vector_store %arg11[%c0_19, %c4_20], %13 {strides = array<i32>} : memref<256x25xf32, #tpu.memory_space<vmem>>, vector<256x1xf32>,
    %c16 = arith.constant 16 : index
    %c0_21 = arith.constant 0 : index
    %15 = vector.load %arg10[%c16, %c0_21] : memref<324x1xf32, #tpu.memory_space<vmem>>, vector<256x1xf32>
    %c0_22 = arith.constant 0 : index
    %c5 = arith.constant 5 : index
    %16 = vector.load %arg11[%c0_22, %c5] : memref<256x25xf32, #tpu.memory_space<vmem>>, vector<256x1xf32>
    tpu.vector_store %arg11[%c0_22, %c5], %15 {strides = array<i32>} : memref<256x25xf32, #tpu.memory_space<vmem>>, vector<256x1xf32>,
    %c17 = arith.constant 17 : index
    %c0_23 = arith.constant 0 : index
    %17 = vector.load %arg10[%c17, %c0_23] : memref<324x1xf32, #tpu.memory_space<vmem>>, vector<256x1xf32>
    %c0_24 = arith.constant 0 : index
    %c6 = arith.constant 6 : index
    %18 = vector.load %arg11[%c0_24, %c6] : memref<256x25xf32, #tpu.memory_space<vmem>>, vector<256x1xf32>
    tpu.vector_store %arg11[%c0_24, %c6], %17 {strides = array<i32>} : memref<256x25xf32, #tpu.memory_space<vmem>>, vector<256x1xf32>,
    %c18 = arith.constant 18 : index
    %c0_25 = arith.constant 0 : index
    %19 = vector.load %arg10[%c18, %c0_25] : memref<324x1xf32, #tpu.memory_space<vmem>>, vector<256x1xf32>
    %c0_26 = arith.constant 0 : index
    %c7 = arith.constant 7 : index
    %20 = vector.load %arg11[%c0_26, %c7] : memref<256x25xf32, #tpu.memory_space<vmem>>, vector<256x1xf32>
    tpu.vector_store %arg11[%c0_26, %c7], %19 {strides = array<i32>} : memref<256x25xf32, #tpu.memory_space<vmem>>, vector<256x1xf32>,
    %c19 = arith.constant 19 : index
    %c0_27 = arith.constant 0 : index
    %21 = vector.load %arg10[%c19, %c0_27] : memref<324x1xf32, #tpu.memory_space<vmem>>, vector<256x1xf32>
    %c0_28 = arith.constant 0 : index
    %c8 = arith.constant 8 : index
    %22 = vector.load %arg11[%c0_28, %c8] : memref<256x25xf32, #tpu.memory_space<vmem>>, vector<256x1xf32>
    tpu.vector_store %arg11[%c0_28, %c8], %21 {strides = array<i32>} : memref<256x25xf32, #tpu.memory_space<vmem>>, vector<256x1xf32>,
    %c20 = arith.constant 20 : index
    %c0_29 = arith.constant 0 : index
    %23 = vector.load %arg10[%c20, %c0_29] : memref<324x1xf32, #tpu.memory_space<vmem>>, vector<256x1xf32>
    %c0_30 = arith.constant 0 : index
    %c9 = arith.constant 9 : index
    %24 = vector.load %arg11[%c0_30, %c9] : memref<256x25xf32, #tpu.memory_space<vmem>>, vector<256x1xf32>
    tpu.vector_store %arg11[%c0_30, %c9], %23 {strides = array<i32>} : memref<256x25xf32, #tpu.memory_space<vmem>>, vector<256x1xf32>,
    %c32 = arith.constant 32 : index
    %c0_31 = arith.constant 0 : index
    %25 = vector.load %arg10[%c32, %c0_31] : memref<324x1xf32, #tpu.memory_space<vmem>>, vector<256x1xf32>
    %c0_32 = arith.constant 0 : index
    %c10 = arith.constant 10 : index
    %26 = vector.load %arg11[%c0_32, %c10] : memref<256x25xf32, #tpu.memory_space<vmem>>, vector<256x1xf32>
    tpu.vector_store %arg11[%c0_32, %c10], %25 {strides = array<i32>} : memref<256x25xf32, #tpu.memory_space<vmem>>, vector<256x1xf32>,
    %c33 = arith.constant 33 : index
    %c0_33 = arith.constant 0 : index
    %27 = vector.load %arg10[%c33, %c0_33] : memref<324x1xf32, #tpu.memory_space<vmem>>, vector<256x1xf32>
    %c0_34 = arith.constant 0 : index
    %c11 = arith.constant 11 : index
    %28 = vector.load %arg11[%c0_34, %c11] : memref<256x25xf32, #tpu.memory_space<vmem>>, vector<256x1xf32>
    tpu.vector_store %arg11[%c0_34, %c11], %27 {strides = array<i32>} : memref<256x25xf32, #tpu.memory_space<vmem>>, vector<256x1xf32>,
    %c34_35 = arith.constant 34 : index
    %c0_36 = arith.constant 0 : index
    %29 = vector.load %arg10[%c34_35, %c0_36] : memref<324x1xf32, #tpu.memory_space<vmem>>, vector<256x1xf32>
    %c0_37 = arith.constant 0 : index
    %c12 = arith.constant 12 : index
    %30 = vector.load %arg11[%c0_37, %c12] : memref<256x25xf32, #tpu.memory_space<vmem>>, vector<256x1xf32>
    tpu.vector_store %arg11[%c0_37, %c12], %29 {strides = array<i32>} : memref<256x25xf32, #tpu.memory_space<vmem>>, vector<256x1xf32>,
    %c35 = arith.constant 35 : index
    %c0_38 = arith.constant 0 : index
    %31 = vector.load %arg10[%c35, %c0_38] : memref<324x1xf32, #tpu.memory_space<vmem>>, vector<256x1xf32>
    %c0_39 = arith.constant 0 : index
    %c13 = arith.constant 13 : index
    %32 = vector.load %arg11[%c0_39, %c13] : memref<256x25xf32, #tpu.memory_space<vmem>>, vector<256x1xf32>
    tpu.vector_store %arg11[%c0_39, %c13], %31 {strides = array<i32>} : memref<256x25xf32, #tpu.memory_space<vmem>>, vector<256x1xf32>,
    %c36 = arith.constant 36 : index
    %c0_40 = arith.constant 0 : index
    %33 = vector.load %arg10[%c36, %c0_40] : memref<324x1xf32, #tpu.memory_space<vmem>>, vector<256x1xf32>
    %c0_41 = arith.constant 0 : index
    %c14 = arith.constant 14 : index
    %34 = vector.load %arg11[%c0_41, %c14] : memref<256x25xf32, #tpu.memory_space<vmem>>, vector<256x1xf32>
    tpu.vector_store %arg11[%c0_41, %c14], %33 {strides = array<i32>} : memref<256x25xf32, #tpu.memory_space<vmem>>, vector<256x1xf32>,
    %c48 = arith.constant 48 : index
    %c0_42 = arith.constant 0 : index
    %35 = vector.load %arg10[%c48, %c0_42] : memref<324x1xf32, #tpu.memory_space<vmem>>, vector<256x1xf32>
    %c0_43 = arith.constant 0 : index
    %c15 = arith.constant 15 : index
    %36 = vector.load %arg11[%c0_43, %c15] : memref<256x25xf32, #tpu.memory_space<vmem>>, vector<256x1xf32>
    tpu.vector_store %arg11[%c0_43, %c15], %35 {strides = array<i32>} : memref<256x25xf32, #tpu.memory_space<vmem>>, vector<256x1xf32>,
    %c49 = arith.constant 49 : index
    %c0_44 = arith.constant 0 : index
    %37 = vector.load %arg10[%c49, %c0_44] : memref<324x1xf32, #tpu.memory_space<vmem>>, vector<256x1xf32>
    %c0_45 = arith.constant 0 : index
    %c16_46 = arith.constant 16 : index
    %38 = vector.load %arg11[%c0_45, %c16_46] : memref<256x25xf32, #tpu.memory_space<vmem>>, vector<256x1xf32>
    tpu.vector_store %arg11[%c0_45, %c16_46], %37 {strides = array<i32>} : memref<256x25xf32, #tpu.memory_space<vmem>>, vector<256x1xf32>,
    %c50 = arith.constant 50 : index
    %c0_47 = arith.constant 0 : index
    %39 = vector.load %arg10[%c50, %c0_47] : memref<324x1xf32, #tpu.memory_space<vmem>>, vector<256x1xf32>
    %c0_48 = arith.constant 0 : index
    %c17_49 = arith.constant 17 : index
    %40 = vector.load %arg11[%c0_48, %c17_49] : memref<256x25xf32, #tpu.memory_space<vmem>>, vector<256x1xf32>
    tpu.vector_store %arg11[%c0_48, %c17_49], %39 {strides = array<i32>} : memref<256x25xf32, #tpu.memory_space<vmem>>, vector<256x1xf32>,
    %c51 = arith.constant 51 : index
    %c0_50 = arith.constant 0 : index
    %41 = vector.load %arg10[%c51, %c0_50] : memref<324x1xf32, #tpu.memory_space<vmem>>, vector<256x1xf32>
    %c0_51 = arith.constant 0 : index
    %c18_52 = arith.constant 18 : index
    %42 = vector.load %arg11[%c0_51, %c18_52] : memref<256x25xf32, #tpu.memory_space<vmem>>, vector<256x1xf32>
    tpu.vector_store %arg11[%c0_51, %c18_52], %41 {strides = array<i32>} : memref<256x25xf32, #tpu.memory_space<vmem>>, vector<256x1xf32>,
    %c52 = arith.constant 52 : index
    %c0_53 = arith.constant 0 : index
    %43 = vector.load %arg10[%c52, %c0_53] : memref<324x1xf32, #tpu.memory_space<vmem>>, vector<256x1xf32>
    %c0_54 = arith.constant 0 : index
    %c19_55 = arith.constant 19 : index
    %44 = vector.load %arg11[%c0_54, %c19_55] : memref<256x25xf32, #tpu.memory_space<vmem>>, vector<256x1xf32>
    tpu.vector_store %arg11[%c0_54, %c19_55], %43 {strides = array<i32>} : memref<256x25xf32, #tpu.memory_space<vmem>>, vector<256x1xf32>,
    %c64 = arith.constant 64 : index
    %c0_56 = arith.constant 0 : index
    %45 = vector.load %arg10[%c64, %c0_56] : memref<324x1xf32, #tpu.memory_space<vmem>>, vector<256x1xf32>
    %c0_57 = arith.constant 0 : index
    %c20_58 = arith.constant 20 : index
    %46 = vector.load %arg11[%c0_57, %c20_58] : memref<256x25xf32, #tpu.memory_space<vmem>>, vector<256x1xf32>
    tpu.vector_store %arg11[%c0_57, %c20_58], %45 {strides = array<i32>} : memref<256x25xf32, #tpu.memory_space<vmem>>, vector<256x1xf32>,
    %c65 = arith.constant 65 : index
    %c0_59 = arith.constant 0 : index
    %47 = vector.load %arg10[%c65, %c0_59] : memref<324x1xf32, #tpu.memory_space<vmem>>, vector<256x1xf32>
    %c0_60 = arith.constant 0 : index
    %c21 = arith.constant 21 : index
    %48 = vector.load %arg11[%c0_60, %c21] : memref<256x25xf32, #tpu.memory_space<vmem>>, vector<256x1xf32>
    tpu.vector_store %arg11[%c0_60, %c21], %47 {strides = array<i32>} : memref<256x25xf32, #tpu.memory_space<vmem>>, vector<256x1xf32>,
    %c66 = arith.constant 66 : index
    %c0_61 = arith.constant 0 : index
    %49 = vector.load %arg10[%c66, %c0_61] : memref<324x1xf32, #tpu.memory_space<vmem>>, vector<256x1xf32>
    %c0_62 = arith.constant 0 : index
    %c22 = arith.constant 22 : index
    %50 = vector.load %arg11[%c0_62, %c22] : memref<256x25xf32, #tpu.memory_space<vmem>>, vector<256x1xf32>
    tpu.vector_store %arg11[%c0_62, %c22], %49 {strides = array<i32>} : memref<256x25xf32, #tpu.memory_space<vmem>>, vector<256x1xf32>,
    %c67 = arith.constant 67 : index
    %c0_63 = arith.constant 0 : index
    %51 = vector.load %arg10[%c67, %c0_63] : memref<324x1xf32, #tpu.memory_space<vmem>>, vector<256x1xf32>
    %c0_64 = arith.constant 0 : index
    %c23 = arith.constant 23 : index
    %52 = vector.load %arg11[%c0_64, %c23] : memref<256x25xf32, #tpu.memory_space<vmem>>, vector<256x1xf32>
    tpu.vector_store %arg11[%c0_64, %c23], %51 {strides = array<i32>} : memref<256x25xf32, #tpu.memory_space<vmem>>, vector<256x1xf32>,
    %c68 = arith.constant 68 : index
    %c0_65 = arith.constant 0 : index
    %53 = vector.load %arg10[%c68, %c0_65] : memref<324x1xf32, #tpu.memory_space<vmem>>, vector<256x1xf32>
    %c0_66 = arith.constant 0 : index
    %c24 = arith.constant 24 : index
    %54 = vector.load %arg11[%c0_66, %c24] : memref<256x25xf32, #tpu.memory_space<vmem>>, vector<256x1xf32>
    tpu.vector_store %arg11[%c0_66, %c24], %53 {strides = array<i32>} : memref<256x25xf32, #tpu.memory_space<vmem>>, vector<256x1xf32>,
    %55 = tpu.iota {dimensions = array<i32: 0>} : vector<256x1xi32>
    %c16_i32 = arith.constant 16 : i32
    %c0_i32 = arith.constant 0 : i32
    %56 = arith.cmpi eq, %c16_i32, %c0_i32 : i32
    %c1_i32 = arith.constant 1 : i32
    %57 = arith.select %56, %c1_i32, %c16_i32 : i32
    %58 = vector.broadcast %57 : i32 to vector<256x1xi32>
    %59 = arith.remsi %55, %58 : vector<256x1xi32>
    %c0_i32_67 = arith.constant 0 : i32
    %60 = vector.broadcast %c0_i32_67 : i32 to vector<256x1xi32>
    %61 = arith.cmpi ne, %59, %60 : vector<256x1xi32>
    %c0_i32_68 = arith.constant 0 : i32
    %62 = vector.broadcast %c0_i32_68 : i32 to vector<256x1xi32>
    %63 = arith.cmpi slt, %59, %62 : vector<256x1xi32>
    %c0_i32_69 = arith.constant 0 : i32
    %64 = arith.cmpi slt, %57, %c0_i32_69 : i32
    %65 = vector.broadcast %64 : i1 to vector<256x1xi1>
    %66 = vector.broadcast %65 : vector<256x1xi1> to vector<256x1xi1>
    %67 = arith.xori %63, %66 : vector<256x1xi1>
    %68 = arith.andi %67, %61 : vector<256x1xi1>
    %69 = vector.broadcast %57 : i32 to vector<256x1xi32>
    %70 = arith.addi %59, %69 : vector<256x1xi32>
    %71 = arith.select %68, %70, %59 : vector<256x1xi1>, vector<256x1xi32>
    %72 = tpu.iota {dimensions = array<i32: 1>} : vector<1x25xi32>
    %c5_i32 = arith.constant 5 : i32
    %c0_i32_70 = arith.constant 0 : i32
    %73 = arith.cmpi eq, %c5_i32, %c0_i32_70 : i32
    %c1_i32_71 = arith.constant 1 : i32
    %74 = arith.select %73, %c1_i32_71, %c5_i32 : i32
    %75 = vector.broadcast %74 : i32 to vector<1x25xi32>
    %76 = arith.remsi %72, %75 : vector<1x25xi32>
    %c0_i32_72 = arith.constant 0 : i32
    %77 = vector.broadcast %c0_i32_72 : i32 to vector<1x25xi32>
    %78 = arith.cmpi ne, %76, %77 : vector<1x25xi32>
    %c0_i32_73 = arith.constant 0 : i32
    %79 = vector.broadcast %c0_i32_73 : i32 to vector<1x25xi32>
    %80 = arith.cmpi slt, %76, %79 : vector<1x25xi32>
    %c0_i32_74 = arith.constant 0 : i32
    %81 = arith.cmpi slt, %74, %c0_i32_74 : i32
    %82 = vector.broadcast %81 : i1 to vector<1x25xi1>
    %83 = vector.broadcast %82 : vector<1x25xi1> to vector<1x25xi1>
    %84 = arith.xori %80, %83 : vector<1x25xi1>
    %85 = arith.andi %84, %78 : vector<1x25xi1>
    %86 = vector.broadcast %74 : i32 to vector<1x25xi32>
    %87 = arith.addi %76, %86 : vector<1x25xi32>
    %88 = arith.select %85, %87, %76 : vector<1x25xi1>, vector<1x25xi32>
    %c2_i32 = arith.constant 2 : i32
    %89 = vector.broadcast %c2_i32 : i32 to vector<1x25xi32>
    %90 = arith.subi %89, %88 : vector<1x25xi32>
    %91 = vector.broadcast %71 : vector<256x1xi32> to vector<256x25xi32>
    %92 = vector.broadcast %90 : vector<1x25xi32> to vector<256x25xi32>
    %93 = arith.cmpi sge, %91, %92 : vector<256x25xi32>
    %c18_i32 = arith.constant 18 : i32
    %94 = vector.broadcast %c18_i32 : i32 to vector<1x25xi32>
    %95 = arith.subi %94, %88 : vector<1x25xi32>
    %96 = vector.broadcast %71 : vector<256x1xi32> to vector<256x25xi32>
    %97 = vector.broadcast %95 : vector<1x25xi32> to vector<256x25xi32>
    %98 = arith.cmpi slt, %96, %97 : vector<256x25xi32>
    %99 = arith.andi %93, %98 : vector<256x25xi1>
    %100 = vector.extract_strided_slice %99 {offsets = [0, 0], sizes = [128, 25], strides = [1, 1]} : vector<256x25xi1> to vector<128x25xi1>
    %c0_75 = arith.constant 0 : index
    %c0_76 = arith.constant 0 : index
    %101 = vector.load %arg11[%c0_75, %c0_76] : memref<256x25xf32, #tpu.memory_space<vmem>>, vector<128x25xf32>
    %cst_77 = arith.constant 0.000000e+00 : f32
    %102 = vector.broadcast %cst_77 : f32 to vector<128x25xf32>
    %103 = arith.select %100, %101, %102 : vector<128x25xi1>, vector<128x25xf32>
    %c0_78 = arith.constant 0 : index
    %c0_79 = arith.constant 0 : index
    %104 = vector.load %arg3[%c0_78, %c0_79] : memref<25x16xf32, #tpu.memory_space<vmem>>, vector<25x16xf32>
    %cst_80 = arith.constant dense<0.000000e+00> : vector<128x16xf32>
    %105 = tpu.matmul %103, %104, %cst_80 {dimension_numbers = #tpu.dot_dimension_numbers<[1], [0], [0], [1], [0, 0, 1, 1], [], []>} : vector<128x25xf32>, vector<25x16xf32>, vector<128x16xf32> -> vector<128x16xf32>
    %c0_81 = arith.constant 0 : index
    %c0_82 = arith.constant 0 : index
    %106 = vector.load %arg4[%c0_81, %c0_82] : memref<1x16xf32, #tpu.memory_space<vmem>>, vector<1x16xf32>
    %107 = vector.broadcast %106 : vector<1x16xf32> to vector<128x16xf32>
    %108 = arith.addf %105, %107 : vector<128x16xf32>
    %cst_83 = arith.constant 0.000000e+00 : f32
    %109 = vector.broadcast %cst_83 : f32 to vector<128x16xf32>
    %110 = arith.maximumf %108, %109 : vector<128x16xf32>
    %c0_84 = arith.constant 0 : index
    %c0_85 = arith.constant 0 : index
    %111 = vector.load %arg12[%c0_84, %c0_85] : memref<256x16xf32, #tpu.memory_space<vmem>>, vector<128x16xf32>
    tpu.vector_store %arg12[%c0_84, %c0_85], %110 {strides = array<i32>} : memref<256x16xf32, #tpu.memory_space<vmem>>, vector<128x16xf32>,
    %112 = vector.extract_strided_slice %99 {offsets = [128, 0], sizes = [128, 25], strides = [1, 1]} : vector<256x25xi1> to vector<128x25xi1>
    %c128 = arith.constant 128 : index
    %c0_86 = arith.constant 0 : index
    %113 = vector.load %arg11[%c128, %c0_86] : memref<256x25xf32, #tpu.memory_space<vmem>>, vector<128x25xf32>
    %cst_87 = arith.constant 0.000000e+00 : f32
    %114 = vector.broadcast %cst_87 : f32 to vector<128x25xf32>
    %115 = arith.select %112, %113, %114 : vector<128x25xi1>, vector<128x25xf32>
    %c0_88 = arith.constant 0 : index
    %c0_89 = arith.constant 0 : index
    %116 = vector.load %arg3[%c0_88, %c0_89] : memref<25x16xf32, #tpu.memory_space<vmem>>, vector<25x16xf32>
    %cst_90 = arith.constant dense<0.000000e+00> : vector<128x16xf32>
    %117 = tpu.matmul %115, %116, %cst_90 {dimension_numbers = #tpu.dot_dimension_numbers<[1], [0], [0], [1], [0, 0, 1, 1], [], []>} : vector<128x25xf32>, vector<25x16xf32>, vector<128x16xf32> -> vector<128x16xf32>
    %c0_91 = arith.constant 0 : index
    %c0_92 = arith.constant 0 : index
    %118 = vector.load %arg4[%c0_91, %c0_92] : memref<1x16xf32, #tpu.memory_space<vmem>>, vector<1x16xf32>
    %119 = vector.broadcast %118 : vector<1x16xf32> to vector<128x16xf32>
    %120 = arith.addf %117, %119 : vector<128x16xf32>
    %cst_93 = arith.constant 0.000000e+00 : f32
    %121 = vector.broadcast %cst_93 : f32 to vector<128x16xf32>
    %122 = arith.maximumf %120, %121 : vector<128x16xf32>
    %c128_94 = arith.constant 128 : index
    %c0_95 = arith.constant 0 : index
    %123 = vector.load %arg12[%c128_94, %c0_95] : memref<256x16xf32, #tpu.memory_space<vmem>>, vector<128x16xf32>
    tpu.vector_store %arg12[%c128_94, %c0_95], %122 {strides = array<i32>} : memref<256x16xf32, #tpu.memory_space<vmem>>, vector<128x16xf32>,
    %cst_96 = arith.constant 0.000000e+00 : f32
    %124 = vector.broadcast %cst_96 : f32 to vector<100x16xf32>
    %c0_97 = arith.constant 0 : index
    %c0_98 = arith.constant 0 : index
    %125 = vector.load %arg13[%c0_97, %c0_98] : memref<100x16xf32, #tpu.memory_space<vmem>>, vector<100x16xf32>
    tpu.vector_store %arg13[%c0_97, %c0_98], %124 {strides = array<i32>} : memref<100x16xf32, #tpu.memory_space<vmem>>, vector<100x16xf32>,
    %c0_99 = arith.constant 0 : index
    %c0_100 = arith.constant 0 : index
    %126 = tpu.strided_load %arg12[%c0_99, %c0_100] {strides = array<i32: 2, 1>} : memref<256x16xf32, #tpu.memory_space<vmem>>, vector<8x16xf32>
    %c1_101 = arith.constant 1 : index
    %c0_102 = arith.constant 0 : index
    %127 = tpu.strided_load %arg12[%c1_101, %c0_102] {strides = array<i32: 2, 1>} : memref<256x16xf32, #tpu.memory_space<vmem>>, vector<8x16xf32>
    %c16_103 = arith.constant 16 : index
    %c0_104 = arith.constant 0 : index
    %128 = tpu.strided_load %arg12[%c16_103, %c0_104] {strides = array<i32: 2, 1>} : memref<256x16xf32, #tpu.memory_space<vmem>>, vector<8x16xf32>
    %c17_105 = arith.constant 17 : index
    %c0_106 = arith.constant 0 : index
    %129 = tpu.strided_load %arg12[%c17_105, %c0_106] {strides = array<i32: 2, 1>} : memref<256x16xf32, #tpu.memory_space<vmem>>, vector<8x16xf32>
    %130 = arith.maximumf %126, %127 : vector<8x16xf32>
    %131 = arith.maximumf %128, %129 : vector<8x16xf32>
    %132 = arith.maximumf %130, %131 : vector<8x16xf32>
    %c18_107 = arith.constant 18 : index
    %c0_108 = arith.constant 0 : index
    %133 = vector.load %arg13[%c18_107, %c0_108] : memref<100x16xf32, #tpu.memory_space<vmem>>, vector<8x16xf32>
    tpu.vector_store %arg13[%c18_107, %c0_108], %132 {strides = array<i32>} : memref<100x16xf32, #tpu.memory_space<vmem>>, vector<8x16xf32>,
    %c32_109 = arith.constant 32 : index
    %c0_110 = arith.constant 0 : index
    %134 = tpu.strided_load %arg12[%c32_109, %c0_110] {strides = array<i32: 2, 1>} : memref<256x16xf32, #tpu.memory_space<vmem>>, vector<8x16xf32>
    %c33_111 = arith.constant 33 : index
    %c0_112 = arith.constant 0 : index
    %135 = tpu.strided_load %arg12[%c33_111, %c0_112] {strides = array<i32: 2, 1>} : memref<256x16xf32, #tpu.memory_space<vmem>>, vector<8x16xf32>
    %c48_113 = arith.constant 48 : index
    %c0_114 = arith.constant 0 : index
    %136 = tpu.strided_load %arg12[%c48_113, %c0_114] {strides = array<i32: 2, 1>} : memref<256x16xf32, #tpu.memory_space<vmem>>, vector<8x16xf32>
    %c49_115 = arith.constant 49 : index
    %c0_116 = arith.constant 0 : index
    %137 = tpu.strided_load %arg12[%c49_115, %c0_116] {strides = array<i32: 2, 1>} : memref<256x16xf32, #tpu.memory_space<vmem>>, vector<8x16xf32>
    %138 = arith.maximumf %134, %135 : vector<8x16xf32>
    %139 = arith.maximumf %136, %137 : vector<8x16xf32>
    %140 = arith.maximumf %138, %139 : vector<8x16xf32>
    %c26 = arith.constant 26 : index
    %c0_117 = arith.constant 0 : index
    %141 = vector.load %arg13[%c26, %c0_117] : memref<100x16xf32, #tpu.memory_space<vmem>>, vector<8x16xf32>
    tpu.vector_store %arg13[%c26, %c0_117], %140 {strides = array<i32>} : memref<100x16xf32, #tpu.memory_space<vmem>>, vector<8x16xf32>,
    %c64_118 = arith.constant 64 : index
    %c0_119 = arith.constant 0 : index
    %142 = tpu.strided_load %arg12[%c64_118, %c0_119] {strides = array<i32: 2, 1>} : memref<256x16xf32, #tpu.memory_space<vmem>>, vector<8x16xf32>
    %c65_120 = arith.constant 65 : index
    %c0_121 = arith.constant 0 : index
    %143 = tpu.strided_load %arg12[%c65_120, %c0_121] {strides = array<i32: 2, 1>} : memref<256x16xf32, #tpu.memory_space<vmem>>, vector<8x16xf32>
    %c80 = arith.constant 80 : index
    %c0_122 = arith.constant 0 : index
    %144 = tpu.strided_load %arg12[%c80, %c0_122] {strides = array<i32: 2, 1>} : memref<256x16xf32, #tpu.memory_space<vmem>>, vector<8x16xf32>
    %c81 = arith.constant 81 : index
    %c0_123 = arith.constant 0 : index
    %145 = tpu.strided_load %arg12[%c81, %c0_123] {strides = array<i32: 2, 1>} : memref<256x16xf32, #tpu.memory_space<vmem>>, vector<8x16xf32>
    %146 = arith.maximumf %142, %143 : vector<8x16xf32>
    %147 = arith.maximumf %144, %145 : vector<8x16xf32>
    %148 = arith.maximumf %146, %147 : vector<8x16xf32>
    %c34_124 = arith.constant 34 : index
    %c0_125 = arith.constant 0 : index
    %149 = vector.load %arg13[%c34_124, %c0_125] : memref<100x16xf32, #tpu.memory_space<vmem>>, vector<8x16xf32>
    tpu.vector_store %arg13[%c34_124, %c0_125], %148 {strides = array<i32>} : memref<100x16xf32, #tpu.memory_space<vmem>>, vector<8x16xf32>,
    %c96 = arith.constant 96 : index
    %c0_126 = arith.constant 0 : index
    %150 = tpu.strided_load %arg12[%c96, %c0_126] {strides = array<i32: 2, 1>} : memref<256x16xf32, #tpu.memory_space<vmem>>, vector<8x16xf32>
    %c97 = arith.constant 97 : index
    %c0_127 = arith.constant 0 : index
    %151 = tpu.strided_load %arg12[%c97, %c0_127] {strides = array<i32: 2, 1>} : memref<256x16xf32, #tpu.memory_space<vmem>>, vector<8x16xf32>
    %c112 = arith.constant 112 : index
    %c0_128 = arith.constant 0 : index
    %152 = tpu.strided_load %arg12[%c112, %c0_128] {strides = array<i32: 2, 1>} : memref<256x16xf32, #tpu.memory_space<vmem>>, vector<8x16xf32>
    %c113 = arith.constant 113 : index
    %c0_129 = arith.constant 0 : index
    %153 = tpu.strided_load %arg12[%c113, %c0_129] {strides = array<i32: 2, 1>} : memref<256x16xf32, #tpu.memory_space<vmem>>, vector<8x16xf32>
    %154 = arith.maximumf %150, %151 : vector<8x16xf32>
    %155 = arith.maximumf %152, %153 : vector<8x16xf32>
    %156 = arith.maximumf %154, %155 : vector<8x16xf32>
    %c42 = arith.constant 42 : index
    %c0_130 = arith.constant 0 : index
    %157 = vector.load %arg13[%c42, %c0_130] : memref<100x16xf32, #tpu.memory_space<vmem>>, vector<8x16xf32>
    tpu.vector_store %arg13[%c42, %c0_130], %156 {strides = array<i32>} : memref<100x16xf32, #tpu.memory_space<vmem>>, vector<8x16xf32>,
    %c128_131 = arith.constant 128 : index
    %c0_132 = arith.constant 0 : index
    %158 = tpu.strided_load %arg12[%c128_131, %c0_132] {strides = array<i32: 2, 1>} : memref<256x16xf32, #tpu.memory_space<vmem>>, vector<8x16xf32>
    %c129 = arith.constant 129 : index
    %c0_133 = arith.constant 0 : index
    %159 = tpu.strided_load %arg12[%c129, %c0_133] {strides = array<i32: 2, 1>} : memref<256x16xf32, #tpu.memory_space<vmem>>, vector<8x16xf32>
    %c144 = arith.constant 144 : index
    %c0_134 = arith.constant 0 : index
    %160 = tpu.strided_load %arg12[%c144, %c0_134] {strides = array<i32: 2, 1>} : memref<256x16xf32, #tpu.memory_space<vmem>>, vector<8x16xf32>
    %c145 = arith.constant 145 : index
    %c0_135 = arith.constant 0 : index
    %161 = tpu.strided_load %arg12[%c145, %c0_135] {strides = array<i32: 2, 1>} : memref<256x16xf32, #tpu.memory_space<vmem>>, vector<8x16xf32>
    %162 = arith.maximumf %158, %159 : vector<8x16xf32>
    %163 = arith.maximumf %160, %161 : vector<8x16xf32>
    %164 = arith.maximumf %162, %163 : vector<8x16xf32>
    %c50_136 = arith.constant 50 : index
    %c0_137 = arith.constant 0 : index
    %165 = vector.load %arg13[%c50_136, %c0_137] : memref<100x16xf32, #tpu.memory_space<vmem>>, vector<8x16xf32>
    tpu.vector_store %arg13[%c50_136, %c0_137], %164 {strides = array<i32>} : memref<100x16xf32, #tpu.memory_space<vmem>>, vector<8x16xf32>,
    %c160 = arith.constant 160 : index
    %c0_138 = arith.constant 0 : index
    %166 = tpu.strided_load %arg12[%c160, %c0_138] {strides = array<i32: 2, 1>} : memref<256x16xf32, #tpu.memory_space<vmem>>, vector<8x16xf32>
    %c161 = arith.constant 161 : index
    %c0_139 = arith.constant 0 : index
    %167 = tpu.strided_load %arg12[%c161, %c0_139] {strides = array<i32: 2, 1>} : memref<256x16xf32, #tpu.memory_space<vmem>>, vector<8x16xf32>
    %c176 = arith.constant 176 : index
    %c0_140 = arith.constant 0 : index
    %168 = tpu.strided_load %arg12[%c176, %c0_140] {strides = array<i32: 2, 1>} : memref<256x16xf32, #tpu.memory_space<vmem>>, vector<8x16xf32>
    %c177 = arith.constant 177 : index
    %c0_141 = arith.constant 0 : index
    %169 = tpu.strided_load %arg12[%c177, %c0_141] {strides = array<i32: 2, 1>} : memref<256x16xf32, #tpu.memory_space<vmem>>, vector<8x16xf32>
    %170 = arith.maximumf %166, %167 : vector<8x16xf32>
    %171 = arith.maximumf %168, %169 : vector<8x16xf32>
    %172 = arith.maximumf %170, %171 : vector<8x16xf32>
    %c58 = arith.constant 58 : index
    %c0_142 = arith.constant 0 : index
    %173 = vector.load %arg13[%c58, %c0_142] : memref<100x16xf32, #tpu.memory_space<vmem>>, vector<8x16xf32>
    tpu.vector_store %arg13[%c58, %c0_142], %172 {strides = array<i32>} : memref<100x16xf32, #tpu.memory_space<vmem>>, vector<8x16xf32>,
    %c192 = arith.constant 192 : index
    %c0_143 = arith.constant 0 : index
    %174 = tpu.strided_load %arg12[%c192, %c0_143] {strides = array<i32: 2, 1>} : memref<256x16xf32, #tpu.memory_space<vmem>>, vector<8x16xf32>
    %c193 = arith.constant 193 : index
    %c0_144 = arith.constant 0 : index
    %175 = tpu.strided_load %arg12[%c193, %c0_144] {strides = array<i32: 2, 1>} : memref<256x16xf32, #tpu.memory_space<vmem>>, vector<8x16xf32>
    %c208 = arith.constant 208 : index
    %c0_145 = arith.constant 0 : index
    %176 = tpu.strided_load %arg12[%c208, %c0_145] {strides = array<i32: 2, 1>} : memref<256x16xf32, #tpu.memory_space<vmem>>, vector<8x16xf32>
    %c209 = arith.constant 209 : index
    %c0_146 = arith.constant 0 : index
    %177 = tpu.strided_load %arg12[%c209, %c0_146] {strides = array<i32: 2, 1>} : memref<256x16xf32, #tpu.memory_space<vmem>>, vector<8x16xf32>
    %178 = arith.maximumf %174, %175 : vector<8x16xf32>
    %179 = arith.maximumf %176, %177 : vector<8x16xf32>
    %180 = arith.maximumf %178, %179 : vector<8x16xf32>
    %c66_147 = arith.constant 66 : index
    %c0_148 = arith.constant 0 : index
    %181 = vector.load %arg13[%c66_147, %c0_148] : memref<100x16xf32, #tpu.memory_space<vmem>>, vector<8x16xf32>
    tpu.vector_store %arg13[%c66_147, %c0_148], %180 {strides = array<i32>} : memref<100x16xf32, #tpu.memory_space<vmem>>, vector<8x16xf32>,
    %c224 = arith.constant 224 : index
    %c0_149 = arith.constant 0 : index
    %182 = tpu.strided_load %arg12[%c224, %c0_149] {strides = array<i32: 2, 1>} : memref<256x16xf32, #tpu.memory_space<vmem>>, vector<8x16xf32>
    %c225 = arith.constant 225 : index
    %c0_150 = arith.constant 0 : index
    %183 = tpu.strided_load %arg12[%c225, %c0_150] {strides = array<i32: 2, 1>} : memref<256x16xf32, #tpu.memory_space<vmem>>, vector<8x16xf32>
    %c240 = arith.constant 240 : index
    %c0_151 = arith.constant 0 : index
    %184 = tpu.strided_load %arg12[%c240, %c0_151] {strides = array<i32: 2, 1>} : memref<256x16xf32, #tpu.memory_space<vmem>>, vector<8x16xf32>
    %c241 = arith.constant 241 : index
    %c0_152 = arith.constant 0 : index
    %185 = tpu.strided_load %arg12[%c241, %c0_152] {strides = array<i32: 2, 1>} : memref<256x16xf32, #tpu.memory_space<vmem>>, vector<8x16xf32>
    %186 = arith.maximumf %182, %183 : vector<8x16xf32>
    %187 = arith.maximumf %184, %185 : vector<8x16xf32>
    %188 = arith.maximumf %186, %187 : vector<8x16xf32>
    %c74 = arith.constant 74 : index
    %c0_153 = arith.constant 0 : index
    %189 = vector.load %arg13[%c74, %c0_153] : memref<100x16xf32, #tpu.memory_space<vmem>>, vector<8x16xf32>
    tpu.vector_store %arg13[%c74, %c0_153], %188 {strides = array<i32>} : memref<100x16xf32, #tpu.memory_space<vmem>>, vector<8x16xf32>,
    %190 = tpu.iota {dimensions = array<i32: 0>} : vector<64x1xi32>
    %c8_i32 = arith.constant 8 : i32
    %c0_i32_154 = arith.constant 0 : i32
    %191 = arith.cmpi eq, %c8_i32, %c0_i32_154 : i32
    %c1_i32_155 = arith.constant 1 : i32
    %192 = arith.select %191, %c1_i32_155, %c8_i32 : i32
    %193 = vector.broadcast %192 : i32 to vector<64x1xi32>
    %194 = arith.remsi %190, %193 : vector<64x1xi32>
    %c0_i32_156 = arith.constant 0 : i32
    %195 = vector.broadcast %c0_i32_156 : i32 to vector<64x1xi32>
    %196 = arith.cmpi ne, %194, %195 : vector<64x1xi32>
    %c0_i32_157 = arith.constant 0 : i32
    %197 = vector.broadcast %c0_i32_157 : i32 to vector<64x1xi32>
    %198 = arith.cmpi slt, %194, %197 : vector<64x1xi32>
    %c0_i32_158 = arith.constant 0 : i32
    %199 = arith.cmpi slt, %192, %c0_i32_158 : i32
    %200 = vector.broadcast %199 : i1 to vector<64x1xi1>
    %201 = vector.broadcast %200 : vector<64x1xi1> to vector<64x1xi1>
    %202 = arith.xori %198, %201 : vector<64x1xi1>
    %203 = arith.andi %202, %196 : vector<64x1xi1>
    %204 = vector.broadcast %192 : i32 to vector<64x1xi32>
    %205 = arith.addi %194, %204 : vector<64x1xi32>
    %206 = arith.select %203, %205, %194 : vector<64x1xi1>, vector<64x1xi32>
    %cst_159 = arith.constant 0.000000e+00 : f32
    %207 = vector.broadcast %cst_159 : f32 to vector<64x32xf32>
    %c2_i32_160 = arith.constant 2 : i32
    %208 = vector.broadcast %c2_i32_160 : i32 to vector<64x1xi32>
    %209 = arith.cmpi sge, %206, %208 : vector<64x1xi32>
    %c10_i32 = arith.constant 10 : i32
    %210 = vector.broadcast %c10_i32 : i32 to vector<64x1xi32>
    %211 = arith.cmpi slt, %206, %210 : vector<64x1xi32>
    %212 = arith.andi %209, %211 : vector<64x1xi1>
    %c0_161 = arith.constant 0 : index
    %c0_162 = arith.constant 0 : index
    %213 = vector.load %arg13[%c0_161, %c0_162] : memref<100x16xf32, #tpu.memory_space<vmem>>, vector<64x16xf32>
    %cst_163 = arith.constant 0.000000e+00 : f32
    %214 = vector.shape_cast %212 : vector<64x1xi1> to vector<64x1xi1>
    %215 = vector.broadcast %214 : vector<64x1xi1> to vector<64x16xi1>
    %216 = vector.broadcast %cst_163 : f32 to vector<64x16xf32>
    %217 = arith.select %215, %213, %216 : vector<64x16xi1>, vector<64x16xf32>
    %c0_164 = arith.constant 0 : index
    %c0_165 = arith.constant 0 : index
    %218 = vector.load %arg5[%c0_164, %c0_165] : memref<400x32xf32, #tpu.memory_space<vmem>>, vector<16x32xf32>
    %cst_166 = arith.constant dense<0.000000e+00> : vector<64x32xf32>
    %219 = tpu.matmul %217, %218, %cst_166 {dimension_numbers = #tpu.dot_dimension_numbers<[1], [0], [0], [1], [0, 0, 1, 1], [], []>} : vector<64x16xf32>, vector<16x32xf32>, vector<64x32xf32> -> vector<64x32xf32>
    %220 = arith.addf %207, %219 : vector<64x32xf32>
    %c8_167 = arith.constant 8 : index
    %c0_168 = arith.constant 0 : index
    %221 = vector.load %arg13[%c8_167, %c0_168] : memref<100x16xf32, #tpu.memory_space<vmem>>, vector<64x16xf32>
    %cst_169 = arith.constant 0.000000e+00 : f32
    %222 = vector.shape_cast %212 : vector<64x1xi1> to vector<64x1xi1>
    %223 = vector.broadcast %222 : vector<64x1xi1> to vector<64x16xi1>
    %224 = vector.broadcast %cst_169 : f32 to vector<64x16xf32>
    %225 = arith.select %223, %221, %224 : vector<64x16xi1>, vector<64x16xf32>
    %c80_170 = arith.constant 80 : index
    %c0_171 = arith.constant 0 : index
    %226 = vector.load %arg5[%c80_170, %c0_171] : memref<400x32xf32, #tpu.memory_space<vmem>>, vector<16x32xf32>
    %cst_172 = arith.constant dense<0.000000e+00> : vector<64x32xf32>
    %227 = tpu.matmul %225, %226, %cst_172 {dimension_numbers = #tpu.dot_dimension_numbers<[1], [0], [0], [1], [0, 0, 1, 1], [], []>} : vector<64x16xf32>, vector<16x32xf32>, vector<64x32xf32> -> vector<64x32xf32>
    %228 = arith.addf %220, %227 : vector<64x32xf32>
    %c16_173 = arith.constant 16 : index
    %c0_174 = arith.constant 0 : index
    %229 = vector.load %arg13[%c16_173, %c0_174] : memref<100x16xf32, #tpu.memory_space<vmem>>, vector<64x16xf32>
    %cst_175 = arith.constant 0.000000e+00 : f32
    %230 = vector.shape_cast %212 : vector<64x1xi1> to vector<64x1xi1>
    %231 = vector.broadcast %230 : vector<64x1xi1> to vector<64x16xi1>
    %232 = vector.broadcast %cst_175 : f32 to vector<64x16xf32>
    %233 = arith.select %231, %229, %232 : vector<64x16xi1>, vector<64x16xf32>
    %c160_176 = arith.constant 160 : index
    %c0_177 = arith.constant 0 : index
    %234 = vector.load %arg5[%c160_176, %c0_177] : memref<400x32xf32, #tpu.memory_space<vmem>>, vector<16x32xf32>
    %cst_178 = arith.constant dense<0.000000e+00> : vector<64x32xf32>
    %235 = tpu.matmul %233, %234, %cst_178 {dimension_numbers = #tpu.dot_dimension_numbers<[1], [0], [0], [1], [0, 0, 1, 1], [], []>} : vector<64x16xf32>, vector<16x32xf32>, vector<64x32xf32> -> vector<64x32xf32>
    %236 = arith.addf %228, %235 : vector<64x32xf32>
    %c24_179 = arith.constant 24 : index
    %c0_180 = arith.constant 0 : index
    %237 = vector.load %arg13[%c24_179, %c0_180] : memref<100x16xf32, #tpu.memory_space<vmem>>, vector<64x16xf32>
    %cst_181 = arith.constant 0.000000e+00 : f32
    %238 = vector.shape_cast %212 : vector<64x1xi1> to vector<64x1xi1>
    %239 = vector.broadcast %238 : vector<64x1xi1> to vector<64x16xi1>
    %240 = vector.broadcast %cst_181 : f32 to vector<64x16xf32>
    %241 = arith.select %239, %237, %240 : vector<64x16xi1>, vector<64x16xf32>
    %c240_182 = arith.constant 240 : index
    %c0_183 = arith.constant 0 : index
    %242 = vector.load %arg5[%c240_182, %c0_183] : memref<400x32xf32, #tpu.memory_space<vmem>>, vector<16x32xf32>
    %cst_184 = arith.constant dense<0.000000e+00> : vector<64x32xf32>
    %243 = tpu.matmul %241, %242, %cst_184 {dimension_numbers = #tpu.dot_dimension_numbers<[1], [0], [0], [1], [0, 0, 1, 1], [], []>} : vector<64x16xf32>, vector<16x32xf32>, vector<64x32xf32> -> vector<64x32xf32>
    %244 = arith.addf %236, %243 : vector<64x32xf32>
    %c32_185 = arith.constant 32 : index
    %c0_186 = arith.constant 0 : index
    %245 = vector.load %arg13[%c32_185, %c0_186] : memref<100x16xf32, #tpu.memory_space<vmem>>, vector<64x16xf32>
    %cst_187 = arith.constant 0.000000e+00 : f32
    %246 = vector.shape_cast %212 : vector<64x1xi1> to vector<64x1xi1>
    %247 = vector.broadcast %246 : vector<64x1xi1> to vector<64x16xi1>
    %248 = vector.broadcast %cst_187 : f32 to vector<64x16xf32>
    %249 = arith.select %247, %245, %248 : vector<64x16xi1>, vector<64x16xf32>
    %c320 = arith.constant 320 : index
    %c0_188 = arith.constant 0 : index
    %250 = vector.load %arg5[%c320, %c0_188] : memref<400x32xf32, #tpu.memory_space<vmem>>, vector<16x32xf32>
    %cst_189 = arith.constant dense<0.000000e+00> : vector<64x32xf32>
    %251 = tpu.matmul %249, %250, %cst_189 {dimension_numbers = #tpu.dot_dimension_numbers<[1], [0], [0], [1], [0, 0, 1, 1], [], []>} : vector<64x16xf32>, vector<16x32xf32>, vector<64x32xf32> -> vector<64x32xf32>
    %252 = arith.addf %244, %251 : vector<64x32xf32>
    %c1_i32_190 = arith.constant 1 : i32
    %253 = vector.broadcast %c1_i32_190 : i32 to vector<64x1xi32>
    %254 = arith.cmpi sge, %206, %253 : vector<64x1xi32>
    %c9_i32 = arith.constant 9 : i32
    %255 = vector.broadcast %c9_i32 : i32 to vector<64x1xi32>
    %256 = arith.cmpi slt, %206, %255 : vector<64x1xi32>
    %257 = arith.andi %254, %256 : vector<64x1xi1>
    %c1_191 = arith.constant 1 : index
    %c0_192 = arith.constant 0 : index
    %258 = vector.load %arg13[%c1_191, %c0_192] : memref<100x16xf32, #tpu.memory_space<vmem>>, vector<64x16xf32>
    %cst_193 = arith.constant 0.000000e+00 : f32
    %259 = vector.shape_cast %257 : vector<64x1xi1> to vector<64x1xi1>
    %260 = vector.broadcast %259 : vector<64x1xi1> to vector<64x16xi1>
    %261 = vector.broadcast %cst_193 : f32 to vector<64x16xf32>
    %262 = arith.select %260, %258, %261 : vector<64x16xi1>, vector<64x16xf32>
    %c16_194 = arith.constant 16 : index
    %c0_195 = arith.constant 0 : index
    %263 = vector.load %arg5[%c16_194, %c0_195] : memref<400x32xf32, #tpu.memory_space<vmem>>, vector<16x32xf32>
    %cst_196 = arith.constant dense<0.000000e+00> : vector<64x32xf32>
    %264 = tpu.matmul %262, %263, %cst_196 {dimension_numbers = #tpu.dot_dimension_numbers<[1], [0], [0], [1], [0, 0, 1, 1], [], []>} : vector<64x16xf32>, vector<16x32xf32>, vector<64x32xf32> -> vector<64x32xf32>
    %265 = arith.addf %252, %264 : vector<64x32xf32>
    %c9_197 = arith.constant 9 : index
    %c0_198 = arith.constant 0 : index
    %266 = vector.load %arg13[%c9_197, %c0_198] : memref<100x16xf32, #tpu.memory_space<vmem>>, vector<64x16xf32>
    %cst_199 = arith.constant 0.000000e+00 : f32
    %267 = vector.shape_cast %257 : vector<64x1xi1> to vector<64x1xi1>
    %268 = vector.broadcast %267 : vector<64x1xi1> to vector<64x16xi1>
    %269 = vector.broadcast %cst_199 : f32 to vector<64x16xf32>
    %270 = arith.select %268, %266, %269 : vector<64x16xi1>, vector<64x16xf32>
    %c96_200 = arith.constant 96 : index
    %c0_201 = arith.constant 0 : index
    %271 = vector.load %arg5[%c96_200, %c0_201] : memref<400x32xf32, #tpu.memory_space<vmem>>, vector<16x32xf32>
    %cst_202 = arith.constant dense<0.000000e+00> : vector<64x32xf32>
    %272 = tpu.matmul %270, %271, %cst_202 {dimension_numbers = #tpu.dot_dimension_numbers<[1], [0], [0], [1], [0, 0, 1, 1], [], []>} : vector<64x16xf32>, vector<16x32xf32>, vector<64x32xf32> -> vector<64x32xf32>
    %273 = arith.addf %265, %272 : vector<64x32xf32>
    %c17_203 = arith.constant 17 : index
    %c0_204 = arith.constant 0 : index
    %274 = vector.load %arg13[%c17_203, %c0_204] : memref<100x16xf32, #tpu.memory_space<vmem>>, vector<64x16xf32>
    %cst_205 = arith.constant 0.000000e+00 : f32
    %275 = vector.shape_cast %257 : vector<64x1xi1> to vector<64x1xi1>
    %276 = vector.broadcast %275 : vector<64x1xi1> to vector<64x16xi1>
    %277 = vector.broadcast %cst_205 : f32 to vector<64x16xf32>
    %278 = arith.select %276, %274, %277 : vector<64x16xi1>, vector<64x16xf32>
    %c176_206 = arith.constant 176 : index
    %c0_207 = arith.constant 0 : index
    %279 = vector.load %arg5[%c176_206, %c0_207] : memref<400x32xf32, #tpu.memory_space<vmem>>, vector<16x32xf32>
    %cst_208 = arith.constant dense<0.000000e+00> : vector<64x32xf32>
    %280 = tpu.matmul %278, %279, %cst_208 {dimension_numbers = #tpu.dot_dimension_numbers<[1], [0], [0], [1], [0, 0, 1, 1], [], []>} : vector<64x16xf32>, vector<16x32xf32>, vector<64x32xf32> -> vector<64x32xf32>
    %281 = arith.addf %273, %280 : vector<64x32xf32>
    %c25 = arith.constant 25 : index
    %c0_209 = arith.constant 0 : index
    %282 = vector.load %arg13[%c25, %c0_209] : memref<100x16xf32, #tpu.memory_space<vmem>>, vector<64x16xf32>
    %cst_210 = arith.constant 0.000000e+00 : f32
    %283 = vector.shape_cast %257 : vector<64x1xi1> to vector<64x1xi1>
    %284 = vector.broadcast %283 : vector<64x1xi1> to vector<64x16xi1>
    %285 = vector.broadcast %cst_210 : f32 to vector<64x16xf32>
    %286 = arith.select %284, %282, %285 : vector<64x16xi1>, vector<64x16xf32>
    %c256 = arith.constant 256 : index
    %c0_211 = arith.constant 0 : index
    %287 = vector.load %arg5[%c256, %c0_211] : memref<400x32xf32, #tpu.memory_space<vmem>>, vector<16x32xf32>
    %cst_212 = arith.constant dense<0.000000e+00> : vector<64x32xf32>
    %288 = tpu.matmul %286, %287, %cst_212 {dimension_numbers = #tpu.dot_dimension_numbers<[1], [0], [0], [1], [0, 0, 1, 1], [], []>} : vector<64x16xf32>, vector<16x32xf32>, vector<64x32xf32> -> vector<64x32xf32>
    %289 = arith.addf %281, %288 : vector<64x32xf32>
    %c33_213 = arith.constant 33 : index
    %c0_214 = arith.constant 0 : index
    %290 = vector.load %arg13[%c33_213, %c0_214] : memref<100x16xf32, #tpu.memory_space<vmem>>, vector<64x16xf32>
    %cst_215 = arith.constant 0.000000e+00 : f32
    %291 = vector.shape_cast %257 : vector<64x1xi1> to vector<64x1xi1>
    %292 = vector.broadcast %291 : vector<64x1xi1> to vector<64x16xi1>
    %293 = vector.broadcast %cst_215 : f32 to vector<64x16xf32>
    %294 = arith.select %292, %290, %293 : vector<64x16xi1>, vector<64x16xf32>
    %c336 = arith.constant 336 : index
    %c0_216 = arith.constant 0 : index
    %295 = vector.load %arg5[%c336, %c0_216] : memref<400x32xf32, #tpu.memory_space<vmem>>, vector<16x32xf32>
    %cst_217 = arith.constant dense<0.000000e+00> : vector<64x32xf32>
    %296 = tpu.matmul %294, %295, %cst_217 {dimension_numbers = #tpu.dot_dimension_numbers<[1], [0], [0], [1], [0, 0, 1, 1], [], []>} : vector<64x16xf32>, vector<16x32xf32>, vector<64x32xf32> -> vector<64x32xf32>
    %297 = arith.addf %289, %296 : vector<64x32xf32>
    %c2_218 = arith.constant 2 : index
    %c0_219 = arith.constant 0 : index
    %298 = vector.load %arg13[%c2_218, %c0_219] : memref<100x16xf32, #tpu.memory_space<vmem>>, vector<64x16xf32>
    %c32_220 = arith.constant 32 : index
    %c0_221 = arith.constant 0 : index
    %299 = vector.load %arg5[%c32_220, %c0_221] : memref<400x32xf32, #tpu.memory_space<vmem>>, vector<16x32xf32>
    %cst_222 = arith.constant dense<0.000000e+00> : vector<64x32xf32>
    %300 = tpu.matmul %298, %299, %cst_222 {dimension_numbers = #tpu.dot_dimension_numbers<[1], [0], [0], [1], [0, 0, 1, 1], [], []>} : vector<64x16xf32>, vector<16x32xf32>, vector<64x32xf32> -> vector<64x32xf32>
    %301 = arith.addf %297, %300 : vector<64x32xf32>
    %c10_223 = arith.constant 10 : index
    %c0_224 = arith.constant 0 : index
    %302 = vector.load %arg13[%c10_223, %c0_224] : memref<100x16xf32, #tpu.memory_space<vmem>>, vector<64x16xf32>
    %c112_225 = arith.constant 112 : index
    %c0_226 = arith.constant 0 : index
    %303 = vector.load %arg5[%c112_225, %c0_226] : memref<400x32xf32, #tpu.memory_space<vmem>>, vector<16x32xf32>
    %cst_227 = arith.constant dense<0.000000e+00> : vector<64x32xf32>
    %304 = tpu.matmul %302, %303, %cst_227 {dimension_numbers = #tpu.dot_dimension_numbers<[1], [0], [0], [1], [0, 0, 1, 1], [], []>} : vector<64x16xf32>, vector<16x32xf32>, vector<64x32xf32> -> vector<64x32xf32>
    %305 = arith.addf %301, %304 : vector<64x32xf32>
    %c18_228 = arith.constant 18 : index
    %c0_229 = arith.constant 0 : index
    %306 = vector.load %arg13[%c18_228, %c0_229] : memref<100x16xf32, #tpu.memory_space<vmem>>, vector<64x16xf32>
    %c192_230 = arith.constant 192 : index
    %c0_231 = arith.constant 0 : index
    %307 = vector.load %arg5[%c192_230, %c0_231] : memref<400x32xf32, #tpu.memory_space<vmem>>, vector<16x32xf32>
    %cst_232 = arith.constant dense<0.000000e+00> : vector<64x32xf32>
    %308 = tpu.matmul %306, %307, %cst_232 {dimension_numbers = #tpu.dot_dimension_numbers<[1], [0], [0], [1], [0, 0, 1, 1], [], []>} : vector<64x16xf32>, vector<16x32xf32>, vector<64x32xf32> -> vector<64x32xf32>
    %309 = arith.addf %305, %308 : vector<64x32xf32>
    %c26_233 = arith.constant 26 : index
    %c0_234 = arith.constant 0 : index
    %310 = vector.load %arg13[%c26_233, %c0_234] : memref<100x16xf32, #tpu.memory_space<vmem>>, vector<64x16xf32>
    %c272 = arith.constant 272 : index
    %c0_235 = arith.constant 0 : index
    %311 = vector.load %arg5[%c272, %c0_235] : memref<400x32xf32, #tpu.memory_space<vmem>>, vector<16x32xf32>
    %cst_236 = arith.constant dense<0.000000e+00> : vector<64x32xf32>
    %312 = tpu.matmul %310, %311, %cst_236 {dimension_numbers = #tpu.dot_dimension_numbers<[1], [0], [0], [1], [0, 0, 1, 1], [], []>} : vector<64x16xf32>, vector<16x32xf32>, vector<64x32xf32> -> vector<64x32xf32>
    %313 = arith.addf %309, %312 : vector<64x32xf32>
    %c34_237 = arith.constant 34 : index
    %c0_238 = arith.constant 0 : index
    %314 = vector.load %arg13[%c34_237, %c0_238] : memref<100x16xf32, #tpu.memory_space<vmem>>, vector<64x16xf32>
    %c352 = arith.constant 352 : index
    %c0_239 = arith.constant 0 : index
    %315 = vector.load %arg5[%c352, %c0_239] : memref<400x32xf32, #tpu.memory_space<vmem>>, vector<16x32xf32>
    %cst_240 = arith.constant dense<0.000000e+00> : vector<64x32xf32>
    %316 = tpu.matmul %314, %315, %cst_240 {dimension_numbers = #tpu.dot_dimension_numbers<[1], [0], [0], [1], [0, 0, 1, 1], [], []>} : vector<64x16xf32>, vector<16x32xf32>, vector<64x32xf32> -> vector<64x32xf32>
    %317 = arith.addf %313, %316 : vector<64x32xf32>
    %c-1_i32 = arith.constant -1 : i32
    %318 = vector.broadcast %c-1_i32 : i32 to vector<64x1xi32>
    %319 = arith.cmpi sge, %206, %318 : vector<64x1xi32>
    %c7_i32 = arith.constant 7 : i32
    %320 = vector.broadcast %c7_i32 : i32 to vector<64x1xi32>
    %321 = arith.cmpi slt, %206, %320 : vector<64x1xi32>
    %322 = arith.andi %319, %321 : vector<64x1xi1>
    %c3_241 = arith.constant 3 : index
    %c0_242 = arith.constant 0 : index
    %323 = vector.load %arg13[%c3_241, %c0_242] : memref<100x16xf32, #tpu.memory_space<vmem>>, vector<64x16xf32>
    %cst_243 = arith.constant 0.000000e+00 : f32
    %324 = vector.shape_cast %322 : vector<64x1xi1> to vector<64x1xi1>
    %325 = vector.broadcast %324 : vector<64x1xi1> to vector<64x16xi1>
    %326 = vector.broadcast %cst_243 : f32 to vector<64x16xf32>
    %327 = arith.select %325, %323, %326 : vector<64x16xi1>, vector<64x16xf32>
    %c48_244 = arith.constant 48 : index
    %c0_245 = arith.constant 0 : index
    %328 = vector.load %arg5[%c48_244, %c0_245] : memref<400x32xf32, #tpu.memory_space<vmem>>, vector<16x32xf32>
    %cst_246 = arith.constant dense<0.000000e+00> : vector<64x32xf32>
    %329 = tpu.matmul %327, %328, %cst_246 {dimension_numbers = #tpu.dot_dimension_numbers<[1], [0], [0], [1], [0, 0, 1, 1], [], []>} : vector<64x16xf32>, vector<16x32xf32>, vector<64x32xf32> -> vector<64x32xf32>
    %330 = arith.addf %317, %329 : vector<64x32xf32>
    %c11_247 = arith.constant 11 : index
    %c0_248 = arith.constant 0 : index
    %331 = vector.load %arg13[%c11_247, %c0_248] : memref<100x16xf32, #tpu.memory_space<vmem>>, vector<64x16xf32>
    %cst_249 = arith.constant 0.000000e+00 : f32
    %332 = vector.shape_cast %322 : vector<64x1xi1> to vector<64x1xi1>
    %333 = vector.broadcast %332 : vector<64x1xi1> to vector<64x16xi1>
    %334 = vector.broadcast %cst_249 : f32 to vector<64x16xf32>
    %335 = arith.select %333, %331, %334 : vector<64x16xi1>, vector<64x16xf32>
    %c128_250 = arith.constant 128 : index
    %c0_251 = arith.constant 0 : index
    %336 = vector.load %arg5[%c128_250, %c0_251] : memref<400x32xf32, #tpu.memory_space<vmem>>, vector<16x32xf32>
    %cst_252 = arith.constant dense<0.000000e+00> : vector<64x32xf32>
    %337 = tpu.matmul %335, %336, %cst_252 {dimension_numbers = #tpu.dot_dimension_numbers<[1], [0], [0], [1], [0, 0, 1, 1], [], []>} : vector<64x16xf32>, vector<16x32xf32>, vector<64x32xf32> -> vector<64x32xf32>
    %338 = arith.addf %330, %337 : vector<64x32xf32>
    %c19_253 = arith.constant 19 : index
    %c0_254 = arith.constant 0 : index
    %339 = vector.load %arg13[%c19_253, %c0_254] : memref<100x16xf32, #tpu.memory_space<vmem>>, vector<64x16xf32>
    %cst_255 = arith.constant 0.000000e+00 : f32
    %340 = vector.shape_cast %322 : vector<64x1xi1> to vector<64x1xi1>
    %341 = vector.broadcast %340 : vector<64x1xi1> to vector<64x16xi1>
    %342 = vector.broadcast %cst_255 : f32 to vector<64x16xf32>
    %343 = arith.select %341, %339, %342 : vector<64x16xi1>, vector<64x16xf32>
    %c208_256 = arith.constant 208 : index
    %c0_257 = arith.constant 0 : index
    %344 = vector.load %arg5[%c208_256, %c0_257] : memref<400x32xf32, #tpu.memory_space<vmem>>, vector<16x32xf32>
    %cst_258 = arith.constant dense<0.000000e+00> : vector<64x32xf32>
    %345 = tpu.matmul %343, %344, %cst_258 {dimension_numbers = #tpu.dot_dimension_numbers<[1], [0], [0], [1], [0, 0, 1, 1], [], []>} : vector<64x16xf32>, vector<16x32xf32>, vector<64x32xf32> -> vector<64x32xf32>
    %346 = arith.addf %338, %345 : vector<64x32xf32>
    %c27 = arith.constant 27 : index
    %c0_259 = arith.constant 0 : index
    %347 = vector.load %arg13[%c27, %c0_259] : memref<100x16xf32, #tpu.memory_space<vmem>>, vector<64x16xf32>
    %cst_260 = arith.constant 0.000000e+00 : f32
    %348 = vector.shape_cast %322 : vector<64x1xi1> to vector<64x1xi1>
    %349 = vector.broadcast %348 : vector<64x1xi1> to vector<64x16xi1>
    %350 = vector.broadcast %cst_260 : f32 to vector<64x16xf32>
    %351 = arith.select %349, %347, %350 : vector<64x16xi1>, vector<64x16xf32>
    %c288 = arith.constant 288 : index
    %c0_261 = arith.constant 0 : index
    %352 = vector.load %arg5[%c288, %c0_261] : memref<400x32xf32, #tpu.memory_space<vmem>>, vector<16x32xf32>
    %cst_262 = arith.constant dense<0.000000e+00> : vector<64x32xf32>
    %353 = tpu.matmul %351, %352, %cst_262 {dimension_numbers = #tpu.dot_dimension_numbers<[1], [0], [0], [1], [0, 0, 1, 1], [], []>} : vector<64x16xf32>, vector<16x32xf32>, vector<64x32xf32> -> vector<64x32xf32>
    %354 = arith.addf %346, %353 : vector<64x32xf32>
    %c35_263 = arith.constant 35 : index
    %c0_264 = arith.constant 0 : index
    %355 = vector.load %arg13[%c35_263, %c0_264] : memref<100x16xf32, #tpu.memory_space<vmem>>, vector<64x16xf32>
    %cst_265 = arith.constant 0.000000e+00 : f32
    %356 = vector.shape_cast %322 : vector<64x1xi1> to vector<64x1xi1>
    %357 = vector.broadcast %356 : vector<64x1xi1> to vector<64x16xi1>
    %358 = vector.broadcast %cst_265 : f32 to vector<64x16xf32>
    %359 = arith.select %357, %355, %358 : vector<64x16xi1>, vector<64x16xf32>
    %c368 = arith.constant 368 : index
    %c0_266 = arith.constant 0 : index
    %360 = vector.load %arg5[%c368, %c0_266] : memref<400x32xf32, #tpu.memory_space<vmem>>, vector<16x32xf32>
    %cst_267 = arith.constant dense<0.000000e+00> : vector<64x32xf32>
    %361 = tpu.matmul %359, %360, %cst_267 {dimension_numbers = #tpu.dot_dimension_numbers<[1], [0], [0], [1], [0, 0, 1, 1], [], []>} : vector<64x16xf32>, vector<16x32xf32>, vector<64x32xf32> -> vector<64x32xf32>
    %362 = arith.addf %354, %361 : vector<64x32xf32>
    %c-2_i32 = arith.constant -2 : i32
    %363 = vector.broadcast %c-2_i32 : i32 to vector<64x1xi32>
    %364 = arith.cmpi sge, %206, %363 : vector<64x1xi32>
    %c6_i32 = arith.constant 6 : i32
    %365 = vector.broadcast %c6_i32 : i32 to vector<64x1xi32>
    %366 = arith.cmpi slt, %206, %365 : vector<64x1xi32>
    %367 = arith.andi %364, %366 : vector<64x1xi1>
    %c4_268 = arith.constant 4 : index
    %c0_269 = arith.constant 0 : index
    %368 = vector.load %arg13[%c4_268, %c0_269] : memref<100x16xf32, #tpu.memory_space<vmem>>, vector<64x16xf32>
    %cst_270 = arith.constant 0.000000e+00 : f32
    %369 = vector.shape_cast %367 : vector<64x1xi1> to vector<64x1xi1>
    %370 = vector.broadcast %369 : vector<64x1xi1> to vector<64x16xi1>
    %371 = vector.broadcast %cst_270 : f32 to vector<64x16xf32>
    %372 = arith.select %370, %368, %371 : vector<64x16xi1>, vector<64x16xf32>
    %c64_271 = arith.constant 64 : index
    %c0_272 = arith.constant 0 : index
    %373 = vector.load %arg5[%c64_271, %c0_272] : memref<400x32xf32, #tpu.memory_space<vmem>>, vector<16x32xf32>
    %cst_273 = arith.constant dense<0.000000e+00> : vector<64x32xf32>
    %374 = tpu.matmul %372, %373, %cst_273 {dimension_numbers = #tpu.dot_dimension_numbers<[1], [0], [0], [1], [0, 0, 1, 1], [], []>} : vector<64x16xf32>, vector<16x32xf32>, vector<64x32xf32> -> vector<64x32xf32>
    %375 = arith.addf %362, %374 : vector<64x32xf32>
    %c12_274 = arith.constant 12 : index
    %c0_275 = arith.constant 0 : index
    %376 = vector.load %arg13[%c12_274, %c0_275] : memref<100x16xf32, #tpu.memory_space<vmem>>, vector<64x16xf32>
    %cst_276 = arith.constant 0.000000e+00 : f32
    %377 = vector.shape_cast %367 : vector<64x1xi1> to vector<64x1xi1>
    %378 = vector.broadcast %377 : vector<64x1xi1> to vector<64x16xi1>
    %379 = vector.broadcast %cst_276 : f32 to vector<64x16xf32>
    %380 = arith.select %378, %376, %379 : vector<64x16xi1>, vector<64x16xf32>
    %c144_277 = arith.constant 144 : index
    %c0_278 = arith.constant 0 : index
    %381 = vector.load %arg5[%c144_277, %c0_278] : memref<400x32xf32, #tpu.memory_space<vmem>>, vector<16x32xf32>
    %cst_279 = arith.constant dense<0.000000e+00> : vector<64x32xf32>
    %382 = tpu.matmul %380, %381, %cst_279 {dimension_numbers = #tpu.dot_dimension_numbers<[1], [0], [0], [1], [0, 0, 1, 1], [], []>} : vector<64x16xf32>, vector<16x32xf32>, vector<64x32xf32> -> vector<64x32xf32>
    %383 = arith.addf %375, %382 : vector<64x32xf32>
    %c20_280 = arith.constant 20 : index
    %c0_281 = arith.constant 0 : index
    %384 = vector.load %arg13[%c20_280, %c0_281] : memref<100x16xf32, #tpu.memory_space<vmem>>, vector<64x16xf32>
    %cst_282 = arith.constant 0.000000e+00 : f32
    %385 = vector.shape_cast %367 : vector<64x1xi1> to vector<64x1xi1>
    %386 = vector.broadcast %385 : vector<64x1xi1> to vector<64x16xi1>
    %387 = vector.broadcast %cst_282 : f32 to vector<64x16xf32>
    %388 = arith.select %386, %384, %387 : vector<64x16xi1>, vector<64x16xf32>
    %c224_283 = arith.constant 224 : index
    %c0_284 = arith.constant 0 : index
    %389 = vector.load %arg5[%c224_283, %c0_284] : memref<400x32xf32, #tpu.memory_space<vmem>>, vector<16x32xf32>
    %cst_285 = arith.constant dense<0.000000e+00> : vector<64x32xf32>
    %390 = tpu.matmul %388, %389, %cst_285 {dimension_numbers = #tpu.dot_dimension_numbers<[1], [0], [0], [1], [0, 0, 1, 1], [], []>} : vector<64x16xf32>, vector<16x32xf32>, vector<64x32xf32> -> vector<64x32xf32>
    %391 = arith.addf %383, %390 : vector<64x32xf32>
    %c28 = arith.constant 28 : index
    %c0_286 = arith.constant 0 : index
    %392 = vector.load %arg13[%c28, %c0_286] : memref<100x16xf32, #tpu.memory_space<vmem>>, vector<64x16xf32>
    %cst_287 = arith.constant 0.000000e+00 : f32
    %393 = vector.shape_cast %367 : vector<64x1xi1> to vector<64x1xi1>
    %394 = vector.broadcast %393 : vector<64x1xi1> to vector<64x16xi1>
    %395 = vector.broadcast %cst_287 : f32 to vector<64x16xf32>
    %396 = arith.select %394, %392, %395 : vector<64x16xi1>, vector<64x16xf32>
    %c304 = arith.constant 304 : index
    %c0_288 = arith.constant 0 : index
    %397 = vector.load %arg5[%c304, %c0_288] : memref<400x32xf32, #tpu.memory_space<vmem>>, vector<16x32xf32>
    %cst_289 = arith.constant dense<0.000000e+00> : vector<64x32xf32>
    %398 = tpu.matmul %396, %397, %cst_289 {dimension_numbers = #tpu.dot_dimension_numbers<[1], [0], [0], [1], [0, 0, 1, 1], [], []>} : vector<64x16xf32>, vector<16x32xf32>, vector<64x32xf32> -> vector<64x32xf32>
    %399 = arith.addf %391, %398 : vector<64x32xf32>
    %c36_290 = arith.constant 36 : index
    %c0_291 = arith.constant 0 : index
    %400 = vector.load %arg13[%c36_290, %c0_291] : memref<100x16xf32, #tpu.memory_space<vmem>>, vector<64x16xf32>
    %cst_292 = arith.constant 0.000000e+00 : f32
    %401 = vector.shape_cast %367 : vector<64x1xi1> to vector<64x1xi1>
    %402 = vector.broadcast %401 : vector<64x1xi1> to vector<64x16xi1>
    %403 = vector.broadcast %cst_292 : f32 to vector<64x16xf32>
    %404 = arith.select %402, %400, %403 : vector<64x16xi1>, vector<64x16xf32>
    %c384 = arith.constant 384 : index
    %c0_293 = arith.constant 0 : index
    %405 = vector.load %arg5[%c384, %c0_293] : memref<400x32xf32, #tpu.memory_space<vmem>>, vector<16x32xf32>
    %cst_294 = arith.constant dense<0.000000e+00> : vector<64x32xf32>
    %406 = tpu.matmul %404, %405, %cst_294 {dimension_numbers = #tpu.dot_dimension_numbers<[1], [0], [0], [1], [0, 0, 1, 1], [], []>} : vector<64x16xf32>, vector<16x32xf32>, vector<64x32xf32> -> vector<64x32xf32>
    %407 = arith.addf %399, %406 : vector<64x32xf32>
    %c0_295 = arith.constant 0 : index
    %c0_296 = arith.constant 0 : index
    %408 = vector.load %arg6[%c0_295, %c0_296] : memref<1x32xf32, #tpu.memory_space<vmem>>, vector<1x32xf32>
    %409 = vector.broadcast %408 : vector<1x32xf32> to vector<64x32xf32>
    %410 = arith.addf %407, %409 : vector<64x32xf32>
    %cst_297 = arith.constant 0.000000e+00 : f32
    %411 = vector.broadcast %cst_297 : f32 to vector<64x32xf32>
    %412 = arith.maximumf %410, %411 : vector<64x32xf32>
    %c0_298 = arith.constant 0 : index
    %c0_299 = arith.constant 0 : index
    %413 = vector.load %arg14[%c0_298, %c0_299] : memref<64x32xf32, #tpu.memory_space<vmem>>, vector<64x32xf32>
    tpu.vector_store %arg14[%c0_298, %c0_299], %412 {strides = array<i32>} : memref<64x32xf32, #tpu.memory_space<vmem>>, vector<64x32xf32>,
    %c0_300 = arith.constant 0 : index
    %c0_301 = arith.constant 0 : index
    %414 = vector.load %arg8[%c0_300, %c0_301] : memref<1x256xf32, #tpu.memory_space<vmem>>, vector<1x256xf32>
    %c0_302 = arith.constant 0 : index
    %c0_303 = arith.constant 0 : index
    %415 = tpu.strided_load %arg14[%c0_302, %c0_303] {strides = array<i32: 2, 1>} : memref<64x32xf32, #tpu.memory_space<vmem>>, vector<4x32xf32>
    %c1_304 = arith.constant 1 : index
    %c0_305 = arith.constant 0 : index
    %416 = tpu.strided_load %arg14[%c1_304, %c0_305] {strides = array<i32: 2, 1>} : memref<64x32xf32, #tpu.memory_space<vmem>>, vector<4x32xf32>
    %c8_306 = arith.constant 8 : index
    %c0_307 = arith.constant 0 : index
    %417 = tpu.strided_load %arg14[%c8_306, %c0_307] {strides = array<i32: 2, 1>} : memref<64x32xf32, #tpu.memory_space<vmem>>, vector<4x32xf32>
    %c9_308 = arith.constant 9 : index
    %c0_309 = arith.constant 0 : index
    %418 = tpu.strided_load %arg14[%c9_308, %c0_309] {strides = array<i32: 2, 1>} : memref<64x32xf32, #tpu.memory_space<vmem>>, vector<4x32xf32>
    %419 = arith.maximumf %415, %416 : vector<4x32xf32>
    %420 = arith.maximumf %417, %418 : vector<4x32xf32>
    %421 = arith.maximumf %419, %420 : vector<4x32xf32>
    %422 = vector.extract_strided_slice %421 {offsets = [0, 0], sizes = [1, 32], strides = [1, 1]} : vector<4x32xf32> to vector<1x32xf32>
    %c0_310 = arith.constant 0 : index
    %c0_311 = arith.constant 0 : index
    %423 = vector.load %arg7[%c0_310, %c0_311] : memref<512x256xf32, #tpu.memory_space<vmem>>, vector<32x256xf32>
    %cst_312 = arith.constant dense<0.000000e+00> : vector<1x256xf32>
    %424 = tpu.matmul %422, %423, %cst_312 {dimension_numbers = #tpu.dot_dimension_numbers<[1], [0], [0], [1], [0, 0, 1, 1], [], []>} : vector<1x32xf32>, vector<32x256xf32>, vector<1x256xf32> -> vector<1x256xf32>
    %425 = arith.addf %414, %424 : vector<1x256xf32>
    %426 = vector.extract_strided_slice %421 {offsets = [1, 0], sizes = [1, 32], strides = [1, 1]} : vector<4x32xf32> to vector<1x32xf32>
    %c32_313 = arith.constant 32 : index
    %c0_314 = arith.constant 0 : index
    %427 = vector.load %arg7[%c32_313, %c0_314] : memref<512x256xf32, #tpu.memory_space<vmem>>, vector<32x256xf32>
    %cst_315 = arith.constant dense<0.000000e+00> : vector<1x256xf32>
    %428 = tpu.matmul %426, %427, %cst_315 {dimension_numbers = #tpu.dot_dimension_numbers<[1], [0], [0], [1], [0, 0, 1, 1], [], []>} : vector<1x32xf32>, vector<32x256xf32>, vector<1x256xf32> -> vector<1x256xf32>
    %429 = arith.addf %425, %428 : vector<1x256xf32>
    %430 = vector.extract_strided_slice %421 {offsets = [2, 0], sizes = [1, 32], strides = [1, 1]} : vector<4x32xf32> to vector<1x32xf32>
    %c64_316 = arith.constant 64 : index
    %c0_317 = arith.constant 0 : index
    %431 = vector.load %arg7[%c64_316, %c0_317] : memref<512x256xf32, #tpu.memory_space<vmem>>, vector<32x256xf32>
    %cst_318 = arith.constant dense<0.000000e+00> : vector<1x256xf32>
    %432 = tpu.matmul %430, %431, %cst_318 {dimension_numbers = #tpu.dot_dimension_numbers<[1], [0], [0], [1], [0, 0, 1, 1], [], []>} : vector<1x32xf32>, vector<32x256xf32>, vector<1x256xf32> -> vector<1x256xf32>
    %433 = arith.addf %429, %432 : vector<1x256xf32>
    %434 = vector.extract_strided_slice %421 {offsets = [3, 0], sizes = [1, 32], strides = [1, 1]} : vector<4x32xf32> to vector<1x32xf32>
    %c96_319 = arith.constant 96 : index
    %c0_320 = arith.constant 0 : index
    %435 = vector.load %arg7[%c96_319, %c0_320] : memref<512x256xf32, #tpu.memory_space<vmem>>, vector<32x256xf32>
    %cst_321 = arith.constant dense<0.000000e+00> : vector<1x256xf32>
    %436 = tpu.matmul %434, %435, %cst_321 {dimension_numbers = #tpu.dot_dimension_numbers<[1], [0], [0], [1], [0, 0, 1, 1], [], []>} : vector<1x32xf32>, vector<32x256xf32>, vector<1x256xf32> -> vector<1x256xf32>
    %437 = arith.addf %433, %436 : vector<1x256xf32>
    %c16_322 = arith.constant 16 : index
    %c0_323 = arith.constant 0 : index
    %438 = tpu.strided_load %arg14[%c16_322, %c0_323] {strides = array<i32: 2, 1>} : memref<64x32xf32, #tpu.memory_space<vmem>>, vector<4x32xf32>
    %c17_324 = arith.constant 17 : index
    %c0_325 = arith.constant 0 : index
    %439 = tpu.strided_load %arg14[%c17_324, %c0_325] {strides = array<i32: 2, 1>} : memref<64x32xf32, #tpu.memory_space<vmem>>, vector<4x32xf32>
    %c24_326 = arith.constant 24 : index
    %c0_327 = arith.constant 0 : index
    %440 = tpu.strided_load %arg14[%c24_326, %c0_327] {strides = array<i32: 2, 1>} : memref<64x32xf32, #tpu.memory_space<vmem>>, vector<4x32xf32>
    %c25_328 = arith.constant 25 : index
    %c0_329 = arith.constant 0 : index
    %441 = tpu.strided_load %arg14[%c25_328, %c0_329] {strides = array<i32: 2, 1>} : memref<64x32xf32, #tpu.memory_space<vmem>>, vector<4x32xf32>
    %442 = arith.maximumf %438, %439 : vector<4x32xf32>
    %443 = arith.maximumf %440, %441 : vector<4x32xf32>
    %444 = arith.maximumf %442, %443 : vector<4x32xf32>
    %445 = vector.extract_strided_slice %444 {offsets = [0, 0], sizes = [1, 32], strides = [1, 1]} : vector<4x32xf32> to vector<1x32xf32>
    %c128_330 = arith.constant 128 : index
    %c0_331 = arith.constant 0 : index
    %446 = vector.load %arg7[%c128_330, %c0_331] : memref<512x256xf32, #tpu.memory_space<vmem>>, vector<32x256xf32>
    %cst_332 = arith.constant dense<0.000000e+00> : vector<1x256xf32>
    %447 = tpu.matmul %445, %446, %cst_332 {dimension_numbers = #tpu.dot_dimension_numbers<[1], [0], [0], [1], [0, 0, 1, 1], [], []>} : vector<1x32xf32>, vector<32x256xf32>, vector<1x256xf32> -> vector<1x256xf32>
    %448 = arith.addf %437, %447 : vector<1x256xf32>
    %449 = vector.extract_strided_slice %444 {offsets = [1, 0], sizes = [1, 32], strides = [1, 1]} : vector<4x32xf32> to vector<1x32xf32>
    %c160_333 = arith.constant 160 : index
    %c0_334 = arith.constant 0 : index
    %450 = vector.load %arg7[%c160_333, %c0_334] : memref<512x256xf32, #tpu.memory_space<vmem>>, vector<32x256xf32>
    %cst_335 = arith.constant dense<0.000000e+00> : vector<1x256xf32>
    %451 = tpu.matmul %449, %450, %cst_335 {dimension_numbers = #tpu.dot_dimension_numbers<[1], [0], [0], [1], [0, 0, 1, 1], [], []>} : vector<1x32xf32>, vector<32x256xf32>, vector<1x256xf32> -> vector<1x256xf32>
    %452 = arith.addf %448, %451 : vector<1x256xf32>
    %453 = vector.extract_strided_slice %444 {offsets = [2, 0], sizes = [1, 32], strides = [1, 1]} : vector<4x32xf32> to vector<1x32xf32>
    %c192_336 = arith.constant 192 : index
    %c0_337 = arith.constant 0 : index
    %454 = vector.load %arg7[%c192_336, %c0_337] : memref<512x256xf32, #tpu.memory_space<vmem>>, vector<32x256xf32>
    %cst_338 = arith.constant dense<0.000000e+00> : vector<1x256xf32>
    %455 = tpu.matmul %453, %454, %cst_338 {dimension_numbers = #tpu.dot_dimension_numbers<[1], [0], [0], [1], [0, 0, 1, 1], [], []>} : vector<1x32xf32>, vector<32x256xf32>, vector<1x256xf32> -> vector<1x256xf32>
    %456 = arith.addf %452, %455 : vector<1x256xf32>
    %457 = vector.extract_strided_slice %444 {offsets = [3, 0], sizes = [1, 32], strides = [1, 1]} : vector<4x32xf32> to vector<1x32xf32>
    %c224_339 = arith.constant 224 : index
    %c0_340 = arith.constant 0 : index
    %458 = vector.load %arg7[%c224_339, %c0_340] : memref<512x256xf32, #tpu.memory_space<vmem>>, vector<32x256xf32>
    %cst_341 = arith.constant dense<0.000000e+00> : vector<1x256xf32>
    %459 = tpu.matmul %457, %458, %cst_341 {dimension_numbers = #tpu.dot_dimension_numbers<[1], [0], [0], [1], [0, 0, 1, 1], [], []>} : vector<1x32xf32>, vector<32x256xf32>, vector<1x256xf32> -> vector<1x256xf32>
    %460 = arith.addf %456, %459 : vector<1x256xf32>
    %c32_342 = arith.constant 32 : index
    %c0_343 = arith.constant 0 : index
    %461 = tpu.strided_load %arg14[%c32_342, %c0_343] {strides = array<i32: 2, 1>} : memref<64x32xf32, #tpu.memory_space<vmem>>, vector<4x32xf32>
    %c33_344 = arith.constant 33 : index
    %c0_345 = arith.constant 0 : index
    %462 = tpu.strided_load %arg14[%c33_344, %c0_345] {strides = array<i32: 2, 1>} : memref<64x32xf32, #tpu.memory_space<vmem>>, vector<4x32xf32>
    %c40 = arith.constant 40 : index
    %c0_346 = arith.constant 0 : index
    %463 = tpu.strided_load %arg14[%c40, %c0_346] {strides = array<i32: 2, 1>} : memref<64x32xf32, #tpu.memory_space<vmem>>, vector<4x32xf32>
    %c41 = arith.constant 41 : index
    %c0_347 = arith.constant 0 : index
    %464 = tpu.strided_load %arg14[%c41, %c0_347] {strides = array<i32: 2, 1>} : memref<64x32xf32, #tpu.memory_space<vmem>>, vector<4x32xf32>
    %465 = arith.maximumf %461, %462 : vector<4x32xf32>
    %466 = arith.maximumf %463, %464 : vector<4x32xf32>
    %467 = arith.maximumf %465, %466 : vector<4x32xf32>
    %468 = vector.extract_strided_slice %467 {offsets = [0, 0], sizes = [1, 32], strides = [1, 1]} : vector<4x32xf32> to vector<1x32xf32>
    %c256_348 = arith.constant 256 : index
    %c0_349 = arith.constant 0 : index
    %469 = vector.load %arg7[%c256_348, %c0_349] : memref<512x256xf32, #tpu.memory_space<vmem>>, vector<32x256xf32>
    %cst_350 = arith.constant dense<0.000000e+00> : vector<1x256xf32>
    %470 = tpu.matmul %468, %469, %cst_350 {dimension_numbers = #tpu.dot_dimension_numbers<[1], [0], [0], [1], [0, 0, 1, 1], [], []>} : vector<1x32xf32>, vector<32x256xf32>, vector<1x256xf32> -> vector<1x256xf32>
    %471 = arith.addf %460, %470 : vector<1x256xf32>
    %472 = vector.extract_strided_slice %467 {offsets = [1, 0], sizes = [1, 32], strides = [1, 1]} : vector<4x32xf32> to vector<1x32xf32>
    %c288_351 = arith.constant 288 : index
    %c0_352 = arith.constant 0 : index
    %473 = vector.load %arg7[%c288_351, %c0_352] : memref<512x256xf32, #tpu.memory_space<vmem>>, vector<32x256xf32>
    %cst_353 = arith.constant dense<0.000000e+00> : vector<1x256xf32>
    %474 = tpu.matmul %472, %473, %cst_353 {dimension_numbers = #tpu.dot_dimension_numbers<[1], [0], [0], [1], [0, 0, 1, 1], [], []>} : vector<1x32xf32>, vector<32x256xf32>, vector<1x256xf32> -> vector<1x256xf32>
    %475 = arith.addf %471, %474 : vector<1x256xf32>
    %476 = vector.extract_strided_slice %467 {offsets = [2, 0], sizes = [1, 32], strides = [1, 1]} : vector<4x32xf32> to vector<1x32xf32>
    %c320_354 = arith.constant 320 : index
    %c0_355 = arith.constant 0 : index
    %477 = vector.load %arg7[%c320_354, %c0_355] : memref<512x256xf32, #tpu.memory_space<vmem>>, vector<32x256xf32>
    %cst_356 = arith.constant dense<0.000000e+00> : vector<1x256xf32>
    %478 = tpu.matmul %476, %477, %cst_356 {dimension_numbers = #tpu.dot_dimension_numbers<[1], [0], [0], [1], [0, 0, 1, 1], [], []>} : vector<1x32xf32>, vector<32x256xf32>, vector<1x256xf32> -> vector<1x256xf32>
    %479 = arith.addf %475, %478 : vector<1x256xf32>
    %480 = vector.extract_strided_slice %467 {offsets = [3, 0], sizes = [1, 32], strides = [1, 1]} : vector<4x32xf32> to vector<1x32xf32>
    %c352_357 = arith.constant 352 : index
    %c0_358 = arith.constant 0 : index
    %481 = vector.load %arg7[%c352_357, %c0_358] : memref<512x256xf32, #tpu.memory_space<vmem>>, vector<32x256xf32>
    %cst_359 = arith.constant dense<0.000000e+00> : vector<1x256xf32>
    %482 = tpu.matmul %480, %481, %cst_359 {dimension_numbers = #tpu.dot_dimension_numbers<[1], [0], [0], [1], [0, 0, 1, 1], [], []>} : vector<1x32xf32>, vector<32x256xf32>, vector<1x256xf32> -> vector<1x256xf32>
    %483 = arith.addf %479, %482 : vector<1x256xf32>
    %c48_360 = arith.constant 48 : index
    %c0_361 = arith.constant 0 : index
    %484 = tpu.strided_load %arg14[%c48_360, %c0_361] {strides = array<i32: 2, 1>} : memref<64x32xf32, #tpu.memory_space<vmem>>, vector<4x32xf32>
    %c49_362 = arith.constant 49 : index
    %c0_363 = arith.constant 0 : index
    %485 = tpu.strided_load %arg14[%c49_362, %c0_363] {strides = array<i32: 2, 1>} : memref<64x32xf32, #tpu.memory_space<vmem>>, vector<4x32xf32>
    %c56 = arith.constant 56 : index
    %c0_364 = arith.constant 0 : index
    %486 = tpu.strided_load %arg14[%c56, %c0_364] {strides = array<i32: 2, 1>} : memref<64x32xf32, #tpu.memory_space<vmem>>, vector<4x32xf32>
    %c57 = arith.constant 57 : index
    %c0_365 = arith.constant 0 : index
    %487 = tpu.strided_load %arg14[%c57, %c0_365] {strides = array<i32: 2, 1>} : memref<64x32xf32, #tpu.memory_space<vmem>>, vector<4x32xf32>
    %488 = arith.maximumf %484, %485 : vector<4x32xf32>
    %489 = arith.maximumf %486, %487 : vector<4x32xf32>
    %490 = arith.maximumf %488, %489 : vector<4x32xf32>
    %491 = vector.extract_strided_slice %490 {offsets = [0, 0], sizes = [1, 32], strides = [1, 1]} : vector<4x32xf32> to vector<1x32xf32>
    %c384_366 = arith.constant 384 : index
    %c0_367 = arith.constant 0 : index
    %492 = vector.load %arg7[%c384_366, %c0_367] : memref<512x256xf32, #tpu.memory_space<vmem>>, vector<32x256xf32>
    %cst_368 = arith.constant dense<0.000000e+00> : vector<1x256xf32>
    %493 = tpu.matmul %491, %492, %cst_368 {dimension_numbers = #tpu.dot_dimension_numbers<[1], [0], [0], [1], [0, 0, 1, 1], [], []>} : vector<1x32xf32>, vector<32x256xf32>, vector<1x256xf32> -> vector<1x256xf32>
    %494 = arith.addf %483, %493 : vector<1x256xf32>
    %495 = vector.extract_strided_slice %490 {offsets = [1, 0], sizes = [1, 32], strides = [1, 1]} : vector<4x32xf32> to vector<1x32xf32>
    %c416 = arith.constant 416 : index
    %c0_369 = arith.constant 0 : index
    %496 = vector.load %arg7[%c416, %c0_369] : memref<512x256xf32, #tpu.memory_space<vmem>>, vector<32x256xf32>
    %cst_370 = arith.constant dense<0.000000e+00> : vector<1x256xf32>
    %497 = tpu.matmul %495, %496, %cst_370 {dimension_numbers = #tpu.dot_dimension_numbers<[1], [0], [0], [1], [0, 0, 1, 1], [], []>} : vector<1x32xf32>, vector<32x256xf32>, vector<1x256xf32> -> vector<1x256xf32>
    %498 = arith.addf %494, %497 : vector<1x256xf32>
    %499 = vector.extract_strided_slice %490 {offsets = [2, 0], sizes = [1, 32], strides = [1, 1]} : vector<4x32xf32> to vector<1x32xf32>
    %c448 = arith.constant 448 : index
    %c0_371 = arith.constant 0 : index
    %500 = vector.load %arg7[%c448, %c0_371] : memref<512x256xf32, #tpu.memory_space<vmem>>, vector<32x256xf32>
    %cst_372 = arith.constant dense<0.000000e+00> : vector<1x256xf32>
    %501 = tpu.matmul %499, %500, %cst_372 {dimension_numbers = #tpu.dot_dimension_numbers<[1], [0], [0], [1], [0, 0, 1, 1], [], []>} : vector<1x32xf32>, vector<32x256xf32>, vector<1x256xf32> -> vector<1x256xf32>
    %502 = arith.addf %498, %501 : vector<1x256xf32>
    %503 = vector.extract_strided_slice %490 {offsets = [3, 0], sizes = [1, 32], strides = [1, 1]} : vector<4x32xf32> to vector<1x32xf32>
    %c480 = arith.constant 480 : index
    %c0_373 = arith.constant 0 : index
    %504 = vector.load %arg7[%c480, %c0_373] : memref<512x256xf32, #tpu.memory_space<vmem>>, vector<32x256xf32>
    %cst_374 = arith.constant dense<0.000000e+00> : vector<1x256xf32>
    %505 = tpu.matmul %503, %504, %cst_374 {dimension_numbers = #tpu.dot_dimension_numbers<[1], [0], [0], [1], [0, 0, 1, 1], [], []>} : vector<1x32xf32>, vector<32x256xf32>, vector<1x256xf32> -> vector<1x256xf32>
    %506 = arith.addf %502, %505 : vector<1x256xf32>
    %c0_375 = arith.constant 0 : index
    %c0_376 = arith.constant 0 : index
    %c0_377 = arith.constant 0 : index
    %507 = vector.load %arg2[%c0_375, %c0_376, %c0_377] : memref<1x8x256xf32, #tpu.memory_space<vmem>>, vector<1x8x256xf32>
    %508 = vector.shape_cast %507 : vector<1x8x256xf32> to vector<8x256xf32>
    %509 = vector.broadcast %506 : vector<1x256xf32> to vector<8x256xf32>
    %510 = arith.mulf %508, %509 : vector<8x256xf32>
    %cst_378 = arith.constant dense<0.000000e+00> : vector<8xf32>
    %511 = vector.multi_reduction <add>, %510, %cst_378 [1] : vector<8x256xf32> to vector<8xf32>
    %512 = vector.shape_cast %511 : vector<8xf32> to vector<8x1xf32>
    %513 = math.absf %512 : vector<8x1xf32>
    %cst_379 = arith.constant 0.000000e+00 : f32
    %514 = vector.broadcast %cst_379 : f32 to vector<8x1xf32>
    %515 = arith.subf %514, %513 : vector<8x1xf32>
    %516 = math.exp %515 : vector<8x1xf32>
    %cst_380 = arith.constant 0.000000e+00 : f32
    %517 = vector.broadcast %cst_380 : f32 to vector<8x1xf32>
    %518 = arith.cmpf oge, %512, %517 : vector<8x1xf32>
    %cst_381 = arith.constant 1.000000e+00 : f32
    %519 = vector.broadcast %cst_381 : f32 to vector<8x1xf32>
    %520 = arith.addf %519, %516 : vector<8x1xf32>
    %cst_382 = arith.constant 1.000000e+00 : f32
    %521 = vector.broadcast %cst_382 : f32 to vector<8x1xf32>
    %522 = arith.divf %521, %520 : vector<8x1xf32>
    %cst_383 = arith.constant 1.000000e+00 : f32
    %523 = vector.broadcast %cst_383 : f32 to vector<8x1xf32>
    %524 = arith.addf %523, %516 : vector<8x1xf32>
    %525 = arith.divf %516, %524 : vector<8x1xf32>
    %526 = arith.select %518, %522, %525 : vector<8x1xi1>, vector<8x1xf32>
    %c0_384 = arith.constant 0 : index
    %c0_385 = arith.constant 0 : index
    %c0_386 = arith.constant 0 : index
    %527 = vector.load %arg9[%c0_384, %c0_385, %c0_386] : memref<1x8x1xf32, #tpu.memory_space<vmem>>, vector<1x8x1xf32>
    %528 = vector.shape_cast %527 : vector<1x8x1xf32> to vector<8x1xf32>
    %529 = vector.shape_cast %526 : vector<8x1xf32> to vector<1x8x1xf32>
    tpu.vector_store %arg9[%c0_384, %c0_385, %c0_386], %529 {strides = array<i32>} : memref<1x8x1xf32, #tpu.memory_space<vmem>>, vector<1x8x1xf32>,
    return
  }
  func.func @transform_0(%arg0: i32) -> (i32, i32, i32) {
    %c0_i32 = arith.constant 0 : i32
    %c0_i32_0 = arith.constant 0 : i32
    %c0_i32_1 = arith.constant 0 : i32
    return %arg0, %c0_i32, %c0_i32_0 : i32, i32, i32
  }
  func.func @transform_1(%arg0: i32) -> (i32, i32, i32) {
    %c0_i32 = arith.constant 0 : i32
    %c0_i32_0 = arith.constant 0 : i32
    %c0_i32_1 = arith.constant 0 : i32
    return %arg0, %c0_i32, %c0_i32_0 : i32, i32, i32
  }
  func.func @transform_2(%arg0: i32) -> (i32, i32) {
    %c0_i32 = arith.constant 0 : i32
    %c0_i32_0 = arith.constant 0 : i32
    %c0_i32_1 = arith.constant 0 : i32
    return %c0_i32, %c0_i32_0 : i32, i32
  }
  func.func @transform_3(%arg0: i32) -> (i32, i32) {
    %c0_i32 = arith.constant 0 : i32
    %c0_i32_0 = arith.constant 0 : i32
    %c0_i32_1 = arith.constant 0 : i32
    return %c0_i32, %c0_i32_0 : i32, i32
  }
  func.func @transform_4(%arg0: i32) -> (i32, i32) {
    %c0_i32 = arith.constant 0 : i32
    %c0_i32_0 = arith.constant 0 : i32
    %c0_i32_1 = arith.constant 0 : i32
    return %c0_i32, %c0_i32_0 : i32, i32
  }
  func.func @transform_5(%arg0: i32) -> (i32, i32) {
    %c0_i32 = arith.constant 0 : i32
    %c0_i32_0 = arith.constant 0 : i32
    %c0_i32_1 = arith.constant 0 : i32
    return %c0_i32, %c0_i32_0 : i32, i32
  }
  func.func @transform_6(%arg0: i32) -> (i32, i32) {
    %c0_i32 = arith.constant 0 : i32
    %c0_i32_0 = arith.constant 0 : i32
    %c0_i32_1 = arith.constant 0 : i32
    return %c0_i32, %c0_i32_0 : i32, i32
  }
  func.func @transform_7(%arg0: i32) -> (i32, i32) {
    %c0_i32 = arith.constant 0 : i32
    %c0_i32_0 = arith.constant 0 : i32
    %c0_i32_1 = arith.constant 0 : i32
    return %c0_i32, %c0_i32_0 : i32, i32
  }
  func.func @transform_8(%arg0: i32) -> (i32, i32, i32) {
    %c0_i32 = arith.constant 0 : i32
    %c0_i32_0 = arith.constant 0 : i32
    %c0_i32_1 = arith.constant 0 : i32
    return %arg0, %c0_i32, %c0_i32_0 : i32, i32, i32
  }
}

</mosaic_0001>

<bundles_post_ra>
// kernel: cnn_module_forward.1
= control target key start
LH: loop header
LB: loop body
LE: loop exit
PB: predicated region body
PF: predicated region fallthrough
CT: control target
= control target key end

     0   :  { %s13753_s27 = smov 0   ;;  %s18376_s0 = inlined_call_operand.vmem [shape: f32[2,256,1], index: 0, kind: input, shape index: {}]   ;;  %s18377_s1 = inlined_call_operand.vmem [shape: f32[2,8,256], index: 1, kind: input, shape index: {}]   ;;  %s18378_s2 = inlined_call_operand.vmem [shape: f32[25,16], index: 2, kind: input, shape index: {}]   ;;  %s18379_s3 = inlined_call_operand.vmem [shape: f32[1,16], index: 3, kind: input, shape index: {}]   ;;  %s18380_s4 = inlined_call_operand.vmem [shape: f32[400,32], index: 4, kind: input, shape index: {}]   ;;  %s18381_s5 = inlined_call_operand.vmem [shape: f32[1,32], index: 5, kind: input, shape index: {}]   ;;  %s18382_s6 = inlined_call_operand.vmem [shape: f32[512,256], index: 6, kind: input, shape index: {}]   ;;  %s18383_s7 = inlined_call_operand.vmem [shape: f32[1,256], index: 7, kind: input, shape index: {}]   ;;  %s18384_s8 = inlined_call_operand.vmem [shape: f32[2,8,1], index: 8, kind: output, shape index: {}]  }
   0x1   :  { %18451 = sst [smem:[#allocation9_spill]] %s18376_s0 }
   0x2   :  { %18452 = sst [smem:[#allocation10_spill]] %s18377_s1 }
   0x3   :  { %18453 = sst [smem:[#allocation11_spill]] %s18383_s7 }
   0x4   :  { %18454 = sst [smem:[#allocation12_spill]] %s18384_s8 }
   0x5 LB: > { %18455 = sst [smem:[#allocation7_spill]] %s13679_s27  ;;  %s12168_s28 = sadd.s32 4294967295, %s13679_s27   ;;  %s13679_s27 = sphi %s13753_s27, %s18_s27  }
   0x6   : > { %p12172_p0 = scmp.ge.s32.totalorder %s13679_s27, 1  ;;  %p272_p1 = scmp.lt.s32.totalorder %s13679_s27, 3 }
   0x8   : > { %p273_p2 = pnand %p12172_p0, %p272_p1 }
   0xa   : > { %276 = sbr.rel (%p273_p2) target bundleno = 2951 (0xb87), region = 52 }
  0x11   : > { %vm18397_vm0 = vcmask 7168   ;;  %p13763_p3 = scmp.lt.s32.totalorder %s12168_s28, 1  ;;  %v13681_v0 = vmov 0.0   ;;  %s18458_s0 = sld [smem:[#allocation9_spill]]  ;;  %vm655_vm1 = vcmask 15368   ;;  %vm848_vm2 = vcmask 23568  }
  0x12   : > { %327 = vst.msk [vmem:[#allocation2 + $0x10] sm:$0xff] %vm18397_vm0, %v13681_v0  ;;  %328 = vst.msk [vmem:[#allocation2 + $0x18] sm:$0xff] %vm18397_vm0, %v13681_v0  ;;  %s13682_s12 = smov 1   ;;  %s13683_s13 = smov 2   ;;  %vm1041_vm3 = vcmask 31768   ;;  %vm18398_vm4 = vcmask 39968  }
  0x13   : > { %325 = vst.msk [vmem:[#allocation2] sm:$0xff] %vm18397_vm0, %v13681_v0  ;;  %326 = vst.msk [vmem:[#allocation2 + $0x8] sm:$0xff] %vm18397_vm0, %v13681_v0  ;;  %s19086_s28 = smov (!%p13763_p3, %s12168_s28), 1  ;;  %s13684_s14 = smov 3   ;;  %vm1427_vm5 = vcmask 48168   ;;  %vm18399_vm6 = vcmask 56368  }
  0x14   : > { %329 = vst.msk [vmem:[#allocation2 + $0x20] sm:$0xff] %vm18397_vm0, %v13681_v0  ;;  %330 = vst.msk [vmem:[#allocation2 + $0x28] sm:$0xff] %vm18397_vm0, %v13681_v0  ;;  %18457 = sst [smem:[#allocation8_spill]] %s19086_s28  ;;  %s12433_s30 = sshll.u32 %s19086_s28, 8  ;;  %vm18406_vm7 = vcmask 64568   ;;  %vm18400_vm8 = vcmask 72768  }
  0x15   : > { %331 = vst.msk [vmem:[#allocation2 + $0x30] sm:$0xff] %vm18397_vm0, %v13681_v0  ;;  %332 = vst.msk [vmem:[#allocation2 + $0x38] sm:$0xff] %vm18397_vm0, %v13681_v0  ;;  %s18385_s15 = smov 4   ;;  %s18409_s16 = smov 5   ;;  %vm2199_vm9 = vcmask 80968   ;;  %vm18437_vm10 = vcmask 89168  }
  0x16   : > { %333 = vst.msk [vmem:[#allocation2 + $0x40] sm:$0xff] %vm18397_vm0, %v13681_v0  ;;  %334 = vst.msk [vmem:[#allocation2 + $0x48] sm:$0xff] %vm18397_vm0, %v13681_v0  ;;  %s18427_s17 = smov 6   ;;  %s18395_s18 = smov 7   ;;  %vm2585_vm11 = vcmask 97368   ;;  %vm2778_vm12 = vcmask 105568  }
  0x17   : > { %335 = vst.msk [vmem:[#allocation2 + $0x50] sm:$0xff] %vm18397_vm0, %v13681_v0  ;;  %336 = vst.msk [vmem:[#allocation2 + $0x58] sm:$0xff] %vm18397_vm0, %v13681_v0  ;;  %s13857_s11 = scalar_lea.vmem %s18458_s0, %s12433_s30  ;;  %s18438_s19 = smov 8   ;;  %vm2971_vm13 = vcmask 113768   ;;  %vm18408_vm14 = vcmask 121968   ;;  %vm3357_vm15 = vcmask 130168  }
  0x18   : > { %337 = vst.msk [vmem:[#allocation2 + $0x60] sm:$0xff] %vm18397_vm0, %v13681_v0  ;;  %338 = vst.msk [vmem:[#allocation2 + $0x68] sm:$0xff] %vm18397_vm0, %v13681_v0  ;;  %v367_v1 = vld [vmem:[%s13857_s11] sm:$0xff]  ;;  %v368_v2 = vld [vmem:[%s13857_s11 + $0x8] sm:$0xff]  ;;  %s18443_s20 = smov 9   ;;  %s18419_s21 = smov 10  }
  0x19   : > { %339 = vst.msk [vmem:[#allocation2 + $0x70] sm:$0xff] %vm18397_vm0, %v13681_v0  ;;  %340 = vst.msk [vmem:[#allocation2 + $0x78] sm:$0xff] %vm18397_vm0, %v13681_v0  ;;  %v369_v3 = vld [vmem:[%s13857_s11 + $0x10] sm:$0xff]  ;;  %v370_v4 = vld [vmem:[%s13857_s11 + $0x18] sm:$0xff]  ;;  %s18393_s22 = smov 11   ;;  %s18435_s23 = smov 12  }
  0x1a   : > { %341 = vst.msk [vmem:[#allocation2 + $0x80] sm:$0xff] %vm18397_vm0, %v13681_v0  ;;  %342 = vst.msk [vmem:[#allocation2 + $0x88] sm:$0xff] %vm18397_vm0, %v13681_v0  ;;  %v371_v5 = vld [vmem:[%s13857_s11 + $0x20] sm:$0xff]  ;;  %v372_v6 = vld [vmem:[%s13857_s11 + $0x28] sm:$0xff]  ;;  %s18415_s24 = smov 13   ;;  %s18402_s25 = smov 14  }
  0x1b   : > { %343 = vst.msk [vmem:[#allocation2 + $0x90] sm:$0xff] %vm18397_vm0, %v13681_v0  ;;  %344 = vst.msk [vmem:[#allocation2 + $0x98] sm:$0xff] %vm18397_vm0, %v13681_v0  ;;  %v497_v7 = vld [vmem:[#allocation2 + $0x11] sm:$0xff]  ;;  %v495_v8 = vld [vmem:[#allocation2 + $0x1] sm:$0xff]  ;;  %s18387_s26 = smov 15   ;;  %s18433_s29 = smov 16  }
  0x1c   : > { %345 = vst.msk [vmem:[#allocation2 + $0xa0] sm:$0xff] %vm18397_vm0, %v13681_v0  ;;  %346 = vst.msk [vmem:[#allocation2 + $0xa8] sm:$0xff] %vm18397_vm0, %v13681_v0  ;;  %v13868_v9 = vld [vmem:[#allocation2 + $0x19] sm:$0xff]  ;;  %563 = vrot.lane.b32.xlu1 %v497_v7, %s13682_s12  ;;  %559 = vrot.lane.b32.xlu0 %v495_v8, %s13682_s12  ;;  %v496_v10 = vld [vmem:[#allocation2 + $0x9] sm:$0xff]  ;;  %s18425_s30 = smov 17   ;;  %s18417_s9 = smov 18  }
  0x1d   : > { %347 = vst.msk [vmem:[#allocation2 + $0xb0] sm:$0xff] %vm18397_vm0, %v13681_v0  ;;  %348 = vst.msk [vmem:[#allocation2 + $0xb8] sm:$0xff] %vm18397_vm0, %v13681_v0  ;;  %v373_v11 = vld [vmem:[%s13857_s11 + $0x30] sm:$0xff]  ;;  %v374_v12 = vld [vmem:[%s13857_s11 + $0x38] sm:$0xff]  ;;  %s18391_s10 = smov 19   ;;  %s18563_s0 = smov 6  }
  0x1e   : > { %349 = vst.msk [vmem:[#allocation2 + $0xc0] sm:$0xff] %vm18397_vm0, %v13681_v0  ;;  %350 = vst.msk [vmem:[#allocation2 + $0xc8] sm:$0xff] %vm18397_vm0, %v13681_v0  ;;  %v375_v13 = vld [vmem:[%s13857_s11 + $0x40] sm:$0xff]  ;;  %v376_v14 = vld [vmem:[%s13857_s11 + $0x48] sm:$0xff]  ;;  %s18583_s8 = smov 8   ;;  %s18682_s7 = smov 9  }
  0x1f   : > { %351 = vst.msk [vmem:[#allocation2 + $0xd0] sm:$0xff] %vm18397_vm0, %v13681_v0  ;;  %352 = vst.msk [vmem:[#allocation2 + $0xd8] sm:$0xff] %vm18397_vm0, %v13681_v0  ;;  %v377_v15 = vld [vmem:[%s13857_s11 + $0x50] sm:$0xff]  ;;  %v378_v16 = vld [vmem:[%s13857_s11 + $0x58] sm:$0xff] }
  0x20   : > { %353 = vst.msk [vmem:[#allocation2 + $0xe0] sm:$0xff] %vm18397_vm0, %v13681_v0  ;;  %354 = vst.msk [vmem:[#allocation2 + $0xe8] sm:$0xff] %vm18397_vm0, %v13681_v0  ;;  %v379_v17 = vld [vmem:[%s13857_s11 + $0x60] sm:$0xff]  ;;  %v380_v18 = vld [vmem:[%s13857_s11 + $0x68] sm:$0xff]  ;;  %565 = vrot.lane.b32.xlu1 %v13868_v9, %s13682_s12  ;;  %561 = vrot.lane.b32.xlu0 %v496_v10, %s13682_s12 }
  0x21   : > { %355 = vst.msk [vmem:[#allocation2 + $0xf0] sm:$0xff] %vm18397_vm0, %v13681_v0  ;;  %356 = vst.msk [vmem:[#allocation2 + $0xf8] sm:$0xff] %vm18397_vm0, %v13681_v0  ;;  %v381_v19 = vld [vmem:[%s13857_s11 + $0x70] sm:$0xff]  ;;  %v382_v20 = vld [vmem:[%s13857_s11 + $0x78] sm:$0xff] }
  0x22   : > { %357 = vst.msk [vmem:[#allocation2 + $0x100] sm:$0xff] %vm18397_vm0, %v13681_v0  ;;  %358 = vst.msk [vmem:[#allocation2 + $0x108] sm:$0xff] %vm18397_vm0, %v13681_v0  ;;  %v383_v21 = vld [vmem:[%s13857_s11 + $0x80] sm:$0xff]  ;;  %v384_v22 = vld [vmem:[%s13857_s11 + $0x88] sm:$0xff] }
  0x23   : > { %359 = vst.msk [vmem:[#allocation2 + $0x110] sm:$0xff] %vm18397_vm0, %v13681_v0  ;;  %360 = vst.msk [vmem:[#allocation2 + $0x118] sm:$0xff] %vm18397_vm0, %v13681_v0  ;;  %v385_v23 = vld [vmem:[%s13857_s11 + $0x90] sm:$0xff]  ;;  %v386_v26 = vld [vmem:[%s13857_s11 + $0x98] sm:$0xff] }
  0x24   : > { %361 = vst.msk [vmem:[#allocation2 + $0x120] sm:$0xff] %vm18397_vm0, %v13681_v0  ;;  %362 = vst.msk [vmem:[#allocation2 + $0x128] sm:$0xff] %vm18397_vm0, %v13681_v0  ;;  %v387_v27 = vld [vmem:[%s13857_s11 + $0xa0] sm:$0xff]  ;;  %v388_v28 = vld [vmem:[%s13857_s11 + $0xa8] sm:$0xff] }
  0x25   : > { %363 = vst.msk [vmem:[#allocation2 + $0x130] sm:$0xff] %vm18397_vm0, %v13681_v0  ;;  %364 = vst.msk [vmem:[#allocation2 + $0x138] sm:$0xff] %vm18397_vm0, %v13681_v0  ;;  %v389_v29 = vld [vmem:[%s13857_s11 + $0xb0] sm:$0xff]  ;;  %v390_v34 = vld [vmem:[%s13857_s11 + $0xb8] sm:$0xff] }
  0x26   : > { %399 = vst.msk [vmem:[#allocation2 + $0x22] sm:$0xff] %vm18397_vm0, %v367_v1  ;;  %400 = vst.msk [vmem:[#allocation2 + $0x2a] sm:$0xff] %vm18397_vm0, %v368_v2  ;;  %v391_v35 = vld [vmem:[%s13857_s11 + $0xc0] sm:$0xff]  ;;  %v392_v36 = vld [vmem:[%s13857_s11 + $0xc8] sm:$0xff] }
  0x27   : > { %401 = vst.msk [vmem:[#allocation2 + $0x32] sm:$0xff] %vm18397_vm0, %v369_v3  ;;  %402 = vst.msk [vmem:[#allocation2 + $0x3a] sm:$0xff] %vm18397_vm0, %v370_v4  ;;  %v393_v37 = vld [vmem:[%s13857_s11 + $0xd0] sm:$0xff]  ;;  %v394_v38 = vld [vmem:[%s13857_s11 + $0xd8] sm:$0xff] }
  0x28   : > { %403 = vst.msk [vmem:[#allocation2 + $0x42] sm:$0xff] %vm18397_vm0, %v371_v5  ;;  %404 = vst.msk [vmem:[#allocation2 + $0x4a] sm:$0xff] %vm18397_vm0, %v372_v6  ;;  %v13935_v45 = vld [vmem:[#allocation2 + $0x10] sm:$0xff]  ;;  %v431_v46 = vld [vmem:[#allocation2] sm:$0xff] }
  0x29   : > { %405 = vst.msk [vmem:[#allocation2 + $0x52] sm:$0xff] %vm18397_vm0, %v373_v11  ;;  %406 = vst.msk [vmem:[#allocation2 + $0x5a] sm:$0xff] %vm18397_vm0, %v374_v12  ;;  %v13940_v47 = vld [vmem:[#allocation2 + $0x18] sm:$0xff]  ;;  %v432_v48 = vld [vmem:[#allocation2 + $0x8] sm:$0xff] }
  0x2a   : > { %407 = vst.msk [vmem:[#allocation2 + $0x62] sm:$0xff] %vm18397_vm0, %v375_v13  ;;  %408 = vst.msk [vmem:[#allocation2 + $0x6a] sm:$0xff] %vm18397_vm0, %v376_v14 }
  0x2b   : > { %409 = vst.msk [vmem:[#allocation2 + $0x72] sm:$0xff] %vm18397_vm0, %v377_v15  ;;  %410 = vst.msk [vmem:[#allocation2 + $0x7a] sm:$0xff] %vm18397_vm0, %v378_v16 }
  0x2c   : > { %411 = vst.msk [vmem:[#allocation2 + $0x82] sm:$0xff] %vm18397_vm0, %v379_v17  ;;  %412 = vst.msk [vmem:[#allocation2 + $0x8a] sm:$0xff] %vm18397_vm0, %v380_v18 }
  0x2d   : > { %413 = vst.msk [vmem:[#allocation2 + $0x92] sm:$0xff] %vm18397_vm0, %v381_v19  ;;  %414 = vst.msk [vmem:[#allocation2 + $0x9a] sm:$0xff] %vm18397_vm0, %v382_v20  ;;  %v500_v24 = vld [vmem:[#allocation2 + $0x29] sm:$0xff]  ;;  %v13902_v25 = vld [vmem:[#allocation2 + $0x21] sm:$0xff] }
  0x2e   : > { %415 = vst.msk [vmem:[#allocation2 + $0xa2] sm:$0xff] %vm18397_vm0, %v383_v21  ;;  %416 = vst.msk [vmem:[#allocation2 + $0xaa] sm:$0xff] %vm18397_vm0, %v384_v22  ;;  %569 = vrot.lane.b32.xlu1 %v500_v24, %s13682_s12  ;;  %567 = vrot.lane.b32.xlu0 %v13902_v25, %s13682_s12  ;;  %v502_v30 = vld [vmem:[#allocation2 + $0x39] sm:$0xff]  ;;  %v501_v31 = vld [vmem:[#allocation2 + $0x31] sm:$0xff] }
  0x2f   : > { %417 = vst.msk [vmem:[#allocation2 + $0xb2] sm:$0xff] %vm18397_vm0, %v385_v23  ;;  %418 = vst.msk [vmem:[#allocation2 + $0xba] sm:$0xff] %vm18397_vm0, %v386_v26  ;;  %v504_v32 = vld [vmem:[#allocation2 + $0x49] sm:$0xff]  ;;  %v503_v33 = vld [vmem:[#allocation2 + $0x41] sm:$0xff] }
  0x30   : > { %419 = vst.msk [vmem:[#allocation2 + $0xc2] sm:$0xff] %vm18397_vm0, %v387_v27  ;;  %420 = vst.msk [vmem:[#allocation2 + $0xca] sm:$0xff] %vm18397_vm0, %v388_v28  ;;  %v506_v39 = vld [vmem:[#allocation2 + $0x59] sm:$0xff]  ;;  %v505_v40 = vld [vmem:[#allocation2 + $0x51] sm:$0xff] }
  0x31   : > { %421 = vst.msk [vmem:[#allocation2 + $0xd2] sm:$0xff] %vm18397_vm0, %v389_v29  ;;  %422 = vst.msk [vmem:[#allocation2 + $0xda] sm:$0xff] %vm18397_vm0, %v390_v34  ;;  %v508_v41 = vld [vmem:[#allocation2 + $0x69] sm:$0xff]  ;;  %v507_v42 = vld [vmem:[#allocation2 + $0x61] sm:$0xff] }
  0x32   : > { %573 = vrot.lane.b32.xlu1 %v502_v30, %s13682_s12  ;;  %571 = vrot.lane.b32.xlu0 %v501_v31, %s13682_s12  ;;  %423 = vst.msk [vmem:[#allocation2 + $0xe2] sm:$0xff] %vm18397_vm0, %v391_v35  ;;  %424 = vst.msk [vmem:[#allocation2 + $0xea] sm:$0xff] %vm18397_vm0, %v392_v36  ;;  %v510_v43 = vld [vmem:[#allocation2 + $0x79] sm:$0xff]  ;;  %v509_v44 = vld [vmem:[#allocation2 + $0x71] sm:$0xff] }
  0x33   : > { %425 = vst.msk [vmem:[#allocation2 + $0xf2] sm:$0xff] %vm18397_vm0, %v393_v37  ;;  %426 = vst.msk [vmem:[#allocation2 + $0xfa] sm:$0xff] %vm18397_vm0, %v394_v38  ;;  %v13947_v49 = vld [vmem:[#allocation2 + $0x28] sm:$0xff]  ;;  %v13949_v50 = vld [vmem:[#allocation2 + $0x20] sm:$0xff] }
  0x34   : > { %465 = vst.msk [vmem:[#allocation3 + $0x10] sm:$0xff] %vm18397_vm0, %v13935_v45  ;;  %463 = vst.msk [vmem:[#allocation3] sm:$0xff] %vm18397_vm0, %v431_v46  ;;  %v512_v51 = vld [vmem:[#allocation2 + $0x89] sm:$0xff]  ;;  %v511_v52 = vld [vmem:[#allocation2 + $0x81] sm:$0xff] }
  0x35   : > { %466 = vst.msk [vmem:[#allocation3 + $0x18] sm:$0xff] %vm18397_vm0, %v13940_v47  ;;  %464 = vst.msk [vmem:[#allocation3 + $0x8] sm:$0xff] %vm18397_vm0, %v432_v48  ;;  %v13955_v53 = vld [vmem:[#allocation2 + $0x38] sm:$0xff]  ;;  %v13959_v54 = vld [vmem:[#allocation2 + $0x30] sm:$0xff] }
  0x36   : > { %577 = vrot.lane.b32.xlu1 %v504_v32, %s13682_s12  ;;  %575 = vrot.lane.b32.xlu0 %v503_v33, %s13682_s12  ;;  %468 = vst.msk [vmem:[#allocation3 + $0x28] sm:$0xff] %vm18397_vm0, %v13947_v49  ;;  %467 = vst.msk [vmem:[#allocation3 + $0x20] sm:$0xff] %vm18397_vm0, %v13949_v50  ;;  %v13963_v55 = vld [vmem:[#allocation2 + $0x48] sm:$0xff]  ;;  %v13965_v56 = vld [vmem:[#allocation2 + $0x40] sm:$0xff] }
  0x37   : > { %470 = vst.msk [vmem:[#allocation3 + $0x38] sm:$0xff] %vm18397_vm0, %v13955_v53  ;;  %469 = vst.msk [vmem:[#allocation3 + $0x30] sm:$0xff] %vm18397_vm0, %v13959_v54  ;;  %v442_v57 = vld [vmem:[#allocation2 + $0x58] sm:$0xff]  ;;  %v441_v58 = vld [vmem:[#allocation2 + $0x50] sm:$0xff] }
  0x38   : > { %472 = vst.msk [vmem:[#allocation3 + $0x48] sm:$0xff] %vm18397_vm0, %v13963_v55  ;;  %471 = vst.msk [vmem:[#allocation3 + $0x40] sm:$0xff] %vm18397_vm0, %v13965_v56  ;;  %v514_v59 = vld [vmem:[#allocation2 + $0x99] sm:$0xff]  ;;  %v513_v60 = vld [vmem:[#allocation2 + $0x91] sm:$0xff] }
  0x39   : > { %474 = vst.msk [vmem:[#allocation3 + $0x58] sm:$0xff] %vm18397_vm0, %v442_v57  ;;  %473 = vst.msk [vmem:[#allocation3 + $0x50] sm:$0xff] %vm18397_vm0, %v441_v58  ;;  %v444_v61 = vld [vmem:[#allocation2 + $0x68] sm:$0xff]  ;;  %v443_v62 = vld [vmem:[#allocation2 + $0x60] sm:$0xff] }
  0x3a   : > { %581 = vrot.lane.b32.xlu1 %v506_v39, %s13682_s12  ;;  %579 = vrot.lane.b32.xlu0 %v505_v40, %s13682_s12  ;;  %476 = vst.msk [vmem:[#allocation3 + $0x68] sm:$0xff] %vm18397_vm0, %v444_v61  ;;  %475 = vst.msk [vmem:[#allocation3 + $0x60] sm:$0xff] %vm18397_vm0, %v443_v62  ;;  %v446_v63 = vld [vmem:[#allocation2 + $0x78] sm:$0xff]  ;;  %v445_v1 = vld [vmem:[#allocation2 + $0x70] sm:$0xff] }
  0x3b   : > { %478 = vst.msk [vmem:[#allocation3 + $0x78] sm:$0xff] %vm18397_vm0, %v446_v63  ;;  %477 = vst.msk [vmem:[#allocation3 + $0x70] sm:$0xff] %vm18397_vm0, %v445_v1  ;;  %v448_v2 = vld [vmem:[#allocation2 + $0x88] sm:$0xff]  ;;  %v447_v3 = vld [vmem:[#allocation2 + $0x80] sm:$0xff] }
  0x3c   : > { %v516_v4 = vld [vmem:[#allocation2 + $0xa9] sm:$0xff]  ;;  %v515_v5 = vld [vmem:[#allocation2 + $0xa1] sm:$0xff]  ;;  %480 = vst.msk [vmem:[#allocation3 + $0x88] sm:$0xff] %vm18397_vm0, %v448_v2  ;;  %479 = vst.msk [vmem:[#allocation3 + $0x80] sm:$0xff] %vm18397_vm0, %v447_v3 }
  0x3d   : > { %v450_v6 = vld [vmem:[#allocation2 + $0x98] sm:$0xff]  ;;  %v449_v7 = vld [vmem:[#allocation2 + $0x90] sm:$0xff]  ;;  %v452_v8 = vld [vmem:[#allocation2 + $0xa8] sm:$0xff] }
  0x3e   : > { %585 = vrot.lane.b32.xlu1 %v508_v41, %s13682_s12  ;;  %583 = vrot.lane.b32.xlu0 %v507_v42, %s13682_s12  ;;  %482 = vst.msk [vmem:[#allocation3 + $0x98] sm:$0xff] %vm18397_vm0, %v450_v6  ;;  %481 = vst.msk [vmem:[#allocation3 + $0x90] sm:$0xff] %vm18397_vm0, %v449_v7  ;;  %v451_v10 = vld [vmem:[#allocation2 + $0xa0] sm:$0xff]  ;;  %v454_v11 = vld [vmem:[#allocation2 + $0xb8] sm:$0xff] }
  0x3f   : > { %484 = vst.msk [vmem:[#allocation3 + $0xa8] sm:$0xff] %vm18397_vm0, %v452_v8  ;;  %483 = vst.msk [vmem:[#allocation3 + $0xa0] sm:$0xff] %vm18397_vm0, %v451_v10  ;;  %v453_v12 = vld [vmem:[#allocation2 + $0xb0] sm:$0xff]  ;;  %v518_v13 = vld [vmem:[#allocation2 + $0xb9] sm:$0xff] }
  0x40   : > { %v517_v14 = vld [vmem:[#allocation2 + $0xb1] sm:$0xff]  ;;  %486 = vst.msk [vmem:[#allocation3 + $0xb8] sm:$0xff] %vm18397_vm0, %v454_v11  ;;  %485 = vst.msk [vmem:[#allocation3 + $0xb0] sm:$0xff] %vm18397_vm0, %v453_v12  ;;  %v456_v15 = vld [vmem:[#allocation2 + $0xc8] sm:$0xff] }
  0x41   : > { %488 = vst.msk [vmem:[#allocation3 + $0xc8] sm:$0xff] %vm18397_vm0, %v456_v15  ;;  %v455_v16 = vld [vmem:[#allocation2 + $0xc0] sm:$0xff]  ;;  %v458_v17 = vld [vmem:[#allocation2 + $0xd8] sm:$0xff]  ;;  %v457_v18 = vld [vmem:[#allocation2 + $0xd0] sm:$0xff] }
  0x42   : > { %589 = vrot.lane.b32.xlu1 %v510_v43, %s13682_s12  ;;  %587 = vrot.lane.b32.xlu0 %v509_v44, %s13682_s12  ;;  %487 = vst.msk [vmem:[#allocation3 + $0xc0] sm:$0xff] %vm18397_vm0, %v455_v16  ;;  %490 = vst.msk [vmem:[#allocation3 + $0xd8] sm:$0xff] %vm18397_vm0, %v458_v17  ;;  %v460_v19 = vld [vmem:[#allocation2 + $0xe8] sm:$0xff]  ;;  %v459_v20 = vld [vmem:[#allocation2 + $0xe0] sm:$0xff] }
  0x43   : > { %489 = vst.msk [vmem:[#allocation3 + $0xd0] sm:$0xff] %vm18397_vm0, %v457_v18  ;;  %v520_v21 = vld [vmem:[#allocation2 + $0xc9] sm:$0xff]  ;;  %v519_v22 = vld [vmem:[#allocation2 + $0xc1] sm:$0xff]  ;;  %492 = vst.msk [vmem:[#allocation3 + $0xe8] sm:$0xff] %vm18397_vm0, %v460_v19 }
  0x44   : > { %491 = vst.msk [vmem:[#allocation3 + $0xe0] sm:$0xff] %vm18397_vm0, %v459_v20  ;;  %v462_v23 = vld [vmem:[#allocation2 + $0xf8] sm:$0xff]  ;;  %v461_v24 = vld [vmem:[#allocation2 + $0xf0] sm:$0xff]  ;;  %v395_v28 = vld [vmem:[%s13857_s11 + $0xe0] sm:$0xff] }
  0x45   : > { %494 = vst.msk [vmem:[#allocation3 + $0xf8] sm:$0xff] %vm18397_vm0, %v462_v23  ;;  %493 = vst.msk [vmem:[#allocation3 + $0xf0] sm:$0xff] %vm18397_vm0, %v461_v24  ;;  %v522_v26 = vld [vmem:[#allocation2 + $0xd9] sm:$0xff]  ;;  %v521_v27 = vld [vmem:[#allocation2 + $0xd1] sm:$0xff] }
  0x46   : > { %593 = vrot.lane.b32.xlu1 %v512_v51, %s13682_s12  ;;  %591 = vrot.lane.b32.xlu0 %v511_v52, %s13682_s12  ;;  %427 = vst.msk [vmem:[#allocation2 + $0x102] sm:$0xff] %vm18397_vm0, %v395_v28  ;;  %v524_v29 = vld [vmem:[#allocation2 + $0xe9] sm:$0xff]  ;;  %v523_v30 = vld [vmem:[#allocation2 + $0xe1] sm:$0xff]  ;;  %v526_v31 = vld [vmem:[#allocation2 + $0xf9] sm:$0xff]  ;;  %vm5752_vm0 = vcmask 1040384  }
  0x47   : > { %v525_v32 = vld [vmem:[#allocation2 + $0xf1] sm:$0xff]  ;;  %v688_v34 = vld [vmem:[#allocation2 + $0x2] sm:$0xff]  ;;  %v14013_v35 = vld [vmem:[#allocation2 + $0x1a] sm:$0xff] }
  0x48   : > { %v689_v33 = vld [vmem:[#allocation2 + $0xa] sm:$0xff]  ;;  %v14015_v36 = vld [vmem:[#allocation2 + $0x12] sm:$0xff]  ;;  %v14023_v38 = vld [vmem:[#allocation2 + $0x22] sm:$0xff] }
  0x49   : > { %v14021_v37 = vld [vmem:[#allocation2 + $0x2a] sm:$0xff]  ;;  %v14029_v39 = vld [vmem:[#allocation2 + $0x3a] sm:$0xff]  ;;  %v14031_v40 = vld [vmem:[#allocation2 + $0x32] sm:$0xff] }
  0x4a   : > { %597 = vrot.lane.b32.xlu1 %v514_v59, %s13682_s12  ;;  %595 = vrot.lane.b32.xlu0 %v513_v60, %s13682_s12  ;;  %v697_v41 = vld [vmem:[#allocation2 + $0x4a] sm:$0xff]  ;;  %v696_v42 = vld [vmem:[#allocation2 + $0x42] sm:$0xff]  ;;  %v699_v43 = vld [vmem:[#allocation2 + $0x5a] sm:$0xff] }
  0x4b   : > { %v698_v44 = vld [vmem:[#allocation2 + $0x52] sm:$0xff]  ;;  %v701_v46 = vld [vmem:[#allocation2 + $0x6a] sm:$0xff]  ;;  %v700_v48 = vld [vmem:[#allocation2 + $0x62] sm:$0xff] }
  0x4c   : > { %v703_v51 = vld [vmem:[#allocation2 + $0x7a] sm:$0xff]  ;;  %v702_v52 = vld [vmem:[#allocation2 + $0x72] sm:$0xff]  ;;  %v705_v57 = vld [vmem:[#allocation2 + $0x8a] sm:$0xff] }
  0x4d   : > { %v704_v58 = vld [vmem:[#allocation2 + $0x82] sm:$0xff]  ;;  %v707_v59 = vld [vmem:[#allocation2 + $0x9a] sm:$0xff]  ;;  %v706_v60 = vld [vmem:[#allocation2 + $0x92] sm:$0xff] }
  0x4e   : > { %601 = vrot.lane.b32.xlu1 %v516_v4, %s13682_s12  ;;  %599 = vrot.lane.b32.xlu0 %v515_v5, %s13682_s12  ;;  %v709_v61 = vld [vmem:[#allocation2 + $0xaa] sm:$0xff]  ;;  %v708_v62 = vld [vmem:[#allocation2 + $0xa2] sm:$0xff]  ;;  %v711_v63 = vld [vmem:[#allocation2 + $0xba] sm:$0xff] }
  0x4f   : > { %v710_v1 = vld [vmem:[#allocation2 + $0xb2] sm:$0xff]  ;;  %v713_v2 = vld [vmem:[#allocation2 + $0xca] sm:$0xff]  ;;  %v712_v3 = vld [vmem:[#allocation2 + $0xc2] sm:$0xff] }
  0x50   : > { %v715_v4 = vld [vmem:[#allocation2 + $0xda] sm:$0xff]  ;;  %v714_v5 = vld [vmem:[#allocation2 + $0xd2] sm:$0xff]  ;;  %v717_v8 = vld [vmem:[#allocation2 + $0xea] sm:$0xff] }
  0x51   : > { %v716_v10 = vld [vmem:[#allocation2 + $0xe2] sm:$0xff]  ;;  %v882_v17 = vld [vmem:[#allocation2 + $0xb] sm:$0xff] }
  0x52   : > { %605 = vrot.lane.b32.xlu1 %v518_v13, %s13682_s12  ;;  %603 = vrot.lane.b32.xlu0 %v517_v14, %s13682_s12  ;;  %v719_v13 = vld [vmem:[#allocation2 + $0xfa] sm:$0xff]  ;;  %v718_v14 = vld [vmem:[#allocation2 + $0xf2] sm:$0xff]  ;;  %v881_v18 = vld [vmem:[#allocation2 + $0x3] sm:$0xff] }
  0x56   : > { %609 = vrot.lane.b32.xlu1 %v520_v21, %s13682_s12  ;;  %607 = vrot.lane.b32.xlu0 %v519_v22, %s13682_s12  ;;  %v14071_v21 = vld [vmem:[#allocation2 + $0x1b] sm:$0xff]  ;;  %v14073_v22 = vld [vmem:[#allocation2 + $0x13] sm:$0xff] }
  0x5a   : > { %613 = vrot.lane.b32.xlu1 %v522_v26, %s13682_s12  ;;  %611 = vrot.lane.b32.xlu0 %v521_v27, %s13682_s12  ;;  %v14081_v26 = vld [vmem:[#allocation2 + $0x2b] sm:$0xff]  ;;  %v14083_v27 = vld [vmem:[#allocation2 + $0x23] sm:$0xff] }
  0x5e   : > { %617 = vrot.lane.b32.xlu1 %v524_v29, %s13682_s12  ;;  %615 = vrot.lane.b32.xlu0 %v523_v30, %s13682_s12  ;;  %v14091_v30 = vld [vmem:[#allocation2 + $0x3b] sm:$0xff] }
  0x62   : > { %621 = vrot.lane.b32.xlu1 %v526_v31, %s13682_s12  ;;  %619 = vrot.lane.b32.xlu0 %v525_v32, %s13682_s12  ;;  %v14093_v31 = vld [vmem:[#allocation2 + $0x33] sm:$0xff]  ;;  %s18429_s12 = smov 20  }
  0x66   : > { %754 = vrot.lane.b32.xlu1 %v689_v33, %s13683_s13  ;;  %752 = vrot.lane.b32.xlu0 %v688_v34, %s13683_s13  ;;  %v890_v34 = vld [vmem:[#allocation2 + $0x4b] sm:$0xff] }
  0x6a   : > { %758 = vrot.lane.b32.xlu1 %v14013_v35, %s13683_s13  ;;  %756 = vrot.lane.b32.xlu0 %v14015_v36, %s13683_s13 }
  0x6e   : > { %762 = vrot.lane.b32.xlu1 %v14021_v37, %s13683_s13  ;;  %760 = vrot.lane.b32.xlu0 %v14023_v38, %s13683_s13 }
  0x72   : > { %766 = vrot.lane.b32.xlu1 %v14029_v39, %s13683_s13  ;;  %764 = vrot.lane.b32.xlu0 %v14031_v40, %s13683_s13 }
  0x76   : > { %770 = vrot.lane.b32.xlu1 %v697_v41, %s13683_s13  ;;  %768 = vrot.lane.b32.xlu0 %v696_v42, %s13683_s13  ;;  %v14101_v41 = vld [vmem:[#allocation2 + $0x43] sm:$0xff] }
  0x7a   : > { %774 = vrot.lane.b32.xlu1 %v699_v43, %s13683_s13  ;;  %772 = vrot.lane.b32.xlu0 %v698_v44, %s13683_s13  ;;  %v892_v44 = vld [vmem:[#allocation2 + $0x5b] sm:$0xff] }
  0x7e   : > { %778 = vrot.lane.b32.xlu1 %v701_v46, %s13683_s13  ;;  %776 = vrot.lane.b32.xlu0 %v700_v48, %s13683_s13  ;;  %v891_v46 = vld [vmem:[#allocation2 + $0x53] sm:$0xff] }
  0x82   : > { %782 = vrot.lane.b32.xlu1 %v703_v51, %s13683_s13  ;;  %780 = vrot.lane.b32.xlu0 %v702_v52, %s13683_s13  ;;  %v894_v52 = vld [vmem:[#allocation2 + $0x6b] sm:$0xff] }
  0x86   : > { %786 = vrot.lane.b32.xlu1 %v705_v57, %s13683_s13  ;;  %784 = vrot.lane.b32.xlu0 %v704_v58, %s13683_s13  ;;  %v893_v57 = vld [vmem:[#allocation2 + $0x63] sm:$0xff] }
  0x8a   : > { %790 = vrot.lane.b32.xlu1 %v707_v59, %s13683_s13  ;;  %788 = vrot.lane.b32.xlu0 %v706_v60, %s13683_s13  ;;  %v896_v60 = vld [vmem:[#allocation2 + $0x7b] sm:$0xff] }
  0x8e   : > { %794 = vrot.lane.b32.xlu1 %v709_v61, %s13683_s13  ;;  %792 = vrot.lane.b32.xlu0 %v708_v62, %s13683_s13  ;;  %v564_v6 = vpop.permute.xlu1 %563  ;;  %v560_v7 = vpop.permute.xlu0 %559  ;;  %v895_v61 = vld [vmem:[#allocation2 + $0x73] sm:$0xff] }
  0x8f   : > { %658 = vst.msk [vmem:[#allocation3 + $0x10] sm:$0xff] %vm655_vm1, %v564_v6  ;;  %656 = vst.msk [vmem:[#allocation3] sm:$0xff] %vm655_vm1, %v560_v7  ;;  %v899_v6 = vld [vmem:[#allocation2 + $0x93] sm:$0xff] }
  0x92   : > { %798 = vrot.lane.b32.xlu1 %v711_v63, %s13683_s13  ;;  %796 = vrot.lane.b32.xlu0 %v710_v1, %s13683_s13  ;;  %v566_v11 = vpop.permute.xlu1 %565  ;;  %v562_v12 = vpop.permute.xlu0 %561  ;;  %v898_v1 = vld [vmem:[#allocation2 + $0x8b] sm:$0xff] }
  0x93   : > { %659 = vst.msk [vmem:[#allocation3 + $0x18] sm:$0xff] %vm655_vm1, %v566_v11  ;;  %657 = vst.msk [vmem:[#allocation3 + $0x8] sm:$0xff] %vm655_vm1, %v562_v12  ;;  %v901_v11 = vld [vmem:[#allocation2 + $0xa3] sm:$0xff] }
  0x96   : > { %802 = vrot.lane.b32.xlu1 %v713_v2, %s13683_s13  ;;  %800 = vrot.lane.b32.xlu0 %v712_v3, %s13683_s13  ;;  %v897_v2 = vld [vmem:[#allocation2 + $0x83] sm:$0xff] }
  0x9a   : > { %806 = vrot.lane.b32.xlu1 %v715_v4, %s13683_s13  ;;  %804 = vrot.lane.b32.xlu0 %v714_v5, %s13683_s13  ;;  %v900_v5 = vld [vmem:[#allocation2 + $0x9b] sm:$0xff] }
  0x9e   : > { %810 = vrot.lane.b32.xlu1 %v717_v8, %s13683_s13  ;;  %808 = vrot.lane.b32.xlu0 %v716_v10, %s13683_s13  ;;  %v902_v10 = vld [vmem:[#allocation2 + $0xab] sm:$0xff] }
  0xa0   : > { %v570_v15 = vpop.permute.xlu1 %569  ;;  %v568_v16 = vpop.permute.xlu0 %567 }
  0xa1   : > { %661 = vst.msk [vmem:[#allocation3 + $0x28] sm:$0xff] %vm655_vm1, %v570_v15  ;;  %660 = vst.msk [vmem:[#allocation3 + $0x20] sm:$0xff] %vm655_vm1, %v568_v16  ;;  %v903_v15 = vld [vmem:[#allocation2 + $0xb3] sm:$0xff] }
  0xa2   : > { %814 = vrot.lane.b32.xlu1 %v719_v13, %s13683_s13  ;;  %812 = vrot.lane.b32.xlu0 %v718_v14, %s13683_s13  ;;  %v904_v14 = vld [vmem:[#allocation2 + $0xbb] sm:$0xff]  ;;  %s18431_s13 = smov 21  }
  0xa4   : > { %v574_v19 = vpop.permute.xlu1 %573  ;;  %v572_v20 = vpop.permute.xlu0 %571 }
  0xa5   : > { %663 = vst.msk [vmem:[#allocation3 + $0x38] sm:$0xff] %vm655_vm1, %v574_v19  ;;  %662 = vst.msk [vmem:[#allocation3 + $0x30] sm:$0xff] %vm655_vm1, %v572_v20  ;;  %v905_v19 = vld [vmem:[#allocation2 + $0xc3] sm:$0xff] }
  0xa6   : > { %947 = vrot.lane.b32.xlu1 %v882_v17, %s13684_s14  ;;  %945 = vrot.lane.b32.xlu0 %v881_v18, %s13684_s14  ;;  %v906_v18 = vld [vmem:[#allocation2 + $0xcb] sm:$0xff] }
  0xa8   : > { %v578_v23 = vpop.permute.xlu1 %577  ;;  %v576_v24 = vpop.permute.xlu0 %575 }
  0xa9   : > { %665 = vst.msk [vmem:[#allocation3 + $0x48] sm:$0xff] %vm655_vm1, %v578_v23  ;;  %664 = vst.msk [vmem:[#allocation3 + $0x40] sm:$0xff] %vm655_vm1, %v576_v24  ;;  %v908_v24 = vld [vmem:[#allocation2 + $0xdb] sm:$0xff] }
  0xaa   : > { %951 = vrot.lane.b32.xlu1 %v14071_v21, %s13684_s14  ;;  %949 = vrot.lane.b32.xlu0 %v14073_v22, %s13684_s14 }
  0xac   : > { %v582_v28 = vpop.permute.xlu1 %581  ;;  %v580_v29 = vpop.permute.xlu0 %579 }
  0xad   : > { %667 = vst.msk [vmem:[#allocation3 + $0x58] sm:$0xff] %vm655_vm1, %v582_v28  ;;  %666 = vst.msk [vmem:[#allocation3 + $0x50] sm:$0xff] %vm655_vm1, %v580_v29  ;;  %v907_v28 = vld [vmem:[#allocation2 + $0xd3] sm:$0xff] }
  0xae   : > { %955 = vrot.lane.b32.xlu1 %v14081_v26, %s13684_s14  ;;  %953 = vrot.lane.b32.xlu0 %v14083_v27, %s13684_s14 }
  0xb0   : > { %v586_v32 = vpop.permute.xlu1 %585  ;;  %v584_v33 = vpop.permute.xlu0 %583 }
  0xb1   : > { %669 = vst.msk [vmem:[#allocation3 + $0x68] sm:$0xff] %vm655_vm1, %v586_v32  ;;  %668 = vst.msk [vmem:[#allocation3 + $0x60] sm:$0xff] %vm655_vm1, %v584_v33  ;;  %v910_v33 = vld [vmem:[#allocation2 + $0xeb] sm:$0xff] }
  0xb2   : > { %959 = vrot.lane.b32.xlu1 %v14091_v30, %s13684_s14  ;;  %957 = vrot.lane.b32.xlu0 %v14093_v31, %s13684_s14 }
  0xb4   : > { %v590_v42 = vpop.permute.xlu1 %589  ;;  %v588_v43 = vpop.permute.xlu0 %587 }
  0xb5   : > { %671 = vst.msk [vmem:[#allocation3 + $0x78] sm:$0xff] %vm655_vm1, %v590_v42  ;;  %670 = vst.msk [vmem:[#allocation3 + $0x70] sm:$0xff] %vm655_vm1, %v588_v43 }
  0xb6   : > { %963 = vrot.lane.b32.xlu1 %v890_v34, %s13684_s14  ;;  %961 = vrot.lane.b32.xlu0 %v14101_v41, %s13684_s14  ;;  %v909_v34 = vld [vmem:[#allocation2 + $0xe3] sm:$0xff] }
  0xb8   : > { %v594_v48 = vpop.permute.xlu1 %593  ;;  %v592_v51 = vpop.permute.xlu0 %591 }
  0xb9   : > { %673 = vst.msk [vmem:[#allocation3 + $0x88] sm:$0xff] %vm655_vm1, %v594_v48  ;;  %672 = vst.msk [vmem:[#allocation3 + $0x80] sm:$0xff] %vm655_vm1, %v592_v51 }
  0xba   : > { %967 = vrot.lane.b32.xlu1 %v892_v44, %s13684_s14  ;;  %965 = vrot.lane.b32.xlu0 %v891_v46, %s13684_s14  ;;  %v912_v44 = vld [vmem:[#allocation2 + $0xfb] sm:$0xff]  ;;  %v911_v46 = vld [vmem:[#allocation2 + $0xf3] sm:$0xff] }
  0xbc   : > { %v598_v58 = vpop.permute.xlu1 %597  ;;  %v596_v59 = vpop.permute.xlu0 %595 }
  0xbd   : > { %675 = vst.msk [vmem:[#allocation3 + $0x98] sm:$0xff] %vm655_vm1, %v598_v58  ;;  %674 = vst.msk [vmem:[#allocation3 + $0x90] sm:$0xff] %vm655_vm1, %v596_v59 }
  0xbe   : > { %971 = vrot.lane.b32.xlu1 %v894_v52, %s13684_s14  ;;  %969 = vrot.lane.b32.xlu0 %v893_v57, %s13684_s14  ;;  %v1075_v52 = vld [vmem:[#allocation2 + $0xc] sm:$0xff]  ;;  %v1074_v57 = vld [vmem:[#allocation2 + $0x4] sm:$0xff] }
  0xc0   : > { %v602_v62 = vpop.permute.xlu1 %601  ;;  %v600_v63 = vpop.permute.xlu0 %599 }
  0xc1   : > { %677 = vst.msk [vmem:[#allocation3 + $0xa8] sm:$0xff] %vm655_vm1, %v602_v62  ;;  %676 = vst.msk [vmem:[#allocation3 + $0xa0] sm:$0xff] %vm655_vm1, %v600_v63 }
  0xc2   : > { %975 = vrot.lane.b32.xlu1 %v896_v60, %s13684_s14  ;;  %973 = vrot.lane.b32.xlu0 %v895_v61, %s13684_s14  ;;  %v14156_v60 = vld [vmem:[#allocation2 + $0x1c] sm:$0xff]  ;;  %v14158_v61 = vld [vmem:[#allocation2 + $0x14] sm:$0xff] }
  0xc4   : > { %v606_v3 = vpop.permute.xlu1 %605  ;;  %v604_v4 = vpop.permute.xlu0 %603 }
  0xc5   : > { %679 = vst.msk [vmem:[#allocation3 + $0xb8] sm:$0xff] %vm655_vm1, %v606_v3  ;;  %678 = vst.msk [vmem:[#allocation3 + $0xb0] sm:$0xff] %vm655_vm1, %v604_v4 }
  0xc6   : > { %979 = vrot.lane.b32.xlu1 %v898_v1, %s13684_s14  ;;  %977 = vrot.lane.b32.xlu0 %v897_v2, %s13684_s14  ;;  %v14166_v1 = vld [vmem:[#allocation2 + $0x2c] sm:$0xff]  ;;  %v14168_v2 = vld [vmem:[#allocation2 + $0x24] sm:$0xff] }
  0xc8   : > { %v610_v7 = vpop.permute.xlu1 %609  ;;  %v608_v8 = vpop.permute.xlu0 %607 }
  0xc9   : > { %681 = vst.msk [vmem:[#allocation3 + $0xc8] sm:$0xff] %vm655_vm1, %v610_v7  ;;  %680 = vst.msk [vmem:[#allocation3 + $0xc0] sm:$0xff] %vm655_vm1, %v608_v8 }
  0xca   : > { %983 = vrot.lane.b32.xlu1 %v900_v5, %s13684_s14  ;;  %981 = vrot.lane.b32.xlu0 %v899_v6, %s13684_s14  ;;  %v14176_v5 = vld [vmem:[#allocation2 + $0x3c] sm:$0xff]  ;;  %v14178_v6 = vld [vmem:[#allocation2 + $0x34] sm:$0xff] }
  0xcc   : > { %v614_v12 = vpop.permute.xlu1 %613  ;;  %v612_v13 = vpop.permute.xlu0 %611 }
  0xcd   : > { %683 = vst.msk [vmem:[#allocation3 + $0xd8] sm:$0xff] %vm655_vm1, %v614_v12  ;;  %682 = vst.msk [vmem:[#allocation3 + $0xd0] sm:$0xff] %vm655_vm1, %v612_v13 }
  0xce   : > { %987 = vrot.lane.b32.xlu1 %v902_v10, %s13684_s14  ;;  %985 = vrot.lane.b32.xlu0 %v901_v11, %s13684_s14  ;;  %v14186_v10 = vld [vmem:[#allocation2 + $0x4c] sm:$0xff]  ;;  %v14188_v11 = vld [vmem:[#allocation2 + $0x44] sm:$0xff] }
  0xd0   : > { %v618_v16 = vpop.permute.xlu1 %617  ;;  %v616_v17 = vpop.permute.xlu0 %615 }
  0xd1   : > { %685 = vst.msk [vmem:[#allocation3 + $0xe8] sm:$0xff] %vm655_vm1, %v618_v16  ;;  %684 = vst.msk [vmem:[#allocation3 + $0xe0] sm:$0xff] %vm655_vm1, %v616_v17 }
  0xd2   : > { %991 = vrot.lane.b32.xlu1 %v904_v14, %s13684_s14  ;;  %989 = vrot.lane.b32.xlu0 %v903_v15, %s13684_s14  ;;  %v1085_v14 = vld [vmem:[#allocation2 + $0x5c] sm:$0xff]  ;;  %v1084_v15 = vld [vmem:[#allocation2 + $0x54] sm:$0xff] }
  0xd4   : > { %v622_v20 = vpop.permute.xlu1 %621  ;;  %v620_v23 = vpop.permute.xlu0 %619 }
  0xd5   : > { %687 = vst.msk [vmem:[#allocation3 + $0xf8] sm:$0xff] %vm655_vm1, %v622_v20  ;;  %686 = vst.msk [vmem:[#allocation3 + $0xf0] sm:$0xff] %vm655_vm1, %v620_v23  ;;  %vm18401_vm1 = vcmask 138368  }
  0xd6   : > { %995 = vrot.lane.b32.xlu1 %v906_v18, %s13684_s14  ;;  %993 = vrot.lane.b32.xlu0 %v905_v19, %s13684_s14  ;;  %v1087_v18 = vld [vmem:[#allocation2 + $0x6c] sm:$0xff]  ;;  %v1086_v19 = vld [vmem:[#allocation2 + $0x64] sm:$0xff] }
  0xd8   : > { %v755_v29 = vpop.permute.xlu1 %754  ;;  %v753_v32 = vpop.permute.xlu0 %752 }
  0xd9   : > { %850 = vst.msk [vmem:[#allocation3 + $0x8] sm:$0xff] %vm848_vm2, %v755_v29  ;;  %849 = vst.msk [vmem:[#allocation3] sm:$0xff] %vm848_vm2, %v753_v32 }
  0xda   : > { %999 = vrot.lane.b32.xlu1 %v908_v24, %s13684_s14  ;;  %997 = vrot.lane.b32.xlu0 %v907_v28, %s13684_s14  ;;  %v1089_v24 = vld [vmem:[#allocation2 + $0x7c] sm:$0xff]  ;;  %v1088_v28 = vld [vmem:[#allocation2 + $0x74] sm:$0xff] }
  0xdc   : > { %v759_v42 = vpop.permute.xlu1 %758  ;;  %v757_v43 = vpop.permute.xlu0 %756 }
  0xdd   : > { %852 = vst.msk [vmem:[#allocation3 + $0x18] sm:$0xff] %vm848_vm2, %v759_v42  ;;  %851 = vst.msk [vmem:[#allocation3 + $0x10] sm:$0xff] %vm848_vm2, %v757_v43  ;;  %v1460_v43 = vld [vmem:[#allocation2 + $0x11] sm:$0xff] }
  0xde   : > { %1003 = vrot.lane.b32.xlu1 %v910_v33, %s13684_s14  ;;  %1001 = vrot.lane.b32.xlu0 %v909_v34, %s13684_s14  ;;  %v1090_v33 = vld [vmem:[#allocation2 + $0x84] sm:$0xff] }
  0xe0   : > { %v763_v48 = vpop.permute.xlu1 %762  ;;  %v761_v51 = vpop.permute.xlu0 %760 }
  0xe1   : > { %854 = vst.msk [vmem:[#allocation3 + $0x28] sm:$0xff] %vm848_vm2, %v763_v48  ;;  %853 = vst.msk [vmem:[#allocation3 + $0x20] sm:$0xff] %vm848_vm2, %v761_v51 }
  0xe2   : > { %1007 = vrot.lane.b32.xlu1 %v912_v44, %s13684_s14  ;;  %1005 = vrot.lane.b32.xlu0 %v911_v46, %s13684_s14  ;;  %s18413_s14 = smov 22  }
  0xe4   : > { %v767_v58 = vpop.permute.xlu1 %766  ;;  %v765_v59 = vpop.permute.xlu0 %764 }
  0xe5   : > { %856 = vst.msk [vmem:[#allocation3 + $0x38] sm:$0xff] %vm848_vm2, %v767_v58  ;;  %855 = vst.msk [vmem:[#allocation3 + $0x30] sm:$0xff] %vm848_vm2, %v765_v59 }
  0xe6   : > { %1140 = vrot.lane.b32.xlu1 %v1075_v52, %s18385_s15  ;;  %1138 = vrot.lane.b32.xlu0 %v1074_v57, %s18385_s15 }
  0xe8   : > { %v771_v62 = vpop.permute.xlu1 %770  ;;  %v769_v63 = vpop.permute.xlu0 %768 }
  0xe9   : > { %858 = vst.msk [vmem:[#allocation3 + $0x48] sm:$0xff] %vm848_vm2, %v771_v62  ;;  %857 = vst.msk [vmem:[#allocation3 + $0x40] sm:$0xff] %vm848_vm2, %v769_v63 }
  0xea   : > { %1144 = vrot.lane.b32.xlu1 %v14156_v60, %s18385_s15  ;;  %1142 = vrot.lane.b32.xlu0 %v14158_v61, %s18385_s15 }
  0xec   : > { %v775_v3 = vpop.permute.xlu1 %774  ;;  %v773_v4 = vpop.permute.xlu0 %772 }
  0xed   : > { %860 = vst.msk [vmem:[#allocation3 + $0x58] sm:$0xff] %vm848_vm2, %v775_v3  ;;  %859 = vst.msk [vmem:[#allocation3 + $0x50] sm:$0xff] %vm848_vm2, %v773_v4 }
  0xee   : > { %1148 = vrot.lane.b32.xlu1 %v14166_v1, %s18385_s15  ;;  %1146 = vrot.lane.b32.xlu0 %v14168_v2, %s18385_s15 }
  0xf0   : > { %v779_v7 = vpop.permute.xlu1 %778  ;;  %v777_v8 = vpop.permute.xlu0 %776 }
  0xf1   : > { %862 = vst.msk [vmem:[#allocation3 + $0x68] sm:$0xff] %vm848_vm2, %v779_v7  ;;  %861 = vst.msk [vmem:[#allocation3 + $0x60] sm:$0xff] %vm848_vm2, %v777_v8 }
  0xf2   : > { %1152 = vrot.lane.b32.xlu1 %v14176_v5, %s18385_s15  ;;  %1150 = vrot.lane.b32.xlu0 %v14178_v6, %s18385_s15 }
  0xf4   : > { %v783_v12 = vpop.permute.xlu1 %782  ;;  %v781_v13 = vpop.permute.xlu0 %780 }
  0xf5   : > { %864 = vst.msk [vmem:[#allocation3 + $0x78] sm:$0xff] %vm848_vm2, %v783_v12  ;;  %863 = vst.msk [vmem:[#allocation3 + $0x70] sm:$0xff] %vm848_vm2, %v781_v13 }
  0xf6   : > { %1156 = vrot.lane.b32.xlu1 %v14186_v10, %s18385_s15  ;;  %1154 = vrot.lane.b32.xlu0 %v14188_v11, %s18385_s15 }
  0xf8   : > { %v787_v16 = vpop.permute.xlu1 %786  ;;  %v785_v17 = vpop.permute.xlu0 %784 }
  0xf9   : > { %866 = vst.msk [vmem:[#allocation3 + $0x88] sm:$0xff] %vm848_vm2, %v787_v16  ;;  %865 = vst.msk [vmem:[#allocation3 + $0x80] sm:$0xff] %vm848_vm2, %v785_v17 }
  0xfa   : > { %1160 = vrot.lane.b32.xlu1 %v1085_v14, %s18385_s15  ;;  %1158 = vrot.lane.b32.xlu0 %v1084_v15, %s18385_s15 }
  0xfc   : > { %v791_v20 = vpop.permute.xlu1 %790  ;;  %v789_v23 = vpop.permute.xlu0 %788 }
  0xfd   : > { %868 = vst.msk [vmem:[#allocation3 + $0x98] sm:$0xff] %vm848_vm2, %v791_v20  ;;  %867 = vst.msk [vmem:[#allocation3 + $0x90] sm:$0xff] %vm848_vm2, %v789_v23 }
  0xfe   : > { %1164 = vrot.lane.b32.xlu1 %v1087_v18, %s18385_s15  ;;  %1162 = vrot.lane.b32.xlu0 %v1086_v19, %s18385_s15  ;;  %v1465_v18 = vld [vmem:[#allocation2 + $0x39] sm:$0xff] }
 0x100   : > { %v795_v29 = vpop.permute.xlu1 %794  ;;  %v793_v32 = vpop.permute.xlu0 %792 }
 0x101   : > { %870 = vst.msk [vmem:[#allocation3 + $0xa8] sm:$0xff] %vm848_vm2, %v795_v29  ;;  %869 = vst.msk [vmem:[#allocation3 + $0xa0] sm:$0xff] %vm848_vm2, %v793_v32 }
 0x102   : > { %1168 = vrot.lane.b32.xlu1 %v1089_v24, %s18385_s15  ;;  %1166 = vrot.lane.b32.xlu0 %v1088_v28, %s18385_s15 }
 0x104   : > { %v799_v34 = vpop.permute.xlu1 %798  ;;  %v797_v42 = vpop.permute.xlu0 %796 }
 0x105   : > { %872 = vst.msk [vmem:[#allocation3 + $0xb8] sm:$0xff] %vm848_vm2, %v799_v34  ;;  %871 = vst.msk [vmem:[#allocation3 + $0xb0] sm:$0xff] %vm848_vm2, %v797_v42 }
 0x106   : > { %1331 = vrot.lane.b32.xlu1 %v13935_v45, %s18409_s16  ;;  %1170 = vrot.lane.b32.xlu0 %v1090_v33, %s18385_s15  ;;  %s18389_s15 = smov 23  }
 0x108   : > { %v803_v44 = vpop.permute.xlu1 %802  ;;  %v801_v46 = vpop.permute.xlu0 %800 }
 0x109   : > { %874 = vst.msk [vmem:[#allocation3 + $0xc8] sm:$0xff] %vm848_vm2, %v803_v44  ;;  %873 = vst.msk [vmem:[#allocation3 + $0xc0] sm:$0xff] %vm848_vm2, %v801_v46  ;;  %v3583_v46 = vld [vmem:[#allocation2 + $0x32] sm:$0xff] }
 0x10a   : > { %1524 = vrot.lane.b32.xlu1 %v1460_v43, %s18427_s17  ;;  %1333 = vrot.lane.b32.xlu0 %v13940_v47, %s18409_s16 }
 0x10c   : > { %v807_v48 = vpop.permute.xlu1 %806  ;;  %v805_v51 = vpop.permute.xlu0 %804 }
 0x10d   : > { %876 = vst.msk [vmem:[#allocation3 + $0xd8] sm:$0xff] %vm848_vm2, %v807_v48  ;;  %875 = vst.msk [vmem:[#allocation3 + $0xd0] sm:$0xff] %vm848_vm2, %v805_v51 }
 0x10e   : > { %1717 = vrot.lane.b32.xlu1 %v14015_v36, %s18395_s18  ;;  %1526 = vrot.lane.b32.xlu0 %v13868_v9, %s18427_s17 }
 0x110   : > { %v811_v45 = vpop.permute.xlu1 %810  ;;  %v809_v52 = vpop.permute.xlu0 %808 }
 0x111   : > { %878 = vst.msk [vmem:[#allocation3 + $0xe8] sm:$0xff] %vm848_vm2, %v811_v45  ;;  %877 = vst.msk [vmem:[#allocation3 + $0xe0] sm:$0xff] %vm848_vm2, %v809_v52  ;;  %v14357_v45 = vld [vmem:[#allocation2 + $0x41] sm:$0xff] }
 0x112   : > { %1910 = vrot.lane.b32.xlu1 %v14073_v22, %s18438_s19  ;;  %1719 = vrot.lane.b32.xlu0 %v14013_v35, %s18395_s18 }
 0x114   : > { %v815_v47 = vpop.permute.xlu1 %814  ;;  %v813_v57 = vpop.permute.xlu0 %812 }
 0x115   : > { %880 = vst.msk [vmem:[#allocation3 + $0xf8] sm:$0xff] %vm848_vm2, %v815_v47  ;;  %879 = vst.msk [vmem:[#allocation3 + $0xf0] sm:$0xff] %vm848_vm2, %v813_v57  ;;  %vm18404_vm2 = vcmask 146568  }
 0x116   : > { %1912 = vrot.lane.b32.xlu1 %v14071_v21, %s18438_s19  ;;  %1335 = vrot.lane.b32.xlu0 %v13949_v50, %s18409_s16  ;;  %v1463_v21 = vld [vmem:[#allocation2 + $0x29] sm:$0xff] }
 0x118   : > { %v948_v9 = vpop.permute.xlu1 %947  ;;  %v946_v36 = vpop.permute.xlu0 %945 }
 0x119   : > { %1043 = vst.msk [vmem:[#allocation3 + $0x8] sm:$0xff] %vm1041_vm3, %v948_v9  ;;  %1042 = vst.msk [vmem:[#allocation3] sm:$0xff] %vm1041_vm3, %v946_v36 }
 0x11a   : > { %1337 = vrot.lane.b32.xlu1 %v13947_v49, %s18409_s16  ;;  %2103 = vrot.lane.b32.xlu0 %v14158_v61, %s18443_s20 }
 0x11c   : > { %v952_v35 = vpop.permute.xlu1 %951  ;;  %v950_v22 = vpop.permute.xlu0 %949 }
 0x11d   : > { %1045 = vst.msk [vmem:[#allocation3 + $0x18] sm:$0xff] %vm1041_vm3, %v952_v35  ;;  %1044 = vst.msk [vmem:[#allocation3 + $0x10] sm:$0xff] %vm1041_vm3, %v950_v22  ;;  %v14376_v22 = vld [vmem:[#allocation2 + $0x49] sm:$0xff] }
 0x11e   : > { %2105 = vrot.lane.b32.xlu1 %v14156_v60, %s18443_s20  ;;  %1528 = vrot.lane.b32.xlu0 %v13902_v25, %s18427_s17  ;;  %v2425_v25 = vld [vmem:[#allocation2 + $0x21] sm:$0xff] }
 0x120   : > { %v956_v58 = vpop.permute.xlu1 %955  ;;  %v954_v59 = vpop.permute.xlu0 %953 }
 0x121   : > { %1047 = vst.msk [vmem:[#allocation3 + $0x28] sm:$0xff] %vm1041_vm3, %v956_v58  ;;  %1046 = vst.msk [vmem:[#allocation3 + $0x20] sm:$0xff] %vm1041_vm3, %v954_v59 }
 0x122   : > { %1530 = vrot.lane.b32.xlu1 %v1463_v21, %s18427_s17  ;;  %2296 = vrot.lane.b32.xlu0 %v13949_v50, %s18419_s21 }
 0x124   : > { %v960_v61 = vpop.permute.xlu1 %959  ;;  %v958_v62 = vpop.permute.xlu0 %957 }
 0x125   : > { %1049 = vst.msk [vmem:[#allocation3 + $0x38] sm:$0xff] %vm1041_vm3, %v960_v61  ;;  %1048 = vst.msk [vmem:[#allocation3 + $0x30] sm:$0xff] %vm1041_vm3, %v958_v62 }
 0x126   : > { %2298 = vrot.lane.b32.xlu1 %v13947_v49, %s18419_s21  ;;  %1721 = vrot.lane.b32.xlu0 %v14023_v38, %s18395_s18 }
 0x128   : > { %v964_v60 = vpop.permute.xlu1 %963  ;;  %v962_v63 = vpop.permute.xlu0 %961 }
 0x129   : > { %1051 = vst.msk [vmem:[#allocation3 + $0x48] sm:$0xff] %vm1041_vm3, %v964_v60  ;;  %1050 = vst.msk [vmem:[#allocation3 + $0x40] sm:$0xff] %vm1041_vm3, %v962_v63 }
 0x12a   : > { %1723 = vrot.lane.b32.xlu1 %v14021_v37, %s18395_s18  ;;  %2489 = vrot.lane.b32.xlu0 %v2425_v25, %s18393_s22 }
 0x12c   : > { %v968_v50 = vpop.permute.xlu1 %967  ;;  %v966_v3 = vpop.permute.xlu0 %965 }
 0x12d   : > { %1053 = vst.msk [vmem:[#allocation3 + $0x58] sm:$0xff] %vm1041_vm3, %v968_v50  ;;  %1052 = vst.msk [vmem:[#allocation3 + $0x50] sm:$0xff] %vm1041_vm3, %v966_v3 }
 0x12e   : > { %2491 = vrot.lane.b32.xlu1 %v1463_v21, %s18393_s22  ;;  %1914 = vrot.lane.b32.xlu0 %v14083_v27, %s18438_s19 }
 0x130   : > { %v972_v49 = vpop.permute.xlu1 %971  ;;  %v970_v4 = vpop.permute.xlu0 %969 }
 0x131   : > { %1055 = vst.msk [vmem:[#allocation3 + $0x68] sm:$0xff] %vm1041_vm3, %v972_v49  ;;  %1054 = vst.msk [vmem:[#allocation3 + $0x60] sm:$0xff] %vm1041_vm3, %v970_v4  ;;  %v3200_v4 = vld [vmem:[#allocation2 + $0x48] sm:$0xff] }
 0x132   : > { %1339 = vrot.lane.b32.xlu1 %v13959_v54, %s18409_s16  ;;  %2682 = vrot.lane.b32.xlu0 %v14023_v38, %s18435_s23  ;;  %v1464_v38 = vld [vmem:[#allocation2 + $0x31] sm:$0xff] }
 0x134   : > { %v976_v7 = vpop.permute.xlu1 %975  ;;  %v974_v8 = vpop.permute.xlu0 %973 }
 0x135   : > { %1057 = vst.msk [vmem:[#allocation3 + $0x78] sm:$0xff] %vm1041_vm3, %v976_v7  ;;  %1056 = vst.msk [vmem:[#allocation3 + $0x70] sm:$0xff] %vm1041_vm3, %v974_v8 }
 0x136   : > { %2107 = vrot.lane.b32.xlu1 %v14168_v2, %s18443_s20  ;;  %1916 = vrot.lane.b32.xlu0 %v14081_v26, %s18438_s19 }
 0x138   : > { %v980_v12 = vpop.permute.xlu1 %979  ;;  %v978_v13 = vpop.permute.xlu0 %977 }
 0x139   : > { %1059 = vst.msk [vmem:[#allocation3 + $0x88] sm:$0xff] %vm1041_vm3, %v980_v12  ;;  %1058 = vst.msk [vmem:[#allocation3 + $0x80] sm:$0xff] %vm1041_vm3, %v978_v13 }
 0x13a   : > { %2875 = vrot.lane.b32.xlu1 %v14083_v27, %s18415_s24  ;;  %2684 = vrot.lane.b32.xlu0 %v14021_v37, %s18435_s23 }
 0x13c   : > { %v984_v14 = vpop.permute.xlu1 %983  ;;  %v982_v15 = vpop.permute.xlu0 %981 }
 0x13d   : > { %1061 = vst.msk [vmem:[#allocation3 + $0x98] sm:$0xff] %vm1041_vm3, %v984_v14  ;;  %1060 = vst.msk [vmem:[#allocation3 + $0x90] sm:$0xff] %vm1041_vm3, %v982_v15  ;;  %v14435_v14 = vld [vmem:[#allocation2 + $0x4b] sm:$0xff] }
 0x13e   : > { %1532 = vrot.lane.b32.xlu1 %v1464_v38, %s18427_s17  ;;  %1341 = vrot.lane.b32.xlu0 %v13955_v53, %s18409_s16 }
 0x140   : > { %v988_v16 = vpop.permute.xlu1 %987  ;;  %v986_v17 = vpop.permute.xlu0 %985 }
 0x141   : > { %1063 = vst.msk [vmem:[#allocation3 + $0xa8] sm:$0xff] %vm1041_vm3, %v988_v16  ;;  %1062 = vst.msk [vmem:[#allocation3 + $0xa0] sm:$0xff] %vm1041_vm3, %v986_v17  ;;  %v14443_v16 = vld [vmem:[#allocation2 + $0x43] sm:$0xff] }
 0x142   : > { %2300 = vrot.lane.b32.xlu1 %v13959_v54, %s18419_s21  ;;  %2109 = vrot.lane.b32.xlu0 %v14166_v1, %s18443_s20 }
 0x144   : > { %v992_v37 = vpop.permute.xlu1 %991  ;;  %v990_v27 = vpop.permute.xlu0 %989 }
 0x145   : > { %1065 = vst.msk [vmem:[#allocation3 + $0xb8] sm:$0xff] %vm1041_vm3, %v992_v37  ;;  %1064 = vst.msk [vmem:[#allocation3 + $0xb0] sm:$0xff] %vm1041_vm3, %v990_v27 }
 0x146   : > { %3068 = vrot.lane.b32.xlu1 %v14168_v2, %s18402_s25  ;;  %2877 = vrot.lane.b32.xlu0 %v14081_v26, %s18415_s24 }
 0x148   : > { %v996_v19 = vpop.permute.xlu1 %995  ;;  %v994_v20 = vpop.permute.xlu0 %993 }
 0x149   : > { %1067 = vst.msk [vmem:[#allocation3 + $0xc8] sm:$0xff] %vm1041_vm3, %v996_v19  ;;  %1066 = vst.msk [vmem:[#allocation3 + $0xc0] sm:$0xff] %vm1041_vm3, %v994_v20 }
 0x14a   : > { %1725 = vrot.lane.b32.xlu1 %v14031_v40, %s18395_s18  ;;  %1534 = vrot.lane.b32.xlu0 %v1465_v18, %s18427_s17 }
 0x14c   : > { %v1000_v23 = vpop.permute.xlu1 %999  ;;  %v998_v24 = vpop.permute.xlu0 %997 }
 0x14d   : > { %1069 = vst.msk [vmem:[#allocation3 + $0xd8] sm:$0xff] %vm1041_vm3, %v1000_v23  ;;  %1068 = vst.msk [vmem:[#allocation3 + $0xd0] sm:$0xff] %vm1041_vm3, %v998_v24  ;;  %v14462_v23 = vld [vmem:[#allocation2 + $0x51] sm:$0xff] }
 0x14e   : > { %2493 = vrot.lane.b32.xlu1 %v1464_v38, %s18393_s22  ;;  %2302 = vrot.lane.b32.xlu0 %v13955_v53, %s18419_s21  ;;  %v14464_v24 = vld [vmem:[#allocation2 + $0x58] sm:$0xff] }
 0x150   : > { %v1004_v26 = vpop.permute.xlu1 %1003  ;;  %v1002_v2 = vpop.permute.xlu0 %1001 }
 0x151   : > { %1071 = vst.msk [vmem:[#allocation3 + $0xe8] sm:$0xff] %vm1041_vm3, %v1004_v26  ;;  %1070 = vst.msk [vmem:[#allocation3 + $0xe0] sm:$0xff] %vm1041_vm3, %v1002_v2 }
 0x152   : > { %3261 = vrot.lane.b32.xlu1 %v13959_v54, %s18387_s26  ;;  %3070 = vrot.lane.b32.xlu0 %v14166_v1, %s18402_s25 }
 0x154   : > { %v1008_v28 = vpop.permute.xlu1 %1007  ;;  %v1006_v29 = vpop.permute.xlu0 %1005 }
 0x155   : > { %1073 = vst.msk [vmem:[#allocation3 + $0xf8] sm:$0xff] %vm1041_vm3, %v1008_v28  ;;  %1072 = vst.msk [vmem:[#allocation3 + $0xf0] sm:$0xff] %vm1041_vm3, %v1006_v29  ;;  %vm18405_vm3 = vcmask 154768  }
 0x156   : > { %1918 = vrot.lane.b32.xlu1 %v14093_v31, %s18438_s19  ;;  %1727 = vrot.lane.b32.xlu0 %v14029_v39, %s18395_s18 }
 0x158   : > { %v1141_v32 = vpop.permute.xlu1 %1140  ;;  %v1139_v33 = vpop.permute.xlu0 %1138 }
 0x159   : > { %1236 = vst.msk [vmem:[#allocation3 + $0x8] sm:$0xff] %vm18398_vm4, %v1141_v32  ;;  %1235 = vst.msk [vmem:[#allocation3] sm:$0xff] %vm18398_vm4, %v1139_v33 }
 0x15a   : > { %2686 = vrot.lane.b32.xlu1 %v14031_v40, %s18435_s23  ;;  %2495 = vrot.lane.b32.xlu0 %v1465_v18, %s18393_s22  ;;  %v2621_v40 = vld [vmem:[#allocation2 + $0x3a] sm:$0xff] }
 0x15c   : > { %v1145_v54 = vpop.permute.xlu1 %1144  ;;  %v1143_v1 = vpop.permute.xlu0 %1142 }
 0x15d   : > { %1238 = vst.msk [vmem:[#allocation3 + $0x18] sm:$0xff] %vm18398_vm4, %v1145_v54  ;;  %1237 = vst.msk [vmem:[#allocation3 + $0x10] sm:$0xff] %vm18398_vm4, %v1143_v1 }
 0x15e   : > { %3454 = vrot.lane.b32.xlu1 %v1464_v38, %s18433_s29  ;;  %3263 = vrot.lane.b32.xlu0 %v13955_v53, %s18387_s26 }
 0x160   : > { %v1149_v39 = vpop.permute.xlu1 %1148  ;;  %v1147_v34 = vpop.permute.xlu0 %1146 }
 0x161   : > { %1240 = vst.msk [vmem:[#allocation3 + $0x28] sm:$0xff] %vm18398_vm4, %v1149_v39  ;;  %1239 = vst.msk [vmem:[#allocation3 + $0x20] sm:$0xff] %vm18398_vm4, %v1147_v34 }
 0x162   : > { %1920 = vrot.lane.b32.xlu1 %v14091_v30, %s18438_s19  ;;  %1343 = vrot.lane.b32.xlu0 %v13965_v56, %s18409_s16 }
 0x164   : > { %v1153_v42 = vpop.permute.xlu1 %1152  ;;  %v1151_v43 = vpop.permute.xlu0 %1150 }
 0x165   : > { %1242 = vst.msk [vmem:[#allocation3 + $0x38] sm:$0xff] %vm18398_vm4, %v1153_v42  ;;  %1241 = vst.msk [vmem:[#allocation3 + $0x30] sm:$0xff] %vm18398_vm4, %v1151_v43  ;;  %v14498_v42 = vld [vmem:[#allocation2 + $0x59] sm:$0xff] }
 0x166   : > { %2688 = vrot.lane.b32.xlu1 %v2621_v40, %s18435_s23  ;;  %2111 = vrot.lane.b32.xlu0 %v14178_v6, %s18443_s20 }
 0x168   : > { %v1157_v53 = vpop.permute.xlu1 %1156  ;;  %v1155_v44 = vpop.permute.xlu0 %1154 }
 0x169   : > { %1244 = vst.msk [vmem:[#allocation3 + $0x48] sm:$0xff] %vm18398_vm4, %v1157_v53  ;;  %1243 = vst.msk [vmem:[#allocation3 + $0x40] sm:$0xff] %vm18398_vm4, %v1155_v44 }
 0x16a   : > { %3456 = vrot.lane.b32.xlu1 %v1465_v18, %s18433_s29  ;;  %2879 = vrot.lane.b32.xlu0 %v14093_v31, %s18415_s24 }
 0x16c   : > { %v1161_v48 = vpop.permute.xlu1 %1160  ;;  %v1159_v51 = vpop.permute.xlu0 %1158 }
 0x16d   : > { %1246 = vst.msk [vmem:[#allocation3 + $0x58] sm:$0xff] %vm18398_vm4, %v1161_v48  ;;  %1245 = vst.msk [vmem:[#allocation3 + $0x50] sm:$0xff] %vm18398_vm4, %v1159_v51 }
 0x16e   : > { %1345 = vrot.lane.b32.xlu1 %v13963_v55, %s18409_s16  ;;  %3647 = vrot.lane.b32.xlu0 %v3583_v46, %s18425_s30 }
 0x170   : > { %v1165_v52 = vpop.permute.xlu1 %1164  ;;  %v1163_v47 = vpop.permute.xlu0 %1162 }
 0x171   : > { %1248 = vst.msk [vmem:[#allocation3 + $0x68] sm:$0xff] %vm18398_vm4, %v1165_v52  ;;  %1247 = vst.msk [vmem:[#allocation3 + $0x60] sm:$0xff] %vm18398_vm4, %v1163_v47 }
 0x172   : > { %2113 = vrot.lane.b32.xlu1 %v14176_v5, %s18443_s20  ;;  %1536 = vrot.lane.b32.xlu0 %v14357_v45, %s18427_s17 }
 0x174   : > { %v1169_v57 = vpop.permute.xlu1 %1168  ;;  %v1167_v9 = vpop.permute.xlu0 %1166 }
 0x175   : > { %1250 = vst.msk [vmem:[#allocation3 + $0x78] sm:$0xff] %vm18398_vm4, %v1169_v57  ;;  %1249 = vst.msk [vmem:[#allocation3 + $0x70] sm:$0xff] %vm18398_vm4, %v1167_v9  ;;  %v14532_v9 = vld [vmem:[#allocation2 + $0x5a] sm:$0xff] }
 0x176   : > { %2881 = vrot.lane.b32.xlu1 %v14091_v30, %s18415_s24  ;;  %2304 = vrot.lane.b32.xlu0 %v13965_v56, %s18419_s21  ;;  %v14384_v56 = vld [vmem:[#allocation2 + $0x42] sm:$0xff] }
 0x178   : > { %v1332_v36 = vpop.permute.xlu1 %1331  ;;  %v1171_v35 = vpop.permute.xlu0 %1170 }
 0x179   : > { %1428 = vst.msk [vmem:[#allocation3] sm:$0xff] %vm1427_vm5, %v1332_v36 }
 0x17a   : > { %1251 = vst.msk [vmem:[#allocation3 + $0x80] sm:$0xff] %vm18398_vm4, %v1171_v35  ;;  %3649 = vrot.lane.b32.xlu1 %v2621_v40, %s18425_s30  ;;  %3072 = vrot.lane.b32.xlu0 %v14178_v6, %s18402_s25  ;;  %v14496_v40 = vld [vmem:[#allocation2 + $0x52] sm:$0xff]  ;;  %vm13706_vm4 = vmmov 1  }
 0x17c   : > { %v1525_v21 = vpop.permute.xlu1 %1524  ;;  %v1334_v58 = vpop.permute.xlu0 %1333 }
 0x17d   : > { %1621 = vst.msk [vmem:[#allocation3] sm:$0xff] %vm18399_vm6, %v1525_v21 }
 0x17e   : > { %1429 = vst.msk [vmem:[#allocation3 + $0x8] sm:$0xff] %vm1427_vm5, %v1334_v58  ;;  %1538 = vrot.lane.b32.xlu1 %v14376_v22, %s18427_s17  ;;  %3840 = vrot.lane.b32.xlu0 %v14093_v31, %s18417_s9  ;;  %v3199_v31 = vld [vmem:[#allocation2 + $0x40] sm:$0xff] }
 0x180   : > { %v1718_v59 = vpop.permute.xlu1 %1717  ;;  %v1527_v61 = vpop.permute.xlu0 %1526 }
 0x181   : > { %1814 = vst.msk [vmem:[#allocation3] sm:$0xff] %vm18406_vm7, %v1718_v59 }
 0x182   : > { %1622 = vst.msk [vmem:[#allocation3 + $0x8] sm:$0xff] %vm18399_vm6, %v1527_v61  ;;  %2306 = vrot.lane.b32.xlu1 %v13963_v55, %s18419_s21  ;;  %1729 = vrot.lane.b32.xlu0 %v14384_v56, %s18395_s18  ;;  %v14403_v55 = vld [vmem:[#allocation2 + $0x4a] sm:$0xff] }
 0x184   : > { %v1911_v62 = vpop.permute.xlu1 %1910  ;;  %v1720_v25 = vpop.permute.xlu0 %1719 }
 0x185   : > { %2007 = vst.msk [vmem:[#allocation3] sm:$0xff] %vm18400_vm8, %v1911_v62  ;;  %v4934_v62 = vld [vmem:[#allocation2 + $0x44] sm:$0xff] }
 0x186   : > { %1815 = vst.msk [vmem:[#allocation3 + $0x8] sm:$0xff] %vm18406_vm7, %v1720_v25  ;;  %3074 = vrot.lane.b32.xlu1 %v14176_v5, %s18402_s25  ;;  %2497 = vrot.lane.b32.xlu0 %v14357_v45, %s18393_s22 }
 0x188   : > { %v1913_v60 = vpop.permute.xlu1 %1912  ;;  %v1336_v63 = vpop.permute.xlu0 %1335 }
 0x189   : > { %2008 = vst.msk [vmem:[#allocation3 + $0x8] sm:$0xff] %vm18400_vm8, %v1913_v60  ;;  %v14562_v60 = vld [vmem:[#allocation2 + $0x5b] sm:$0xff] }
 0x18a   : > { %1430 = vst.msk [vmem:[#allocation3 + $0x10] sm:$0xff] %vm1427_vm5, %v1336_v63  ;;  %3842 = vrot.lane.b32.xlu1 %v14091_v30, %s18417_s9  ;;  %3265 = vrot.lane.b32.xlu0 %v3199_v31, %s18387_s26  ;;  %v14564_v63 = vld [vmem:[#allocation2 + $0x60] sm:$0xff] }
 0x18c   : > { %v1338_v50 = vpop.permute.xlu1 %1337  ;;  %v2104_v3 = vpop.permute.xlu0 %2103 }
 0x18d   : > { %1431 = vst.msk [vmem:[#allocation3 + $0x18] sm:$0xff] %vm1427_vm5, %v1338_v50 }
 0x18e   : > { %2200 = vst.msk [vmem:[#allocation3] sm:$0xff] %vm2199_vm9, %v2104_v3  ;;  %1731 = vrot.lane.b32.xlu1 %v14403_v55, %s18395_s18  ;;  %4033 = vrot.lane.b32.xlu0 %v14178_v6, %s18391_s10  ;;  %v14572_v3 = vld [vmem:[#allocation2 + $0x54] sm:$0xff] }
 0x190   : > { %v2106_v49 = vpop.permute.xlu1 %2105  ;;  %v1529_v30 = vpop.permute.xlu0 %1528 }
 0x191   : > { %2201 = vst.msk [vmem:[#allocation3 + $0x8] sm:$0xff] %vm2199_vm9, %v2106_v49  ;;  %v5692_v49 = vld [vmem:[%s18378_s2] sm:$0xff] }
 0x192   : > { %1623 = vst.msk [vmem:[#allocation3 + $0x10] sm:$0xff] %vm18399_vm6, %v1529_v30  ;;  %2499 = vrot.lane.b32.xlu1 %v14376_v22, %s18393_s22  ;;  %1922 = vrot.lane.b32.xlu0 %v14101_v41, %s18438_s19  ;;  %v14428_v41 = vld [vmem:[#allocation2 + $0x50] sm:$0xff]  ;;  %v5693_v30 = vld [vmem:[%s18378_s2 + $0x8] sm:$0xff] }
 0x194   : > { %v1531_v7 = vpop.permute.xlu1 %1530  ;;  %v2297_v8 = vpop.permute.xlu0 %2296 }
 0x195   : > { %1624 = vst.msk [vmem:[#allocation3 + $0x18] sm:$0xff] %vm18399_vm6, %v1531_v7 }
 0x196   : > { %2393 = vst.msk [vmem:[#allocation3] sm:$0xff] %vm18437_vm10, %v2297_v8  ;;  %3267 = vrot.lane.b32.xlu1 %v3200_v4, %s18387_s26  ;;  %2690 = vrot.lane.b32.xlu0 %v14384_v56, %s18435_s23  ;;  %v13189_v8 = vpack.c.bf16 %v5693_v30, %v5692_v49 }
 0x198   : > { %v2299_v6 = vpop.permute.xlu1 %2298  ;;  %v1722_v12 = vpop.permute.xlu0 %1721  ;;  %13190 = vmatprep.subr.bf16.mxu1 %v13189_v8 }
 0x199   : > { %2394 = vst.msk [vmem:[#allocation3 + $0x8] sm:$0xff] %vm18437_vm10, %v2299_v6  ;;  %v5694_v6 = vld [vmem:[%s18378_s2 + $0x10] sm:$0xff]  ;;  %13192 = vmatpush3.bf16.msra.mxu1 %v13189_v8 }
 0x19a   : > { %1816 = vst.msk [vmem:[#allocation3 + $0x10] sm:$0xff] %vm18406_vm7, %v1722_v12  ;;  %4035 = vrot.lane.b32.xlu1 %v14176_v5, %s18391_s10  ;;  %3458 = vrot.lane.b32.xlu0 %v14357_v45, %s18433_s29  ;;  %v5695_v12 = vld [vmem:[%s18378_s2 + $0x18] sm:$0x1] }
 0x19c   : > { %v1724_v13 = vpop.permute.xlu1 %1723  ;;  %v2490_v38 = vpop.permute.xlu0 %2489 }
 0x19d   : > { %1817 = vst.msk [vmem:[#allocation3 + $0x18] sm:$0xff] %vm18406_vm7, %v1724_v13 }
 0x19e   : > { %2586 = vst.msk [vmem:[#allocation3] sm:$0xff] %vm2585_vm11, %v2490_v38  ;;  %1347 = vrot.lane.b32.xlu1 %v14428_v41, %s18409_s16  ;;  %4226 = vrot.lane.b32.xlu0 %v3199_v31, %s18429_s12  ;;  %v13193_v38 = vpack.c.bf16 %v5695_v12, %v5694_v6 }
 0x1a0   : > { %v2492_v5 = vpop.permute.xlu1 %2491  ;;  %v1915_v15 = vpop.permute.xlu0 %1914 }
 0x1a1   : > { %2587 = vst.msk [vmem:[#allocation3 + $0x8] sm:$0xff] %vm2585_vm11, %v2492_v5 }
 0x1a2   : > { %2009 = vst.msk [vmem:[#allocation3 + $0x10] sm:$0xff] %vm18400_vm8, %v1915_v15  ;;  %2115 = vrot.lane.b32.xlu1 %v14188_v11, %s18443_s20  ;;  %1924 = vrot.lane.b32.xlu0 %v14435_v14, %s18438_s19 }
 0x1a4   : > { %v1340_v17 = vpop.permute.xlu1 %1339  ;;  %v2683_v37 = vpop.permute.xlu0 %2682 }
 0x1a5   : > { %1432 = vst.msk [vmem:[#allocation3 + $0x20] sm:$0xff] %vm1427_vm5, %v1340_v17 }
 0x1a6   : > { %2779 = vst.msk [vmem:[#allocation3] sm:$0xff] %vm2778_vm12, %v2683_v37  ;;  %2883 = vrot.lane.b32.xlu1 %v14443_v16, %s18415_s24  ;;  %2692 = vrot.lane.b32.xlu0 %v14403_v55, %s18435_s23  ;;  %v14617_v37 = vld [vmem:[#allocation2 + $0x61] sm:$0xff] }
 0x1a8   : > { %v2108_v27 = vpop.permute.xlu1 %2107  ;;  %v1917_v18 = vpop.permute.xlu0 %1916 }
 0x1a9   : > { %2202 = vst.msk [vmem:[#allocation3 + $0x10] sm:$0xff] %vm2199_vm9, %v2108_v27  ;;  %v14619_v27 = vld [vmem:[#allocation2 + $0x68] sm:$0xff] }
 0x1aa   : > { %2010 = vst.msk [vmem:[#allocation3 + $0x18] sm:$0xff] %vm18400_vm8, %v1917_v18  ;;  %3651 = vrot.lane.b32.xlu1 %v14384_v56, %s18425_s30  ;;  %3460 = vrot.lane.b32.xlu0 %v14376_v22, %s18433_s29 }
 0x1ac   : > { %v2876_v19 = vpop.permute.xlu1 %2875  ;;  %v2685_v20 = vpop.permute.xlu0 %2684 }
 0x1ad   : > { %2972 = vst.msk [vmem:[#allocation3] sm:$0xff] %vm2971_vm13, %v2876_v19 }
 0x1ae   : > { %2780 = vst.msk [vmem:[#allocation3 + $0x8] sm:$0xff] %vm2778_vm12, %v2685_v20  ;;  %4419 = vrot.lane.b32.xlu1 %v14357_v45, %s18431_s13  ;;  %4228 = vrot.lane.b32.xlu0 %v3200_v4, %s18429_s12  ;;  %v14627_v20 = vld [vmem:[#allocation2 + $0x5c] sm:$0xff] }
 0x1b0   : > { %v1533_v26 = vpop.permute.xlu1 %1532  ;;  %v1342_v2 = vpop.permute.xlu0 %1341 }
 0x1b1   : > { %1625 = vst.msk [vmem:[#allocation3 + $0x20] sm:$0xff] %vm18399_vm6, %v1533_v26 }
 0x1b2   : > { %1433 = vst.msk [vmem:[#allocation3 + $0x28] sm:$0xff] %vm1427_vm5, %v1342_v2  ;;  %1540 = vrot.lane.b32.xlu1 %v14462_v23, %s18427_s17  ;;  %1349 = vrot.lane.b32.xlu0 %v14464_v24, %s18409_s16 }
 0x1b4   : > { %v2301_v28 = vpop.permute.xlu1 %2300  ;;  %v2110_v29 = vpop.permute.xlu0 %2109 }
 0x1b5   : > { %2395 = vst.msk [vmem:[#allocation3 + $0x10] sm:$0xff] %vm18437_vm10, %v2301_v28 }
 0x1b6   : > { %2203 = vst.msk [vmem:[#allocation3 + $0x18] sm:$0xff] %vm2199_vm9, %v2110_v29  ;;  %2308 = vrot.lane.b32.xlu1 %v14428_v41, %s18419_s21  ;;  %2117 = vrot.lane.b32.xlu0 %v14186_v10, %s18443_s20 }
 0x1b8   : > { %v3069_v32 = vpop.permute.xlu1 %3068  ;;  %v2878_v33 = vpop.permute.xlu0 %2877 }
 0x1b9   : > { %3165 = vst.msk [vmem:[#allocation3] sm:$0xff] %vm18408_vm14, %v3069_v32 }
 0x1ba   : > { %2973 = vst.msk [vmem:[#allocation3 + $0x8] sm:$0xff] %vm2971_vm13, %v2878_v33  ;;  %3076 = vrot.lane.b32.xlu1 %v14188_v11, %s18402_s25  ;;  %2885 = vrot.lane.b32.xlu0 %v14435_v14, %s18415_s24 }
 0x1bc   : > { %v1726_v54 = vpop.permute.xlu1 %1725  ;;  %v1535_v1 = vpop.permute.xlu0 %1534 }
 0x1bd   : > { %1818 = vst.msk [vmem:[#allocation3 + $0x20] sm:$0xff] %vm18406_vm7, %v1726_v54  ;;  %v14653_v54 = vld [vmem:[#allocation2 + $0x62] sm:$0xff] }
 0x1be   : > { %1626 = vst.msk [vmem:[#allocation3 + $0x28] sm:$0xff] %vm18399_vm6, %v1535_v1  ;;  %3844 = vrot.lane.b32.xlu1 %v14443_v16, %s18417_s9  ;;  %3653 = vrot.lane.b32.xlu0 %v14403_v55, %s18425_s30  ;;  %v14655_v1 = vld [vmem:[#allocation2 + $0x69] sm:$0xff] }
 0x1c0   : > { %v2494_v39 = vpop.permute.xlu1 %2493  ;;  %v2303_v34 = vpop.permute.xlu0 %2302 }
 0x1c1   : > { %2588 = vst.msk [vmem:[#allocation3 + $0x10] sm:$0xff] %vm2585_vm11, %v2494_v39 }
 0x1c2   : > { %2396 = vst.msk [vmem:[#allocation3 + $0x18] sm:$0xff] %vm18437_vm10, %v2303_v34  ;;  %4612 = vrot.lane.b32.xlu1 %v14384_v56, %s18413_s14  ;;  %4421 = vrot.lane.b32.xlu0 %v14376_v22, %s18431_s13  ;;  %v3972_v56 = vld [vmem:[#allocation2 + $0x4c] sm:$0xff] }
 0x1c4   : > { %v3262_v43 = vpop.permute.xlu1 %3261  ;;  %v3071_v53 = vpop.permute.xlu0 %3070 }
 0x1c5   : > { %3358 = vst.msk [vmem:[#allocation3] sm:$0xff] %vm3357_vm15, %v3262_v43 }
 0x1c6   : > { %3166 = vst.msk [vmem:[#allocation3 + $0x8] sm:$0xff] %vm18408_vm14, %v3071_v53  ;;  %1733 = vrot.lane.b32.xlu1 %v14496_v40, %s18395_s18  ;;  %1542 = vrot.lane.b32.xlu0 %v14498_v42, %s18427_s17 }
 0x1c8   : > { %v1919_v44 = vpop.permute.xlu1 %1918  ;;  %v1728_v46 = vpop.permute.xlu0 %1727 }
 0x1c9   : > { %2011 = vst.msk [vmem:[#allocation3 + $0x20] sm:$0xff] %vm18400_vm8, %v1919_v44 }
 0x1ca   : > { %1819 = vst.msk [vmem:[#allocation3 + $0x28] sm:$0xff] %vm18406_vm7, %v1728_v46  ;;  %2501 = vrot.lane.b32.xlu1 %v14462_v23, %s18393_s22  ;;  %2310 = vrot.lane.b32.xlu0 %v14464_v24, %s18419_s21 }
 0x1cc   : > { %v2687_v48 = vpop.permute.xlu1 %2686  ;;  %v2496_v51 = vpop.permute.xlu0 %2495 }
 0x1cd   : > { %2781 = vst.msk [vmem:[#allocation3 + $0x10] sm:$0xff] %vm2778_vm12, %v2687_v48 }
 0x1ce   : > { %2589 = vst.msk [vmem:[#allocation3 + $0x18] sm:$0xff] %vm2585_vm11, %v2496_v51  ;;  %3269 = vrot.lane.b32.xlu1 %v14428_v41, %s18387_s26  ;;  %3078 = vrot.lane.b32.xlu0 %v14186_v10, %s18402_s25  ;;  %v14530_v10 = vld [vmem:[#allocation2 + $0x53] sm:$0xff] }
 0x1d0   : > { %v3455_v45 = vpop.permute.xlu1 %3454  ;;  %v3264_v52 = vpop.permute.xlu0 %3263 }
 0x1d1   : > { %3551 = vst.msk [vmem:[#allocation3] sm:$0xff] %vm18401_vm1, %v3455_v45  ;;  %v14687_v45 = vld [vmem:[#allocation2 + $0x63] sm:$0xff] }
 0x1d2   : > { %3359 = vst.msk [vmem:[#allocation3 + $0x8] sm:$0xff] %vm3357_vm15, %v3264_v52  ;;  %4037 = vrot.lane.b32.xlu1 %v14188_v11, %s18391_s10  ;;  %3846 = vrot.lane.b32.xlu0 %v14435_v14, %s18417_s9  ;;  %v14689_v52 = vld [vmem:[#allocation2 + $0x6a] sm:$0xff] }
 0x1d4   : > { %v1921_v47 = vpop.permute.xlu1 %1920  ;;  %v1344_v57 = vpop.permute.xlu0 %1343 }
 0x1d5   : > { %2012 = vst.msk [vmem:[#allocation3 + $0x28] sm:$0xff] %vm18400_vm8, %v1921_v47 }
 0x1d6   : > { %1434 = vst.msk [vmem:[#allocation3 + $0x30] sm:$0xff] %vm1427_vm5, %v1344_v57  ;;  %4805 = vrot.lane.b32.xlu1 %v14443_v16, %s18389_s15  ;;  %4614 = vrot.lane.b32.xlu0 %v14403_v55, %s18413_s14 }
 0x1d8   : > { %v2689_v11 = vpop.permute.xlu1 %2688  ;;  %v2112_v36 = vpop.permute.xlu0 %2111 }
 0x1d9   : > { %2782 = vst.msk [vmem:[#allocation3 + $0x18] sm:$0xff] %vm2778_vm12, %v2689_v11 }
 0x1da   : > { %2204 = vst.msk [vmem:[#allocation3 + $0x20] sm:$0xff] %vm2199_vm9, %v2112_v36  ;;  %1926 = vrot.lane.b32.xlu1 %v14530_v10, %s18438_s19  ;;  %1735 = vrot.lane.b32.xlu0 %v14532_v9, %s18395_s18  ;;  %s18463_s18 = smov 15  }
 0x1dc   : > { %v3457_v35 = vpop.permute.xlu1 %3456  ;;  %v2880_v22 = vpop.permute.xlu0 %2879 }
 0x1dd   : > { %3552 = vst.msk [vmem:[#allocation3 + $0x8] sm:$0xff] %vm18401_vm1, %v3457_v35 }
 0x1de   : > { %2974 = vst.msk [vmem:[#allocation3 + $0x10] sm:$0xff] %vm2971_vm13, %v2880_v22  ;;  %2694 = vrot.lane.b32.xlu1 %v14496_v40, %s18435_s23  ;;  %2503 = vrot.lane.b32.xlu0 %v14498_v42, %s18393_s22  ;;  %s18464_s22 = smov 19  }
 0x1e0   : > { %v1346_v21 = vpop.permute.xlu1 %1345  ;;  %v3648_v58 = vpop.permute.xlu0 %3647 }
 0x1e1   : > { %1435 = vst.msk [vmem:[#allocation3 + $0x38] sm:$0xff] %vm1427_vm5, %v1346_v21  ;;  %v5127_v21 = vlaneseq }
 0x1e2   : > { %3744 = vst.msk [vmem:[#allocation3] sm:$0xff] %vm18404_vm2, %v3648_v58  ;;  %3462 = vrot.lane.b32.xlu1 %v14462_v23, %s18433_s29  ;;  %3271 = vrot.lane.b32.xlu0 %v14464_v24, %s18387_s26  ;;  %s18422_s26 = smov 24  }
 0x1e4   : > { %v2114_v59 = vpop.permute.xlu1 %2113  ;;  %v1537_v61 = vpop.permute.xlu0 %1536 }
 0x1e5   : > { %2205 = vst.msk [vmem:[#allocation3 + $0x28] sm:$0xff] %vm2199_vm9, %v2114_v59  ;;  %v5545_v59 = vand.u32 127, %v5127_v21 }
 0x1e6   : > { %1627 = vst.msk [vmem:[#allocation3 + $0x30] sm:$0xff] %vm18399_vm6, %v1537_v61  ;;  %4230 = vrot.lane.b32.xlu1 %v14428_v41, %s18429_s12  ;;  %4039 = vrot.lane.b32.xlu0 %v3972_v56, %s18391_s10  ;;  %s18462_s10 = smov 11   ;;  %v14722_v61 = vld [vmem:[#allocation2 + $0x6b] sm:$0xff] }
 0x1e8   : > { %v2882_v25 = vpop.permute.xlu1 %2881  ;;  %v2305_v31 = vpop.permute.xlu0 %2304 }
 0x1e9   : > { %2975 = vst.msk [vmem:[#allocation3 + $0x18] sm:$0xff] %vm2971_vm13, %v2882_v25 }
 0x1ea   : > { %2397 = vst.msk [vmem:[#allocation3 + $0x20] sm:$0xff] %vm18437_vm10, %v2305_v31  ;;  %4998 = vrot.lane.b32.xlu1 %v4934_v62, %s18422_s26  ;;  %4807 = vrot.lane.b32.xlu0 %v14435_v14, %s18389_s15  ;;  %s18461_s15 = smov 7   ;;  %v14724_v62 = vld [vmem:[#allocation2 + $0x70] sm:$0xff] }
 0x1ec   : > { %v3650_v55 = vpop.permute.xlu1 %3649  ;;  %v3073_v50 = vpop.permute.xlu0 %3072 }
 0x1ed   : > { %3745 = vst.msk [vmem:[#allocation3 + $0x8] sm:$0xff] %vm18404_vm2, %v3650_v55  ;;  %v14735_v55 = vld [vmem:[#allocation2 + $0x64] sm:$0xff] }
 0x1ee   : > { %3167 = vst.msk [vmem:[#allocation3 + $0x10] sm:$0xff] %vm18408_vm14, %v3073_v50  ;;  %1928 = vrot.lane.b32.xlu1 %v14562_v60, %s18438_s19  ;;  %1351 = vrot.lane.b32.xlu0 %v14564_v63, %s18409_s16 }
 0x1f0   : > { %v1539_v4 = vpop.permute.xlu1 %1538  ;;  %v3841_v7 = vpop.permute.xlu0 %3840 }
 0x1f1   : > { %1628 = vst.msk [vmem:[#allocation3 + $0x38] sm:$0xff] %vm18399_vm6, %v1539_v4  ;;  %vm14594_vm6 = vmpackc.low %vm5752_vm0, %vm13706_vm4  ;;  %vm18424_vm0 = vcmask 162968   ;;  %vm4322_vm4 = vcmask 171168  }
 0x1f2   : > { %3937 = vst.msk [vmem:[#allocation3] sm:$0xff] %vm18405_vm3, %v3841_v7  ;;  %2696 = vrot.lane.b32.xlu1 %v14532_v9, %s18435_s23  ;;  %2119 = vrot.lane.b32.xlu0 %v14572_v3, %s18443_s20 }
 0x1f3   : > { %13195 = vmatprep.subr.msk.bf16.mxu1 %vm14594_vm6, %v13193_v38 }
 0x1f4   : > { %v2307_v41 = vpop.permute.xlu1 %2306  ;;  %v1730_v13 = vpop.permute.xlu0 %1729  ;;  %13198 = vmatpush3.bf16.msk.msra.mxu1 %vm14594_vm6, %v13193_v38  ;;  %v14762_v38 = vld [vmem:[#allocation2 + $0x71] sm:$0xff] }
 0x1f5   : > { %2398 = vst.msk [vmem:[#allocation3 + $0x28] sm:$0xff] %vm18437_vm10, %v2307_v41 }
 0x1f6   : > { %1820 = vst.msk [vmem:[#allocation3 + $0x30] sm:$0xff] %vm18406_vm7, %v1730_v13  ;;  %3464 = vrot.lane.b32.xlu1 %v14498_v42, %s18433_s29  ;;  %2887 = vrot.lane.b32.xlu0 %v14530_v10, %s18415_s24 }
 0x1f8   : > { %v3075_v5 = vpop.permute.xlu1 %3074  ;;  %v2498_v15 = vpop.permute.xlu0 %2497 }
 0x1f9   : > { %3168 = vst.msk [vmem:[#allocation3 + $0x18] sm:$0xff] %vm18408_vm14, %v3075_v5  ;;  %v14764_v5 = vld [vmem:[#allocation2 + $0x78] sm:$0xff] }
 0x1fa   : > { %2590 = vst.msk [vmem:[#allocation3 + $0x20] sm:$0xff] %vm2585_vm11, %v2498_v15  ;;  %4232 = vrot.lane.b32.xlu1 %v14464_v24, %s18429_s12  ;;  %3655 = vrot.lane.b32.xlu0 %v14496_v40, %s18425_s30 }
 0x1fc   : > { %v3843_v16 = vpop.permute.xlu1 %3842  ;;  %v3266_v17 = vpop.permute.xlu0 %3265 }
 0x1fd   : > { %3938 = vst.msk [vmem:[#allocation3 + $0x8] sm:$0xff] %vm18405_vm3, %v3843_v16 }
 0x1fe   : > { %3360 = vst.msk [vmem:[#allocation3 + $0x10] sm:$0xff] %vm3357_vm15, %v3266_v17  ;;  %5000 = vrot.lane.b32.xlu1 %v3972_v56, %s18422_s26  ;;  %4423 = vrot.lane.b32.xlu0 %v14462_v23, %s18431_s13  ;;  %v14772_v17 = vld [vmem:[#allocation2 + $0x6c] sm:$0xff] }
 0x200   : > { %v1732_v18 = vpop.permute.xlu1 %1731  ;;  %v4034_v19 = vpop.permute.xlu0 %4033 }
 0x201   : > { %1821 = vst.msk [vmem:[#allocation3 + $0x38] sm:$0xff] %vm18406_vm7, %v1732_v18 }
 0x202   : > { %4130 = vst.msk [vmem:[#allocation3] sm:$0xff] %vm18424_vm0, %v4034_v19  ;;  %1544 = vrot.lane.b32.xlu1 %v14617_v37, %s18427_s17  ;;  %1353 = vrot.lane.b32.xlu0 %v14619_v27, %s18409_s16  ;;  %v14781_v19 = vshrl.u32 %v5127_v21, 7 }
 0x204   : > { %v2500_v23 = vpop.permute.xlu1 %2499  ;;  %v1923_v24 = vpop.permute.xlu0 %1922 }
 0x205   : > { %2591 = vst.msk [vmem:[#allocation3 + $0x28] sm:$0xff] %vm2585_vm11, %v2500_v23 }
 0x206   : > { %2013 = vst.msk [vmem:[#allocation3 + $0x30] sm:$0xff] %vm18400_vm8, %v1923_v24  ;;  %2312 = vrot.lane.b32.xlu1 %v14564_v63, %s18419_s21  ;;  %2121 = vrot.lane.b32.xlu0 %v14627_v20, %s18443_s20 }
 0x208   : > { %v3268_v26 = vpop.permute.xlu1 %3267  ;;  %v2691_v2 = vpop.permute.xlu0 %2690 }
 0x209   : > { %3361 = vst.msk [vmem:[#allocation3 + $0x18] sm:$0xff] %vm3357_vm15, %v3268_v26  ;;  %v5164_v26 = vand.u32 15, %v14781_v19 }
 0x20a   : > { %2783 = vst.msk [vmem:[#allocation3 + $0x20] sm:$0xff] %vm2778_vm12, %v2691_v2  ;;  %3080 = vrot.lane.b32.xlu1 %v14572_v3, %s18402_s25  ;;  %2889 = vrot.lane.b32.xlu0 %v14562_v60, %s18415_s24 }
 0x20c   : > { %v4036_v28 = vpop.permute.xlu1 %4035  ;;  %v3459_v29 = vpop.permute.xlu0 %3458 }
 0x20d   : > { %4131 = vst.msk [vmem:[#allocation3 + $0x8] sm:$0xff] %vm18424_vm0, %v4036_v28 }
 0x20e   : > { %3553 = vst.msk [vmem:[#allocation3 + $0x10] sm:$0xff] %vm18401_vm1, %v3459_v29  ;;  %3848 = vrot.lane.b32.xlu1 %v14530_v10, %s18417_s9  ;;  %3657 = vrot.lane.b32.xlu0 %v14532_v9, %s18425_s30 }
 0x210   : > { %v1348_v32 = vpop.permute.xlu1 %1347  ;;  %v4227_v33 = vpop.permute.xlu0 %4226 }
 0x211   : > { %1436 = vst.msk [vmem:[#allocation3 + $0x40] sm:$0xff] %vm1427_vm5, %v1348_v32 }
 0x212   : > { %4323 = vst.msk [vmem:[#allocation3] sm:$0xff] %vm4322_vm4, %v4227_v33  ;;  %4616 = vrot.lane.b32.xlu1 %v14496_v40, %s18413_s14  ;;  %4425 = vrot.lane.b32.xlu0 %v14498_v42, %s18431_s13 }
 0x214   : > { %v2116_v39 = vpop.permute.xlu1 %2115  ;;  %v1925_v34 = vpop.permute.xlu0 %1924 }
 0x215   : > { %2206 = vst.msk [vmem:[#allocation3 + $0x30] sm:$0xff] %vm2199_vm9, %v2116_v39 }
 0x216   : > { %2014 = vst.msk [vmem:[#allocation3 + $0x38] sm:$0xff] %vm18400_vm8, %v1925_v34  ;;  %1737 = vrot.lane.b32.xlu1 %v14653_v54, %s18461_s15  ;;  %1546 = vrot.lane.b32.xlu0 %v14655_v1, %s18427_s17  ;;  %vm4515_vm8 = vcmask 179368  }
 0x218   : > { %v2884_v40 = vpop.permute.xlu1 %2883  ;;  %v2693_v43 = vpop.permute.xlu0 %2692 }
 0x219   : > { %2976 = vst.msk [vmem:[#allocation3 + $0x20] sm:$0xff] %vm2971_vm13, %v2884_v40 }
 0x21a   : > { %2784 = vst.msk [vmem:[#allocation3 + $0x28] sm:$0xff] %vm2778_vm12, %v2693_v43  ;;  %2505 = vrot.lane.b32.xlu1 %v14617_v37, %s18462_s10  ;;  %2314 = vrot.lane.b32.xlu0 %v14619_v27, %s18419_s21  ;;  %v14820_v43 = vld [vmem:[#allocation2 + $0x72] sm:$0xff] }
 0x21c   : > { %v3652_v42 = vpop.permute.xlu1 %3651  ;;  %v3461_v53 = vpop.permute.xlu0 %3460 }
 0x21d   : > { %3746 = vst.msk [vmem:[#allocation3 + $0x10] sm:$0xff] %vm18404_vm2, %v3652_v42  ;;  %v14822_v42 = vld [vmem:[#allocation2 + $0x79] sm:$0xff] }
 0x21e   : > { %3554 = vst.msk [vmem:[#allocation3 + $0x18] sm:$0xff] %vm18401_vm1, %v3461_v53  ;;  %3273 = vrot.lane.b32.xlu1 %v14564_v63, %s18463_s18  ;;  %3082 = vrot.lane.b32.xlu0 %v14627_v20, %s18402_s25  ;;  %vm18465_vm1 = vcmask 56368   ;;  %s18466_s25 = smov 23  }
 0x220   : > { %v4420_v44 = vpop.permute.xlu1 %4419  ;;  %v4229_v46 = vpop.permute.xlu0 %4228 }
 0x221   : > { %4516 = vst.msk [vmem:[#allocation3] sm:$0xff] %vm4515_vm8, %v4420_v44 }
 0x222   : > { %4324 = vst.msk [vmem:[#allocation3 + $0x8] sm:$0xff] %vm4322_vm4, %v4229_v46  ;;  %4041 = vrot.lane.b32.xlu1 %v14572_v3, %s18464_s22  ;;  %3850 = vrot.lane.b32.xlu0 %v14562_v60, %s18417_s9 }
 0x224   : > { %v1541_v48 = vpop.permute.xlu1 %1540  ;;  %v1350_v51 = vpop.permute.xlu0 %1349 }
 0x225   : > { %1629 = vst.msk [vmem:[#allocation3 + $0x40] sm:$0xff] %vm18465_vm1, %v1541_v48  ;;  %vm18407_vm1 = vcmask 187568  }
 0x226   : > { %1437 = vst.msk [vmem:[#allocation3 + $0x48] sm:$0xff] %vm1427_vm5, %v1350_v51  ;;  %4809 = vrot.lane.b32.xlu1 %v14530_v10, %s18466_s25  ;;  %4618 = vrot.lane.b32.xlu0 %v14532_v9, %s18413_s14  ;;  %v14838_v51 = vadd.s32 8, %v14781_v19 }
 0x228   : > { %v2309_v47 = vpop.permute.xlu1 %2308  ;;  %v2118_v57 = vpop.permute.xlu0 %2117 }
 0x229   : > { %2399 = vst.msk [vmem:[#allocation3 + $0x30] sm:$0xff] %vm18437_vm10, %v2309_v47 }
 0x22a   : > { %2207 = vst.msk [vmem:[#allocation3 + $0x38] sm:$0xff] %vm2199_vm9, %v2118_v57  ;;  %1930 = vrot.lane.b32.xlu1 %v14687_v45, %s18438_s19  ;;  %1739 = vrot.lane.b32.xlu0 %v14689_v52, %s18461_s15 }
 0x22c   : > { %v3077_v10 = vpop.permute.xlu1 %3076  ;;  %v2886_v11 = vpop.permute.xlu0 %2885 }
 0x22d   : > { %3169 = vst.msk [vmem:[#allocation3 + $0x20] sm:$0xff] %vm18408_vm14, %v3077_v10  ;;  %v5171_v10 = vand.u32 15, %v14838_v51 }
 0x22e   : > { %2977 = vst.msk [vmem:[#allocation3 + $0x28] sm:$0xff] %vm2971_vm13, %v2886_v11  ;;  %2698 = vrot.lane.b32.xlu1 %v14653_v54, %s18435_s23  ;;  %2507 = vrot.lane.b32.xlu0 %v14655_v1, %s18462_s10 }
 0x230   : > { %v3845_v9 = vpop.permute.xlu1 %3844  ;;  %v3654_v36 = vpop.permute.xlu0 %3653 }
 0x231   : > { %3939 = vst.msk [vmem:[#allocation3 + $0x10] sm:$0xff] %vm18405_vm3, %v3845_v9 }
 0x232   : > { %3747 = vst.msk [vmem:[#allocation3 + $0x18] sm:$0xff] %vm18404_vm2, %v3654_v36  ;;  %3466 = vrot.lane.b32.xlu1 %v14617_v37, %s18433_s29  ;;  %3275 = vrot.lane.b32.xlu0 %v14619_v27, %s18463_s18  ;;  %vm18467_vm2 = vcmask 56368  }
 0x234   : > { %v4613_v35 = vpop.permute.xlu1 %4612  ;;  %v4422_v22 = vpop.permute.xlu0 %4421 }
 0x235   : > { %4709 = vst.msk [vmem:[#allocation3] sm:$0xff] %vm18407_vm1, %v4613_v35 }
 0x236   : > { %4517 = vst.msk [vmem:[#allocation3 + $0x8] sm:$0xff] %vm4515_vm8, %v4422_v22  ;;  %4234 = vrot.lane.b32.xlu1 %v14564_v63, %s18429_s12  ;;  %4043 = vrot.lane.b32.xlu0 %v14627_v20, %s18464_s22 }
 0x238   : > { %v1734_v58 = vpop.permute.xlu1 %1733  ;;  %v1543_v56 = vpop.permute.xlu0 %1542 }
 0x239   : > { %1822 = vst.msk [vmem:[#allocation3 + $0x40] sm:$0xff] %vm18406_vm7, %v1734_v58  ;;  %v14873_v58 = vld [vmem:[#allocation2 + $0x73] sm:$0xff] }
 0x23a   : > { %1630 = vst.msk [vmem:[#allocation3 + $0x48] sm:$0xff] %vm18467_vm2, %v1543_v56  ;;  %5002 = vrot.lane.b32.xlu1 %v14572_v3, %s18422_s26  ;;  %4811 = vrot.lane.b32.xlu0 %v14562_v60, %s18466_s25  ;;  %v14732_v63 = vmul.u32.u64.low 3435973837, %v5545_v59  ;;  %v14733_v60 = vmul.u32.u64.high 3435973837, %v5545_v59, %v14732_v63  ;;  %vm18411_vm2 = vcmask 195768   ;;  %v14875_v56 = vld [vmem:[#allocation2 + $0x7a] sm:$0xff] }
 0x23c   : > { %v2502_v25 = vpop.permute.xlu1 %2501  ;;  %v2311_v31 = vpop.permute.xlu0 %2310  ;;  %v5552_v4 = vshrl.u32 %v14733_v60, 2 }
 0x23d   : > { %2592 = vst.msk [vmem:[#allocation3 + $0x30] sm:$0xff] %vm2585_vm11, %v2502_v25 }
 0x23e   : > { %2400 = vst.msk [vmem:[#allocation3 + $0x38] sm:$0xff] %vm18437_vm10, %v2311_v31  ;;  %1932 = vrot.lane.b32.xlu1 %v14722_v61, %s18438_s19  ;;  %1355 = vrot.lane.b32.xlu0 %v14724_v62, %s18409_s16  ;;  %v5553_v6 = vmul.u32 5, %v5552_v4 }
 0x240   : > { %v3270_v50 = vpop.permute.xlu1 %3269  ;;  %v3079_v3 = vpop.permute.xlu0 %3078  ;;  %v5554_v13 = vsub.s32 %v5545_v59, %v5553_v6 }
 0x241   : > { %3362 = vst.msk [vmem:[#allocation3 + $0x20] sm:$0xff] %vm3357_vm15, %v3270_v50 }
 0x242   : > { %3170 = vst.msk [vmem:[#allocation3 + $0x28] sm:$0xff] %vm18408_vm14, %v3079_v3  ;;  %2700 = vrot.lane.b32.xlu1 %v14689_v52, %s18435_s23  ;;  %2123 = vrot.lane.b32.xlu0 %v14735_v55, %s18443_s20  ;;  %v5560_v18 = vadd.s32 5, %v5554_v13 }
 0x244   : > { %v4038_v49 = vpop.permute.xlu1 %4037  ;;  %v3847_v30 = vpop.permute.xlu0 %3846 }
 0x245   : > { %4132 = vst.msk [vmem:[#allocation3 + $0x10] sm:$0xff] %vm18424_vm0, %v4038_v49 }
 0x246   : > { %3940 = vst.msk [vmem:[#allocation3 + $0x18] sm:$0xff] %vm18405_vm3, %v3847_v30  ;;  %3468 = vrot.lane.b32.xlu1 %v14655_v1, %s18433_s29  ;;  %2891 = vrot.lane.b32.xlu0 %v14687_v45, %s18415_s24  ;;  %vm18468_vm3 = vcmask 72768  }
 0x248   : > { %v4806_v7 = vpop.permute.xlu1 %4805  ;;  %v4615_v8 = vpop.permute.xlu0 %4614 }
 0x249   : > { %4902 = vst.msk [vmem:[#allocation3] sm:$0xff] %vm18411_vm2, %v4806_v7  ;;  %v14908_v7 = vld [vmem:[#allocation2 + $0x7b] sm:$0xff] }
 0x24a   : > { %4710 = vst.msk [vmem:[#allocation3 + $0x8] sm:$0xff] %vm18407_vm1, %v4615_v8  ;;  %4236 = vrot.lane.b32.xlu1 %v14619_v27, %s18429_s12  ;;  %3659 = vrot.lane.b32.xlu0 %v14653_v54, %s18425_s30  ;;  %vm18469_vm1 = vcmask 138368   ;;  %v14910_v8 = vld [vmem:[#allocation2 + $0x80] sm:$0xff] }
 0x24c   : > { %v1927_v12 = vpop.permute.xlu1 %1926  ;;  %v1736_v41 = vpop.permute.xlu0 %1735 }
 0x24d   : > { %2015 = vst.msk [vmem:[#allocation3 + $0x40] sm:$0xff] %vm18468_vm3, %v1927_v12  ;;  %vm5557_vm3 = vcmp.ne.s32.totalorder %v5554_v13, 0 }
 0x24e   : > { %1823 = vst.msk [vmem:[#allocation3 + $0x48] sm:$0xff] %vm18406_vm7, %v1736_v41  ;;  %5004 = vrot.lane.b32.xlu1 %v14627_v20, %s18422_s26  ;;  %4427 = vrot.lane.b32.xlu0 %v14617_v37, %s18431_s13  ;;  %vm5558_vm7 = vcmp.lt.s32.totalorder %v5554_v13, 0 }
 0x24f   : > { %vm5559_vm14 = vmand %vm5558_vm7, %vm5557_vm3  ;;  %vm18412_vm7 = vcmask 203968   ;;  %vm18475_vm3 = vcmask 72768  }
 0x250   : > { %v2695_v15 = vpop.permute.xlu1 %2694  ;;  %v2504_v16 = vpop.permute.xlu0 %2503  ;;  %v5561_v24 = vsel %vm5559_vm14, %v5560_v18, %v5554_v13  ;;  %v14944_v18 = vld [vmem:[#allocation2 + $0x81] sm:$0xff] }
 0x251   : > { %2785 = vst.msk [vmem:[#allocation3 + $0x30] sm:$0xff] %vm2778_vm12, %v2695_v15  ;;  %v14790_v2 = vsub.s32 2, %v5561_v24  ;;  %v14792_v28 = vsub.s32 18, %v5561_v24 }
 0x252   : > { %2593 = vst.msk [vmem:[#allocation3 + $0x38] sm:$0xff] %vm2585_vm11, %v2504_v16  ;;  %1548 = vrot.lane.b32.xlu1 %v14762_v38, %s18427_s17  ;;  %1357 = vrot.lane.b32.xlu0 %v14764_v5, %s18409_s16  ;;  %s18470_s16 = smov 14  }
 0x253   : > { %vm14801_vm14 = vcmp.ge.s32.totalorder %v5164_v26, %v14790_v2 }
 0x254   : > { %v3463_v37 = vpop.permute.xlu1 %3462  ;;  %v3272_v27 = vpop.permute.xlu0 %3271 }
 0x255   : > { %3555 = vst.msk [vmem:[#allocation3 + $0x20] sm:$0xff] %vm18469_vm1, %v3463_v37  ;;  %vm14806_vm1 = vcmp.lt.s32.totalorder %v5164_v26, %v14792_v28  ;;  %v14963_v26 = vadd.s32 16, %v14781_v19 }
 0x256   : > { %3363 = vst.msk [vmem:[#allocation3 + $0x28] sm:$0xff] %vm3357_vm15, %v3272_v27  ;;  %2316 = vrot.lane.b32.xlu1 %v14724_v62, %s18419_s21  ;;  %2125 = vrot.lane.b32.xlu0 %v14772_v17, %s18443_s20 }
 0x257   : > { %v5178_v33 = vand.u32 15, %v14963_v26 }
 0x258   : > { %v4231_v20 = vpop.permute.xlu1 %4230  ;;  %v4040_v23 = vpop.permute.xlu0 %4039 }
 0x259   : > { %4325 = vst.msk [vmem:[#allocation3 + $0x10] sm:$0xff] %vm4322_vm4, %v4231_v20  ;;  %v14946_v20 = vld [vmem:[#allocation2 + $0x88] sm:$0xff] }
 0x25a   : > { %4133 = vst.msk [vmem:[#allocation3 + $0x18] sm:$0xff] %vm18424_vm0, %v4040_v23  ;;  %3084 = vrot.lane.b32.xlu1 %v14735_v55, %s18470_s16  ;;  %2893 = vrot.lane.b32.xlu0 %v14722_v61, %s18415_s24 }
 0x25c   : > { %v4999_v29 = vpop.permute.xlu1 %4998  ;;  %v4808_v32 = vpop.permute.xlu0 %4807 }
 0x25d   : > { %5095 = vst.msk [vmem:[#allocation3] sm:$0xff] %vm18412_vm7, %v4999_v29 }
 0x25e   : > { %4903 = vst.msk [vmem:[#allocation3 + $0x8] sm:$0xff] %vm18411_vm2, %v4808_v32  ;;  %3852 = vrot.lane.b32.xlu1 %v14687_v45, %s18417_s9  ;;  %3661 = vrot.lane.b32.xlu0 %v14689_v52, %s18425_s30  ;;  %vm5628_vm2 = vmand %vm14801_vm14, %vm14806_vm1  ;;  %vm18476_vm14 = vcmask 138368   ;;  %vm14854_vm1 = vcmp.ge.s32.totalorder %v5171_v10, %v14790_v2 }
 0x260   : > { %v1929_v34 = vpop.permute.xlu1 %1928  ;;  %v1352_v40 = vpop.permute.xlu0 %1351 }
 0x261   : > { %2016 = vst.msk [vmem:[#allocation3 + $0x48] sm:$0xff] %vm18475_vm3, %v1929_v34  ;;  %vm5703_vm3 = vcmask 203776  }
 0x262   : > { %1438 = vst.msk [vmem:[#allocation3 + $0x50] sm:$0xff] %vm1427_vm5, %v1352_v40  ;;  %4620 = vrot.lane.b32.xlu1 %v14653_v54, %s18413_s14  ;;  %4429 = vrot.lane.b32.xlu0 %v14655_v1, %s18431_s13 }
 0x264   : > { %v2697_v53 = vpop.permute.xlu1 %2696  ;;  %v2120_v44 = vpop.permute.xlu0 %2119  ;;  %v5660_v46 = vld [vmem:[#allocation3] sm:$0xff] }
 0x265   : > { %2786 = vst.msk [vmem:[#allocation3 + $0x38] sm:$0xff] %vm2778_vm12, %v2697_v53  ;;  %v5676_v54 = vsel %vm5628_vm2, %v5660_v46, 0.0  ;;  %vm18477_vm2 = vcmask 146568  }
 0x266   : > { %2208 = vst.msk [vmem:[#allocation3 + $0x40] sm:$0xff] %vm2199_vm9, %v2120_v44  ;;  %1741 = vrot.lane.b32.xlu1 %v14820_v43, %s18461_s15  ;;  %1550 = vrot.lane.b32.xlu0 %v14822_v42, %s18427_s17 }
 0x267   : > { %12733 = vmatprep.mubr.msk.f32.mxu1 %vm5703_vm3, %v5676_v54  ;;  %v14998_v54 = vld [vmem:[#allocation2 + $0x82] sm:$0xff] }
 0x268   : > { %v3465_v1 = vpop.permute.xlu1 %3464  ;;  %v2888_v48 = vpop.permute.xlu0 %2887 }
 0x269   : > { %3556 = vst.msk [vmem:[#allocation3 + $0x28] sm:$0xff] %vm18476_vm14, %v3465_v1  ;;  %vm14859_vm14 = vcmp.lt.s32.totalorder %v5171_v10, %v14792_v28  ;;  %v15000_v1 = vld [vmem:[#allocation2 + $0x89] sm:$0xff] }
 0x26a   : > { %2978 = vst.msk [vmem:[#allocation3 + $0x30] sm:$0xff] %vm2971_vm13, %v2888_v48  ;;  %2509 = vrot.lane.b32.xlu1 %v14762_v38, %s18462_s10  ;;  %2318 = vrot.lane.b32.xlu0 %v14764_v5, %s18419_s21 }
 0x26c   : > { %v4233_v47 = vpop.permute.xlu1 %4232  ;;  %v3656_v57 = vpop.permute.xlu0 %3655 }
 0x26d   : > { %4326 = vst.msk [vmem:[#allocation3 + $0x18] sm:$0xff] %vm4322_vm4, %v4233_v47 }
 0x26e   : > { %3748 = vst.msk [vmem:[#allocation3 + $0x20] sm:$0xff] %vm18477_vm2, %v3656_v57  ;;  %3277 = vrot.lane.b32.xlu1 %v14724_v62, %s18463_s18  ;;  %3086 = vrot.lane.b32.xlu0 %v14772_v17, %s18470_s16  ;;  %vm18482_vm2 = vcmask 56368  }
 0x270   : > { %v5001_v11 = vpop.permute.xlu1 %5000  ;;  %v4424_v9 = vpop.permute.xlu0 %4423 }
 0x271   : > { %5096 = vst.msk [vmem:[#allocation3 + $0x8] sm:$0xff] %vm18412_vm7, %v5001_v11  ;;  %vm5629_vm7 = vmand %vm14854_vm1, %vm14859_vm14  ;;  %vm18483_vm1 = vcmask 121968   ;;  %vm18485_vm14 = vcmask 146568   ;;  %v15016_v11 = vadd.s32 24, %v14781_v19 }
 0x272   : > { %4518 = vst.msk [vmem:[#allocation3 + $0x10] sm:$0xff] %vm4515_vm8, %v4424_v9  ;;  %4045 = vrot.lane.b32.xlu1 %v14735_v55, %s18464_s22  ;;  %3854 = vrot.lane.b32.xlu0 %v14722_v61, %s18417_s9 }
 0x273   : > { %v5185_v35 = vand.u32 15, %v15016_v11 }
 0x274   : > { %v1545_v22 = vpop.permute.xlu1 %1544  ;;  %v1354_v21 = vpop.permute.xlu0 %1353 }
 0x275   : > { %1631 = vst.msk [vmem:[#allocation3 + $0x50] sm:$0xff] %vm18482_vm2, %v1545_v22  ;;  %vm18486_vm2 = vcmask 187568  }
 0x276   : > { %1439 = vst.msk [vmem:[#allocation3 + $0x58] sm:$0xff] %vm1427_vm5, %v1354_v21  ;;  %4813 = vrot.lane.b32.xlu1 %v14687_v45, %s18466_s25  ;;  %4622 = vrot.lane.b32.xlu0 %v14689_v52, %s18413_s14  ;;  %s18489_s14 = smov 5  }
 0x278   : > { %v2313_v59 = vpop.permute.xlu1 %2312  ;;  %v2122_v25 = vpop.permute.xlu0 %2121  ;;  %v5661_v31 = vld [vmem:[#allocation3 + $0x8] sm:$0xff] }
 0x279   : > { %2401 = vst.msk [vmem:[#allocation3 + $0x40] sm:$0xff] %vm18437_vm10, %v2313_v59  ;;  %v5677_v45 = vsel %vm5629_vm7, %v5661_v31, 0.0  ;;  %vm18484_vm7 = vcmask 154768   ;;  %v15212_v59 = vadd.s32 40, %v14781_v19 }
 0x27a   : > { %2209 = vst.msk [vmem:[#allocation3 + $0x48] sm:$0xff] %vm2199_vm9, %v2122_v25  ;;  %1934 = vrot.lane.b32.xlu1 %v14873_v58, %s18438_s19  ;;  %1743 = vrot.lane.b32.xlu0 %v14875_v56, %s18461_s15 }
 0x27b   : > { %12734 = vmatmul.mubr.msk.f32.vlgmr.msra.gmra.mrb[0].mxu1 %vm5703_vm3, %v5677_v45 }
 0x27c   : > { %v3081_v52 = vpop.permute.xlu1 %3080  ;;  %v2890_v63 = vpop.permute.xlu0 %2889 }
 0x27d   : > { %3171 = vst.msk [vmem:[#allocation3 + $0x30] sm:$0xff] %vm18483_vm1, %v3081_v52  ;;  %vm18487_vm1 = vcmask 64568   ;;  %v15051_v52 = vld [vmem:[#allocation2 + $0x83] sm:$0xff] }
 0x27e   : > { %2979 = vst.msk [vmem:[#allocation3 + $0x38] sm:$0xff] %vm2971_vm13, %v2890_v63  ;;  %2702 = vrot.lane.b32.xlu1 %v14820_v43, %s18435_s23  ;;  %2511 = vrot.lane.b32.xlu0 %v14822_v42, %s18462_s10  ;;  %v15053_v63 = vld [vmem:[#allocation2 + $0x8a] sm:$0xff] }
 0x280   : > { %v3849_v60 = vpop.permute.xlu1 %3848  ;;  %v3658_v50 = vpop.permute.xlu0 %3657 }
 0x281   : > { %3941 = vst.msk [vmem:[#allocation3 + $0x20] sm:$0xff] %vm18484_vm7, %v3849_v60  ;;  %vm18488_vm7 = vcmask 56368  }
 0x282   : > { %3749 = vst.msk [vmem:[#allocation3 + $0x28] sm:$0xff] %vm18485_vm14, %v3658_v50  ;;  %3470 = vrot.lane.b32.xlu1 %v14762_v38, %s18433_s29  ;;  %3279 = vrot.lane.b32.xlu0 %v14764_v5, %s18463_s18  ;;  %vm18490_vm14 = vcmask 121968  }
 0x284   : > { %v4617_v3 = vpop.permute.xlu1 %4616  ;;  %v4426_v49 = vpop.permute.xlu0 %4425 }
 0x285   : > { %4711 = vst.msk [vmem:[#allocation3 + $0x10] sm:$0xff] %vm18486_vm2, %v4617_v3  ;;  %vm18491_vm2 = vcmask 154768  }
 0x286   : > { %4519 = vst.msk [vmem:[#allocation3 + $0x18] sm:$0xff] %vm4515_vm8, %v4426_v49  ;;  %4238 = vrot.lane.b32.xlu1 %v14724_v62, %s18429_s12  ;;  %4047 = vrot.lane.b32.xlu0 %v14772_v17, %s18464_s22 }
 0x288   : > { %v1738_v30 = vpop.permute.xlu1 %1737  ;;  %v1547_v4 = vpop.permute.xlu0 %1546 }
 0x289   : > { %1824 = vst.msk [vmem:[#allocation3 + $0x50] sm:$0xff] %vm18487_vm1, %v1738_v30  ;;  %vm18492_vm1 = vcmask 195768  }
 0x28a   : > { %1632 = vst.msk [vmem:[#allocation3 + $0x58] sm:$0xff] %vm18488_vm7, %v1547_v4  ;;  %5006 = vrot.lane.b32.xlu1 %v14735_v55, %s18422_s26  ;;  %4815 = vrot.lane.b32.xlu0 %v14722_v61, %s18466_s25  ;;  %v14918_v55 = vld [vmem:[#allocation2 + $0x74] sm:$0xff]  ;;  %vm18493_vm7 = vcmask 187568  }
 0x28c   : > { %v2506_v62 = vpop.permute.xlu1 %2505  ;;  %v2315_v6 = vpop.permute.xlu0 %2314 }
 0x28d   : > { %2594 = vst.msk [vmem:[#allocation3 + $0x40] sm:$0xff] %vm2585_vm11, %v2506_v62 }
 0x28e   : > { %2402 = vst.msk [vmem:[#allocation3 + $0x48] sm:$0xff] %vm18437_vm10, %v2315_v6  ;;  %1936 = vrot.lane.b32.xlu1 %v14908_v7, %s18438_s19  ;;  %1359 = vrot.lane.b32.xlu0 %v14910_v8, %s18489_s14 }
 0x290   : > { %v3274_v12 = vpop.permute.xlu1 %3273  ;;  %v3083_v61 = vpop.permute.xlu0 %3082 }
 0x291   : > { %3364 = vst.msk [vmem:[#allocation3 + $0x30] sm:$0xff] %vm3357_vm15, %v3274_v12 }
 0x292   : > { %3172 = vst.msk [vmem:[#allocation3 + $0x38] sm:$0xff] %vm18490_vm14, %v3083_v61  ;;  %2704 = vrot.lane.b32.xlu1 %v14875_v56, %s18435_s23  ;;  %2127 = vrot.lane.b32.xlu0 %v14918_v55, %s18443_s20  ;;  %vm18494_vm14 = vcmask 72768  }
 0x294   : > { %v4042_v41 = vpop.permute.xlu1 %4041  ;;  %v3851_v13 = vpop.permute.xlu0 %3850 }
 0x295   : > { %4134 = vst.msk [vmem:[#allocation3 + $0x20] sm:$0xff] %vm18424_vm0, %v4042_v41  ;;  %v15110_v41 = vld [vmem:[#allocation2 + $0x90] sm:$0xff] }
 0x296   : > { %3942 = vst.msk [vmem:[#allocation3 + $0x28] sm:$0xff] %vm18491_vm2, %v3851_v13  ;;  %3472 = vrot.lane.b32.xlu1 %v14822_v42, %s18433_s29  ;;  %2895 = vrot.lane.b32.xlu0 %v14873_v58, %s18415_s24  ;;  %vm18495_vm2 = vcmask 64568   ;;  %v15112_v13 = vld [vmem:[#allocation2 + $0x8c] sm:$0xff] }
 0x298   : > { %v4810_v15 = vpop.permute.xlu1 %4809  ;;  %v4619_v16 = vpop.permute.xlu0 %4618 }
 0x299   : > { %4904 = vst.msk [vmem:[#allocation3 + $0x10] sm:$0xff] %vm18492_vm1, %v4810_v15  ;;  %vm18496_vm1 = vcmask 138368  }
 0x29a   : > { %4712 = vst.msk [vmem:[#allocation3 + $0x18] sm:$0xff] %vm18493_vm7, %v4619_v16  ;;  %4240 = vrot.lane.b32.xlu1 %v14764_v5, %s18429_s12  ;;  %3663 = vrot.lane.b32.xlu0 %v14820_v43, %s18425_s30  ;;  %vm18497_vm7 = vcmask 203968   ;;  %v15122_v16 = vld [vmem:[#allocation2 + $0x8b] sm:$0xff] }
 0x29c   : > { %v1931_v37 = vpop.permute.xlu1 %1930  ;;  %v1740_v27 = vpop.permute.xlu0 %1739 }
 0x29d   : > { %2017 = vst.msk [vmem:[#allocation3 + $0x50] sm:$0xff] %vm18494_vm14, %v1931_v37  ;;  %vm18498_vm14 = vcmask 195768  }
 0x29e   : > { %1825 = vst.msk [vmem:[#allocation3 + $0x58] sm:$0xff] %vm18495_vm2, %v1740_v27  ;;  %5008 = vrot.lane.b32.xlu1 %v14772_v17, %s18422_s26  ;;  %4431 = vrot.lane.b32.xlu0 %v14762_v38, %s18431_s13  ;;  %v14954_v17 = vld [vmem:[#allocation2 + $0x7c] sm:$0xff]  ;;  %vm14979_vm2 = vcmp.ge.s32.totalorder %v5178_v33, %v14790_v2 }
 0x2a0   : > { %v2699_v5 = vpop.permute.xlu1 %2698  ;;  %v2508_v23 = vpop.permute.xlu0 %2507 }
 0x2a1   : > { %2787 = vst.msk [vmem:[#allocation3 + $0x40] sm:$0xff] %vm2778_vm12, %v2699_v5 }
 0x2a2   : > { %2595 = vst.msk [vmem:[#allocation3 + $0x48] sm:$0xff] %vm2585_vm11, %v2508_v23  ;;  %1552 = vrot.lane.b32.xlu1 %v14944_v18, %s18427_s17  ;;  %1361 = vrot.lane.b32.xlu0 %v14946_v20, %s18489_s14 }
 0x2a4   : > { %v3467_v24 = vpop.permute.xlu1 %3466  ;;  %v3276_v38 = vpop.permute.xlu0 %3275 }
 0x2a5   : > { %3557 = vst.msk [vmem:[#allocation3 + $0x30] sm:$0xff] %vm18496_vm1, %v3467_v24  ;;  %vm14984_vm1 = vcmp.lt.s32.totalorder %v5178_v33, %v14792_v28 }
 0x2a6   : > { %3365 = vst.msk [vmem:[#allocation3 + $0x38] sm:$0xff] %vm3357_vm15, %v3276_v38  ;;  %2320 = vrot.lane.b32.xlu1 %v14910_v8, %s18419_s21  ;;  %2129 = vrot.lane.b32.xlu0 %v14954_v17, %s18443_s20 }
 0x2a8   : > { %v4235_v29 = vpop.permute.xlu1 %4234  ;;  %v4044_v32 = vpop.permute.xlu0 %4043 }
 0x2a9   : > { %4327 = vst.msk [vmem:[#allocation3 + $0x20] sm:$0xff] %vm4322_vm4, %v4235_v29 }
 0x2aa   : > { %4135 = vst.msk [vmem:[#allocation3 + $0x28] sm:$0xff] %vm18424_vm0, %v4044_v32  ;;  %3088 = vrot.lane.b32.xlu1 %v14918_v55, %s18470_s16  ;;  %2897 = vrot.lane.b32.xlu0 %v14908_v7, %s18415_s24  ;;  %s18504_s24 = smov 22   ;;  %v15148_v32 = vld [vmem:[#allocation2 + $0x98] sm:$0xff] }
 0x2ac   : > { %v5003_v39 = vpop.permute.xlu1 %5002  ;;  %v4812_v34 = vpop.permute.xlu0 %4811 }
 0x2ad   : > { %5097 = vst.msk [vmem:[#allocation3 + $0x10] sm:$0xff] %vm18497_vm7, %v5003_v39  ;;  %vm18503_vm7 = vcmask 72768  }
 0x2ae   : > { %4905 = vst.msk [vmem:[#allocation3 + $0x18] sm:$0xff] %vm18498_vm14, %v4812_v34  ;;  %3856 = vrot.lane.b32.xlu1 %v14873_v58, %s18417_s9  ;;  %3665 = vrot.lane.b32.xlu0 %v14875_v56, %s18425_s30  ;;  %vm5630_vm14 = vmand %vm14979_vm2, %vm14984_vm1  ;;  %vm18505_vm2 = vcmask 138368   ;;  %vm18506_vm1 = vcmask 146568   ;;  %v15156_v34 = vld [vmem:[#allocation2 + $0x91] sm:$0xff] }
 0x2b0   : > { %v1933_v44 = vpop.permute.xlu1 %1932  ;;  %v1356_v46 = vpop.permute.xlu0 %1355 }
 0x2b1   : > { %2018 = vst.msk [vmem:[#allocation3 + $0x58] sm:$0xff] %vm18503_vm7, %v1933_v44  ;;  %vm18507_vm7 = vcmask 203968  }
 0x2b2   : > { %1440 = vst.msk [vmem:[#allocation3 + $0x60] sm:$0xff] %vm1427_vm5, %v1356_v46  ;;  %4624 = vrot.lane.b32.xlu1 %v14820_v43, %s18504_s24  ;;  %4433 = vrot.lane.b32.xlu0 %v14822_v42, %s18431_s13 }
 0x2b4   : > { %v2701_v48 = vpop.permute.xlu1 %2700  ;;  %v2124_v47 = vpop.permute.xlu0 %2123  ;;  %v5662_v57 = vld [vmem:[#allocation3 + $0x10] sm:$0xff] }
 0x2b5   : > { %2788 = vst.msk [vmem:[#allocation3 + $0x48] sm:$0xff] %vm2778_vm12, %v2701_v48  ;;  %v5678_v43 = vsel %vm5630_vm14, %v5662_v57, 0.0  ;;  %vm15032_vm14 = vcmp.ge.s32.totalorder %v5185_v35, %v14790_v2 }
 0x2b6   : > { %2210 = vst.msk [vmem:[#allocation3 + $0x50] sm:$0xff] %vm2199_vm9, %v2124_v47  ;;  %1745 = vrot.lane.b32.xlu1 %v14998_v54, %s18461_s15  ;;  %1554 = vrot.lane.b32.xlu0 %v15000_v1, %s18427_s17 }
 0x2b7   : > { %12736 = vmatprep.mubr.msk.f32.mxu1 %vm5703_vm3, %v5678_v43 }
 0x2b8   : > { %v3469_v42 = vpop.permute.xlu1 %3468  ;;  %v2892_v10 = vpop.permute.xlu0 %2891 }
 0x2b9   : > { %3558 = vst.msk [vmem:[#allocation3 + $0x38] sm:$0xff] %vm18505_vm2, %v3469_v42  ;;  %vm15037_vm2 = vcmp.lt.s32.totalorder %v5185_v35, %v14792_v28  ;;  %v15194_v42 = vld [vmem:[#allocation2 + $0x99] sm:$0xff] }
 0x2ba   : > { %2980 = vst.msk [vmem:[#allocation3 + $0x40] sm:$0xff] %vm2971_vm13, %v2892_v10  ;;  %2513 = vrot.lane.b32.xlu1 %v14944_v18, %s18462_s10  ;;  %2322 = vrot.lane.b32.xlu0 %v14946_v20, %s18419_s21  ;;  %s18522_s21 = smov 13  }
 0x2bc   : > { %v4237_v9 = vpop.permute.xlu1 %4236  ;;  %v3660_v36 = vpop.permute.xlu0 %3659 }
 0x2bd   : > { %4328 = vst.msk [vmem:[#allocation3 + $0x28] sm:$0xff] %vm4322_vm4, %v4237_v9 }
 0x2be   : > { %3750 = vst.msk [vmem:[#allocation3 + $0x30] sm:$0xff] %vm18506_vm1, %v3660_v36  ;;  %3281 = vrot.lane.b32.xlu1 %v14910_v8, %s18463_s18  ;;  %3090 = vrot.lane.b32.xlu0 %v14954_v17, %s18470_s16  ;;  %vm18512_vm1 = vcmask 56368  }
 0x2c0   : > { %v5005_v22 = vpop.permute.xlu1 %5004  ;;  %v4428_v21 = vpop.permute.xlu0 %4427 }
 0x2c1   : > { %5098 = vst.msk [vmem:[#allocation3 + $0x18] sm:$0xff] %vm18507_vm7, %v5005_v22  ;;  %vm5631_vm7 = vmand %vm15032_vm14, %vm15037_vm2  ;;  %vm18513_vm14 = vcmask 121968   ;;  %vm18514_vm2 = vcmask 154768  }
 0x2c2   : > { %4520 = vst.msk [vmem:[#allocation3 + $0x20] sm:$0xff] %vm4515_vm8, %v4428_v21  ;;  %4049 = vrot.lane.b32.xlu1 %v14918_v55, %s18464_s22  ;;  %3858 = vrot.lane.b32.xlu0 %v14908_v7, %s18417_s9  ;;  %s18519_s9 = smov 4  }
 0x2c4   : > { %v1549_v31 = vpop.permute.xlu1 %1548  ;;  %v1358_v45 = vpop.permute.xlu0 %1357 }
 0x2c5   : > { %1633 = vst.msk [vmem:[#allocation3 + $0x60] sm:$0xff] %vm18512_vm1, %v1549_v31  ;;  %vm18515_vm1 = vcmask 146568   ;;  %v5199_v31 = vand.u32 15, %v15212_v59 }
 0x2c6   : > { %1441 = vst.msk [vmem:[#allocation3 + $0x68] sm:$0xff] %vm1427_vm5, %v1358_v45  ;;  %4817 = vrot.lane.b32.xlu1 %v14873_v58, %s18466_s25  ;;  %4626 = vrot.lane.b32.xlu0 %v14875_v56, %s18504_s24 }
 0x2c8   : > { %v2317_v60 = vpop.permute.xlu1 %2316  ;;  %v2126_v50 = vpop.permute.xlu0 %2125  ;;  %v5663_v3 = vld [vmem:[#allocation3 + $0x18] sm:$0xff] }
 0x2c9   : > { %2403 = vst.msk [vmem:[#allocation3 + $0x50] sm:$0xff] %vm18437_vm10, %v2317_v60  ;;  %v5679_v58 = vsel %vm5631_vm7, %v5663_v3, 0.0  ;;  %vm18421_vm7 = vcmask 130048  }
 0x2ca   : > { %2211 = vst.msk [vmem:[#allocation3 + $0x58] sm:$0xff] %vm2199_vm9, %v2126_v50  ;;  %1938 = vrot.lane.b32.xlu1 %v15051_v52, %s18438_s19  ;;  %1747 = vrot.lane.b32.xlu0 %v15053_v63, %s18461_s15 }
 0x2cb   : > { %12737 = vmatmul.mubr.msk.f32.gmra.mrb[2].mxu1 %vm5703_vm3, %v5679_v58  ;;  %6205 = vst.msk [vmem:[#allocation5] sm:$0xff] %vm18421_vm7, %v13681_v0  ;;  %6206 = vst.msk [vmem:[#allocation5 + $0x8] sm:$0xff] %vm18421_vm7, %v13681_v0 }
 0x2cc   : > { %v3085_v56 = vpop.permute.xlu1 %3084  ;;  %v2894_v49 = vpop.permute.xlu0 %2893  ;;  %6207 = vst.msk [vmem:[#allocation5 + $0x10] sm:$0xff] %vm18421_vm7, %v13681_v0  ;;  %6208 = vst.msk [vmem:[#allocation5 + $0x18] sm:$0xff] %vm18421_vm7, %v13681_v0 }
 0x2cd   : > { %3173 = vst.msk [vmem:[#allocation3 + $0x40] sm:$0xff] %vm18513_vm14, %v3085_v56  ;;  %vm18516_vm14 = vcmask 187568   ;;  %v15241_v56 = vld [vmem:[#allocation2 + $0x94] sm:$0xff] }
 0x2ce   : > { %2981 = vst.msk [vmem:[#allocation3 + $0x48] sm:$0xff] %vm2971_vm13, %v2894_v49  ;;  %2706 = vrot.lane.b32.xlu1 %v14998_v54, %s18435_s23  ;;  %2515 = vrot.lane.b32.xlu0 %v15000_v1, %s18462_s10 }
 0x2cf   : > { %6209 = vst.msk [vmem:[#allocation5 + $0x20] sm:$0xff] %vm18421_vm7, %v13681_v0  ;;  %6210 = vst.msk [vmem:[#allocation5 + $0x28] sm:$0xff] %vm18421_vm7, %v13681_v0 }
 0x2d0   : > { %v3853_v30 = vpop.permute.xlu1 %3852  ;;  %v3662_v4 = vpop.permute.xlu0 %3661  ;;  %6211 = vst.msk [vmem:[#allocation5 + $0x30] sm:$0xff] %vm18421_vm7, %v13681_v0  ;;  %6212 = vst.msk [vmem:[#allocation5 + $0x38] sm:$0xff] %vm18421_vm7, %v13681_v0 }
 0x2d1   : > { %3943 = vst.msk [vmem:[#allocation3 + $0x30] sm:$0xff] %vm18514_vm2, %v3853_v30  ;;  %vm18517_vm2 = vcmask 64568  }
 0x2d2   : > { %3751 = vst.msk [vmem:[#allocation3 + $0x38] sm:$0xff] %vm18515_vm1, %v3662_v4  ;;  %3474 = vrot.lane.b32.xlu1 %v14944_v18, %s18433_s29  ;;  %3283 = vrot.lane.b32.xlu0 %v14946_v20, %s18463_s18  ;;  %vm18518_vm1 = vcmask 56368  }
 0x2d3   : > { %6213 = vst.msk [vmem:[#allocation5 + $0x40] sm:$0xff] %vm18421_vm7, %v13681_v0  ;;  %6214 = vst.msk [vmem:[#allocation5 + $0x48] sm:$0xff] %vm18421_vm7, %v13681_v0 }
 0x2d4   : > { %6215 = vst.msk [vmem:[#allocation5 + $0x50] sm:$0xff] %vm18421_vm7, %v13681_v0  ;;  %6216 = vst.msk [vmem:[#allocation5 + $0x58] sm:$0xff] %vm18421_vm7, %v13681_v0  ;;  %v4621_v62 = vpop.permute.xlu1 %4620  ;;  %v4430_v6 = vpop.permute.xlu0 %4429  ;;  %vm18526_vm7 = vcmask 64568  }
 0x2d5   : > { %4713 = vst.msk [vmem:[#allocation3 + $0x20] sm:$0xff] %vm18516_vm14, %v4621_v62  ;;  %vm18520_vm14 = vcmask 121968  }
 0x2d6   : > { %4521 = vst.msk [vmem:[#allocation3 + $0x28] sm:$0xff] %vm4515_vm8, %v4430_v6  ;;  %4242 = vrot.lane.b32.xlu1 %v14910_v8, %s18429_s12  ;;  %4051 = vrot.lane.b32.xlu0 %v14954_v17, %s18464_s22  ;;  %v15252_v6 = vld [vmem:[#allocation2 + $0x9a] sm:$0xff] }
 0x2d8   : > { %v1742_v12 = vpop.permute.xlu1 %1741  ;;  %v1551_v61 = vpop.permute.xlu0 %1550 }
 0x2d9   : > { %1826 = vst.msk [vmem:[#allocation3 + $0x60] sm:$0xff] %vm18517_vm2, %v1742_v12  ;;  %vm18521_vm2 = vcmask 154768  }
 0x2da   : > { %1634 = vst.msk [vmem:[#allocation3 + $0x68] sm:$0xff] %vm18518_vm1, %v1551_v61  ;;  %5010 = vrot.lane.b32.xlu1 %v14918_v55, %s18422_s26  ;;  %4819 = vrot.lane.b32.xlu0 %v14908_v7, %s18466_s25  ;;  %v15120_v55 = vld [vmem:[#allocation2 + $0x84] sm:$0xff]  ;;  %vm18523_vm1 = vcmask 195768  }
 0x2dc   : > { %v2510_v8 = vpop.permute.xlu1 %2509  ;;  %v2319_v15 = vpop.permute.xlu0 %2318 }
 0x2dd   : > { %2596 = vst.msk [vmem:[#allocation3 + $0x50] sm:$0xff] %vm2585_vm11, %v2510_v8 }
 0x2de   : > { %2404 = vst.msk [vmem:[#allocation3 + $0x58] sm:$0xff] %vm18437_vm10, %v2319_v15  ;;  %1363 = vrot.lane.b32.xlu1 %v15110_v41, %s18489_s14  ;;  %1172 = vrot.lane.b32.xlu0 %v15112_v13, %s18519_s9 }
 0x2e0   : > { %v3278_v7 = vpop.permute.xlu1 %3277  ;;  %v3087_v37 = vpop.permute.xlu0 %3086 }
 0x2e1   : > { %3366 = vst.msk [vmem:[#allocation3 + $0x40] sm:$0xff] %vm3357_vm15, %v3278_v7 }
 0x2e2   : > { %3174 = vst.msk [vmem:[#allocation3 + $0x48] sm:$0xff] %vm18520_vm14, %v3087_v37  ;;  %2131 = vrot.lane.b32.xlu1 %v15120_v55, %s18443_s20  ;;  %1940 = vrot.lane.b32.xlu0 %v15122_v16, %s18438_s19  ;;  %vm18524_vm14 = vcmask 187568  }
 0x2e4   : > { %v4046_v27 = vpop.permute.xlu1 %4045  ;;  %v3855_v5 = vpop.permute.xlu0 %3854 }
 0x2e5   : > { %4136 = vst.msk [vmem:[#allocation3 + $0x30] sm:$0xff] %vm18424_vm0, %v4046_v27 }
 0x2e6   : > { %3944 = vst.msk [vmem:[#allocation3 + $0x38] sm:$0xff] %vm18521_vm2, %v3855_v5  ;;  %2899 = vrot.lane.b32.xlu1 %v15051_v52, %s18522_s21  ;;  %2708 = vrot.lane.b32.xlu0 %v15053_v63, %s18435_s23  ;;  %vm18525_vm2 = vcmask 72768  }
 0x2e8   : > { %v4814_v23 = vpop.permute.xlu1 %4813  ;;  %v4623_v24 = vpop.permute.xlu0 %4622 }
 0x2e9   : > { %4906 = vst.msk [vmem:[#allocation3 + $0x20] sm:$0xff] %vm18523_vm1, %v4814_v23  ;;  %vm18529_vm1 = vcmask 203968  }
 0x2ea   : > { %4714 = vst.msk [vmem:[#allocation3 + $0x28] sm:$0xff] %vm18524_vm14, %v4623_v24  ;;  %3667 = vrot.lane.b32.xlu1 %v14998_v54, %s18425_s30  ;;  %3476 = vrot.lane.b32.xlu0 %v15000_v1, %s18433_s29  ;;  %vm18530_vm14 = vcmask 195768   ;;  %v15284_v24 = vld [vmem:[#allocation2 + $0xa0] sm:$0xff] }
 0x2ec   : > { %v1935_v38 = vpop.permute.xlu1 %1934  ;;  %v1744_v29 = vpop.permute.xlu0 %1743 }
 0x2ed   : > { %2019 = vst.msk [vmem:[#allocation3 + $0x60] sm:$0xff] %vm18525_vm2, %v1935_v38  ;;  %v15286_v38 = vld [vmem:[#allocation2 + $0x9c] sm:$0xff] }
 0x2ee   : > { %1827 = vst.msk [vmem:[#allocation3 + $0x68] sm:$0xff] %vm18526_vm7, %v1744_v29  ;;  %4435 = vrot.lane.b32.xlu1 %v14944_v18, %s18431_s13  ;;  %4244 = vrot.lane.b32.xlu0 %v14946_v20, %s18429_s12  ;;  %vm18527_vm7 = vcmask 138368   ;;  %v15165_v20 = vadd.s32 32, %v14781_v19 }
 0x2f0   : > { %v2703_v33 = vpop.permute.xlu1 %2702  ;;  %v2512_v39 = vpop.permute.xlu0 %2511 }
 0x2f1   : > { %2789 = vst.msk [vmem:[#allocation3 + $0x50] sm:$0xff] %vm2778_vm12, %v2703_v33  ;;  %v15300_v33 = vld [vmem:[#allocation2 + $0x9b] sm:$0xff] }
 0x2f2   : > { %2597 = vst.msk [vmem:[#allocation3 + $0x58] sm:$0xff] %vm2585_vm11, %v2512_v39  ;;  %1365 = vrot.lane.b32.xlu1 %v15148_v32, %s18489_s14  ;;  %5012 = vrot.lane.b32.xlu0 %v14954_v17, %s18422_s26  ;;  %s18528_s26 = smov 10   ;;  %v5192_v17 = vand.u32 15, %v15165_v20 }
 0x2f4   : > { %v3471_v18 = vpop.permute.xlu1 %3470  ;;  %v3280_v40 = vpop.permute.xlu0 %3279  ;;  %vm15181_vm2 = vcmp.ge.s32.totalorder %v5192_v17, %v14790_v2 }
 0x2f5   : > { %3559 = vst.msk [vmem:[#allocation3 + $0x40] sm:$0xff] %vm18527_vm7, %v3471_v18  ;;  %vm5600_vm7 = vcmp.lt.s32.totalorder %v5192_v17, %v14792_v28 }
 0x2f6   : > { %3367 = vst.msk [vmem:[#allocation3 + $0x48] sm:$0xff] %vm3357_vm15, %v3280_v40  ;;  %2133 = vrot.lane.b32.xlu1 %v15112_v13, %s18443_s20  ;;  %1556 = vrot.lane.b32.xlu0 %v15156_v34, %s18427_s17 }
 0x2f8   : > { %v4239_v53 = vpop.permute.xlu1 %4238  ;;  %v4048_v44 = vpop.permute.xlu0 %4047 }
 0x2f9   : > { %4329 = vst.msk [vmem:[#allocation3 + $0x30] sm:$0xff] %vm4322_vm4, %v4239_v53  ;;  %v15305_v53 = vand.u32 7, %v14781_v19 }
 0x2fa   : > { %4137 = vst.msk [vmem:[#allocation3 + $0x38] sm:$0xff] %vm18424_vm0, %v4048_v44  ;;  %2901 = vrot.lane.b32.xlu1 %v15122_v16, %s18522_s21  ;;  %2324 = vrot.lane.b32.xlu0 %v15110_v41, %s18528_s26  ;;  %vm18533_vm0 = vcmask 72768   ;;  %v7397_v44 = vld [vmem:[#allocation5 + $0x9] sm:$0xff] }
 0x2fc   : > { %v5007_v46 = vpop.permute.xlu1 %5006  ;;  %v4816_v48 = vpop.permute.xlu0 %4815 }
 0x2fd   : > { %5099 = vst.msk [vmem:[#allocation3 + $0x20] sm:$0xff] %vm18529_vm1, %v5007_v46  ;;  %vm5632_vm1 = vmand %vm15181_vm2, %vm5600_vm7  ;;  %vm18537_vm2 = vcmask 203968   ;;  %vm15228_vm7 = vcmp.ge.s32.totalorder %v5199_v31, %v14790_v2 }
 0x2fe   : > { %4907 = vst.msk [vmem:[#allocation3 + $0x28] sm:$0xff] %vm18530_vm14, %v4816_v48  ;;  %3669 = vrot.lane.b32.xlu1 %v15053_v63, %s18425_s30  ;;  %3092 = vrot.lane.b32.xlu0 %v15120_v55, %s18470_s16  ;;  %s18534_s30 = smov 18   ;;  %vm18536_vm14 = vcmask 146568  }
 0x300   : > { %v1937_v57 = vpop.permute.xlu1 %1936  ;;  %v1360_v43 = vpop.permute.xlu0 %1359 }
 0x301   : > { %2020 = vst.msk [vmem:[#allocation3 + $0x68] sm:$0xff] %vm18533_vm0, %v1937_v57  ;;  %vm18535_vm0 = vcmask 138368  }
 0x302   : > { %1442 = vst.msk [vmem:[#allocation3 + $0x70] sm:$0xff] %vm1427_vm5, %v1360_v43  ;;  %4437 = vrot.lane.b32.xlu1 %v15000_v1, %s18431_s13  ;;  %3860 = vrot.lane.b32.xlu0 %v15051_v52, %s18534_s30  ;;  %v15203_v1 = vld [vmem:[#allocation2 + $0x92] sm:$0xff]  ;;  %s18559_s13 = smov 21  }
 0x304   : > { %v2705_v10 = vpop.permute.xlu1 %2704  ;;  %v2128_v9 = vpop.permute.xlu0 %2127  ;;  %v5664_v36 = vld [vmem:[#allocation3 + $0x20] sm:$0xff] }
 0x305   : > { %2790 = vst.msk [vmem:[#allocation3 + $0x58] sm:$0xff] %vm2778_vm12, %v2705_v10  ;;  %v5680_v35 = vsel %vm5632_vm1, %v5664_v36, 0.0  ;;  %vm5601_vm1 = vcmp.lt.s32.totalorder %v5199_v31, %v14792_v28  ;;  %v15360_v31 = vld [vmem:[%s18379_s3] ss:$0 sm:$0xff] }
 0x306   : > { %2212 = vst.msk [vmem:[#allocation3 + $0x60] sm:$0xff] %vm2199_vm9, %v2128_v9  ;;  %1558 = vrot.lane.b32.xlu1 %v15194_v42, %s18427_s17  ;;  %4628 = vrot.lane.b32.xlu0 %v14998_v54, %s18504_s24  ;;  %s18547_s17 = smov 24   ;;  %v15337_v9 = vld [vmem:[#allocation2 + $0xa8] sm:$0xff] }
 0x307   : > { %12739 = vmatprep.mubr.msk.f32.mxu1 %vm5703_vm3, %v5680_v35 }
 0x308   : > { %v3473_v22 = vpop.permute.xlu1 %3472  ;;  %v2896_v21 = vpop.permute.xlu0 %2895 }
 0x309   : > { %3560 = vst.msk [vmem:[#allocation3 + $0x48] sm:$0xff] %vm18535_vm0, %v3473_v22  ;;  %vm18540_vm0 = vcmask 56368   ;;  %v15345_v22 = vld [vmem:[#allocation2 + $0xa1] sm:$0xff] }
 0x30a   : > { %2982 = vst.msk [vmem:[#allocation3 + $0x50] sm:$0xff] %vm2971_vm13, %v2896_v21  ;;  %2326 = vrot.lane.b32.xlu1 %v15148_v32, %s18528_s26  ;;  %1749 = vrot.lane.b32.xlu0 %v15203_v1, %s18461_s15 }
 0x30c   : > { %v4241_v54 = vpop.permute.xlu1 %4240  ;;  %v3664_v25 = vpop.permute.xlu0 %3663 }
 0x30d   : > { %4330 = vst.msk [vmem:[#allocation3 + $0x38] sm:$0xff] %vm4322_vm4, %v4241_v54 }
 0x30e   : > { %3752 = vst.msk [vmem:[#allocation3 + $0x40] sm:$0xff] %vm18536_vm14, %v3664_v25  ;;  %3094 = vrot.lane.b32.xlu1 %v15112_v13, %s18470_s16  ;;  %2517 = vrot.lane.b32.xlu0 %v15156_v34, %s18462_s10  ;;  %vm5633_vm14 = vmand %vm15228_vm7, %vm5601_vm1  ;;  %vm18542_vm7 = vcmask 154768   ;;  %vm18543_vm1 = vcmask 146568  }
 0x310   : > { %v5009_v45 = vpop.permute.xlu1 %5008  ;;  %v4432_v60 = vpop.permute.xlu0 %4431 }
 0x311   : > { %5100 = vst.msk [vmem:[#allocation3 + $0x28] sm:$0xff] %vm18537_vm2, %v5009_v45  ;;  %vm18541_vm2 = vcmask 121968  }
 0x312   : > { %4522 = vst.msk [vmem:[#allocation3 + $0x30] sm:$0xff] %vm4515_vm8, %v4432_v60  ;;  %3862 = vrot.lane.b32.xlu1 %v15122_v16, %s18534_s30  ;;  %3285 = vrot.lane.b32.xlu0 %v15110_v41, %s18463_s18 }
 0x314   : > { %v1553_v3 = vpop.permute.xlu1 %1552  ;;  %v1362_v58 = vpop.permute.xlu0 %1361 }
 0x315   : > { %1635 = vst.msk [vmem:[#allocation3 + $0x70] sm:$0xff] %vm18540_vm0, %v1553_v3  ;;  %vm18544_vm0 = vcmask 187568   ;;  %v15490_v3 = vld [vmem:[#allocation2 + $0xac] sm:$0xff] }
 0x316   : > { %1443 = vst.msk [vmem:[#allocation3 + $0x78] sm:$0xff] %vm1427_vm5, %v1362_v58  ;;  %4630 = vrot.lane.b32.xlu1 %v15053_v63, %s18504_s24  ;;  %4053 = vrot.lane.b32.xlu0 %v15120_v55, %s18464_s22  ;;  %v15250_v63 = vld [vmem:[#allocation2 + $0x93] sm:$0xff] }
 0x318   : > { %v2321_v49 = vpop.permute.xlu1 %2320  ;;  %v2130_v30 = vpop.permute.xlu0 %2129  ;;  %v5665_v4 = vld [vmem:[#allocation3 + $0x28] sm:$0xff] }
 0x319   : > { %2405 = vst.msk [vmem:[#allocation3 + $0x60] sm:$0xff] %vm18437_vm10, %v2321_v49  ;;  %v5681_v62 = vsel %vm5633_vm14, %v5665_v4, 0.0  ;;  %vm18545_vm14 = vcmask 64568  }
 0x31a   : > { %2213 = vst.msk [vmem:[#allocation3 + $0x68] sm:$0xff] %vm2199_vm9, %v2130_v30  ;;  %1174 = vrot.lane.b32.xlu1 %v15241_v56, %s18519_s9  ;;  %4821 = vrot.lane.b32.xlu0 %v15051_v52, %s18466_s25 }
 0x31b   : > { %12740 = vmatmul.mubr.msk.f32.gmra.mrb[4].mxu1 %vm5703_vm3, %v5681_v62 }
 0x31c   : > { %v3089_v12 = vpop.permute.xlu1 %3088  ;;  %v2898_v61 = vpop.permute.xlu0 %2897 }
 0x31d   : > { %3175 = vst.msk [vmem:[#allocation3 + $0x50] sm:$0xff] %vm18541_vm2, %v3089_v12  ;;  %vm18546_vm2 = vcmask 56368  }
 0x31e   : > { %2983 = vst.msk [vmem:[#allocation3 + $0x58] sm:$0xff] %vm2971_vm13, %v2898_v61  ;;  %1942 = vrot.lane.b32.xlu1 %v15250_v63, %s18438_s19  ;;  %1751 = vrot.lane.b32.xlu0 %v15252_v6, %s18461_s15 }
 0x320   : > { %v3857_v8 = vpop.permute.xlu1 %3856  ;;  %v3666_v52 = vpop.permute.xlu0 %3665 }
 0x321   : > { %3945 = vst.msk [vmem:[#allocation3 + $0x40] sm:$0xff] %vm18542_vm7, %v3857_v8  ;;  %vm18548_vm7 = vcmask 121968  }
 0x322   : > { %3753 = vst.msk [vmem:[#allocation3 + $0x48] sm:$0xff] %vm18543_vm1, %v3666_v52  ;;  %2710 = vrot.lane.b32.xlu1 %v15203_v1, %s18435_s23  ;;  %2519 = vrot.lane.b32.xlu0 %v15194_v42, %s18462_s10  ;;  %vm18549_vm1 = vcmask 162968   ;;  %s18554_s23 = smov 12  }
 0x324   : > { %v4625_v15 = vpop.permute.xlu1 %4624  ;;  %v4434_v7 = vpop.permute.xlu0 %4433 }
 0x325   : > { %4715 = vst.msk [vmem:[#allocation3 + $0x30] sm:$0xff] %vm18544_vm0, %v4625_v15  ;;  %vm18550_vm0 = vcmask 154768  }
 0x326   : > { %4523 = vst.msk [vmem:[#allocation3 + $0x38] sm:$0xff] %vm4515_vm8, %v4434_v7  ;;  %3478 = vrot.lane.b32.xlu1 %v15156_v34, %s18433_s29  ;;  %3287 = vrot.lane.b32.xlu0 %v15148_v32, %s18463_s18  ;;  %s18557_s29 = smov 17   ;;  %v15399_v7 = vld [vmem:[#allocation2 + $0xa9] sm:$0xff] }
 0x328   : > { %v1746_v37 = vpop.permute.xlu1 %1745  ;;  %v1555_v27 = vpop.permute.xlu0 %1554 }
 0x329   : > { %1828 = vst.msk [vmem:[#allocation3 + $0x70] sm:$0xff] %vm18545_vm14, %v1746_v37  ;;  %vm18441_vm14 = vcmp.ge.s32.totalorder %v15305_v53, 1 }
 0x32a   : > { %1636 = vst.msk [vmem:[#allocation3 + $0x78] sm:$0xff] %vm18546_vm2, %v1555_v27  ;;  %4246 = vrot.lane.b32.xlu1 %v15110_v41, %s18429_s12  ;;  %4055 = vrot.lane.b32.xlu0 %v15112_v13, %s18464_s22  ;;  %v7405_v17 = vsel %vm18441_vm14, %v7397_v44, 0.0  ;;  %vm18551_vm2 = vcmask 130048   ;;  %s18558_s12 = smov 16  }
 0x32b   : > { %12889 = vmatprep.mubr.msk.f32.mxu0 %vm18551_vm2, %v7405_v17  ;;  %vm18562_vm2 = vcmask 162968  }
 0x32c   : > { %v2514_v5 = vpop.permute.xlu1 %2513  ;;  %v2323_v23 = vpop.permute.xlu0 %2322 }
 0x32d   : > { %2598 = vst.msk [vmem:[#allocation3 + $0x60] sm:$0xff] %vm2585_vm11, %v2514_v5 }
 0x32e   : > { %2406 = vst.msk [vmem:[#allocation3 + $0x68] sm:$0xff] %vm18437_vm10, %v2323_v23  ;;  %5014 = vrot.lane.b32.xlu1 %v15120_v55, %s18547_s17  ;;  %4823 = vrot.lane.b32.xlu0 %v15122_v16, %s18466_s25  ;;  %v7413_v55 = vld [vmem:[%s18380_s4 + $0x60] sm:$0xff]  ;;  %v7414_v16 = vld [vmem:[%s18380_s4 + $0x68] sm:$0xff]  ;;  %vm18556_vm10 = vcmask 64568  }
 0x32f   : > { %v15302_v39 = vpack.c.bf16 %v7414_v16, %v7413_v55 }
 0x330   : > { %v3282_v41 = vpop.permute.xlu1 %3281  ;;  %v3091_v29 = vpop.permute.xlu0 %3090 }
 0x331   : > { %3368 = vst.msk [vmem:[#allocation3 + $0x50] sm:$0xff] %vm3357_vm15, %v3282_v41  ;;  %13234 = vmatprep.subr.bf16.mxu0 %v15302_v39  ;;  %v15416_v41 = vadd.s32 56, %v14781_v19 }
 0x332   : > { %3176 = vst.msk [vmem:[#allocation3 + $0x58] sm:$0xff] %vm18548_vm7, %v3091_v29  ;;  %1367 = vrot.lane.b32.xlu1 %v15284_v24, %s18489_s14  ;;  %1176 = vrot.lane.b32.xlu0 %v15286_v38, %s18519_s9  ;;  %vm18552_vm7 = vcmask 195768  }
 0x333   : > { %13236 = vmatpush3.bf16.msra.mxu0 %v15302_v39 }
 0x334   : > { %v4050_v18 = vpop.permute.xlu1 %4049  ;;  %v3859_v40 = vpop.permute.xlu0 %3858 }
 0x335   : > { %4138 = vst.msk [vmem:[#allocation3 + $0x40] sm:$0xff] %vm18549_vm1, %v4050_v18  ;;  %vm18553_vm1 = vcmask 187568  }
 0x336   : > { %3946 = vst.msk [vmem:[#allocation3 + $0x48] sm:$0xff] %vm18550_vm0, %v3859_v40  ;;  %2135 = vrot.lane.b32.xlu1 %v15241_v56, %s18443_s20  ;;  %1944 = vrot.lane.b32.xlu0 %v15300_v33, %s18438_s19  ;;  %vm18555_vm0 = vcmask 72768   ;;  %s18560_s19 = smov 20  }
 0x338   : > { %v4818_v46 = vpop.permute.xlu1 %4817  ;;  %v4627_v48 = vpop.permute.xlu0 %4626 }
 0x339   : > { %4908 = vst.msk [vmem:[#allocation3 + $0x30] sm:$0xff] %vm18552_vm7, %v4818_v46  ;;  %vm18564_vm7 = vcmask 203968   ;;  %v15445_v46 = vld [vmem:[#allocation2 + $0xa4] sm:$0xff] }
 0x33a   : > { %4716 = vst.msk [vmem:[#allocation3 + $0x38] sm:$0xff] %vm18553_vm1, %v4627_v48  ;;  %2903 = vrot.lane.b32.xlu1 %v15250_v63, %s18522_s21  ;;  %2712 = vrot.lane.b32.xlu0 %v15252_v6, %s18554_s23  ;;  %vm18565_vm1 = vcmask 195768  }
 0x33c   : > { %v1939_v47 = vpop.permute.xlu1 %1938  ;;  %v1748_v57 = vpop.permute.xlu0 %1747 }
 0x33d   : > { %2021 = vst.msk [vmem:[#allocation3 + $0x70] sm:$0xff] %vm18555_vm0, %v1939_v47 }
 0x33e   : > { %1829 = vst.msk [vmem:[#allocation3 + $0x78] sm:$0xff] %vm18556_vm10, %v1748_v57  ;;  %3671 = vrot.lane.b32.xlu1 %v15203_v1, %s18557_s29  ;;  %3480 = vrot.lane.b32.xlu0 %v15194_v42, %s18558_s12  ;;  %vm18561_vm10 = vcmask 138368  }
 0x340   : > { %v2707_v43 = vpop.permute.xlu1 %2706  ;;  %v2516_v10 = vpop.permute.xlu0 %2515 }
 0x341   : > { %2791 = vst.msk [vmem:[#allocation3 + $0x60] sm:$0xff] %vm2778_vm12, %v2707_v43 }
 0x342   : > { %2599 = vst.msk [vmem:[#allocation3 + $0x68] sm:$0xff] %vm2585_vm11, %v2516_v10  ;;  %4439 = vrot.lane.b32.xlu1 %v15156_v34, %s18559_s13  ;;  %4248 = vrot.lane.b32.xlu0 %v15148_v32, %s18560_s19  ;;  %v15348_v34 = vadd.s32 48, %v14781_v19  ;;  %v15456_v10 = vld [vmem:[#allocation2 + $0xaa] sm:$0xff] }
 0x344   : > { %v3475_v36 = vpop.permute.xlu1 %3474  ;;  %v3284_v35 = vpop.permute.xlu0 %3283  ;;  %v5206_v54 = vand.u32 15, %v15348_v34 }
 0x345   : > { %3561 = vst.msk [vmem:[#allocation3 + $0x50] sm:$0xff] %vm18561_vm10, %v3475_v36 }
 0x346   : > { %3369 = vst.msk [vmem:[#allocation3 + $0x58] sm:$0xff] %vm3357_vm15, %v3284_v35  ;;  %1369 = vrot.lane.b32.xlu1 %v15337_v9, %s18489_s14  ;;  %5016 = vrot.lane.b32.xlu0 %v15112_v13, %s18547_s17  ;;  %vm15370_vm0 = vcmp.ge.s32.totalorder %v5206_v54, %v14790_v2  ;;  %vm15375_vm10 = vcmp.lt.s32.totalorder %v5206_v54, %v14792_v28 }
 0x348   : > { %v4243_v32 = vpop.permute.xlu1 %4242  ;;  %v4052_v21 = vpop.permute.xlu0 %4051 }
 0x349   : > { %4331 = vst.msk [vmem:[#allocation3 + $0x40] sm:$0xff] %vm4322_vm4, %v4243_v32 }
 0x34a   : > { %4139 = vst.msk [vmem:[#allocation3 + $0x48] sm:$0xff] %vm18562_vm2, %v4052_v21  ;;  %2137 = vrot.lane.b32.xlu1 %v15286_v38, %s18443_s20  ;;  %1560 = vrot.lane.b32.xlu0 %v15345_v22, %s18563_s0  ;;  %vm18570_vm2 = vcmask 39968  }
 0x34c   : > { %v5011_v13 = vpop.permute.xlu1 %5010  ;;  %v4820_v25 = vpop.permute.xlu0 %4819 }
 0x34d   : > { %5101 = vst.msk [vmem:[#allocation3 + $0x30] sm:$0xff] %vm18564_vm7, %v5011_v13  ;;  %vm5634_vm7 = vmand %vm15370_vm0, %vm15375_vm10  ;;  %vm18575_vm0 = vcmask 138368   ;;  %vm18576_vm10 = vcmask 203968  }
 0x34e   : > { %4909 = vst.msk [vmem:[#allocation3 + $0x38] sm:$0xff] %vm18565_vm1, %v4820_v25  ;;  %v12735_v45 = vpop.f32.mrb[0].mxu1  ;;  %2905 = vrot.lane.b32.xlu1 %v15300_v33, %s18522_s21  ;;  %2328 = vrot.lane.b32.xlu0 %v15284_v24, %s18528_s26  ;;  %vm18571_vm1 = vcmask 130048  }
 0x34f   : > { %v5828_v60 = vadd.f32 %v12735_v45, %v15360_v31  ;;  %v5822_v50 = vpop.f32.mrb[1].mxu1  ;;  %vm18572_vm14 = vmmov %vm18571_vm1 }
 0x350   : > { %v5823_v49 = vadd.f32 %v15360_v31, %v5822_v50  ;;  %v1364_v30 = vpop.permute.xlu1 %1363  ;;  %v1173_v4 = vpop.permute.xlu0 %1172  ;;  %v15488_v50 = vld [vmem:[#allocation2 + $0xb0] sm:$0xff] }
 0x351   : > { %v5902_v62 = vmax.f32 %v5828_v60, 0.0  ;;  %1444 = vst.msk [vmem:[#allocation3 + $0x80] sm:$0xff] %vm1427_vm5, %v1364_v30 }
 0x352   : > { %1252 = vst.msk [vmem:[#allocation3 + $0x88] sm:$0xff] %vm18570_vm2, %v1173_v4  ;;  %v5901_v12 = vmax.f32 %v5823_v49, 0.0  ;;  %3673 = vrot.lane.b32.xlu1 %v15252_v6, %s18557_s29  ;;  %3096 = vrot.lane.b32.xlu0 %v15241_v56, %s18470_s16  ;;  %vm18573_vm2 = vcmask 72768  }
 0x353   : > { %5919 = vst.msk [vmem:[#allocation4 + $0x8] sm:$0xff] %vm18571_vm1, %v5902_v62 }
 0x354   : > { %5918 = vst.msk [vmem:[#allocation4] sm:$0xff] %vm18572_vm14, %v5901_v12  ;;  %v2132_v61 = vpop.permute.xlu1 %2131  ;;  %v1941_v8 = vpop.permute.xlu0 %1940  ;;  %v5666_v52 = vld [vmem:[#allocation3 + $0x30] sm:$0xff]  ;;  %vm18574_vm14 = vcmask 146568  }
 0x355   : > { %2214 = vst.msk [vmem:[#allocation3 + $0x70] sm:$0xff] %vm2199_vm9, %v2132_v61  ;;  %v5682_v15 = vsel %vm5634_vm7, %v5666_v52, 0.0  ;;  %v15524_v52 = vld [vmem:[#allocation2 + $0xb8] sm:$0xff] }
 0x356   : > { %2022 = vst.msk [vmem:[#allocation3 + $0x78] sm:$0xff] %vm18573_vm2, %v1941_v8  ;;  %4441 = vrot.lane.b32.xlu1 %v15194_v42, %s18559_s13  ;;  %3864 = vrot.lane.b32.xlu0 %v15250_v63, %s18534_s30  ;;  %v15407_v42 = vld [vmem:[#allocation2 + $0xa2] sm:$0xff]  ;;  %vm18579_vm2 = vcmask 56368  }
 0x357   : > { %12742 = vmatprep.mubr.msk.f32.mxu1 %vm5703_vm3, %v5682_v15 }
 0x358   : > { %v2900_v37 = vpop.permute.xlu1 %2899  ;;  %v2709_v27 = vpop.permute.xlu0 %2708 }
 0x359   : > { %2984 = vst.msk [vmem:[#allocation3 + $0x60] sm:$0xff] %vm2971_vm13, %v2900_v37 }
 0x35a   : > { %2792 = vst.msk [vmem:[#allocation3 + $0x68] sm:$0xff] %vm2778_vm12, %v2709_v27  ;;  %1562 = vrot.lane.b32.xlu1 %v15399_v7, %s18563_s0  ;;  %4632 = vrot.lane.b32.xlu0 %v15203_v1, %s18504_s24  ;;  %v5213_v1 = vand.u32 15, %v15416_v41  ;;  %v15532_v27 = vld [vmem:[#allocation2 + $0xb1] sm:$0xff] }
 0x35c   : > { %v3668_v5 = vpop.permute.xlu1 %3667  ;;  %v3477_v23 = vpop.permute.xlu0 %3476  ;;  %vm15432_vm7 = vcmp.ge.s32.totalorder %v5213_v1, %v14790_v2  ;;  %vm5603_vm1 = vcmp.lt.s32.totalorder %v5213_v1, %v14792_v28 }
 0x35d   : > { %3754 = vst.msk [vmem:[#allocation3 + $0x50] sm:$0xff] %vm18574_vm14, %v3668_v5  ;;  %vm5635_vm14 = vmand %vm15432_vm7, %vm5603_vm1  ;;  %vm18582_vm7 = vcmask 121968   ;;  %vm18584_vm1 = vcmask 154768  }
 0x35e   : > { %3562 = vst.msk [vmem:[#allocation3 + $0x58] sm:$0xff] %vm18575_vm0, %v3477_v23  ;;  %2330 = vrot.lane.b32.xlu1 %v15337_v9, %s18528_s26  ;;  %1753 = vrot.lane.b32.xlu0 %v15407_v42, %s18461_s15  ;;  %vm18580_vm0 = vcmask 89168  }
 0x360   : > { %v4436_v29 = vpop.permute.xlu1 %4435  ;;  %v4245_v55 = vpop.permute.xlu0 %4244 }
 0x361   : > { %4524 = vst.msk [vmem:[#allocation3 + $0x40] sm:$0xff] %vm4515_vm8, %v4436_v29 }
 0x362   : > { %4332 = vst.msk [vmem:[#allocation3 + $0x48] sm:$0xff] %vm4322_vm4, %v4245_v55  ;;  %3098 = vrot.lane.b32.xlu1 %v15286_v38, %s18470_s16  ;;  %2521 = vrot.lane.b32.xlu0 %v15345_v22, %s18462_s10 }
 0x364   : > { %v1366_v16 = vpop.permute.xlu1 %1365  ;;  %v5013_v18 = vpop.permute.xlu0 %5012 }
 0x365   : > { %1445 = vst.msk [vmem:[#allocation3 + $0x88] sm:$0xff] %vm1427_vm5, %v1366_v16 }
 0x366   : > { %5102 = vst.msk [vmem:[#allocation3 + $0x38] sm:$0xff] %vm18576_vm10, %v5013_v18  ;;  %3866 = vrot.lane.b32.xlu1 %v15300_v33, %s18534_s30  ;;  %3289 = vrot.lane.b32.xlu0 %v15284_v24, %s18463_s18  ;;  %vm18581_vm10 = vcmask 146568  }
 0x368   : > { %v2134_v44 = vpop.permute.xlu1 %2133  ;;  %v1557_v17 = vpop.permute.xlu0 %1556 }
 0x369   : > { %2215 = vst.msk [vmem:[#allocation3 + $0x78] sm:$0xff] %vm2199_vm9, %v2134_v44 }
 0x36a   : > { %1637 = vst.msk [vmem:[#allocation3 + $0x80] sm:$0xff] %vm18579_vm2, %v1557_v17  ;;  %4634 = vrot.lane.b32.xlu1 %v15252_v6, %s18504_s24  ;;  %4057 = vrot.lane.b32.xlu0 %v15241_v56, %s18464_s22  ;;  %v15454_v6 = vld [vmem:[#allocation2 + $0xa3] sm:$0xff] }
 0x36c   : > { %v2902_v48 = vpop.permute.xlu1 %2901  ;;  %v2325_v47 = vpop.permute.xlu0 %2324 }
 0x36d   : > { %v5667_v57 = vld [vmem:[#allocation3 + $0x38] sm:$0xff]  ;;  %2985 = vst.msk [vmem:[#allocation3 + $0x68] sm:$0xff] %vm2971_vm13, %v2902_v48 }
 0x36e   : > { %2407 = vst.msk [vmem:[#allocation3 + $0x70] sm:$0xff] %vm18580_vm0, %v2325_v47  ;;  %v5683_v43 = vsel %vm5635_vm14, %v5667_v57, 0.0  ;;  %1178 = vrot.lane.b32.xlu1 %v15445_v46, %s18519_s9  ;;  %4825 = vrot.lane.b32.xlu0 %v15250_v63, %s18466_s25  ;;  %vm18585_vm14 = vcmask 187568  }
 0x36f   : > { %12743 = vmatmul.mubr.msk.f32.gmra.mrb[6].mxu1 %vm5703_vm3, %v5683_v43 }
 0x370   : > { %v3670_v36 = vpop.permute.xlu1 %3669  ;;  %v3093_v35 = vpop.permute.xlu0 %3092 }
 0x371   : > { %3755 = vst.msk [vmem:[#allocation3 + $0x58] sm:$0xff] %vm18581_vm10, %v3670_v36  ;;  %vm18586_vm10 = vcmask 64568  }
 0x372   : > { %3177 = vst.msk [vmem:[#allocation3 + $0x60] sm:$0xff] %vm18582_vm7, %v3093_v35  ;;  %1946 = vrot.lane.b32.xlu1 %v15454_v6, %s18583_s8  ;;  %1755 = vrot.lane.b32.xlu0 %v15456_v10, %s18461_s15 }
 0x374   : > { %v4438_v32 = vpop.permute.xlu1 %4437  ;;  %v3861_v63 = vpop.permute.xlu0 %3860 }
 0x375   : > { %4525 = vst.msk [vmem:[#allocation3 + $0x48] sm:$0xff] %vm4515_vm8, %v4438_v32  ;;  %v6219_v32 = vld [vmem:[#allocation4] ss:$2 sm:$0xff] }
 0x376   : > { %3947 = vst.msk [vmem:[#allocation3 + $0x50] sm:$0xff] %vm18584_vm1, %v3861_v63  ;;  %2714 = vrot.lane.b32.xlu1 %v15407_v42, %s18554_s23  ;;  %2523 = vrot.lane.b32.xlu0 %v15399_v7, %s18462_s10  ;;  %v6221_v63 = vld [vmem:[#allocation4 + $0x1] ss:$2 sm:$0xff] }
 0x378   : > { %v1559_v21 = vpop.permute.xlu1 %1558  ;;  %v4629_v54 = vpop.permute.xlu0 %4628 }
 0x379   : > { %1638 = vst.msk [vmem:[#allocation3 + $0x88] sm:$0xff] %vm18579_vm2, %v1559_v21  ;;  %vm18587_vm2 = vmmov %vm18585_vm14 }
 0x37a   : > { %4717 = vst.msk [vmem:[#allocation3 + $0x40] sm:$0xff] %vm18585_vm14, %v4629_v54  ;;  %3482 = vrot.lane.b32.xlu1 %v15345_v22, %s18558_s12  ;;  %3291 = vrot.lane.b32.xlu0 %v15337_v9, %s18463_s18  ;;  %vm18588_vm14 = vcmask 162968  }
 0x37c   : > { %v2327_v13 = vpop.permute.xlu1 %2326  ;;  %v1750_v25 = vpop.permute.xlu0 %1749 }
 0x37d   : > { %2408 = vst.msk [vmem:[#allocation3 + $0x78] sm:$0xff] %vm18580_vm0, %v2327_v13  ;;  %vm18589_vm0 = vcmask 39968  }
 0x37e   : > { %1830 = vst.msk [vmem:[#allocation3 + $0x80] sm:$0xff] %vm18586_vm10, %v1750_v25  ;;  %4250 = vrot.lane.b32.xlu1 %v15284_v24, %s18560_s19  ;;  %4059 = vrot.lane.b32.xlu0 %v15286_v38, %s18464_s22  ;;  %vm18590_vm10 = vcmask 195768   ;;  %v15578_v25 = vld [vmem:[#allocation2 + $0xb9] sm:$0xff] }
 0x380   : > { %v3095_v45 = vpop.permute.xlu1 %3094  ;;  %v2518_v60 = vpop.permute.xlu0 %2517 }
 0x381   : > { %3178 = vst.msk [vmem:[#allocation3 + $0x68] sm:$0xff] %vm18582_vm7, %v3095_v45  ;;  %vm18591_vm7 = vcmask 72768   ;;  %v6226_v45 = vmax.f32 %v6219_v32, %v6221_v63  ;;  %v15674_v32 = vld [vmem:[#allocation2 + $0xbc] sm:$0xff] }
 0x382   : > { %2600 = vst.msk [vmem:[#allocation3 + $0x70] sm:$0xff] %vm2585_vm11, %v2518_v60  ;;  %5018 = vrot.lane.b32.xlu1 %v15241_v56, %s18547_s17  ;;  %4827 = vrot.lane.b32.xlu0 %v15300_v33, %s18466_s25  ;;  %v15498_v56 = vld [vmem:[#allocation2 + $0xab] sm:$0xff] }
 0x384   : > { %v3863_v24 = vpop.permute.xlu1 %3862  ;;  %v3286_v58 = vpop.permute.xlu0 %3285 }
 0x385   : > { %3948 = vst.msk [vmem:[#allocation3 + $0x58] sm:$0xff] %vm18584_vm1, %v3863_v24  ;;  %vm18592_vm1 = vcmask 64568  }
 0x386   : > { %3370 = vst.msk [vmem:[#allocation3 + $0x60] sm:$0xff] %vm3357_vm15, %v3286_v58  ;;  %1371 = vrot.lane.b32.xlu1 %v15488_v50, %s18489_s14  ;;  %1180 = vrot.lane.b32.xlu0 %v15490_v3, %s18519_s9 }
 0x388   : > { %v4631_v49 = vpop.permute.xlu1 %4630  ;;  %v4054_v33 = vpop.permute.xlu0 %4053 }
 0x389   : > { %4718 = vst.msk [vmem:[#allocation3 + $0x48] sm:$0xff] %vm18587_vm2, %v4631_v49  ;;  %vm18593_vm2 = vcmask 138368  }
 0x38a   : > { %4140 = vst.msk [vmem:[#allocation3 + $0x50] sm:$0xff] %vm18588_vm14, %v4054_v33  ;;  %2139 = vrot.lane.b32.xlu1 %v15445_v46, %s18443_s20  ;;  %1948 = vrot.lane.b32.xlu0 %v15498_v56, %s18583_s8 }
 0x38c   : > { %v1175_v30 = vpop.permute.xlu1 %1174  ;;  %v4822_v4 = vpop.permute.xlu0 %4821 }
 0x38d   : > { %1253 = vst.msk [vmem:[#allocation3 + $0x90] sm:$0xff] %vm18589_vm0, %v1175_v30  ;;  %vm18594_vm0 = vcmask 203968  }
 0x38e   : > { %4910 = vst.msk [vmem:[#allocation3 + $0x40] sm:$0xff] %vm18590_vm10, %v4822_v4  ;;  %2907 = vrot.lane.b32.xlu1 %v15454_v6, %s18522_s21  ;;  %2716 = vrot.lane.b32.xlu0 %v15456_v10, %s18554_s23  ;;  %v15590_v4 = vand.u32 7, %v14838_v51 }
 0x390   : > { %v1943_v62 = vpop.permute.xlu1 %1942  ;;  %v1752_v12 = vpop.permute.xlu0 %1751 }
 0x391   : > { %2023 = vst.msk [vmem:[#allocation3 + $0x80] sm:$0xff] %vm18591_vm7, %v1943_v62  ;;  %vm18595_vm7 = vcmask 130048  }
 0x392   : > { %1831 = vst.msk [vmem:[#allocation3 + $0x88] sm:$0xff] %vm18592_vm1, %v1752_v12  ;;  %3675 = vrot.lane.b32.xlu1 %v15407_v42, %s18557_s29  ;;  %3484 = vrot.lane.b32.xlu0 %v15399_v7, %s18558_s12 }
 0x394   : > { %v2711_v61 = vpop.permute.xlu1 %2710  ;;  %v2520_v8 = vpop.permute.xlu0 %2519 }
 0x395   : > { %2793 = vst.msk [vmem:[#allocation3 + $0x70] sm:$0xff] %vm2778_vm12, %v2711_v61 }
 0x396   : > { %2601 = vst.msk [vmem:[#allocation3 + $0x78] sm:$0xff] %vm2585_vm11, %v2520_v8  ;;  %4443 = vrot.lane.b32.xlu1 %v15345_v22, %s18559_s13  ;;  %4252 = vrot.lane.b32.xlu0 %v15337_v9, %s18560_s19  ;;  %v5136_v22 = vadd.s32 64, %v14781_v19 }
 0x398   : > { %v3479_v15 = vpop.permute.xlu1 %3478  ;;  %v3288_v37 = vpop.permute.xlu0 %3287  ;;  %v5220_v55 = vand.u32 15, %v5136_v22 }
 0x399   : > { %3563 = vst.msk [vmem:[#allocation3 + $0x60] sm:$0xff] %vm18593_vm2, %v3479_v15 }
 0x39a   : > { %3371 = vst.msk [vmem:[#allocation3 + $0x68] sm:$0xff] %vm3357_vm15, %v3288_v37  ;;  %1373 = vrot.lane.b32.xlu1 %v15524_v52, %s18489_s14  ;;  %5020 = vrot.lane.b32.xlu0 %v15286_v38, %s18547_s17  ;;  %vm15551_vm1 = vcmp.ge.s32.totalorder %v5220_v55, %v14790_v2  ;;  %vm15556_vm2 = vcmp.lt.s32.totalorder %v5220_v55, %v14792_v28 }
 0x39c   : > { %v4247_v5 = vpop.permute.xlu1 %4246  ;;  %v4056_v9 = vpop.permute.xlu0 %4055 }
 0x39d   : > { %4333 = vst.msk [vmem:[#allocation3 + $0x50] sm:$0xff] %vm4322_vm4, %v4247_v5 }
 0x39e   : > { %4141 = vst.msk [vmem:[#allocation3 + $0x58] sm:$0xff] %vm18588_vm14, %v4056_v9  ;;  %v12738_v23 = vpop.f32.mrb[2].mxu1  ;;  %2141 = vrot.lane.b32.xlu1 %v15490_v3, %s18443_s20  ;;  %1564 = vrot.lane.b32.xlu0 %v15532_v27, %s18563_s0  ;;  %vm18600_vm14 = vmmov %vm18595_vm7 }
 0x39f   : > { %v5838_v29 = vadd.f32 %v12738_v23, %v15360_v31  ;;  %v5832_v38 = vpop.f32.mrb[3].mxu1  ;;  %v15629_v23 = vld [vmem:[#allocation2 + $0xb4] sm:$0xff] }
 0x3a0   : > { %v5833_v1 = vadd.f32 %v15360_v31, %v5832_v38  ;;  %v5015_v16 = vpop.permute.xlu1 %5014  ;;  %v4824_v18 = vpop.permute.xlu0 %4823 }
 0x3a1   : > { %v5904_v40 = vmax.f32 %v5838_v29, 0.0  ;;  %5103 = vst.msk [vmem:[#allocation3 + $0x40] sm:$0xff] %vm18594_vm0, %v5015_v16  ;;  %vm18601_vm0 = vcmask 39968   ;;  %v15640_v16 = vld [vmem:[#allocation2 + $0xba] sm:$0xff] }
 0x3a2   : > { %4911 = vst.msk [vmem:[#allocation3 + $0x48] sm:$0xff] %vm18590_vm10, %v4824_v18  ;;  %v5903_v44 = vmax.f32 %v5833_v1, 0.0  ;;  %2909 = vrot.lane.b32.xlu1 %v15498_v56, %s18522_s21  ;;  %2332 = vrot.lane.b32.xlu0 %v15488_v50, %s18528_s26  ;;  %vm5636_vm10 = vmand %vm15551_vm1, %vm15556_vm2  ;;  %vm18604_vm2 = vcmask 146568  }
 0x3a3   : > { %5921 = vst.msk [vmem:[#allocation4 + $0x18] sm:$0xff] %vm18595_vm7, %v5904_v40  ;;  %vm18602_vm7 = vcmask 72768   ;;  %vm18603_vm1 = vmmov %vm18600_vm14 }
 0x3a4   : > { %5920 = vst.msk [vmem:[#allocation4 + $0x10] sm:$0xff] %vm18600_vm14, %v5903_v44  ;;  %v1368_v47 = vpop.permute.xlu1 %1367  ;;  %v1177_v57 = vpop.permute.xlu0 %1176  ;;  %vm18605_vm14 = vcmask 138368  }
 0x3a5   : > { %1446 = vst.msk [vmem:[#allocation3 + $0x90] sm:$0xff] %vm1427_vm5, %v1368_v47 }
 0x3a6   : > { %1254 = vst.msk [vmem:[#allocation3 + $0x98] sm:$0xff] %vm18601_vm0, %v1177_v57  ;;  %3677 = vrot.lane.b32.xlu1 %v15456_v10, %s18557_s29  ;;  %3100 = vrot.lane.b32.xlu0 %v15445_v46, %s18470_s16  ;;  %vm18442_vm0 = vcmp.ge.s32.totalorder %v15590_v4, 1 }
 0x3a8   : > { %v2136_v43 = vpop.permute.xlu1 %2135  ;;  %v1945_v36 = vpop.permute.xlu0 %1944  ;;  %v5668_v35 = vld [vmem:[#allocation3 + $0x40] sm:$0xff] }
 0x3a9   : > { %2216 = vst.msk [vmem:[#allocation3 + $0x80] sm:$0xff] %vm2199_vm9, %v2136_v43  ;;  %v5684_v21 = vsel %vm5636_vm10, %v5668_v35, 0.0  ;;  %vm18606_vm10 = vmmov %vm18603_vm1  ;;  %v15672_v35 = vld [vmem:[#allocation2 + $0xc0] sm:$0xff] }
 0x3aa   : > { %2024 = vst.msk [vmem:[#allocation3 + $0x88] sm:$0xff] %vm18602_vm7, %v1945_v36  ;;  %4445 = vrot.lane.b32.xlu1 %v15399_v7, %s18559_s13  ;;  %3868 = vrot.lane.b32.xlu0 %v15454_v6, %s18534_s30  ;;  %v15586_v7 = vld [vmem:[#allocation2 + $0xb2] sm:$0xff]  ;;  %vm18607_vm7 = vcmask 203968  }
 0x3ab   : > { %v6223_v54 = vld [vmem:[#allocation4 + $0x10] ss:$2 sm:$0xff]  ;;  %v6225_v13 = vld [vmem:[#allocation4 + $0x11] ss:$2 sm:$0xff]  ;;  %12745 = vmatprep.mubr.msk.f32.mxu1 %vm5703_vm3, %v5684_v21 }
 0x3ac   : > { %v6227_v60 = vmax.f32 %v6223_v54, %v6225_v13  ;;  %v2904_v24 = vpop.permute.xlu1 %2903  ;;  %v2713_v58 = vpop.permute.xlu0 %2712 }
 0x3ad   : > { %2986 = vst.msk [vmem:[#allocation3 + $0x70] sm:$0xff] %vm2971_vm13, %v2904_v24 }
 0x3ae   : > { %2794 = vst.msk [vmem:[#allocation3 + $0x78] sm:$0xff] %vm2778_vm12, %v2713_v58  ;;  %v6228_v49 = vmax.f32 %v6226_v45, %v6227_v60  ;;  %1566 = vrot.lane.b32.xlu1 %v15578_v25, %s18563_s0  ;;  %4636 = vrot.lane.b32.xlu0 %v15407_v42, %s18504_s24  ;;  %v5137_v42 = vadd.s32 72, %v14781_v19 }
 0x3b0   : > { %6229 = vst.msk [vmem:[#allocation5 + $0x12] sm:$0xff] %vm18603_vm1, %v6228_v49  ;;  %v3672_v33 = vpop.permute.xlu1 %3671  ;;  %v3481_v30 = vpop.permute.xlu0 %3480  ;;  %v5227_v61 = vand.u32 15, %v5137_v42  ;;  %v15708_v49 = vld [vmem:[#allocation2 + $0xc8] sm:$0xff] }
 0x3b1   : > { %3756 = vst.msk [vmem:[#allocation3 + $0x60] sm:$0xff] %vm18604_vm2, %v3672_v33 }
 0x3b2   : > { %3564 = vst.msk [vmem:[#allocation3 + $0x68] sm:$0xff] %vm18605_vm14, %v3481_v30  ;;  %2334 = vrot.lane.b32.xlu1 %v15524_v52, %s18528_s26  ;;  %1757 = vrot.lane.b32.xlu0 %v15586_v7, %s18461_s15  ;;  %vm15616_vm1 = vcmp.ge.s32.totalorder %v5227_v61, %v14790_v2  ;;  %vm5605_vm2 = vcmp.lt.s32.totalorder %v5227_v61, %v14792_v28  ;;  %vm18610_vm14 = vcmask 56368  }
 0x3b4   : > { %v4440_v62 = vpop.permute.xlu1 %4439  ;;  %v4249_v12 = vpop.permute.xlu0 %4248 }
 0x3b5   : > { %4526 = vst.msk [vmem:[#allocation3 + $0x50] sm:$0xff] %vm4515_vm8, %v4440_v62 }
 0x3b6   : > { %4334 = vst.msk [vmem:[#allocation3 + $0x58] sm:$0xff] %vm4322_vm4, %v4249_v12  ;;  %3102 = vrot.lane.b32.xlu1 %v15490_v3, %s18470_s16  ;;  %2525 = vrot.lane.b32.xlu0 %v15532_v27, %s18462_s10  ;;  %v15717_v12 = vld [vmem:[#allocation2 + $0xc1] sm:$0xff] }
 0x3b7   : > { %v7398_v51 = vld [vmem:[#allocation5 + $0x11] sm:$0xff] }
 0x3b8   : > { %v1370_v8 = vpop.permute.xlu1 %1369  ;;  %v7406_v15 = vsel %vm18442_vm0, %v7398_v51, 0.0  ;;  %v5017_v37 = vpop.permute.xlu0 %5016 }
 0x3b9   : > { %1447 = vst.msk [vmem:[#allocation3 + $0x98] sm:$0xff] %vm1427_vm5, %v1370_v8  ;;  %12890 = vmatmul.mubr.msk.f32.vlgmr.msra.gmra.mrb[0].mxu0 %vm18606_vm10, %v7406_v15  ;;  %vm5637_vm10 = vmand %vm15616_vm1, %vm5605_vm2  ;;  %vm18612_vm1 = vcmask 146568   ;;  %vm18613_vm2 = vcmask 121968  }
 0x3ba   : > { %5104 = vst.msk [vmem:[#allocation3 + $0x48] sm:$0xff] %vm18607_vm7, %v5017_v37  ;;  %3870 = vrot.lane.b32.xlu1 %v15498_v56, %s18534_s30  ;;  %3293 = vrot.lane.b32.xlu0 %v15488_v50, %s18463_s18  ;;  %vm18611_vm7 = vcmask 89168  }
 0x3bc   : > { %v2138_v5 = vpop.permute.xlu1 %2137  ;;  %v1561_v9 = vpop.permute.xlu0 %1560 }
 0x3bd   : > { %2217 = vst.msk [vmem:[#allocation3 + $0x88] sm:$0xff] %vm2199_vm9, %v2138_v5 }
 0x3be   : > { %1639 = vst.msk [vmem:[#allocation3 + $0x90] sm:$0xff] %vm18610_vm14, %v1561_v9  ;;  %4638 = vrot.lane.b32.xlu1 %v15456_v10, %s18504_s24  ;;  %4061 = vrot.lane.b32.xlu0 %v15445_v46, %s18464_s22  ;;  %v15638_v10 = vld [vmem:[#allocation2 + $0xb3] sm:$0xff]  ;;  %vm18614_vm14 = vcmask 154768  }
 0x3c0   : > { %v2906_v29 = vpop.permute.xlu1 %2905  ;;  %v2329_v38 = vpop.permute.xlu0 %2328 }
 0x3c1   : > { %v5669_v55 = vld [vmem:[#allocation3 + $0x48] sm:$0xff]  ;;  %2987 = vst.msk [vmem:[#allocation3 + $0x78] sm:$0xff] %vm2971_vm13, %v2906_v29 }
 0x3c2   : > { %2409 = vst.msk [vmem:[#allocation3 + $0x80] sm:$0xff] %vm18611_vm7, %v2329_v38  ;;  %v5685_v1 = vsel %vm5637_vm10, %v5669_v55, 0.0  ;;  %1182 = vrot.lane.b32.xlu1 %v15629_v23, %s18519_s9  ;;  %4829 = vrot.lane.b32.xlu0 %v15454_v6, %s18466_s25  ;;  %vm18615_vm10 = vcmask 56368   ;;  %vm18616_vm7 = vcmask 187568  }
 0x3c3   : > { %12746 = vmatmul.mubr.msk.f32.gmra.mrb[8].mxu1 %vm5703_vm3, %v5685_v1 }
 0x3c4   : > { %v3674_v18 = vpop.permute.xlu1 %3673  ;;  %v3097_v40 = vpop.permute.xlu0 %3096 }
 0x3c5   : > { %3757 = vst.msk [vmem:[#allocation3 + $0x68] sm:$0xff] %vm18612_vm1, %v3674_v18  ;;  %vm18617_vm1 = vcmask 89168  }
 0x3c6   : > { %3179 = vst.msk [vmem:[#allocation3 + $0x70] sm:$0xff] %vm18613_vm2, %v3097_v40  ;;  %1950 = vrot.lane.b32.xlu1 %v15638_v10, %s18583_s8  ;;  %1759 = vrot.lane.b32.xlu0 %v15640_v16, %s18461_s15  ;;  %vm18618_vm2 = vcmask 64568   ;;  %v15750_v40 = vld [vmem:[#allocation2 + $0xc9] sm:$0xff] }
 0x3c8   : > { %v4442_v44 = vpop.permute.xlu1 %4441  ;;  %v3865_v6 = vpop.permute.xlu0 %3864 }
 0x3c9   : > { %4527 = vst.msk [vmem:[#allocation3 + $0x58] sm:$0xff] %vm4515_vm8, %v4442_v44 }
 0x3ca   : > { %3949 = vst.msk [vmem:[#allocation3 + $0x60] sm:$0xff] %vm18614_vm14, %v3865_v6  ;;  %2718 = vrot.lane.b32.xlu1 %v15586_v7, %s18554_s23  ;;  %2527 = vrot.lane.b32.xlu0 %v15578_v25, %s18462_s10  ;;  %vm18619_vm14 = vcmask 121968  }
 0x3cc   : > { %v1563_v17 = vpop.permute.xlu1 %1562  ;;  %v4633_v48 = vpop.permute.xlu0 %4632 }
 0x3cd   : > { %1640 = vst.msk [vmem:[#allocation3 + $0x98] sm:$0xff] %vm18615_vm10, %v1563_v17  ;;  %vm18620_vm10 = vcmask 154768  }
 0x3ce   : > { %4719 = vst.msk [vmem:[#allocation3 + $0x50] sm:$0xff] %vm18616_vm7, %v4633_v48  ;;  %3486 = vrot.lane.b32.xlu1 %v15532_v27, %s18558_s12  ;;  %3295 = vrot.lane.b32.xlu0 %v15524_v52, %s18463_s18 }
 0x3d0   : > { %v2331_v47 = vpop.permute.xlu1 %2330  ;;  %v1754_v57 = vpop.permute.xlu0 %1753 }
 0x3d1   : > { %2410 = vst.msk [vmem:[#allocation3 + $0x88] sm:$0xff] %vm18617_vm1, %v2331_v47  ;;  %vm18621_vm1 = vcmask 162968   ;;  %v5139_v47 = vadd.s32 88, %v14781_v19 }
 0x3d2   : > { %1832 = vst.msk [vmem:[#allocation3 + $0x90] sm:$0xff] %vm18618_vm2, %v1754_v57  ;;  %4254 = vrot.lane.b32.xlu1 %v15488_v50, %s18560_s19  ;;  %4063 = vrot.lane.b32.xlu0 %v15490_v3, %s18464_s22  ;;  %vm18622_vm2 = vcmask 39968  }
 0x3d4   : > { %v3099_v43 = vpop.permute.xlu1 %3098  ;;  %v2522_v36 = vpop.permute.xlu0 %2521 }
 0x3d5   : > { %3180 = vst.msk [vmem:[#allocation3 + $0x78] sm:$0xff] %vm18619_vm14, %v3099_v43  ;;  %vm18623_vm14 = vcmask 195768  }
 0x3d6   : > { %2602 = vst.msk [vmem:[#allocation3 + $0x80] sm:$0xff] %vm2585_vm11, %v2522_v36  ;;  %5022 = vrot.lane.b32.xlu1 %v15445_v46, %s18547_s17  ;;  %4831 = vrot.lane.b32.xlu0 %v15498_v56, %s18466_s25  ;;  %v15682_v46 = vld [vmem:[#allocation2 + $0xbb] sm:$0xff] }
 0x3d8   : > { %v3867_v50 = vpop.permute.xlu1 %3866  ;;  %v3290_v63 = vpop.permute.xlu0 %3289 }
 0x3d9   : > { %3950 = vst.msk [vmem:[#allocation3 + $0x68] sm:$0xff] %vm18620_vm10, %v3867_v50  ;;  %vm18624_vm10 = vcmask 72768  }
 0x3da   : > { %3372 = vst.msk [vmem:[#allocation3 + $0x70] sm:$0xff] %vm3357_vm15, %v3290_v63  ;;  %1375 = vrot.lane.b32.xlu1 %v15672_v35, %s18489_s14  ;;  %1184 = vrot.lane.b32.xlu0 %v15674_v32, %s18519_s9 }
 0x3dc   : > { %v4635_v21 = vpop.permute.xlu1 %4634  ;;  %v4058_v56 = vpop.permute.xlu0 %4057 }
 0x3dd   : > { %4720 = vst.msk [vmem:[#allocation3 + $0x58] sm:$0xff] %vm18616_vm7, %v4635_v21  ;;  %vm18625_vm7 = vcmask 64568  }
 0x3de   : > { %4142 = vst.msk [vmem:[#allocation3 + $0x60] sm:$0xff] %vm18621_vm1, %v4058_v56  ;;  %2143 = vrot.lane.b32.xlu1 %v15629_v23, %s18443_s20  ;;  %1952 = vrot.lane.b32.xlu0 %v15682_v46, %s18583_s8  ;;  %vm18626_vm1 = vcmask 138368  }
 0x3e0   : > { %v1179_v54 = vpop.permute.xlu1 %1178  ;;  %v4826_v13 = vpop.permute.xlu0 %4825 }
 0x3e1   : > { %1255 = vst.msk [vmem:[#allocation3 + $0xa0] sm:$0xff] %vm18622_vm2, %v1179_v54  ;;  %vm18627_vm2 = vcmask 162968   ;;  %v15793_v54 = vld [vmem:[#allocation2 + $0xc4] sm:$0xff] }
 0x3e2   : > { %4912 = vst.msk [vmem:[#allocation3 + $0x50] sm:$0xff] %vm18623_vm14, %v4826_v13  ;;  %2911 = vrot.lane.b32.xlu1 %v15638_v10, %s18522_s21  ;;  %2720 = vrot.lane.b32.xlu0 %v15640_v16, %s18554_s23  ;;  %vm18628_vm14 = vcmask 130048  }
 0x3e4   : > { %v1947_v45 = vpop.permute.xlu1 %1946  ;;  %v1756_v60 = vpop.permute.xlu0 %1755 }
 0x3e5   : > { %2025 = vst.msk [vmem:[#allocation3 + $0x90] sm:$0xff] %vm18624_vm10, %v1947_v45  ;;  %vm18629_vm10 = vmmov %vm18628_vm14 }
 0x3e6   : > { %1833 = vst.msk [vmem:[#allocation3 + $0x98] sm:$0xff] %vm18625_vm7, %v1756_v60  ;;  %3679 = vrot.lane.b32.xlu1 %v15586_v7, %s18557_s29  ;;  %3488 = vrot.lane.b32.xlu0 %v15578_v25, %s18558_s12  ;;  %vm18630_vm7 = vcmask 203968  }
 0x3e8   : > { %v2715_v24 = vpop.permute.xlu1 %2714  ;;  %v2524_v58 = vpop.permute.xlu0 %2523 }
 0x3e9   : > { %2795 = vst.msk [vmem:[#allocation3 + $0x80] sm:$0xff] %vm2778_vm12, %v2715_v24 }
 0x3ea   : > { %2603 = vst.msk [vmem:[#allocation3 + $0x88] sm:$0xff] %vm2585_vm11, %v2524_v58  ;;  %4447 = vrot.lane.b32.xlu1 %v15532_v27, %s18559_s13  ;;  %4256 = vrot.lane.b32.xlu0 %v15524_v52, %s18560_s19  ;;  %v5138_v52 = vadd.s32 80, %v14781_v19  ;;  %v15804_v58 = vld [vmem:[#allocation2 + $0xca] sm:$0xff] }
 0x3ec   : > { %v3483_v33 = vpop.permute.xlu1 %3482  ;;  %v3292_v30 = vpop.permute.xlu0 %3291 }
 0x3ed   : > { %3565 = vst.msk [vmem:[#allocation3 + $0x70] sm:$0xff] %vm18626_vm1, %v3483_v33  ;;  %vm18631_vm1 = vcmask 195768  }
 0x3ee   : > { %3373 = vst.msk [vmem:[#allocation3 + $0x78] sm:$0xff] %vm3357_vm15, %v3292_v30  ;;  %v12741_v42 = vpop.f32.mrb[4].mxu1  ;;  %1377 = vrot.lane.b32.xlu1 %v15708_v49, %s18489_s14  ;;  %5024 = vrot.lane.b32.xlu0 %v15490_v3, %s18547_s17  ;;  %v5234_v3 = vand.u32 15, %v5138_v52 }
 0x3ef   : > { %v5848_v27 = vadd.f32 %v12741_v42, %v15360_v31  ;;  %v5842_v62 = vpop.f32.mrb[5].mxu1 }
 0x3f0   : > { %v5843_v51 = vadd.f32 %v15360_v31, %v5842_v62  ;;  %v4251_v61 = vpop.permute.xlu1 %4250  ;;  %v4060_v8 = vpop.permute.xlu0 %4059  ;;  %vm5606_vm0 = vcmp.lt.s32.totalorder %v5234_v3, %v14792_v28 }
 0x3f1   : > { %v5906_v15 = vmax.f32 %v5848_v27, 0.0  ;;  %4335 = vst.msk [vmem:[#allocation3 + $0x60] sm:$0xff] %vm4322_vm4, %v4251_v61 }
 0x3f2   : > { %4143 = vst.msk [vmem:[#allocation3 + $0x68] sm:$0xff] %vm18627_vm2, %v4060_v8  ;;  %v5905_v37 = vmax.f32 %v5843_v51, 0.0  ;;  %2145 = vrot.lane.b32.xlu1 %v15674_v32, %s18443_s20  ;;  %1568 = vrot.lane.b32.xlu0 %v15717_v12, %s18563_s0  ;;  %vm5573_vm2 = vcmp.ge.s32.totalorder %v5234_v3, %v14790_v2 }
 0x3f3   : > { %5923 = vst.msk [vmem:[#allocation4 + $0x28] sm:$0xff] %vm18628_vm14, %v5906_v15  ;;  %vm18632_vm14 = vcmask 39968   ;;  %v15836_v15 = vld [vmem:[#allocation2 + $0xd0] sm:$0xff] }
 0x3f4   : > { %5922 = vst.msk [vmem:[#allocation4 + $0x20] sm:$0xff] %vm18629_vm10, %v5905_v37  ;;  %v5019_v22 = vpop.permute.xlu1 %5018  ;;  %v4828_v5 = vpop.permute.xlu0 %4827  ;;  %vm5638_vm10 = vmand %vm5573_vm2, %vm5606_vm0  ;;  %vm18634_vm0 = vcmask 146568   ;;  %vm18636_vm2 = vcmask 203968   ;;  %v15838_v37 = vld [vmem:[#allocation2 + $0xcc] sm:$0xff] }
 0x3f5   : > { %5105 = vst.msk [vmem:[#allocation3 + $0x50] sm:$0xff] %vm18630_vm7, %v5019_v22  ;;  %vm18633_vm7 = vcmask 72768  }
 0x3f6   : > { %4913 = vst.msk [vmem:[#allocation3 + $0x58] sm:$0xff] %vm18631_vm1, %v4828_v5  ;;  %2913 = vrot.lane.b32.xlu1 %v15682_v46, %s18522_s21  ;;  %2336 = vrot.lane.b32.xlu0 %v15672_v35, %s18528_s26  ;;  %vm18635_vm1 = vcmask 138368  }
 0x3f8   : > { %v1372_v9 = vpop.permute.xlu1 %1371  ;;  %v1181_v29 = vpop.permute.xlu0 %1180 }
 0x3f9   : > { %1448 = vst.msk [vmem:[#allocation3 + $0xa0] sm:$0xff] %vm1427_vm5, %v1372_v9 }
 0x3fa   : > { %1256 = vst.msk [vmem:[#allocation3 + $0xa8] sm:$0xff] %vm18632_vm14, %v1181_v29  ;;  %3681 = vrot.lane.b32.xlu1 %v15640_v16, %s18557_s29  ;;  %3104 = vrot.lane.b32.xlu0 %v15629_v23, %s18470_s16 }
 0x3fc   : > { %v2140_v38 = vpop.permute.xlu1 %2139  ;;  %v1949_v55 = vpop.permute.xlu0 %1948  ;;  %v5670_v1 = vld [vmem:[#allocation3 + $0x50] sm:$0xff] }
 0x3fd   : > { %2218 = vst.msk [vmem:[#allocation3 + $0x90] sm:$0xff] %vm2199_vm9, %v2140_v38  ;;  %v5686_v18 = vsel %vm5638_vm10, %v5670_v1, 0.0 }
 0x3fe   : > { %2026 = vst.msk [vmem:[#allocation3 + $0x98] sm:$0xff] %vm18633_vm7, %v1949_v55  ;;  %4449 = vrot.lane.b32.xlu1 %v15578_v25, %s18559_s13  ;;  %3872 = vrot.lane.b32.xlu0 %v15638_v10, %s18534_s30  ;;  %v15758_v25 = vld [vmem:[#allocation2 + $0xc2] sm:$0xff]  ;;  %vm18639_vm7 = vcmask 56368  }
 0x3ff   : > { %12748 = vmatprep.mubr.msk.f32.mxu1 %vm5703_vm3, %v5686_v18  ;;  %v15872_v18 = vld [vmem:[#allocation2 + $0xd8] sm:$0xff] }
 0x400   : > { %v2908_v44 = vpop.permute.xlu1 %2907  ;;  %v2717_v6 = vpop.permute.xlu0 %2716 }
 0x401   : > { %2988 = vst.msk [vmem:[#allocation3 + $0x80] sm:$0xff] %vm2971_vm13, %v2908_v44 }
 0x402   : > { %2796 = vst.msk [vmem:[#allocation3 + $0x88] sm:$0xff] %vm2778_vm12, %v2717_v6  ;;  %1570 = vrot.lane.b32.xlu1 %v15750_v40, %s18563_s0  ;;  %4640 = vrot.lane.b32.xlu0 %v15586_v7, %s18504_s24  ;;  %v5241_v7 = vand.u32 15, %v5139_v47  ;;  %v15881_v47 = vld [vmem:[#allocation2 + $0xd1] sm:$0xff] }
 0x404   : > { %v3676_v17 = vpop.permute.xlu1 %3675  ;;  %v3485_v48 = vpop.permute.xlu0 %3484  ;;  %vm15780_vm14 = vcmp.ge.s32.totalorder %v5241_v7, %v14790_v2  ;;  %vm5607_vm10 = vcmp.lt.s32.totalorder %v5241_v7, %v14792_v28 }
 0x405   : > { %3758 = vst.msk [vmem:[#allocation3 + $0x70] sm:$0xff] %vm18634_vm0, %v3676_v17  ;;  %vm5639_vm0 = vmand %vm15780_vm14, %vm5607_vm10  ;;  %vm18642_vm14 = vcmask 121968   ;;  %vm18643_vm10 = vcmask 154768  }
 0x406   : > { %3566 = vst.msk [vmem:[#allocation3 + $0x78] sm:$0xff] %vm18635_vm1, %v3485_v48  ;;  %2338 = vrot.lane.b32.xlu1 %v15708_v49, %s18528_s26  ;;  %1761 = vrot.lane.b32.xlu0 %v15758_v25, %s18461_s15  ;;  %vm18640_vm1 = vcmask 89168  }
 0x408   : > { %v4444_v57 = vpop.permute.xlu1 %4443  ;;  %v4253_v43 = vpop.permute.xlu0 %4252 }
 0x409   : > { %4528 = vst.msk [vmem:[#allocation3 + $0x60] sm:$0xff] %vm4515_vm8, %v4444_v57 }
 0x40a   : > { %4336 = vst.msk [vmem:[#allocation3 + $0x68] sm:$0xff] %vm4322_vm4, %v4253_v43  ;;  %3106 = vrot.lane.b32.xlu1 %v15674_v32, %s18470_s16  ;;  %2529 = vrot.lane.b32.xlu0 %v15717_v12, %s18462_s10 }
 0x40c   : > { %v1374_v36 = vpop.permute.xlu1 %1373  ;;  %v5021_v50 = vpop.permute.xlu0 %5020 }
 0x40d   : > { %1449 = vst.msk [vmem:[#allocation3 + $0xa8] sm:$0xff] %vm1427_vm5, %v1374_v36 }
 0x40e   : > { %5106 = vst.msk [vmem:[#allocation3 + $0x58] sm:$0xff] %vm18636_vm2, %v5021_v50  ;;  %3874 = vrot.lane.b32.xlu1 %v15682_v46, %s18534_s30  ;;  %3297 = vrot.lane.b32.xlu0 %v15672_v35, %s18463_s18  ;;  %vm18641_vm2 = vcmask 146568  }
 0x410   : > { %v2142_v21 = vpop.permute.xlu1 %2141  ;;  %v1565_v56 = vpop.permute.xlu0 %1564 }
 0x411   : > { %2219 = vst.msk [vmem:[#allocation3 + $0x98] sm:$0xff] %vm2199_vm9, %v2142_v21 }
 0x412   : > { %1641 = vst.msk [vmem:[#allocation3 + $0xa0] sm:$0xff] %vm18639_vm7, %v1565_v56  ;;  %4642 = vrot.lane.b32.xlu1 %v15640_v16, %s18504_s24  ;;  %4065 = vrot.lane.b32.xlu0 %v15629_v23, %s18464_s22  ;;  %v15802_v16 = vld [vmem:[#allocation2 + $0xc3] sm:$0xff] }
 0x414   : > { %v2910_v13 = vpop.permute.xlu1 %2909  ;;  %v2333_v45 = vpop.permute.xlu0 %2332 }
 0x415   : > { %v5671_v60 = vld [vmem:[#allocation3 + $0x58] sm:$0xff]  ;;  %2989 = vst.msk [vmem:[#allocation3 + $0x88] sm:$0xff] %vm2971_vm13, %v2910_v13 }
 0x416   : > { %2411 = vst.msk [vmem:[#allocation3 + $0x90] sm:$0xff] %vm18640_vm1, %v2333_v45  ;;  %v5687_v24 = vsel %vm5639_vm0, %v5671_v60, 0.0  ;;  %1186 = vrot.lane.b32.xlu1 %v15793_v54, %s18519_s9  ;;  %4833 = vrot.lane.b32.xlu0 %v15638_v10, %s18466_s25  ;;  %vm18644_vm0 = vcmask 187568   ;;  %v6231_v60 = vld [vmem:[#allocation4 + $0x20] ss:$2 sm:$0xff] }
 0x417   : > { %12749 = vmatmul.mubr.msk.f32.gmra.mrb[10].mxu1 %vm5703_vm3, %v5687_v24  ;;  %v6233_v24 = vld [vmem:[#allocation4 + $0x21] ss:$2 sm:$0xff] }
 0x418   : > { %v3678_v33 = vpop.permute.xlu1 %3677  ;;  %v3101_v30 = vpop.permute.xlu0 %3100 }
 0x419   : > { %3759 = vst.msk [vmem:[#allocation3 + $0x78] sm:$0xff] %vm18641_vm2, %v3678_v33  ;;  %vm18645_vm2 = vcmask 64568  }
 0x41a   : > { %3181 = vst.msk [vmem:[#allocation3 + $0x80] sm:$0xff] %vm18642_vm14, %v3101_v30  ;;  %1954 = vrot.lane.b32.xlu1 %v15802_v16, %s18583_s8  ;;  %1763 = vrot.lane.b32.xlu0 %v15804_v58, %s18461_s15 }
 0x41c   : > { %v4446_v42 = vpop.permute.xlu1 %4445  ;;  %v3869_v10 = vpop.permute.xlu0 %3868 }
 0x41d   : > { %4529 = vst.msk [vmem:[#allocation3 + $0x68] sm:$0xff] %vm4515_vm8, %v4446_v42  ;;  %v6238_v42 = vmax.f32 %v6231_v60, %v6233_v24  ;;  %v16023_v24 = vld [vmem:[#allocation2 + $0xe0] sm:$0xff] }
 0x41e   : > { %3951 = vst.msk [vmem:[#allocation3 + $0x70] sm:$0xff] %vm18643_vm10, %v3869_v10  ;;  %2722 = vrot.lane.b32.xlu1 %v15758_v25, %s18554_s23  ;;  %2531 = vrot.lane.b32.xlu0 %v15750_v40, %s18462_s10 }
 0x420   : > { %v1567_v27 = vpop.permute.xlu1 %1566  ;;  %v4637_v62 = vpop.permute.xlu0 %4636 }
 0x421   : > { %1642 = vst.msk [vmem:[#allocation3 + $0xa8] sm:$0xff] %vm18639_vm7, %v1567_v27  ;;  %vm18646_vm7 = vmmov %vm18644_vm0 }
 0x422   : > { %4721 = vst.msk [vmem:[#allocation3 + $0x60] sm:$0xff] %vm18644_vm0, %v4637_v62  ;;  %3490 = vrot.lane.b32.xlu1 %v15717_v12, %s18558_s12  ;;  %3299 = vrot.lane.b32.xlu0 %v15708_v49, %s18463_s18  ;;  %vm18647_vm0 = vcmask 162968  }
 0x424   : > { %v2335_v52 = vpop.permute.xlu1 %2334  ;;  %v1758_v51 = vpop.permute.xlu0 %1757 }
 0x425   : > { %2412 = vst.msk [vmem:[#allocation3 + $0x98] sm:$0xff] %vm18640_vm1, %v2335_v52  ;;  %vm18648_vm1 = vcmask 39968  }
 0x426   : > { %1834 = vst.msk [vmem:[#allocation3 + $0xa0] sm:$0xff] %vm18645_vm2, %v1758_v51  ;;  %4258 = vrot.lane.b32.xlu1 %v15672_v35, %s18560_s19  ;;  %4067 = vrot.lane.b32.xlu0 %v15674_v32, %s18464_s22  ;;  %vm18649_vm2 = vcmask 195768  }
 0x428   : > { %v3103_v61 = vpop.permute.xlu1 %3102  ;;  %v2526_v8 = vpop.permute.xlu0 %2525 }
 0x429   : > { %3182 = vst.msk [vmem:[#allocation3 + $0x88] sm:$0xff] %vm18642_vm14, %v3103_v61  ;;  %vm18650_vm14 = vcmask 72768  }
 0x42a   : > { %2604 = vst.msk [vmem:[#allocation3 + $0x90] sm:$0xff] %vm2585_vm11, %v2526_v8  ;;  %5026 = vrot.lane.b32.xlu1 %v15629_v23, %s18547_s17  ;;  %4835 = vrot.lane.b32.xlu0 %v15682_v46, %s18466_s25  ;;  %v15846_v23 = vld [vmem:[#allocation2 + $0xcb] sm:$0xff]  ;;  %v15926_v8 = vld [vmem:[#allocation2 + $0xd9] sm:$0xff] }
 0x42c   : > { %v3871_v35 = vpop.permute.xlu1 %3870  ;;  %v3294_v3 = vpop.permute.xlu0 %3293 }
 0x42d   : > { %3952 = vst.msk [vmem:[#allocation3 + $0x78] sm:$0xff] %vm18643_vm10, %v3871_v35  ;;  %vm18651_vm10 = vcmask 64568  }
 0x42e   : > { %3374 = vst.msk [vmem:[#allocation3 + $0x80] sm:$0xff] %vm3357_vm15, %v3294_v3  ;;  %1379 = vrot.lane.b32.xlu1 %v15836_v15, %s18489_s14  ;;  %1188 = vrot.lane.b32.xlu0 %v15838_v37, %s18519_s9 }
 0x430   : > { %v4639_v22 = vpop.permute.xlu1 %4638  ;;  %v4062_v46 = vpop.permute.xlu0 %4061 }
 0x431   : > { %4722 = vst.msk [vmem:[#allocation3 + $0x68] sm:$0xff] %vm18646_vm7, %v4639_v22  ;;  %vm18652_vm7 = vcmask 138368   ;;  %v15938_v22 = vld [vmem:[#allocation2 + $0xd2] sm:$0xff] }
 0x432   : > { %4144 = vst.msk [vmem:[#allocation3 + $0x70] sm:$0xff] %vm18647_vm0, %v4062_v46  ;;  %2147 = vrot.lane.b32.xlu1 %v15793_v54, %s18443_s20  ;;  %1956 = vrot.lane.b32.xlu0 %v15846_v23, %s18583_s8 }
 0x434   : > { %v1183_v5 = vpop.permute.xlu1 %1182  ;;  %v4830_v9 = vpop.permute.xlu0 %4829 }
 0x435   : > { %1257 = vst.msk [vmem:[#allocation3 + $0xb0] sm:$0xff] %vm18648_vm1, %v1183_v5  ;;  %vm18653_vm1 = vcmask 130048  }
 0x436   : > { %4914 = vst.msk [vmem:[#allocation3 + $0x60] sm:$0xff] %vm18649_vm2, %v4830_v9  ;;  %2915 = vrot.lane.b32.xlu1 %v15802_v16, %s18522_s21  ;;  %2724 = vrot.lane.b32.xlu0 %v15804_v58, %s18554_s23  ;;  %vm18654_vm2 = vmmov %vm18653_vm1 }
 0x438   : > { %v1951_v29 = vpop.permute.xlu1 %1950  ;;  %v1760_v38 = vpop.permute.xlu0 %1759 }
 0x439   : > { %2027 = vst.msk [vmem:[#allocation3 + $0xa0] sm:$0xff] %vm18650_vm14, %v1951_v29  ;;  %vm18655_vm14 = vcmask 203968  }
 0x43a   : > { %1835 = vst.msk [vmem:[#allocation3 + $0xa8] sm:$0xff] %vm18651_vm10, %v1760_v38  ;;  %3683 = vrot.lane.b32.xlu1 %v15758_v25, %s18557_s29  ;;  %3492 = vrot.lane.b32.xlu0 %v15750_v40, %s18558_s12  ;;  %vm18656_vm10 = vcmask 195768  }
 0x43c   : > { %v2719_v55 = vpop.permute.xlu1 %2718  ;;  %v2528_v1 = vpop.permute.xlu0 %2527 }
 0x43d   : > { %2797 = vst.msk [vmem:[#allocation3 + $0x90] sm:$0xff] %vm2778_vm12, %v2719_v55 }
 0x43e   : > { %2605 = vst.msk [vmem:[#allocation3 + $0x98] sm:$0xff] %vm2585_vm11, %v2528_v1  ;;  %4451 = vrot.lane.b32.xlu1 %v15717_v12, %s18559_s13  ;;  %4260 = vrot.lane.b32.xlu0 %v15708_v49, %s18560_s19  ;;  %v5140_v49 = vadd.s32 96, %v14781_v19 }
 0x440   : > { %v3487_v44 = vpop.permute.xlu1 %3486  ;;  %v3296_v6 = vpop.permute.xlu0 %3295 }
 0x441   : > { %3567 = vst.msk [vmem:[#allocation3 + $0x80] sm:$0xff] %vm18652_vm7, %v3487_v44 }
 0x442   : > { %3375 = vst.msk [vmem:[#allocation3 + $0x88] sm:$0xff] %vm3357_vm15, %v3296_v6  ;;  %v12744_v17 = vpop.f32.mrb[6].mxu1  ;;  %1381 = vrot.lane.b32.xlu1 %v15872_v18, %s18489_s14  ;;  %5028 = vrot.lane.b32.xlu0 %v15674_v32, %s18547_s17  ;;  %v5248_v32 = vand.u32 15, %v5140_v49 }
 0x443   : > { %v5858_v12 = vadd.f32 %v12744_v17, %v15360_v31  ;;  %v5852_v48 = vpop.f32.mrb[7].mxu1 }
 0x444   : > { %v5853_v57 = vadd.f32 %v15360_v31, %v5852_v48  ;;  %v4255_v43 = vpop.permute.xlu1 %4254  ;;  %v4064_v7 = vpop.permute.xlu0 %4063  ;;  %vm15900_vm7 = vcmp.ge.s32.totalorder %v5248_v32, %v14790_v2  ;;  %v15980_v48 = vld [vmem:[#allocation2 + $0xd4] sm:$0xff] }
 0x445   : > { %v5908_v36 = vmax.f32 %v5858_v12, 0.0  ;;  %4337 = vst.msk [vmem:[#allocation3 + $0x70] sm:$0xff] %vm4322_vm4, %v4255_v43 }
 0x446   : > { %4145 = vst.msk [vmem:[#allocation3 + $0x78] sm:$0xff] %vm18647_vm0, %v4064_v7  ;;  %v5907_v50 = vmax.f32 %v5853_v57, 0.0  ;;  %2149 = vrot.lane.b32.xlu1 %v15838_v37, %s18443_s20  ;;  %1572 = vrot.lane.b32.xlu0 %v15881_v47, %s18563_s0  ;;  %vm15905_vm0 = vcmp.lt.s32.totalorder %v5248_v32, %v14792_v28 }
 0x447   : > { %5925 = vst.msk [vmem:[#allocation4 + $0x38] sm:$0xff] %vm18653_vm1, %v5908_v36  ;;  %vm18661_vm1 = vcmask 39968   ;;  %v15991_v36 = vld [vmem:[#allocation2 + $0xda] sm:$0xff] }
 0x448   : > { %5924 = vst.msk [vmem:[#allocation4 + $0x30] sm:$0xff] %vm18654_vm2, %v5907_v50  ;;  %v5023_v31 = vpop.permute.xlu1 %5022  ;;  %v4832_v63 = vpop.permute.xlu0 %4831  ;;  %vm5640_vm2 = vmand %vm15900_vm7, %vm15905_vm0  ;;  %vm18664_vm7 = vcmask 146568   ;;  %vm18665_vm0 = vcmask 138368  }
 0x449   : > { %5107 = vst.msk [vmem:[#allocation3 + $0x60] sm:$0xff] %vm18655_vm14, %v5023_v31  ;;  %vm18662_vm14 = vcmask 72768  }
 0x44a   : > { %4915 = vst.msk [vmem:[#allocation3 + $0x68] sm:$0xff] %vm18656_vm10, %v4832_v63  ;;  %2917 = vrot.lane.b32.xlu1 %v15846_v23, %s18522_s21  ;;  %2340 = vrot.lane.b32.xlu0 %v15836_v15, %s18528_s26  ;;  %vm18663_vm10 = vcmask 130048  }
 0x44c   : > { %v1376_v13 = vpop.permute.xlu1 %1375  ;;  %v1185_v45 = vpop.permute.xlu0 %1184 }
 0x44d   : > { %1450 = vst.msk [vmem:[#allocation3 + $0xb0] sm:$0xff] %vm1427_vm5, %v1376_v13 }
 0x44e   : > { %1258 = vst.msk [vmem:[#allocation3 + $0xb8] sm:$0xff] %vm18661_vm1, %v1185_v45  ;;  %3685 = vrot.lane.b32.xlu1 %v15804_v58, %s18557_s29  ;;  %3108 = vrot.lane.b32.xlu0 %v15793_v54, %s18470_s16 }
 0x44f   : > { %v6235_v33 = vld [vmem:[#allocation4 + $0x30] ss:$2 sm:$0xff]  ;;  %v6237_v30 = vld [vmem:[#allocation4 + $0x31] ss:$2 sm:$0xff] }
 0x450   : > { %v6239_v10 = vmax.f32 %v6235_v33, %v6237_v30  ;;  %v2144_v27 = vpop.permute.xlu1 %2143  ;;  %v1953_v62 = vpop.permute.xlu0 %1952  ;;  %v5672_v52 = vld [vmem:[#allocation3 + $0x60] sm:$0xff]  ;;  %v16025_v33 = vld [vmem:[#allocation2 + $0xdc] sm:$0xff] }
 0x451   : > { %2220 = vst.msk [vmem:[#allocation3 + $0xa0] sm:$0xff] %vm2199_vm9, %v2144_v27  ;;  %v5688_v51 = vsel %vm5640_vm2, %v5672_v52, 0.0  ;;  %vm18666_vm2 = vmmov %vm18663_vm10 }
 0x452   : > { %2028 = vst.msk [vmem:[#allocation3 + $0xa8] sm:$0xff] %vm18662_vm14, %v1953_v62  ;;  %v6240_v61 = vmax.f32 %v6238_v42, %v6239_v10  ;;  %4453 = vrot.lane.b32.xlu1 %v15750_v40, %s18559_s13  ;;  %3876 = vrot.lane.b32.xlu0 %v15802_v16, %s18534_s30  ;;  %v15936_v40 = vand.u32 7, %v14963_v26  ;;  %v5141_v26 = vadd.s32 104, %v14781_v19  ;;  %vm18667_vm14 = vcmask 203968   ;;  %v16039_v42 = vld [vmem:[#allocation2 + $0xdb] sm:$0xff] }
 0x453   : > { %12751 = vmatprep.mubr.msk.f32.mxu1 %vm5703_vm3, %v5688_v51 }
 0x454   : > { %6241 = vst.msk [vmem:[#allocation5 + $0x1a] sm:$0xff] %vm18663_vm10, %v6240_v61  ;;  %v2912_v35 = vpop.permute.xlu1 %2911  ;;  %v2721_v3 = vpop.permute.xlu0 %2720  ;;  %vm7204_vm1 = vcmp.ge.s32.totalorder %v15936_v40, 1  ;;  %v5255_v55 = vand.u32 15, %v5141_v26  ;;  %v5966_v61 = vld [vmem:[%s18378_s2] sm:$0xff]  ;;  %v5968_v26 = vld [vmem:[%s18378_s2 + $0x10] sm:$0xff] }
 0x455   : > { %2990 = vst.msk [vmem:[#allocation3 + $0x90] sm:$0xff] %vm2971_vm13, %v2912_v35  ;;  %v5967_v35 = vld [vmem:[%s18378_s2 + $0x8] sm:$0xff] }
 0x456   : > { %2798 = vst.msk [vmem:[#allocation3 + $0x98] sm:$0xff] %vm2778_vm12, %v2721_v3  ;;  %1574 = vrot.lane.b32.xlu1 %v15926_v8, %s18563_s0  ;;  %4644 = vrot.lane.b32.xlu0 %v15758_v25, %s18504_s24  ;;  %vm15967_vm10 = vcmp.ge.s32.totalorder %v5255_v55, %v14790_v2  ;;  %v13199_v3 = vpack.c.bf16 %v5967_v35, %v5966_v61  ;;  %v396_v35 = vld [vmem:[%s13857_s11 + $0xe8] sm:$0xff] }
 0x458   : > { %v3680_v46 = vpop.permute.xlu1 %3679  ;;  %v3489_v5 = vpop.permute.xlu0 %3488  ;;  %13200 = vmatprep.subr.bf16.mxu1 %v13199_v3 }
 0x459   : > { %3760 = vst.msk [vmem:[#allocation3 + $0x80] sm:$0xff] %vm18664_vm7, %v3680_v46  ;;  %vm5609_vm7 = vcmp.lt.s32.totalorder %v5255_v55, %v14792_v28  ;;  %13202 = vmatpush3.bf16.msra.mxu1 %v13199_v3 }
 0x45a   : > { %3568 = vst.msk [vmem:[#allocation3 + $0x88] sm:$0xff] %vm18665_vm0, %v3489_v5  ;;  %2342 = vrot.lane.b32.xlu1 %v15872_v18, %s18528_s26  ;;  %1765 = vrot.lane.b32.xlu0 %v15938_v22, %s18461_s15  ;;  %vm18670_vm0 = vcmask 56368  }
 0x45b   : > { %v15947_v25 = vld [vmem:[#allocation5 + $0x19] sm:$0xff] }
 0x45c   : > { %v4448_v9 = vpop.permute.xlu1 %4447  ;;  %v4257_v29 = vpop.permute.xlu0 %4256  ;;  %v7407_v38 = vsel %vm7204_vm1, %v15947_v25, 0.0 }
 0x45d   : > { %4530 = vst.msk [vmem:[#allocation3 + $0x70] sm:$0xff] %vm4515_vm8, %v4448_v9  ;;  %12892 = vmatprep.mubr.msk.f32.mxu0 %vm18666_vm2, %v7407_v38  ;;  %vm5641_vm2 = vmand %vm15967_vm10, %vm5609_vm7  ;;  %vm18672_vm10 = vcmask 146568   ;;  %vm18673_vm7 = vcmask 121968   ;;  %v5969_v9 = vld [vmem:[%s18378_s2 + $0x18] sm:$0x1] }
 0x45e   : > { %4338 = vst.msk [vmem:[#allocation3 + $0x78] sm:$0xff] %vm4322_vm4, %v4257_v29  ;;  %3110 = vrot.lane.b32.xlu1 %v15838_v37, %s18470_s16  ;;  %2533 = vrot.lane.b32.xlu0 %v15881_v47, %s18462_s10  ;;  %v13203_v29 = vpack.c.bf16 %v5969_v9, %v5968_v26  ;;  %v16179_v9 = vld [vmem:[#allocation2 + $0xe4] sm:$0xff] }
 0x460   : > { %v1378_v1 = vpop.permute.xlu1 %1377  ;;  %v5025_v44 = vpop.permute.xlu0 %5024  ;;  %13205 = vmatprep.subr.msk.bf16.mxu1 %vm14594_vm6, %v13203_v29 }
 0x461   : > { %1451 = vst.msk [vmem:[#allocation3 + $0xb8] sm:$0xff] %vm1427_vm5, %v1378_v1  ;;  %13208 = vmatpush3.bf16.msk.msra.mxu1 %vm14594_vm6, %v13203_v29  ;;  %v16081_v1 = vld [vmem:[#allocation2 + $0xe8] sm:$0xff]  ;;  %vm18688_vm6 = vcmask 162968  }
 0x462   : > { %5108 = vst.msk [vmem:[#allocation3 + $0x68] sm:$0xff] %vm18667_vm14, %v5025_v44  ;;  %3878 = vrot.lane.b32.xlu1 %v15846_v23, %s18534_s30  ;;  %3301 = vrot.lane.b32.xlu0 %v15836_v15, %s18463_s18  ;;  %vm18671_vm14 = vcmask 89168  }
 0x464   : > { %v2146_v17 = vpop.permute.xlu1 %2145  ;;  %v1569_v12 = vpop.permute.xlu0 %1568 }
 0x465   : > { %2221 = vst.msk [vmem:[#allocation3 + $0xa8] sm:$0xff] %vm2199_vm9, %v2146_v17 }
 0x466   : > { %1643 = vst.msk [vmem:[#allocation3 + $0xb0] sm:$0xff] %vm18670_vm0, %v1569_v12  ;;  %4646 = vrot.lane.b32.xlu1 %v15804_v58, %s18504_s24  ;;  %4069 = vrot.lane.b32.xlu0 %v15793_v54, %s18464_s22  ;;  %v15989_v58 = vld [vmem:[#allocation2 + $0xd3] sm:$0xff]  ;;  %vm18674_vm0 = vcmask 154768   ;;  %v16095_v12 = vld [vmem:[#allocation2 + $0xe1] sm:$0xff] }
 0x468   : > { %v2914_v49 = vpop.permute.xlu1 %2913  ;;  %v2337_v57 = vpop.permute.xlu0 %2336 }
 0x469   : > { %v5673_v43 = vld [vmem:[#allocation3 + $0x68] sm:$0xff]  ;;  %2991 = vst.msk [vmem:[#allocation3 + $0x98] sm:$0xff] %vm2971_vm13, %v2914_v49  ;;  %v5142_v49 = vadd.s32 112, %v14781_v19 }
 0x46a   : > { %2413 = vst.msk [vmem:[#allocation3 + $0xa0] sm:$0xff] %vm18671_vm14, %v2337_v57  ;;  %v5689_v7 = vsel %vm5641_vm2, %v5673_v43, 0.0  ;;  %1190 = vrot.lane.b32.xlu1 %v15980_v48, %s18519_s9  ;;  %4837 = vrot.lane.b32.xlu0 %v15802_v16, %s18466_s25  ;;  %vm18675_vm2 = vcmask 56368   ;;  %vm18676_vm14 = vcmask 187568  }
 0x46b   : > { %12752 = vmatmul.mubr.msk.f32.gmra.mrb[12].mxu1 %vm5703_vm3, %v5689_v7 }
 0x46c   : > { %v3682_v50 = vpop.permute.xlu1 %3681  ;;  %v3105_v32 = vpop.permute.xlu0 %3104 }
 0x46d   : > { %3761 = vst.msk [vmem:[#allocation3 + $0x88] sm:$0xff] %vm18672_vm10, %v3682_v50  ;;  %vm18677_vm10 = vcmask 89168  }
 0x46e   : > { %3183 = vst.msk [vmem:[#allocation3 + $0x90] sm:$0xff] %vm18673_vm7, %v3105_v32  ;;  %1958 = vrot.lane.b32.xlu1 %v15989_v58, %s18583_s8  ;;  %1767 = vrot.lane.b32.xlu0 %v15991_v36, %s18461_s15  ;;  %vm18678_vm7 = vcmask 64568   ;;  %v5262_v32 = vand.u32 15, %v5142_v49 }
 0x470   : > { %v4450_v31 = vpop.permute.xlu1 %4449  ;;  %v3873_v16 = vpop.permute.xlu0 %3872 }
 0x471   : > { %4531 = vst.msk [vmem:[#allocation3 + $0x78] sm:$0xff] %vm4515_vm8, %v4450_v31 }
 0x472   : > { %3953 = vst.msk [vmem:[#allocation3 + $0x80] sm:$0xff] %vm18674_vm0, %v3873_v16  ;;  %2726 = vrot.lane.b32.xlu1 %v15938_v22, %s18554_s23  ;;  %2535 = vrot.lane.b32.xlu0 %v15926_v8, %s18462_s10  ;;  %vm18679_vm0 = vcmask 121968  }
 0x474   : > { %v1571_v63 = vpop.permute.xlu1 %1570  ;;  %v4641_v21 = vpop.permute.xlu0 %4640 }
 0x475   : > { %1644 = vst.msk [vmem:[#allocation3 + $0xb8] sm:$0xff] %vm18675_vm2, %v1571_v63  ;;  %vm18680_vm2 = vcmask 154768  }
 0x476   : > { %4723 = vst.msk [vmem:[#allocation3 + $0x70] sm:$0xff] %vm18676_vm14, %v4641_v21  ;;  %3494 = vrot.lane.b32.xlu1 %v15881_v47, %s18558_s12  ;;  %3303 = vrot.lane.b32.xlu0 %v15872_v18, %s18463_s18 }
 0x478   : > { %v2339_v56 = vpop.permute.xlu1 %2338  ;;  %v1762_v13 = vpop.permute.xlu0 %1761 }
 0x479   : > { %2414 = vst.msk [vmem:[#allocation3 + $0xa8] sm:$0xff] %vm18677_vm10, %v2339_v56  ;;  %vm18681_vm10 = vcmask 162968  }
 0x47a   : > { %1836 = vst.msk [vmem:[#allocation3 + $0xb0] sm:$0xff] %vm18678_vm7, %v1762_v13  ;;  %4262 = vrot.lane.b32.xlu1 %v15836_v15, %s18560_s19  ;;  %4071 = vrot.lane.b32.xlu0 %v15838_v37, %s18464_s22  ;;  %vm18683_vm7 = vcmask 39968  }
 0x47c   : > { %v3107_v45 = vpop.permute.xlu1 %3106  ;;  %v2530_v60 = vpop.permute.xlu0 %2529 }
 0x47d   : > { %3184 = vst.msk [vmem:[#allocation3 + $0x98] sm:$0xff] %vm18679_vm0, %v3107_v45  ;;  %vm18684_vm0 = vcmask 195768  }
 0x47e   : > { %2606 = vst.msk [vmem:[#allocation3 + $0xa0] sm:$0xff] %vm2585_vm11, %v2530_v60  ;;  %5030 = vrot.lane.b32.xlu1 %v15793_v54, %s18547_s17  ;;  %4839 = vrot.lane.b32.xlu0 %v15846_v23, %s18466_s25  ;;  %v7568_v54 = vld [vmem:[%s18380_s4 + $0xb0] sm:$0xff]  ;;  %v7569_v23 = vld [vmem:[%s18380_s4 + $0xb8] sm:$0xff] }
 0x47f   : > { %v13237_v10 = vpack.c.bf16 %v7569_v23, %v7568_v54 }
 0x480   : > { %v3875_v15 = vpop.permute.xlu1 %3874  ;;  %v3298_v30 = vpop.permute.xlu0 %3297 }
 0x481   : > { %3954 = vst.msk [vmem:[#allocation3 + $0x88] sm:$0xff] %vm18680_vm2, %v3875_v15  ;;  %13238 = vmatprep.subr.bf16.mxu0 %v13237_v10  ;;  %vm18685_vm2 = vcmask 72768   ;;  %v16128_v15 = vld [vmem:[#allocation2 + $0xe9] sm:$0xff] }
 0x482   : > { %3376 = vst.msk [vmem:[#allocation3 + $0x90] sm:$0xff] %vm3357_vm15, %v3298_v30  ;;  %1383 = vrot.lane.b32.xlu1 %v16023_v24, %s18489_s14  ;;  %1192 = vrot.lane.b32.xlu0 %v16025_v33, %s18519_s9 }
 0x483   : > { %13240 = vmatpush3.bf16.msra.mxu0 %v13237_v10 }
 0x484   : > { %v4643_v27 = vpop.permute.xlu1 %4642  ;;  %v4066_v62 = vpop.permute.xlu0 %4065 }
 0x485   : > { %4724 = vst.msk [vmem:[#allocation3 + $0x78] sm:$0xff] %vm18676_vm14, %v4643_v27  ;;  %vm18686_vm14 = vcmask 64568   ;;  %v5143_v27 = vadd.s32 120, %v14781_v19 }
 0x486   : > { %4146 = vst.msk [vmem:[#allocation3 + $0x80] sm:$0xff] %vm18681_vm10, %v4066_v62  ;;  %2151 = vrot.lane.b32.xlu1 %v15980_v48, %s18682_s7  ;;  %1960 = vrot.lane.b32.xlu0 %v16039_v42, %s18583_s8  ;;  %vm18687_vm10 = vcmask 138368  }
 0x488   : > { %v1187_v52 = vpop.permute.xlu1 %1186  ;;  %v4834_v51 = vpop.permute.xlu0 %4833 }
 0x489   : > { %1259 = vst.msk [vmem:[#allocation3 + $0xc0] sm:$0xff] %vm18683_vm7, %v1187_v52  ;;  %vm18689_vm7 = vcmask 130048  }
 0x48a   : > { %4916 = vst.msk [vmem:[#allocation3 + $0x70] sm:$0xff] %vm18684_vm0, %v4834_v51  ;;  %2919 = vrot.lane.b32.xlu1 %v15989_v58, %s18522_s21  ;;  %2728 = vrot.lane.b32.xlu0 %v15991_v36, %s18554_s23  ;;  %vm18690_vm0 = vmmov %vm18689_vm7 }
 0x48c   : > { %v1955_v46 = vpop.permute.xlu1 %1954  ;;  %v1764_v5 = vpop.permute.xlu0 %1763 }
 0x48d   : > { %2029 = vst.msk [vmem:[#allocation3 + $0xb0] sm:$0xff] %vm18685_vm2, %v1955_v46  ;;  %vm18691_vm2 = vcmask 203968  }
 0x48e   : > { %1837 = vst.msk [vmem:[#allocation3 + $0xb8] sm:$0xff] %vm18686_vm14, %v1764_v5  ;;  %3687 = vrot.lane.b32.xlu1 %v15938_v22, %s18557_s29  ;;  %3496 = vrot.lane.b32.xlu0 %v15926_v8, %s18558_s12  ;;  %vm18692_vm14 = vcmask 195768  }
 0x490   : > { %v2723_v38 = vpop.permute.xlu1 %2722  ;;  %v2532_v55 = vpop.permute.xlu0 %2531 }
 0x491   : > { %2799 = vst.msk [vmem:[#allocation3 + $0xa0] sm:$0xff] %vm2778_vm12, %v2723_v38 }
 0x492   : > { %2607 = vst.msk [vmem:[#allocation3 + $0xa8] sm:$0xff] %vm2585_vm11, %v2532_v55  ;;  %4455 = vrot.lane.b32.xlu1 %v15881_v47, %s18559_s13  ;;  %4264 = vrot.lane.b32.xlu0 %v15872_v18, %s18560_s19  ;;  %v16092_v47 = vld [vmem:[%s18379_s3] ss:$0 sm:$0xff] }
 0x494   : > { %v3491_v44 = vpop.permute.xlu1 %3490  ;;  %v3300_v6 = vpop.permute.xlu0 %3299 }
 0x495   : > { %3569 = vst.msk [vmem:[#allocation3 + $0x90] sm:$0xff] %vm18687_vm10, %v3491_v44  ;;  %vm5577_vm10 = vcmp.ge.s32.totalorder %v5262_v32, %v14790_v2 }
 0x496   : > { %3377 = vst.msk [vmem:[#allocation3 + $0x98] sm:$0xff] %vm3357_vm15, %v3300_v6  ;;  %v12747_v14 = vpop.f32.mrb[8].mxu1  ;;  %1385 = vrot.lane.b32.xlu1 %v16081_v1, %s18489_s14  ;;  %5032 = vrot.lane.b32.xlu0 %v15838_v37, %s18547_s17  ;;  %v16190_v6 = vld [vmem:[#allocation2 + $0xea] sm:$0xff] }
 0x497   : > { %v5868_v18 = vadd.f32 %v16092_v47, %v12747_v14  ;;  %v5862_v17 = vpop.f32.mrb[9].mxu1 }
 0x498   : > { %v5863_v57 = vadd.f32 %v16092_v47, %v5862_v17  ;;  %v4259_v43 = vpop.permute.xlu1 %4258  ;;  %v4068_v7 = vpop.permute.xlu0 %4067 }
 0x499   : > { %v5910_v50 = vmax.f32 %v5868_v18, 0.0  ;;  %4339 = vst.msk [vmem:[#allocation3 + $0x80] sm:$0xff] %vm4322_vm4, %v4259_v43 }
 0x49a   : > { %4147 = vst.msk [vmem:[#allocation3 + $0x88] sm:$0xff] %vm18688_vm6, %v4068_v7  ;;  %v5909_v37 = vmax.f32 %v5863_v57, 0.0  ;;  %2153 = vrot.lane.b32.xlu1 %v16025_v33, %s18682_s7  ;;  %1576 = vrot.lane.b32.xlu0 %v16095_v12, %s18563_s0  ;;  %vm5610_vm6 = vcmp.lt.s32.totalorder %v5262_v32, %v14792_v28  ;;  %v16222_v32 = vld [vmem:[#allocation2 + $0xf0] sm:$0xff] }
 0x49b   : > { %5927 = vst.msk [vmem:[#allocation4 + $0x48] sm:$0xff] %vm18689_vm7, %v5910_v50  ;;  %vm18693_vm7 = vcmask 39968  }
 0x49c   : > { %5926 = vst.msk [vmem:[#allocation4 + $0x40] sm:$0xff] %vm18690_vm0, %v5909_v37  ;;  %v5027_v31 = vpop.permute.xlu1 %5026  ;;  %v4836_v16 = vpop.permute.xlu0 %4835  ;;  %vm5642_vm0 = vmand %vm5577_vm10, %vm5610_vm6  ;;  %vm18696_vm10 = vcmask 138368   ;;  %vm18697_vm6 = vcmask 203968  }
 0x49d   : > { %5109 = vst.msk [vmem:[#allocation3 + $0x70] sm:$0xff] %vm18691_vm2, %v5027_v31  ;;  %vm18694_vm2 = vcmask 72768   ;;  %v16224_v31 = vld [vmem:[#allocation2 + $0xec] sm:$0xff] }
 0x49e   : > { %4917 = vst.msk [vmem:[#allocation3 + $0x78] sm:$0xff] %vm18692_vm14, %v4836_v16  ;;  %2921 = vrot.lane.b32.xlu1 %v16039_v42, %s18522_s21  ;;  %2344 = vrot.lane.b32.xlu0 %v16023_v24, %s18528_s26  ;;  %vm18695_vm14 = vcmask 146568  }
 0x4a0   : > { %v1380_v63 = vpop.permute.xlu1 %1379  ;;  %v1189_v21 = vpop.permute.xlu0 %1188 }
 0x4a1   : > { %1452 = vst.msk [vmem:[#allocation3 + $0xc0] sm:$0xff] %vm1427_vm5, %v1380_v63 }
 0x4a2   : > { %1260 = vst.msk [vmem:[#allocation3 + $0xc8] sm:$0xff] %vm18693_vm7, %v1189_v21  ;;  %3689 = vrot.lane.b32.xlu1 %v15991_v36, %s18557_s29  ;;  %3112 = vrot.lane.b32.xlu0 %v15980_v48, %s18470_s16 }
 0x4a4   : > { %v2148_v56 = vpop.permute.xlu1 %2147  ;;  %v1957_v13 = vpop.permute.xlu0 %1956  ;;  %v5674_v45 = vld [vmem:[#allocation3 + $0x70] sm:$0xff] }
 0x4a5   : > { %2222 = vst.msk [vmem:[#allocation3 + $0xb0] sm:$0xff] %vm2199_vm9, %v2148_v56  ;;  %v5690_v60 = vsel %vm5642_vm0, %v5674_v45, 0.0 }
 0x4a6   : > { %2030 = vst.msk [vmem:[#allocation3 + $0xb8] sm:$0xff] %vm18694_vm2, %v1957_v13  ;;  %4457 = vrot.lane.b32.xlu1 %v15926_v8, %s18559_s13  ;;  %3880 = vrot.lane.b32.xlu0 %v15989_v58, %s18534_s30  ;;  %v16136_v8 = vld [vmem:[#allocation2 + $0xe2] sm:$0xff]  ;;  %vm18702_vm2 = vcmask 7168  }
 0x4a7   : > { %12754 = vmatprep.mubr.msk.f32.mxu1 %vm5703_vm3, %v5690_v60  ;;  %428 = vst.msk [vmem:[#allocation2 + $0x10a] sm:$0xff] %vm18702_vm2, %v396_v35  ;;  %vm18707_vm2 = vcmask 154768  }
 0x4a8   : > { %v2916_v30 = vpop.permute.xlu1 %2915  ;;  %v2725_v54 = vpop.permute.xlu0 %2724 }
 0x4a9   : > { %2992 = vst.msk [vmem:[#allocation3 + $0xa0] sm:$0xff] %vm2971_vm13, %v2916_v30 }
 0x4aa   : > { %2800 = vst.msk [vmem:[#allocation3 + $0xa8] sm:$0xff] %vm2778_vm12, %v2725_v54  ;;  %1578 = vrot.lane.b32.xlu1 %v16128_v15, %s18563_s0  ;;  %4648 = vrot.lane.b32.xlu0 %v15938_v22, %s18504_s24  ;;  %v5269_v22 = vand.u32 15, %v5143_v27  ;;  %v16258_v54 = vld [vmem:[#allocation2 + $0xf8] sm:$0xff] }
 0x4ac   : > { %v3684_v23 = vpop.permute.xlu1 %3683  ;;  %v3493_v10 = vpop.permute.xlu0 %3492  ;;  %vm16159_vm7 = vcmp.ge.s32.totalorder %v5269_v22, %v14790_v2  ;;  %vm16164_vm0 = vcmp.lt.s32.totalorder %v5269_v22, %v14792_v28 }
 0x4ad   : > { %3762 = vst.msk [vmem:[#allocation3 + $0x90] sm:$0xff] %vm18695_vm14, %v3684_v23  ;;  %vm18703_vm14 = vcmask 56368  }
 0x4ae   : > { %3570 = vst.msk [vmem:[#allocation3 + $0x98] sm:$0xff] %vm18696_vm10, %v3493_v10  ;;  %2346 = vrot.lane.b32.xlu1 %v16081_v1, %s18528_s26  ;;  %1769 = vrot.lane.b32.xlu0 %v16136_v8, %s18461_s15  ;;  %vm5643_vm10 = vmand %vm16159_vm7, %vm16164_vm0  ;;  %vm18705_vm7 = vcmask 146568   ;;  %vm18706_vm0 = vcmask 121968  }
 0x4b0   : > { %v4452_v62 = vpop.permute.xlu1 %4451  ;;  %v4261_v52 = vpop.permute.xlu0 %4260 }
 0x4b1   : > { %4532 = vst.msk [vmem:[#allocation3 + $0x80] sm:$0xff] %vm4515_vm8, %v4452_v62 }
 0x4b2   : > { %4340 = vst.msk [vmem:[#allocation3 + $0x88] sm:$0xff] %vm4322_vm4, %v4261_v52  ;;  %3114 = vrot.lane.b32.xlu1 %v16025_v33, %s18470_s16  ;;  %2537 = vrot.lane.b32.xlu0 %v16095_v12, %s18462_s10  ;;  %v16267_v52 = vld [vmem:[#allocation2 + $0xf1] sm:$0xff] }
 0x4b4   : > { %v1382_v51 = vpop.permute.xlu1 %1381  ;;  %v5029_v61 = vpop.permute.xlu0 %5028 }
 0x4b5   : > { %1453 = vst.msk [vmem:[#allocation3 + $0xc8] sm:$0xff] %vm1427_vm5, %v1382_v51 }
 0x4b6   : > { %5110 = vst.msk [vmem:[#allocation3 + $0x78] sm:$0xff] %vm18697_vm6, %v5029_v61  ;;  %3882 = vrot.lane.b32.xlu1 %v16039_v42, %s18534_s30  ;;  %3305 = vrot.lane.b32.xlu0 %v16023_v24, %s18463_s18  ;;  %vm18704_vm6 = vcmask 89168  }
 0x4b8   : > { %v2150_v5 = vpop.permute.xlu1 %2149  ;;  %v1573_v26 = vpop.permute.xlu0 %1572 }
 0x4b9   : > { %2223 = vst.msk [vmem:[#allocation3 + $0xb8] sm:$0xff] %vm2199_vm9, %v2150_v5 }
 0x4ba   : > { %1645 = vst.msk [vmem:[#allocation3 + $0xc0] sm:$0xff] %vm18703_vm14, %v1573_v26  ;;  %4650 = vrot.lane.b32.xlu1 %v15991_v36, %s18504_s24  ;;  %4073 = vrot.lane.b32.xlu0 %v15980_v48, %s18464_s22  ;;  %v16188_v36 = vld [vmem:[#allocation2 + $0xe3] sm:$0xff]  ;;  %v397_v26 = vld [vmem:[%s13857_s11 + $0xf0] sm:$0xff] }
 0x4bc   : > { %v2918_v29 = vpop.permute.xlu1 %2917  ;;  %v2341_v38 = vpop.permute.xlu0 %2340 }
 0x4bd   : > { %v5675_v55 = vld [vmem:[#allocation3 + $0x78] sm:$0xff]  ;;  %2993 = vst.msk [vmem:[#allocation3 + $0xa8] sm:$0xff] %vm2971_vm13, %v2918_v29 }
 0x4be   : > { %2415 = vst.msk [vmem:[#allocation3 + $0xb0] sm:$0xff] %vm18704_vm6, %v2341_v38  ;;  %v5691_v44 = vsel %vm5643_vm10, %v5675_v55, 0.0  ;;  %1194 = vrot.lane.b32.xlu1 %v16179_v9, %s18519_s9  ;;  %4841 = vrot.lane.b32.xlu0 %v15989_v58, %s18466_s25  ;;  %vm18708_vm10 = vcmask 187568   ;;  %v16386_v38 = vld [vmem:[#allocation2 + $0xfa] sm:$0xff] }
 0x4bf   : > { %12755 = vmatmul.mubr.msk.f32.gmra.mrb[14].mxu1 %vm5703_vm3, %v5691_v44 }
 0x4c0   : > { %v3686_v14 = vpop.permute.xlu1 %3685  ;;  %v3109_v18 = vpop.permute.xlu0 %3108 }
 0x4c1   : > { %3763 = vst.msk [vmem:[#allocation3 + $0x98] sm:$0xff] %vm18705_vm7, %v3686_v14  ;;  %vm18709_vm7 = vcmask 64568   ;;  %v6243_v14 = vld [vmem:[#allocation4 + $0x40] ss:$2 sm:$0xff] }
 0x4c2   : > { %3185 = vst.msk [vmem:[#allocation3 + $0xa0] sm:$0xff] %vm18706_vm0, %v3109_v18  ;;  %1962 = vrot.lane.b32.xlu1 %v16188_v36, %s18583_s8  ;;  %1771 = vrot.lane.b32.xlu0 %v16190_v6, %s18461_s15  ;;  %v6245_v18 = vld [vmem:[#allocation4 + $0x41] ss:$2 sm:$0xff] }
 0x4c4   : > { %v4454_v17 = vpop.permute.xlu1 %4453  ;;  %v3877_v58 = vpop.permute.xlu0 %3876 }
 0x4c5   : > { %4533 = vst.msk [vmem:[#allocation3 + $0x88] sm:$0xff] %vm4515_vm8, %v4454_v17 }
 0x4c6   : > { %3955 = vst.msk [vmem:[#allocation3 + $0x90] sm:$0xff] %vm18707_vm2, %v3877_v58  ;;  %2730 = vrot.lane.b32.xlu1 %v16136_v8, %s18554_s23  ;;  %2539 = vrot.lane.b32.xlu0 %v16128_v15, %s18462_s10 }
 0x4c8   : > { %v1575_v49 = vpop.permute.xlu1 %1574  ;;  %v4645_v57 = vpop.permute.xlu0 %4644 }
 0x4c9   : > { %1646 = vst.msk [vmem:[#allocation3 + $0xc8] sm:$0xff] %vm18703_vm14, %v1575_v49  ;;  %vm18710_vm14 = vmmov %vm18708_vm10  ;;  %v6250_v49 = vmax.f32 %v6243_v14, %v6245_v18 }
 0x4ca   : > { %4725 = vst.msk [vmem:[#allocation3 + $0x80] sm:$0xff] %vm18708_vm10, %v4645_v57  ;;  %3498 = vrot.lane.b32.xlu1 %v16095_v12, %s18558_s12  ;;  %3307 = vrot.lane.b32.xlu0 %v16081_v1, %s18463_s18  ;;  %vm18711_vm10 = vcmask 162968  }
 0x4cc   : > { %v2343_v43 = vpop.permute.xlu1 %2342  ;;  %v1766_v7 = vpop.permute.xlu0 %1765 }
 0x4cd   : > { %2416 = vst.msk [vmem:[#allocation3 + $0xb8] sm:$0xff] %vm18704_vm6, %v2343_v43  ;;  %vm18712_vm6 = vcmask 39968  }
 0x4ce   : > { %1838 = vst.msk [vmem:[#allocation3 + $0xc0] sm:$0xff] %vm18709_vm7, %v1766_v7  ;;  %4266 = vrot.lane.b32.xlu1 %v16023_v24, %s18560_s19  ;;  %4075 = vrot.lane.b32.xlu0 %v16025_v33, %s18464_s22  ;;  %vm18713_vm7 = vcmask 195768  }
 0x4d0   : > { %v3111_v50 = vpop.permute.xlu1 %3110  ;;  %v2534_v37 = vpop.permute.xlu0 %2533 }
 0x4d1   : > { %3186 = vst.msk [vmem:[#allocation3 + $0xa8] sm:$0xff] %vm18706_vm0, %v3111_v50  ;;  %vm18714_vm0 = vcmask 72768  }
 0x4d2   : > { %2608 = vst.msk [vmem:[#allocation3 + $0xb0] sm:$0xff] %vm2585_vm11, %v2534_v37  ;;  %5034 = vrot.lane.b32.xlu1 %v15980_v48, %s18547_s17  ;;  %4843 = vrot.lane.b32.xlu0 %v16039_v42, %s18466_s25  ;;  %v16232_v48 = vld [vmem:[#allocation2 + $0xeb] sm:$0xff] }
 0x4d4   : > { %v3879_v24 = vpop.permute.xlu1 %3878  ;;  %v3302_v16 = vpop.permute.xlu0 %3301 }
 0x4d5   : > { %3956 = vst.msk [vmem:[#allocation3 + $0x98] sm:$0xff] %vm18707_vm2, %v3879_v24  ;;  %vm18715_vm2 = vcmask 64568  }
 0x4d6   : > { %3378 = vst.msk [vmem:[#allocation3 + $0xa0] sm:$0xff] %vm3357_vm15, %v3302_v16  ;;  %1387 = vrot.lane.b32.xlu1 %v16222_v32, %s18489_s14  ;;  %1196 = vrot.lane.b32.xlu0 %v16224_v31, %s18519_s9  ;;  %v16314_v16 = vld [vmem:[#allocation2 + $0xf9] sm:$0xff] }
 0x4d8   : > { %v4647_v63 = vpop.permute.xlu1 %4646  ;;  %v4070_v42 = vpop.permute.xlu0 %4069 }
 0x4d9   : > { %4726 = vst.msk [vmem:[#allocation3 + $0x88] sm:$0xff] %vm18710_vm14, %v4647_v63  ;;  %vm18716_vm14 = vcmask 138368  }
 0x4da   : > { %4148 = vst.msk [vmem:[#allocation3 + $0x90] sm:$0xff] %vm18711_vm10, %v4070_v42  ;;  %2155 = vrot.lane.b32.xlu1 %v16179_v9, %s18682_s7  ;;  %1964 = vrot.lane.b32.xlu0 %v16232_v48, %s18583_s8 }
 0x4dc   : > { %v1191_v21 = vpop.permute.xlu1 %1190  ;;  %v4838_v56 = vpop.permute.xlu0 %4837 }
 0x4dd   : > { %1261 = vst.msk [vmem:[#allocation3 + $0xd0] sm:$0xff] %vm18712_vm6, %v1191_v21  ;;  %vm18717_vm6 = vcmask 130048   ;;  %v16326_v21 = vld [vmem:[#allocation2 + $0xf2] sm:$0xff] }
 0x4de   : > { %4918 = vst.msk [vmem:[#allocation3 + $0x80] sm:$0xff] %vm18713_vm7, %v4838_v56  ;;  %2923 = vrot.lane.b32.xlu1 %v16188_v36, %s18522_s21  ;;  %2732 = vrot.lane.b32.xlu0 %v16190_v6, %s18554_s23  ;;  %vm18718_vm7 = vmmov %vm18717_vm6 }
 0x4e0   : > { %v1959_v13 = vpop.permute.xlu1 %1958  ;;  %v1768_v45 = vpop.permute.xlu0 %1767 }
 0x4e1   : > { %2031 = vst.msk [vmem:[#allocation3 + $0xc0] sm:$0xff] %vm18714_vm0, %v1959_v13  ;;  %vm18719_vm0 = vcmask 203968  }
 0x4e2   : > { %1839 = vst.msk [vmem:[#allocation3 + $0xc8] sm:$0xff] %vm18715_vm2, %v1768_v45  ;;  %3691 = vrot.lane.b32.xlu1 %v16136_v8, %s18557_s29  ;;  %3500 = vrot.lane.b32.xlu0 %v16128_v15, %s18558_s12  ;;  %vm18720_vm2 = vcmask 195768   ;;  %v7552_v45 = vld [vmem:[#allocation5 + $0x11] sm:$0xff] }
 0x4e4   : > { %v2727_v60 = vpop.permute.xlu1 %2726  ;;  %v2536_v30 = vpop.permute.xlu0 %2535 }
 0x4e5   : > { %2801 = vst.msk [vmem:[#allocation3 + $0xb0] sm:$0xff] %vm2778_vm12, %v2727_v60 }
 0x4e6   : > { %2609 = vst.msk [vmem:[#allocation3 + $0xb8] sm:$0xff] %vm2585_vm11, %v2536_v30  ;;  %4459 = vrot.lane.b32.xlu1 %v16095_v12, %s18559_s13  ;;  %4268 = vrot.lane.b32.xlu0 %v16081_v1, %s18560_s19  ;;  %v5144_v1 = vadd.s32 128, %v14781_v19 }
 0x4e8   : > { %v3495_v23 = vpop.permute.xlu1 %3494  ;;  %v3304_v10 = vpop.permute.xlu0 %3303 }
 0x4e9   : > { %3571 = vst.msk [vmem:[#allocation3 + $0xa0] sm:$0xff] %vm18716_vm14, %v3495_v23 }
 0x4ea   : > { %3379 = vst.msk [vmem:[#allocation3 + $0xa8] sm:$0xff] %vm3357_vm15, %v3304_v10  ;;  %v12750_v27 = vpop.f32.mrb[10].mxu1  ;;  %1389 = vrot.lane.b32.xlu1 %v16258_v54, %s18489_s14  ;;  %5036 = vrot.lane.b32.xlu0 %v16025_v33, %s18547_s17  ;;  %v5276_v33 = vand.u32 15, %v5144_v1 }
 0x4eb   : > { %v5878_v12 = vadd.f32 %v16092_v47, %v12750_v27  ;;  %v5872_v62 = vpop.f32.mrb[11].mxu1 }
 0x4ec   : > { %v5873_v22 = vadd.f32 %v16092_v47, %v5872_v62  ;;  %v4263_v51 = vpop.permute.xlu1 %4262  ;;  %v4072_v61 = vpop.permute.xlu0 %4071  ;;  %vm16287_vm14 = vcmp.ge.s32.totalorder %v5276_v33, %v14790_v2 }
 0x4ed   : > { %v5912_v35 = vmax.f32 %v5878_v12, 0.0  ;;  %4341 = vst.msk [vmem:[#allocation3 + $0x90] sm:$0xff] %vm4322_vm4, %v4263_v51 }
 0x4ee   : > { %4149 = vst.msk [vmem:[#allocation3 + $0x98] sm:$0xff] %vm18711_vm10, %v4072_v61  ;;  %v5911_v3 = vmax.f32 %v5873_v22, 0.0  ;;  %2157 = vrot.lane.b32.xlu1 %v16224_v31, %s18682_s7  ;;  %1580 = vrot.lane.b32.xlu0 %v16267_v52, %s18563_s0  ;;  %vm16292_vm10 = vcmp.lt.s32.totalorder %v5276_v33, %v14792_v28 }
 0x4ef   : > { %5929 = vst.msk [vmem:[#allocation4 + $0x58] sm:$0xff] %vm18717_vm6, %v5912_v35  ;;  %vm18725_vm6 = vcmask 7168   ;;  %v16375_v35 = vld [vmem:[#allocation2 + $0xf4] sm:$0xff] }
 0x4f0   : > { %5928 = vst.msk [vmem:[#allocation4 + $0x50] sm:$0xff] %vm18718_vm7, %v5911_v3  ;;  %v5031_v46 = vpop.permute.xlu1 %5030  ;;  %v4840_v5 = vpop.permute.xlu0 %4839  ;;  %vm18726_vm7 = vcmask 39968  }
 0x4f1   : > { %5111 = vst.msk [vmem:[#allocation3 + $0x80] sm:$0xff] %vm18719_vm0, %v5031_v46  ;;  %vm5644_vm0 = vmand %vm16287_vm14, %vm16292_vm10  ;;  %vm18728_vm14 = vcmask 130048   ;;  %vm18729_vm10 = vcmask 146568  }
 0x4f2   : > { %4919 = vst.msk [vmem:[#allocation3 + $0x88] sm:$0xff] %vm18720_vm2, %v4840_v5  ;;  %2925 = vrot.lane.b32.xlu1 %v16232_v48, %s18522_s21  ;;  %2348 = vrot.lane.b32.xlu0 %v16222_v32, %s18528_s26  ;;  %vm18727_vm2 = vcmask 72768  }
 0x4f3   : > { %429 = vst.msk [vmem:[#allocation2 + $0x112] sm:$0xff] %vm18725_vm6, %v397_v26  ;;  %vm18730_vm6 = vcmask 138368  }
 0x4f4   : > { %v1384_v55 = vpop.permute.xlu1 %1383  ;;  %v1193_v44 = vpop.permute.xlu0 %1192 }
 0x4f5   : > { %1454 = vst.msk [vmem:[#allocation3 + $0xd0] sm:$0xff] %vm1427_vm5, %v1384_v55  ;;  %v398_v55 = vld [vmem:[%s13857_s11 + $0xf8] sm:$0xff] }
 0x4f6   : > { %1262 = vst.msk [vmem:[#allocation3 + $0xd8] sm:$0xff] %vm18726_vm7, %v1193_v44  ;;  %3693 = vrot.lane.b32.xlu1 %v16190_v6, %s18557_s29  ;;  %3116 = vrot.lane.b32.xlu0 %v16179_v9, %s18470_s16 }
 0x4f7   : > { %v6247_v17 = vld [vmem:[#allocation4 + $0x50] ss:$2 sm:$0xff]  ;;  %v6249_v58 = vld [vmem:[#allocation4 + $0x51] ss:$2 sm:$0xff] }
 0x4f8   : > { %v6251_v57 = vmax.f32 %v6247_v17, %v6249_v58  ;;  %v2152_v43 = vpop.permute.xlu1 %2151  ;;  %v1961_v7 = vpop.permute.xlu0 %1960  ;;  %v5934_v50 = vld [vmem:[#allocation3 + $0x80] sm:$0xff] }
 0x4f9   : > { %2224 = vst.msk [vmem:[#allocation3 + $0xc0] sm:$0xff] %vm2199_vm9, %v2152_v43  ;;  %v5950_v37 = vsel %vm5644_vm0, %v5934_v50, 0.0  ;;  %vm18731_vm0 = vmmov %vm18728_vm14  ;;  %v16420_v43 = vld [vmem:[#allocation2 + $0x100] sm:$0xff] }
 0x4fa   : > { %2032 = vst.msk [vmem:[#allocation3 + $0xc8] sm:$0xff] %vm18727_vm2, %v1961_v7  ;;  %v6252_v24 = vmax.f32 %v6250_v49, %v6251_v57  ;;  %4461 = vrot.lane.b32.xlu1 %v16128_v15, %s18559_s13  ;;  %3884 = vrot.lane.b32.xlu0 %v16188_v36, %s18534_s30  ;;  %v16324_v15 = vand.u32 7, %v15016_v11  ;;  %v5145_v11 = vadd.s32 136, %v14781_v19  ;;  %vm18732_vm2 = vcmp.ge.s32.totalorder %v15305_v53, 1 }
 0x4fb   : > { %12765 = vmatprep.mubr.msk.f32.mxu1 %vm5703_vm3, %v5950_v37  ;;  %v7560_v10 = vsel %vm18732_vm2, %v7552_v45, 0.0  ;;  %vm18736_vm2 = vmmov %vm18731_vm0 }
 0x4fc   : > { %6253 = vst.msk [vmem:[#allocation5 + $0x22] sm:$0xff] %vm18728_vm14, %v6252_v24  ;;  %v2920_v63 = vpop.permute.xlu1 %2919  ;;  %v2729_v42 = vpop.permute.xlu0 %2728  ;;  %vm7205_vm7 = vcmp.ge.s32.totalorder %v16324_v15, 1  ;;  %vm18733_vm14 = vmmov %vm18731_vm0  ;;  %v5283_v27 = vand.u32 15, %v5145_v11  ;;  %v16430_v24 = vld [vmem:[#allocation2 + $0xfb] sm:$0xff] }
 0x4fd   : > { %2994 = vst.msk [vmem:[#allocation3 + $0xb0] sm:$0xff] %vm2971_vm13, %v2920_v63 }
 0x4fe   : > { %2802 = vst.msk [vmem:[#allocation3 + $0xb8] sm:$0xff] %vm2778_vm12, %v2729_v42  ;;  %1582 = vrot.lane.b32.xlu1 %v16314_v16, %s18563_s0  ;;  %4652 = vrot.lane.b32.xlu0 %v16136_v8, %s18504_s24 }
 0x500   : > { %v3688_v56 = vpop.permute.xlu1 %3687  ;;  %v3497_v13 = vpop.permute.xlu0 %3496 }
 0x501   : > { %3764 = vst.msk [vmem:[#allocation3 + $0xa0] sm:$0xff] %vm18729_vm10, %v3688_v56  ;;  %vm18734_vm10 = vcmp.ge.s32.totalorder %v15590_v4, 1 }
 0x502   : > { %3572 = vst.msk [vmem:[#allocation3 + $0xa8] sm:$0xff] %vm18730_vm6, %v3497_v13  ;;  %2350 = vrot.lane.b32.xlu1 %v16258_v54, %s18528_s26  ;;  %1773 = vrot.lane.b32.xlu0 %v16326_v21, %s18461_s15  ;;  %v7561_v1 = vsel %vm18734_vm10, %v15947_v25, 0.0  ;;  %vm18735_vm6 = vcmask 203968   ;;  %vm5613_vm10 = vcmp.lt.s32.totalorder %v5283_v27, %v14792_v28 }
 0x503   : > { %v7400_v8 = vld [vmem:[#allocation5 + $0x21] sm:$0xff] }
 0x504   : > { %v4456_v60 = vpop.permute.xlu1 %4455  ;;  %v4265_v30 = vpop.permute.xlu0 %4264  ;;  %v7408_v23 = vsel %vm7205_vm7, %v7400_v8, 0.0  ;;  %v7562_v22 = vsel %vm7204_vm1, %v7400_v8, 0.0  ;;  %v16456_v8 = vld [vmem:[#allocation2 + $0x108] sm:$0xff] }
 0x505   : > { %4534 = vst.msk [vmem:[#allocation3 + $0x90] sm:$0xff] %vm4515_vm8, %v4456_v60  ;;  %12893 = vmatmul.mubr.msk.f32.gmra.mrb[2].mxu0 %vm18731_vm0, %v7408_v23 }
 0x506   : > { %4342 = vst.msk [vmem:[#allocation3 + $0x98] sm:$0xff] %vm4322_vm4, %v4265_v30  ;;  %12905 = vmatprep.mubr.msk.f32.mxu0 %vm18733_vm14, %v7560_v10  ;;  %3118 = vrot.lane.b32.xlu1 %v16224_v31, %s18470_s16  ;;  %vm16362_vm14 = vcmp.ge.s32.totalorder %v5283_v27, %v14790_v2 }
 0x507   : > { %2541 = vrot.lane.b32.xlu0 %v16267_v52, %s18462_s10 }
 0x508   : > { %v1386_v12 = vpop.permute.xlu1 %1385  ;;  %v5033_v62 = vpop.permute.xlu0 %5032 }
 0x509   : > { %1455 = vst.msk [vmem:[#allocation3 + $0xd8] sm:$0xff] %vm1427_vm5, %v1386_v12  ;;  %12906 = vmatmul.mubr.msk.f32.vlgmr.msra.gmra.mrb[0].mxu0 %vm18731_vm0, %v7561_v1  ;;  %vm5645_vm0 = vmand %vm16362_vm14, %vm5613_vm10  ;;  %vm18741_vm14 = vcmask 146568   ;;  %vm18742_vm10 = vcmask 121968  }
 0x50a   : > { %5112 = vst.msk [vmem:[#allocation3 + $0x88] sm:$0xff] %vm18735_vm6, %v5033_v62  ;;  %12908 = vmatprep.mubr.msk.f32.mxu0 %vm18736_vm2, %v7562_v22  ;;  %3886 = vrot.lane.b32.xlu1 %v16232_v48, %s18534_s30  ;;  %vm18739_vm6 = vcmask 56368   ;;  %vm18740_vm2 = vcmask 89168   ;;  %v16467_v62 = vld [vmem:[#allocation2 + $0x101] sm:$0xff] }
 0x50b   : > { %3309 = vrot.lane.b32.xlu0 %v16222_v32, %s18463_s18 }
 0x50c   : > { %v2154_v51 = vpop.permute.xlu1 %2153  ;;  %v1577_v61 = vpop.permute.xlu0 %1576 }
 0x50d   : > { %2225 = vst.msk [vmem:[#allocation3 + $0xc8] sm:$0xff] %vm2199_vm9, %v2154_v51 }
 0x50e   : > { %1647 = vst.msk [vmem:[#allocation3 + $0xd0] sm:$0xff] %vm18739_vm6, %v1577_v61  ;;  %4654 = vrot.lane.b32.xlu1 %v16190_v6, %s18504_s24  ;;  %v16384_v6 = vld [vmem:[#allocation2 + $0xf3] sm:$0xff]  ;;  %vm18743_vm6 = vcmask 7168  }
 0x50f   : > { %4077 = vrot.lane.b32.xlu0 %v16179_v9, %s18464_s22  ;;  %430 = vst.msk [vmem:[#allocation2 + $0x11a] sm:$0xff] %vm18743_vm6, %v398_v55  ;;  %vm18748_vm6 = vcmask 64568  }
 0x510   : > { %v2922_v3 = vpop.permute.xlu1 %2921  ;;  %v2345_v33 = vpop.permute.xlu0 %2344 }
 0x511   : > { %v5935_v46 = vld [vmem:[#allocation3 + $0x88] sm:$0xff]  ;;  %2995 = vst.msk [vmem:[#allocation3 + $0xb8] sm:$0xff] %vm2971_vm13, %v2922_v3 }
 0x512   : > { %2417 = vst.msk [vmem:[#allocation3 + $0xc0] sm:$0xff] %vm18740_vm2, %v2345_v33  ;;  %v5951_v5 = vsel %vm5645_vm0, %v5935_v46, 0.0  ;;  %1198 = vrot.lane.b32.xlu1 %v16375_v35, %s18519_s9  ;;  %vm18744_vm0 = vcmask 154768   ;;  %vm18745_vm2 = vcmask 56368  }
 0x513   : > { %12766 = vmatmul.mubr.msk.f32.vlgmr.msra.gmra.mrb[16].mxu1 %vm5703_vm3, %v5951_v5  ;;  %4845 = vrot.lane.b32.xlu0 %v16188_v36, %s18466_s25 }
 0x514   : > { %v3690_v26 = vpop.permute.xlu1 %3689  ;;  %v3113_v29 = vpop.permute.xlu0 %3112 }
 0x515   : > { %3765 = vst.msk [vmem:[#allocation3 + $0xa8] sm:$0xff] %vm18741_vm14, %v3690_v26  ;;  %vm18746_vm14 = vcmask 187568  }
 0x516   : > { %3187 = vst.msk [vmem:[#allocation3 + $0xb0] sm:$0xff] %vm18742_vm10, %v3113_v29  ;;  %1966 = vrot.lane.b32.xlu1 %v16384_v6, %s18583_s8  ;;  %vm18747_vm10 = vcmask 89168   ;;  %v16498_v29 = vld [vmem:[#allocation2 + $0x109] sm:$0xff] }
 0x517   : > { %1775 = vrot.lane.b32.xlu0 %v16386_v38, %s18461_s15 }
 0x518   : > { %v4458_v36 = vpop.permute.xlu1 %4457  ;;  %v3881_v44 = vpop.permute.xlu0 %3880 }
 0x519   : > { %4535 = vst.msk [vmem:[#allocation3 + $0x98] sm:$0xff] %vm4515_vm8, %v4458_v36 }
 0x51a   : > { %3957 = vst.msk [vmem:[#allocation3 + $0xa0] sm:$0xff] %vm18744_vm0, %v3881_v44  ;;  %2734 = vrot.lane.b32.xlu1 %v16326_v21, %s18554_s23  ;;  %vm18749_vm0 = vcmask 121968  }
 0x51b   : > { %2543 = vrot.lane.b32.xlu0 %v16314_v16, %s18462_s10 }
 0x51c   : > { %v1579_v14 = vpop.permute.xlu1 %1578  ;;  %v4649_v18 = vpop.permute.xlu0 %4648 }
 0x51d   : > { %1648 = vst.msk [vmem:[#allocation3 + $0xd8] sm:$0xff] %vm18745_vm2, %v1579_v14  ;;  %vm18750_vm2 = vcmask 154768   ;;  %v16506_v14 = vld [vmem:[#allocation2 + $0x102] sm:$0xff] }
 0x51e   : > { %4727 = vst.msk [vmem:[#allocation3 + $0x90] sm:$0xff] %vm18746_vm14, %v4649_v18  ;;  %3502 = vrot.lane.b32.xlu1 %v16267_v52, %s18558_s12  ;;  %v5147_v18 = vadd.s32 152, %v14781_v19 }
 0x51f   : > { %3311 = vrot.lane.b32.xlu0 %v16258_v54, %s18463_s18 }
 0x520   : > { %v2347_v17 = vpop.permute.xlu1 %2346  ;;  %v1770_v58 = vpop.permute.xlu0 %1769 }
 0x521   : > { %2418 = vst.msk [vmem:[#allocation3 + $0xc8] sm:$0xff] %vm18747_vm10, %v2347_v17  ;;  %vm18751_vm10 = vcmask 162968  }
 0x522   : > { %1840 = vst.msk [vmem:[#allocation3 + $0xd0] sm:$0xff] %vm18748_vm6, %v1770_v58  ;;  %4270 = vrot.lane.b32.xlu1 %v16222_v32, %s18560_s19  ;;  %v16422_v32 = vld [vmem:[#allocation2 + $0xfc] sm:$0xff]  ;;  %vm18752_vm6 = vcmask 39968  }
 0x523   : > { %4079 = vrot.lane.b32.xlu0 %v16224_v31, %s18464_s22 }
 0x524   : > { %v3115_v49 = vpop.permute.xlu1 %3114  ;;  %v2538_v57 = vpop.permute.xlu0 %2537 }
 0x525   : > { %3188 = vst.msk [vmem:[#allocation3 + $0xb8] sm:$0xff] %vm18749_vm0, %v3115_v49  ;;  %vm18753_vm0 = vcmask 195768  }
 0x526   : > { %2610 = vst.msk [vmem:[#allocation3 + $0xc0] sm:$0xff] %vm2585_vm11, %v2538_v57  ;;  %5038 = vrot.lane.b32.xlu1 %v16179_v9, %s18547_s17 }
 0x527   : > { %4847 = vrot.lane.b32.xlu0 %v16232_v48, %s18466_s25 }
 0x528   : > { %v3883_v7 = vpop.permute.xlu1 %3882  ;;  %v3306_v50 = vpop.permute.xlu0 %3305 }
 0x529   : > { %3958 = vst.msk [vmem:[#allocation3 + $0xa8] sm:$0xff] %vm18750_vm2, %v3883_v7  ;;  %vm18754_vm2 = vcmask 72768  }
 0x52a   : > { %3380 = vst.msk [vmem:[#allocation3 + $0xb0] sm:$0xff] %vm3357_vm15, %v3306_v50  ;;  %1391 = vrot.lane.b32.xlu1 %v16420_v43, %s18489_s14 }
 0x52b   : > { %1200 = vrot.lane.b32.xlu0 %v16422_v32, %s18519_s9 }
 0x52c   : > { %v4651_v9 = vpop.permute.xlu1 %4650  ;;  %v4074_v37 = vpop.permute.xlu0 %4073 }
 0x52d   : > { %4728 = vst.msk [vmem:[#allocation3 + $0x98] sm:$0xff] %vm18746_vm14, %v4651_v9  ;;  %vm18755_vm14 = vcmask 64568  }
 0x52e   : > { %4150 = vst.msk [vmem:[#allocation3 + $0xa0] sm:$0xff] %vm18751_vm10, %v4074_v37  ;;  %2159 = vrot.lane.b32.xlu1 %v16375_v35, %s18682_s7  ;;  %vm18756_vm10 = vcmask 138368   ;;  %v16541_v37 = vld [vmem:[#allocation2 + $0x10a] sm:$0xff] }
 0x52f   : > { %1968 = vrot.lane.b32.xlu0 %v16430_v24, %s18583_s8 }
 0x530   : > { %v1195_v48 = vpop.permute.xlu1 %1194  ;;  %v4842_v63 = vpop.permute.xlu0 %4841 }
 0x531   : > { %1263 = vst.msk [vmem:[#allocation3 + $0xe0] sm:$0xff] %vm18752_vm6, %v1195_v48  ;;  %vm18757_vm6 = vcmask 162968  }
 0x532   : > { %4920 = vst.msk [vmem:[#allocation3 + $0x90] sm:$0xff] %vm18753_vm0, %v4842_v63  ;;  %2927 = vrot.lane.b32.xlu1 %v16384_v6, %s18522_s21  ;;  %vm18758_vm0 = vcmask 130048  }
 0x533   : > { %2736 = vrot.lane.b32.xlu0 %v16386_v38, %s18554_s23 }
 0x534   : > { %v1963_v42 = vpop.permute.xlu1 %1962  ;;  %v1772_v56 = vpop.permute.xlu0 %1771 }
 0x535   : > { %2033 = vst.msk [vmem:[#allocation3 + $0xd0] sm:$0xff] %vm18754_vm2, %v1963_v42  ;;  %vm18759_vm2 = vmmov %vm18758_vm0 }
 0x536   : > { %1841 = vst.msk [vmem:[#allocation3 + $0xd8] sm:$0xff] %vm18755_vm14, %v1772_v56  ;;  %3695 = vrot.lane.b32.xlu1 %v16326_v21, %s18557_s29  ;;  %vm18760_vm14 = vcmask 203968  }
 0x537   : > { %3504 = vrot.lane.b32.xlu0 %v16314_v16, %s18558_s12 }
 0x538   : > { %v2731_v13 = vpop.permute.xlu1 %2730  ;;  %v2540_v45 = vpop.permute.xlu0 %2539 }
 0x539   : > { %2803 = vst.msk [vmem:[#allocation3 + $0xc0] sm:$0xff] %vm2778_vm12, %v2731_v13 }
 0x53a   : > { %2611 = vst.msk [vmem:[#allocation3 + $0xc8] sm:$0xff] %vm2585_vm11, %v2540_v45  ;;  %4463 = vrot.lane.b32.xlu1 %v16267_v52, %s18559_s13  ;;  %v16550_v45 = vld [vmem:[#allocation2 + $0x103] sm:$0xff] }
 0x53b   : > { %4272 = vrot.lane.b32.xlu0 %v16258_v54, %s18560_s19  ;;  %v5146_v54 = vadd.s32 144, %v14781_v19 }
 0x53c   : > { %v3499_v11 = vpop.permute.xlu1 %3498  ;;  %v3308_v60 = vpop.permute.xlu0 %3307 }
 0x53d   : > { %3573 = vst.msk [vmem:[#allocation3 + $0xb0] sm:$0xff] %vm18756_vm10, %v3499_v11  ;;  %vm18761_vm10 = vcmask 195768  }
 0x53e   : > { %3381 = vst.msk [vmem:[#allocation3 + $0xb8] sm:$0xff] %vm3357_vm15, %v3308_v60  ;;  %v12753_v30 = vpop.f32.mrb[12].mxu1  ;;  %1393 = vrot.lane.b32.xlu1 %v16456_v8, %s18489_s14 }
 0x53f   : > { %v5888_v23 = vadd.f32 %v16092_v47, %v12753_v30  ;;  %5040 = vrot.lane.b32.xlu0 %v16224_v31, %s18547_s17  ;;  %v5882_v52 = vpop.f32.mrb[13].mxu1  ;;  %v5290_v31 = vand.u32 15, %v5146_v54  ;;  %v16576_v54 = vld [vmem:[#allocation2 + $0x10b] sm:$0xff] }
 0x540   : > { %v5883_v10 = vadd.f32 %v16092_v47, %v5882_v52  ;;  %v4267_v27 = vpop.permute.xlu1 %4266  ;;  %v4076_v12 = vpop.permute.xlu0 %4075 }
 0x541   : > { %v5914_v1 = vmax.f32 %v5888_v23, 0.0  ;;  %4343 = vst.msk [vmem:[#allocation3 + $0xa0] sm:$0xff] %vm4322_vm4, %v4267_v27 }
 0x542   : > { %4151 = vst.msk [vmem:[#allocation3 + $0xa8] sm:$0xff] %vm18757_vm6, %v4076_v12  ;;  %v5913_v22 = vmax.f32 %v5883_v10, 0.0  ;;  %2161 = vrot.lane.b32.xlu1 %v16422_v32, %s18682_s7  ;;  %vm5581_vm6 = vcmp.ge.s32.totalorder %v5290_v31, %v14790_v2 }
 0x543   : > { %5931 = vst.msk [vmem:[#allocation4 + $0x68] sm:$0xff] %vm18758_vm0, %v5914_v1  ;;  %1584 = vrot.lane.b32.xlu0 %v16467_v62, %s18563_s0  ;;  %vm5614_vm0 = vcmp.lt.s32.totalorder %v5290_v31, %v14792_v28  ;;  %v16584_v1 = vld [vmem:[#allocation2 + $0x104] sm:$0xff] }
 0x544   : > { %5930 = vst.msk [vmem:[#allocation4 + $0x60] sm:$0xff] %vm18759_vm2, %v5913_v22  ;;  %v5035_v25 = vpop.permute.xlu1 %5034  ;;  %v4844_v51 = vpop.permute.xlu0 %4843  ;;  %vm18762_vm2 = vcmask 39968  }
 0x545   : > { %5113 = vst.msk [vmem:[#allocation3 + $0x90] sm:$0xff] %vm18760_vm14, %v5035_v25  ;;  %vm5646_vm14 = vmand %vm5581_vm6, %vm5614_vm0  ;;  %vm18764_vm6 = vcmask 146568   ;;  %vm18765_vm0 = vcmask 138368  }
 0x546   : > { %4921 = vst.msk [vmem:[#allocation3 + $0x98] sm:$0xff] %vm18761_vm10, %v4844_v51  ;;  %2929 = vrot.lane.b32.xlu1 %v16430_v24, %s18522_s21  ;;  %vm18763_vm10 = vcmask 72768  }
 0x547   : > { %2352 = vrot.lane.b32.xlu0 %v16420_v43, %s18528_s26 }
 0x548   : > { %v1388_v61 = vpop.permute.xlu1 %1387  ;;  %v1197_v3 = vpop.permute.xlu0 %1196 }
 0x549   : > { %1456 = vst.msk [vmem:[#allocation3 + $0xe0] sm:$0xff] %vm1427_vm5, %v1388_v61  ;;  %v16610_v61 = vld [vmem:[#allocation2 + $0x110] sm:$0xff] }
 0x54a   : > { %1264 = vst.msk [vmem:[#allocation3 + $0xe8] sm:$0xff] %vm18762_vm2, %v1197_v3  ;;  %3697 = vrot.lane.b32.xlu1 %v16386_v38, %s18557_s29  ;;  %vm18766_vm2 = vcmask 203968  }
 0x54b   : > { %3120 = vrot.lane.b32.xlu0 %v16375_v35, %s18470_s16 }
 0x54c   : > { %v2156_v33 = vpop.permute.xlu1 %2155  ;;  %v1965_v46 = vpop.permute.xlu0 %1964  ;;  %v5936_v5 = vld [vmem:[#allocation3 + $0x90] sm:$0xff] }
 0x54d   : > { %2226 = vst.msk [vmem:[#allocation3 + $0xd0] sm:$0xff] %vm2199_vm9, %v2156_v33  ;;  %v5952_v26 = vsel %vm5646_vm14, %v5936_v5, 0.0  ;;  %v16612_v33 = vld [vmem:[#allocation2 + $0x10c] sm:$0xff] }
 0x54e   : > { %2034 = vst.msk [vmem:[#allocation3 + $0xd8] sm:$0xff] %vm18763_vm10, %v1965_v46  ;;  %4465 = vrot.lane.b32.xlu1 %v16314_v16, %s18559_s13  ;;  %12768 = vmatprep.mubr.msk.f32.mxu1 %vm5703_vm3, %v5952_v26 }
 0x54f   : > { %3888 = vrot.lane.b32.xlu0 %v16384_v6, %s18534_s30 }
 0x550   : > { %v2924_v55 = vpop.permute.xlu1 %2923  ;;  %v2733_v36 = vpop.permute.xlu0 %2732 }
 0x551   : > { %2996 = vst.msk [vmem:[#allocation3 + $0xc0] sm:$0xff] %vm2971_vm13, %v2924_v55  ;;  %v5148_v55 = vadd.s32 160, %v14781_v19 }
 0x552   : > { %2804 = vst.msk [vmem:[#allocation3 + $0xc8] sm:$0xff] %vm2778_vm12, %v2733_v36  ;;  %1586 = vrot.lane.b32.xlu1 %v16498_v29, %s18563_s0  ;;  %s19082_s0 = sld [smem:[#allocation12_spill]] }
 0x553   : > { %4656 = vrot.lane.b32.xlu0 %v16326_v21, %s18504_s24  ;;  %v5297_v21 = vand.u32 15, %v5147_v18 }
 0x554   : > { %v3692_v16 = vpop.permute.xlu1 %3691  ;;  %v3501_v44 = vpop.permute.xlu0 %3500 }
 0x555   : > { %3766 = vst.msk [vmem:[#allocation3 + $0xb0] sm:$0xff] %vm18764_vm6, %v3692_v16  ;;  %vm16528_vm14 = vcmp.ge.s32.totalorder %v5297_v21, %v14790_v2  ;;  %vm5615_vm10 = vcmp.lt.s32.totalorder %v5297_v21, %v14792_v28  ;;  %vm18769_vm6 = vcmask 56368  }
 0x556   : > { %3574 = vst.msk [vmem:[#allocation3 + $0xb8] sm:$0xff] %vm18765_vm0, %v3501_v44  ;;  %2354 = vrot.lane.b32.xlu1 %v16456_v8, %s18528_s26  ;;  %vm5647_vm0 = vmand %vm16528_vm14, %vm5615_vm10  ;;  %vm18771_vm14 = vcmask 146568   ;;  %vm18772_vm10 = vcmask 121968  }
 0x557   : > { %1777 = vrot.lane.b32.xlu0 %v16506_v14, %s18461_s15 }
 0x558   : > { %v4460_v17 = vpop.permute.xlu1 %4459  ;;  %v4269_v58 = vpop.permute.xlu0 %4268 }
 0x559   : > { %4536 = vst.msk [vmem:[#allocation3 + $0xa0] sm:$0xff] %vm4515_vm8, %v4460_v17 }
 0x55a   : > { %4344 = vst.msk [vmem:[#allocation3 + $0xa8] sm:$0xff] %vm4322_vm4, %v4269_v58  ;;  %3122 = vrot.lane.b32.xlu1 %v16422_v32, %s18470_s16  ;;  %v5304_v58 = vand.u32 15, %v5148_v55  ;;  %v2649_v55 = vld [vmem:[#allocation2 + $0x11a] sm:$0xff] }
 0x55b   : > { %2545 = vrot.lane.b32.xlu0 %v16467_v62, %s18462_s10 }
 0x55c   : > { %v1390_v49 = vpop.permute.xlu1 %1389  ;;  %v5037_v57 = vpop.permute.xlu0 %5036 }
 0x55d   : > { %1457 = vst.msk [vmem:[#allocation3 + $0xe8] sm:$0xff] %vm1427_vm5, %v1390_v49  ;;  %v16644_v49 = vld [vmem:[#allocation2 + $0x111] sm:$0xff] }
 0x55e   : > { %5114 = vst.msk [vmem:[#allocation3 + $0x98] sm:$0xff] %vm18766_vm2, %v5037_v57  ;;  %3890 = vrot.lane.b32.xlu1 %v16430_v24, %s18534_s30  ;;  %vm18770_vm2 = vcmask 89168  }
 0x55f   : > { %3313 = vrot.lane.b32.xlu0 %v16420_v43, %s18463_s18 }
 0x560   : > { %v2158_v50 = vpop.permute.xlu1 %2157  ;;  %v1581_v9 = vpop.permute.xlu0 %1580 }
 0x561   : > { %2227 = vst.msk [vmem:[#allocation3 + $0xd8] sm:$0xff] %vm2199_vm9, %v2158_v50 }
 0x562   : > { %1649 = vst.msk [vmem:[#allocation3 + $0xe0] sm:$0xff] %vm18769_vm6, %v1581_v9  ;;  %4658 = vrot.lane.b32.xlu1 %v16386_v38, %s18504_s24  ;;  %vm18773_vm6 = vcmask 154768   ;;  %v16656_v9 = vld [vmem:[#allocation2 + $0x118] sm:$0xff] }
 0x563   : > { %4081 = vrot.lane.b32.xlu0 %v16375_v35, %s18464_s22 }
 0x564   : > { %v2926_v48 = vpop.permute.xlu1 %2925  ;;  %v2349_v63 = vpop.permute.xlu0 %2348 }
 0x565   : > { %v5937_v42 = vld [vmem:[#allocation3 + $0x98] sm:$0xff]  ;;  %2997 = vst.msk [vmem:[#allocation3 + $0xc8] sm:$0xff] %vm2971_vm13, %v2926_v48  ;;  %v6255_v48 = vld [vmem:[#allocation4 + $0x60] ss:$2 sm:$0xff] }
 0x566   : > { %2419 = vst.msk [vmem:[#allocation3 + $0xd0] sm:$0xff] %vm18770_vm2, %v2349_v63  ;;  %v5953_v56 = vsel %vm5647_vm0, %v5937_v42, 0.0  ;;  %1779 = vrot.lane.b32.xlu1 %v16541_v37, %s18461_s15  ;;  %vm18774_vm0 = vcmask 56368   ;;  %vm18775_vm2 = vcmask 187568  }
 0x567   : > { %12769 = vmatmul.mubr.msk.f32.gmra.mrb[18].mxu1 %vm5703_vm3, %v5953_v56  ;;  %4849 = vrot.lane.b32.xlu0 %v16384_v6, %s18466_s25 }
 0x568   : > { %v3694_v38 = vpop.permute.xlu1 %3693  ;;  %v3117_v13 = vpop.permute.xlu0 %3116 }
 0x569   : > { %3767 = vst.msk [vmem:[#allocation3 + $0xb8] sm:$0xff] %vm18771_vm14, %v3694_v38  ;;  %vm18776_vm14 = vcmask 89168  }
 0x56a   : > { %3189 = vst.msk [vmem:[#allocation3 + $0xc0] sm:$0xff] %vm18772_vm10, %v3117_v13  ;;  %2547 = vrot.lane.b32.xlu1 %v16498_v29, %s18462_s10  ;;  %vm18777_vm10 = vcmask 64568  }
 0x56b   : > { %1970 = vrot.lane.b32.xlu0 %v16550_v45, %s18583_s8 }
 0x56c   : > { %v4462_v11 = vpop.permute.xlu1 %4461  ;;  %v3885_v60 = vpop.permute.xlu0 %3884 }
 0x56d   : > { %4537 = vst.msk [vmem:[#allocation3 + $0xa8] sm:$0xff] %vm4515_vm8, %v4462_v11 }
 0x56e   : > { %3959 = vst.msk [vmem:[#allocation3 + $0xb0] sm:$0xff] %vm18773_vm6, %v3885_v60  ;;  %3315 = vrot.lane.b32.xlu1 %v16456_v8, %s18463_s18  ;;  %vm18778_vm6 = vcmask 121968  }
 0x56f   : > { %2738 = vrot.lane.b32.xlu0 %v16506_v14, %s18554_s23 }
 0x570   : > { %v1583_v6 = vpop.permute.xlu1 %1582  ;;  %v4653_v30 = vpop.permute.xlu0 %4652 }
 0x571   : > { %1650 = vst.msk [vmem:[#allocation3 + $0xe8] sm:$0xff] %vm18774_vm0, %v1583_v6  ;;  %vm18779_vm0 = vcmask 154768  }
 0x572   : > { %4729 = vst.msk [vmem:[#allocation3 + $0xa0] sm:$0xff] %vm18775_vm2, %v4653_v30  ;;  %4083 = vrot.lane.b32.xlu1 %v16422_v32, %s18464_s22 }
 0x573   : > { %3506 = vrot.lane.b32.xlu0 %v16467_v62, %s18558_s12 }
 0x574   : > { %v2351_v23 = vpop.permute.xlu1 %2350  ;;  %v1774_v52 = vpop.permute.xlu0 %1773 }
 0x575   : > { %2420 = vst.msk [vmem:[#allocation3 + $0xd8] sm:$0xff] %vm18776_vm14, %v2351_v23  ;;  %vm18780_vm14 = vcmask 162968  }
 0x576   : > { %1842 = vst.msk [vmem:[#allocation3 + $0xe0] sm:$0xff] %vm18777_vm10, %v1774_v52  ;;  %4851 = vrot.lane.b32.xlu1 %v16430_v24, %s18466_s25  ;;  %vm18781_vm10 = vcmask 39968  }
 0x577   : > { %4274 = vrot.lane.b32.xlu0 %v16420_v43, %s18560_s19 }
 0x578   : > { %v3119_v10 = vpop.permute.xlu1 %3118 }
 0x579   : > { %3190 = vst.msk [vmem:[#allocation3 + $0xc8] sm:$0xff] %vm18778_vm6, %v3119_v10  ;;  %v2542_v27 = vpop.permute.xlu0 %2541  ;;  %vm18782_vm6 = vcmask 195768  }
 0x57a   : > { %2612 = vst.msk [vmem:[#allocation3 + $0xd0] sm:$0xff] %vm2585_vm11, %v2542_v27  ;;  %1972 = vrot.lane.b32.xlu1 %v16576_v54, %s18583_s8  ;;  %s19081_s8 = sld [smem:[#allocation10_spill]] }
 0x57b   : > { %5042 = vrot.lane.b32.xlu0 %v16375_v35, %s18547_s17 }
 0x57c   : > { %v3887_v12 = vpop.permute.xlu1 %3886 }
 0x57d   : > { %3960 = vst.msk [vmem:[#allocation3 + $0xb8] sm:$0xff] %vm18779_vm0, %v3887_v12  ;;  %v3310_v43 = vpop.permute.xlu0 %3309  ;;  %vm18783_vm0 = vcmask 72768  }
 0x57e   : > { %3382 = vst.msk [vmem:[#allocation3 + $0xc0] sm:$0xff] %vm3357_vm15, %v3310_v43  ;;  %2740 = vrot.lane.b32.xlu1 %v16541_v37, %s18554_s23  ;;  %v16688_v43 = vld [vmem:[#allocation2 + $0x112] sm:$0xff] }
 0x57f   : > { %2163 = vrot.lane.b32.xlu0 %v16584_v1, %s18682_s7 }
 0x580   : > { %v4655_v24 = vpop.permute.xlu1 %4654 }
 0x581   : > { %4730 = vst.msk [vmem:[#allocation3 + $0xa8] sm:$0xff] %vm18775_vm2, %v4655_v24  ;;  %v4078_v22 = vpop.permute.xlu0 %4077  ;;  %vm18784_vm2 = vcmask 64568  }
 0x582   : > { %4152 = vst.msk [vmem:[#allocation3 + $0xb0] sm:$0xff] %vm18780_vm14, %v4078_v22  ;;  %3508 = vrot.lane.b32.xlu1 %v16498_v29, %s18558_s12  ;;  %vm365_vm14 = vcmask 3072  }
 0x583   : > { %2931 = vrot.lane.b32.xlu0 %v16550_v45, %s18522_s21  ;;  %366 = vst.msk [vmem:[#allocation2 + $0x140] sm:$0xf] %vm365_vm14, %v13681_v0  ;;  %vm18789_vm14 = vcmask 203968  }
 0x584   : > { %v1199_v35 = vpop.permute.xlu1 %1198 }
 0x585   : > { %1265 = vst.msk [vmem:[#allocation3 + $0xf0] sm:$0xff] %vm18781_vm10, %v1199_v35  ;;  %v4846_v31 = vpop.permute.xlu0 %4845  ;;  %vm18785_vm10 = vcmask 138368   ;;  %v16692_v35 = vld [vmem:[#allocation2 + $0x119] sm:$0xff] }
 0x586   : > { %4922 = vst.msk [vmem:[#allocation3 + $0xa0] sm:$0xff] %vm18782_vm6, %v4846_v31  ;;  %4276 = vrot.lane.b32.xlu1 %v16456_v8, %s18560_s19  ;;  %vm18786_vm6 = vcmask 162968   ;;  %v5149_v31 = vadd.s32 168, %v14781_v19 }
 0x587   : > { %3699 = vrot.lane.b32.xlu0 %v16506_v14, %s18557_s29 }
 0x588   : > { %v1967_v25 = vpop.permute.xlu1 %1966 }
 0x589   : > { %2035 = vst.msk [vmem:[#allocation3 + $0xe0] sm:$0xff] %vm18783_vm0, %v1967_v25  ;;  %v1776_v51 = vpop.permute.xlu0 %1775  ;;  %vm18787_vm0 = vcmask 130048  }
 0x58a   : > { %1843 = vst.msk [vmem:[#allocation3 + $0xe8] sm:$0xff] %vm18784_vm2, %v1776_v51  ;;  %5044 = vrot.lane.b32.xlu1 %v16422_v32, %s18547_s17  ;;  %vm18788_vm2 = vmmov %vm18787_vm0 }
 0x58b   : > { %4467 = vrot.lane.b32.xlu0 %v16467_v62, %s18559_s13 }
 0x58c   : > { %v2735_v3 = vpop.permute.xlu1 %2734 }
 0x58d   : > { %2805 = vst.msk [vmem:[#allocation3 + $0xd0] sm:$0xff] %vm2778_vm12, %v2735_v3  ;;  %v2544_v8 = vpop.permute.xlu0 %2543 }
 0x58e   : > { %2613 = vst.msk [vmem:[#allocation3 + $0xd8] sm:$0xff] %vm2585_vm11, %v2544_v8  ;;  %2356 = vrot.lane.b32.xlu1 %v16610_v61, %s18528_s26 }
 0x58f   : > { %2165 = vrot.lane.b32.xlu0 %v16612_v33, %s18682_s7 }
 0x590   : > { %v3503_v32 = vpop.permute.xlu1 %3502 }
 0x591   : > { %3575 = vst.msk [vmem:[#allocation3 + $0xc0] sm:$0xff] %vm18785_vm10, %v3503_v32  ;;  %v3312_v62 = vpop.permute.xlu0 %3311  ;;  %vm18790_vm10 = vcmask 195768  }
 0x592   : > { %3383 = vst.msk [vmem:[#allocation3 + $0xc8] sm:$0xff] %vm3357_vm15, %v3312_v62  ;;  %v12756_v46 = vpop.f32.mrb[14].mxu1  ;;  %3124 = vrot.lane.b32.xlu1 %v16584_v1, %s18470_s16 }
 0x593   : > { %v5898_v5 = vadd.f32 %v16092_v47, %v12756_v46  ;;  %2933 = vrot.lane.b32.xlu0 %v16576_v54, %s18522_s21  ;;  %v5892_v26 = vpop.f32.mrb[15].mxu1 }
 0x594   : > { %v5893_v36 = vadd.f32 %v16092_v47, %v5892_v26  ;;  %v4271_v16 = vpop.permute.xlu1 %4270 }
 0x595   : > { %v5916_v44 = vmax.f32 %v5898_v5, 0.0  ;;  %4345 = vst.msk [vmem:[#allocation3 + $0xb0] sm:$0xff] %vm4322_vm4, %v4271_v16  ;;  %v4080_v18 = vpop.permute.xlu0 %4079 }
 0x596   : > { %v5915_v17 = vmax.f32 %v5893_v36, 0.0  ;;  %4153 = vst.msk [vmem:[#allocation3 + $0xb8] sm:$0xff] %vm18786_vm6, %v4080_v18  ;;  %3892 = vrot.lane.b32.xlu1 %v16550_v45, %s18534_s30  ;;  %vm16647_vm6 = vcmp.ge.s32.totalorder %v5304_v58, %v14790_v2  ;;  %v16742_v18 = vld [vmem:[#allocation2 + $0x11b] sm:$0xff] }
 0x597   : > { %5933 = vst.msk [vmem:[#allocation4 + $0x78] sm:$0xff] %vm18787_vm0, %v5916_v44  ;;  %3701 = vrot.lane.b32.xlu0 %v16541_v37, %s18557_s29  ;;  %vm16652_vm0 = vcmp.lt.s32.totalorder %v5304_v58, %v14792_v28 }
 0x598   : > { %5932 = vst.msk [vmem:[#allocation4 + $0x70] sm:$0xff] %vm18788_vm2, %v5915_v17  ;;  %v5039_v47 = vpop.permute.xlu1 %5038  ;;  %vm18795_vm2 = vcmask 39968  }
 0x599   : > { %5115 = vst.msk [vmem:[#allocation3 + $0xa0] sm:$0xff] %vm18789_vm14, %v5039_v47  ;;  %v4848_v21 = vpop.permute.xlu0 %4847  ;;  %vm5648_vm14 = vmand %vm16647_vm6, %vm16652_vm0  ;;  %vm18797_vm6 = vcmask 130048   ;;  %vm18798_vm0 = vcmask 146568  }
 0x59a   : > { %4923 = vst.msk [vmem:[#allocation3 + $0xa8] sm:$0xff] %vm18790_vm10, %v4848_v21  ;;  %4660 = vrot.lane.b32.xlu1 %v16506_v14, %s18504_s24  ;;  %v6257_v14 = vld [vmem:[#allocation4 + $0x61] ss:$2 sm:$0xff]  ;;  %vm18796_vm10 = vcmask 72768  }
 0x59b   : > { %4469 = vrot.lane.b32.xlu0 %v16498_v29, %s18559_s13  ;;  %v6262_v56 = vmax.f32 %v6255_v48, %v6257_v14  ;;  %v16750_v21 = vld [vmem:[#allocation2 + $0x114] sm:$0xff]  ;;  %v3227_v14 = vld [vmem:[#allocation2 + $0x120] sm:$0xff] }
 0x59c   : > { %v1392_v50 = vpop.permute.xlu1 %1391 }
 0x59d   : > { %1458 = vst.msk [vmem:[#allocation3 + $0xf0] sm:$0xff] %vm1427_vm5, %v1392_v50  ;;  %v1201_v29 = vpop.permute.xlu0 %1200 }
 0x59e   : > { %1266 = vst.msk [vmem:[#allocation3 + $0xf8] sm:$0xff] %vm18795_vm2, %v1201_v29  ;;  %2549 = vrot.lane.b32.xlu1 %v16644_v49, %s18462_s10  ;;  %vm18799_vm2 = vcmask 138368  }
 0x59f   : > { %v6259_v63 = vld [vmem:[#allocation4 + $0x70] ss:$2 sm:$0xff]  ;;  %v6261_v42 = vld [vmem:[#allocation4 + $0x71] ss:$2 sm:$0xff]  ;;  %2358 = vrot.lane.b32.xlu0 %v16656_v9, %s18528_s26 }
 0x5a0   : > { %v6263_v38 = vmax.f32 %v6259_v63, %v6261_v42  ;;  %v2160_v13 = vpop.permute.xlu1 %2159  ;;  %v5938_v11 = vld [vmem:[#allocation3 + $0xa0] sm:$0xff] }
 0x5a1   : > { %2228 = vst.msk [vmem:[#allocation3 + $0xe0] sm:$0xff] %vm2199_vm9, %v2160_v13  ;;  %v1969_v60 = vpop.permute.xlu0 %1968  ;;  %v5954_v6 = vsel %vm5648_vm14, %v5938_v11, 0.0  ;;  %vm18800_vm14 = vmmov %vm18797_vm6  ;;  %v16789_v11 = vld [vmem:[%s18379_s3] ss:$0 sm:$0xff] }
 0x5a2   : > { %v6264_v30 = vmax.f32 %v6262_v56, %v6263_v38  ;;  %2036 = vst.msk [vmem:[#allocation3 + $0xe8] sm:$0xff] %vm18796_vm10, %v1969_v60  ;;  %3317 = vrot.lane.b32.xlu1 %v16610_v61, %s18463_s18  ;;  %12771 = vmatprep.mubr.msk.f32.mxu1 %vm5703_vm3, %v5954_v6  ;;  %vm18801_vm10 = vcmask 203968   ;;  %v3228_v56 = vld [vmem:[#allocation2 + $0x128] sm:$0xff] }
 0x5a3   : > { %3126 = vrot.lane.b32.xlu0 %v16612_v33, %s18470_s16  ;;  %v3420_v6 = vld [vmem:[#allocation2 + $0x121] sm:$0xff] }
 0x5a4   : > { %6265 = vst.msk [vmem:[#allocation5 + $0x2a] sm:$0xff] %vm18797_vm6, %v6264_v30  ;;  %v2928_v23 = vpop.permute.xlu1 %2927 }
 0x5a5   : > { %2998 = vst.msk [vmem:[#allocation3 + $0xd0] sm:$0xff] %vm2971_vm13, %v2928_v23  ;;  %v2737_v52 = vpop.permute.xlu0 %2736 }
 0x5a6   : > { %2806 = vst.msk [vmem:[#allocation3 + $0xd8] sm:$0xff] %vm2778_vm12, %v2737_v52  ;;  %4085 = vrot.lane.b32.xlu1 %v16584_v1, %s18464_s22 }
 0x5a7   : > { %3894 = vrot.lane.b32.xlu0 %v16576_v54, %s18534_s30 }
 0x5a8   : > { %v3696_v10 = vpop.permute.xlu1 %3695 }
 0x5a9   : > { %3768 = vst.msk [vmem:[#allocation3 + $0xc0] sm:$0xff] %vm18798_vm0, %v3696_v10  ;;  %v3505_v27 = vpop.permute.xlu0 %3504 }
 0x5aa   : > { %3576 = vst.msk [vmem:[#allocation3 + $0xc8] sm:$0xff] %vm18799_vm2, %v3505_v27  ;;  %4853 = vrot.lane.b32.xlu1 %v16550_v45, %s18466_s25  ;;  %v5311_v45 = vand.u32 15, %v5149_v31  ;;  %vm18802_vm2 = vcmask 56368   ;;  %v3421_v31 = vld [vmem:[#allocation2 + $0x129] sm:$0xff] }
 0x5ab   : > { %4662 = vrot.lane.b32.xlu0 %v16541_v37, %s18504_s24  ;;  %v7555_v12 = vld [vmem:[#allocation5 + $0x29] sm:$0xff] }
 0x5ac   : > { %v4464_v24 = vpop.permute.xlu1 %4463  ;;  %v7563_v22 = vsel %vm7205_vm7, %v7555_v12, 0.0  ;;  %vm5584_vm6 = vcmp.ge.s32.totalorder %v5311_v45, %v14790_v2  ;;  %vm5617_vm0 = vcmp.lt.s32.totalorder %v5311_v45, %v14792_v28 }
 0x5ad   : > { %4538 = vst.msk [vmem:[#allocation3 + $0xb0] sm:$0xff] %vm4515_vm8, %v4464_v24  ;;  %v4273_v25 = vpop.permute.xlu0 %4272  ;;  %12909 = vmatmul.mubr.msk.f32.gmra.mrb[2].mxu0 %vm18800_vm14, %v7563_v22  ;;  %vm18803_vm14 = vcmask 89168   ;;  %v5150_v24 = vadd.s32 176, %v14781_v19 }
 0x5ae   : > { %4346 = vst.msk [vmem:[#allocation3 + $0xb8] sm:$0xff] %vm4322_vm4, %v4273_v25  ;;  %2742 = vrot.lane.b32.xlu1 %v16688_v43, %s18554_s23 }
 0x5af   : > { %2551 = vrot.lane.b32.xlu0 %v16692_v35, %s18462_s10 }
 0x5b0   : > { %v1394_v37 = vpop.permute.xlu1 %1393 }
 0x5b1   : > { %1459 = vst.msk [vmem:[#allocation3 + $0xf8] sm:$0xff] %vm1427_vm5, %v1394_v37  ;;  %v5041_v51 = vpop.permute.xlu0 %5040  ;;  %vm5649_vm5 = vmand %vm5584_vm6, %vm5617_vm0  ;;  %vm18805_vm6 = vcmask 121968   ;;  %vm18806_vm0 = vcmask 154768   ;;  %v5318_v37 = vand.u32 15, %v5150_v24 }
 0x5b2   : > { %5116 = vst.msk [vmem:[#allocation3 + $0xa8] sm:$0xff] %vm18801_vm10, %v5041_v51  ;;  %3510 = vrot.lane.b32.xlu1 %v16644_v49, %s18558_s12  ;;  %vm18804_vm10 = vcmask 146568  }
 0x5b3   : > { %3319 = vrot.lane.b32.xlu0 %v16656_v9, %s18463_s18 }
 0x5b4   : > { %v2162_v3 = vpop.permute.xlu1 %2161 }
 0x5b5   : > { %2229 = vst.msk [vmem:[#allocation3 + $0xe8] sm:$0xff] %vm2199_vm9, %v2162_v3  ;;  %v1585_v8 = vpop.permute.xlu0 %1584  ;;  %v3613_v3 = vld [vmem:[#allocation2 + $0x122] sm:$0xff] }
 0x5b6   : > { %1651 = vst.msk [vmem:[#allocation3 + $0xf0] sm:$0xff] %vm18802_vm2, %v1585_v8  ;;  %4278 = vrot.lane.b32.xlu1 %v16610_v61, %s18560_s19  ;;  %v16723_v61 = vld [vmem:[#allocation2 + $0x113] sm:$0xff] }
 0x5b7   : > { %4087 = vrot.lane.b32.xlu0 %v16612_v33, %s18464_s22 }
 0x5b8   : > { %v2930_v32 = vpop.permute.xlu1 %2929 }
 0x5b9   : > { %2999 = vst.msk [vmem:[#allocation3 + $0xd8] sm:$0xff] %vm2971_vm13, %v2930_v32  ;;  %v2353_v62 = vpop.permute.xlu0 %2352  ;;  %v5939_v46 = vld [vmem:[#allocation3 + $0xa8] sm:$0xff] }
 0x5ba   : > { %2421 = vst.msk [vmem:[#allocation3 + $0xe0] sm:$0xff] %vm18803_vm14, %v2353_v62  ;;  %5046 = vrot.lane.b32.xlu1 %v16584_v1, %s18547_s17  ;;  %v5955_v5 = vsel %vm5649_vm5, %v5939_v46, 0.0  ;;  %vm18807_vm5 = vcmask 187568  }
 0x5bb   : > { %4855 = vrot.lane.b32.xlu0 %v16576_v54, %s18466_s25  ;;  %12772 = vmatmul.mubr.msk.f32.gmra.mrb[20].mxu1 %vm5703_vm3, %v5955_v5 }
 0x5bc   : > { %v3698_v26 = vpop.permute.xlu1 %3697 }
 0x5bd   : > { %3769 = vst.msk [vmem:[#allocation3 + $0xc8] sm:$0xff] %vm18804_vm10, %v3698_v26  ;;  %v3121_v36 = vpop.permute.xlu0 %3120  ;;  %vm18808_vm10 = vcmask 64568   ;;  %v5151_v26 = vadd.s32 184, %v14781_v19 }
 0x5be   : > { %3191 = vst.msk [vmem:[#allocation3 + $0xd0] sm:$0xff] %vm18805_vm6, %v3121_v36  ;;  %2935 = vrot.lane.b32.xlu1 %v16723_v61, %s18522_s21  ;;  %v3614_v36 = vld [vmem:[#allocation2 + $0x12a] sm:$0xff] }
 0x5bf   : > { %2744 = vrot.lane.b32.xlu0 %v2649_v55, %s18554_s23  ;;  %s19080_s23 = sld [smem:[#allocation8_spill]] }
 0x5c0   : > { %v4466_v1 = vpop.permute.xlu1 %4465 }
 0x5c1   : > { %4539 = vst.msk [vmem:[#allocation3 + $0xb8] sm:$0xff] %vm4515_vm8, %v4466_v1  ;;  %v3889_v54 = vpop.permute.xlu0 %3888 }
 0x5c2   : > { %3961 = vst.msk [vmem:[#allocation3 + $0xc0] sm:$0xff] %vm18806_vm0, %v3889_v54  ;;  %3703 = vrot.lane.b32.xlu1 %v16688_v43, %s18557_s29  ;;  %v5325_v54 = vand.u32 15, %v5151_v26 }
 0x5c3   : > { %3512 = vrot.lane.b32.xlu0 %v16692_v35, %s18558_s12 }
 0x5c4   : > { %v1587_v16 = vpop.permute.xlu1 %1586 }
 0x5c5   : > { %1652 = vst.msk [vmem:[#allocation3 + $0xf8] sm:$0xff] %vm18802_vm2, %v1587_v16  ;;  %v4657_v44 = vpop.permute.xlu0 %4656  ;;  %vm18809_vm2 = vmmov %vm18807_vm5  ;;  %s12177_s27 = sshll.u32 %s19080_s23, 3 }
 0x5c6   : > { %4731 = vst.msk [vmem:[#allocation3 + $0xb0] sm:$0xff] %vm18807_vm5, %v4657_v44  ;;  %4471 = vrot.lane.b32.xlu1 %v16644_v49, %s18559_s13  ;;  %vm18810_vm5 = vcmask 162968   ;;  %s323_s7 = scalar_lea.vmem %s19082_s0, %s12177_s27 }
 0x5c7   : > { %4280 = vrot.lane.b32.xlu0 %v16656_v9, %s18560_s19 }
 0x5c8   : > { %v2355_v17 = vpop.permute.xlu1 %2354 }
 0x5c9   : > { %2422 = vst.msk [vmem:[#allocation3 + $0xe8] sm:$0xff] %vm18803_vm14, %v2355_v17  ;;  %v1778_v58 = vpop.permute.xlu0 %1777  ;;  %vm18811_vm14 = vmmov %vm18808_vm10 }
 0x5ca   : > { %1844 = vst.msk [vmem:[#allocation3 + $0xf0] sm:$0xff] %vm18808_vm10, %v1778_v58  ;;  %2937 = vrot.lane.b32.xlu1 %v16742_v18, %s18522_s21  ;;  %vm18812_vm10 = vcmask 195768   ;;  %v3807_v58 = vld [vmem:[#allocation2 + $0x12b] sm:$0xff] }
 0x5cb   : > { %5048 = vrot.lane.b32.xlu0 %v16612_v33, %s18547_s17  ;;  %v16763_v33 = vld [vmem:[#allocation2 + $0x11c] sm:$0xff] }
 0x5cc   : > { %v3123_v47 = vpop.permute.xlu1 %3122 }
 0x5cd   : > { %3192 = vst.msk [vmem:[#allocation3 + $0xd8] sm:$0xff] %vm18805_vm6, %v3123_v47  ;;  %v2546_v49 = vpop.permute.xlu0 %2545  ;;  %vm18813_vm6 = vcmask 72768  }
 0x5ce   : > { %2614 = vst.msk [vmem:[#allocation3 + $0xe0] sm:$0xff] %vm2585_vm11, %v2546_v49  ;;  %3705 = vrot.lane.b32.xlu1 %v2649_v55, %s18557_s29 }
 0x5cf   : > { %3128 = vrot.lane.b32.xlu0 %v16750_v21, %s18470_s16 }
 0x5d0   : > { %v3891_v57 = vpop.permute.xlu1 %3890 }
 0x5d1   : > { %3962 = vst.msk [vmem:[#allocation3 + $0xc8] sm:$0xff] %vm18806_vm0, %v3891_v57  ;;  %v3314_v7 = vpop.permute.xlu0 %3313  ;;  %vm18814_vm0 = vmmov %vm18810_vm5 }
 0x5d2   : > { %3384 = vst.msk [vmem:[#allocation3 + $0xd0] sm:$0xff] %vm3357_vm15, %v3314_v7  ;;  %4473 = vrot.lane.b32.xlu1 %v16692_v35, %s18559_s13 }
 0x5d3   : > { %3896 = vrot.lane.b32.xlu0 %v16723_v61, %s18534_s30 }
 0x5d4   : > { %v4659_v50 = vpop.permute.xlu1 %4658 }
 0x5d5   : > { %4732 = vst.msk [vmem:[#allocation3 + $0xb8] sm:$0xff] %vm18809_vm2, %v4659_v50  ;;  %v4082_v9 = vpop.permute.xlu0 %4081  ;;  %vm18815_vm2 = vcmask 138368  }
 0x5d6   : > { %4154 = vst.msk [vmem:[#allocation3 + $0xc0] sm:$0xff] %vm18810_vm5, %v4082_v9  ;;  %3130 = vrot.lane.b32.xlu1 %v16763_v33, %s18470_s16  ;;  %vm18816_vm5 = vmmov %vm18812_vm10  ;;  %v4000_v9 = vld [vmem:[#allocation2 + $0x12c] sm:$0xff] }
 0x5d7   : > { %4664 = vrot.lane.b32.xlu0 %v16688_v43, %s18504_s24 }
 0x5d8   : > { %v1780_v48 = vpop.permute.xlu1 %1779 }
 0x5d9   : > { %1845 = vst.msk [vmem:[#allocation3 + $0xf8] sm:$0xff] %vm18811_vm14, %v1780_v48  ;;  %v4850_v29 = vpop.permute.xlu0 %4849  ;;  %vm18817_vm14 = vcmask 130048  }
 0x5da   : > { %4924 = vst.msk [vmem:[#allocation3 + $0xb0] sm:$0xff] %vm18812_vm10, %v4850_v29  ;;  %3898 = vrot.lane.b32.xlu1 %v16742_v18, %s18534_s30  ;;  %vm18818_vm10 = vmmov %vm18817_vm14 }
 0x5db   : > { %3321 = vrot.lane.b32.xlu0 %v3227_v14, %s18463_s18 }
 0x5dc   : > { %v2548_v63 = vpop.permute.xlu1 %2547 }
 0x5dd   : > { %2615 = vst.msk [vmem:[#allocation3 + $0xe8] sm:$0xff] %vm2585_vm11, %v2548_v63  ;;  %v1971_v42 = vpop.permute.xlu0 %1970  ;;  %v4385_v63 = vld [vmem:[#allocation2 + $0x131] sm:$0xff] }
 0x5de   : > { %2037 = vst.msk [vmem:[#allocation3 + $0xf0] sm:$0xff] %vm18813_vm6, %v1971_v42  ;;  %4666 = vrot.lane.b32.xlu1 %v2649_v55, %s18504_s24 }
 0x5df   : > { %4089 = vrot.lane.b32.xlu0 %v16750_v21, %s18464_s22 }
 0x5e0   : > { %v3316_v38 = vpop.permute.xlu1 %3315 }
 0x5e1   : > { %3385 = vst.msk [vmem:[#allocation3 + $0xd8] sm:$0xff] %vm3357_vm15, %v3316_v38  ;;  %v2739_v13 = vpop.permute.xlu0 %2738 }
 0x5e2   : > { %2807 = vst.msk [vmem:[#allocation3 + $0xe0] sm:$0xff] %vm2778_vm12, %v2739_v13  ;;  %3323 = vrot.lane.b32.xlu1 %v3228_v56, %s18463_s18  ;;  %v4386_v13 = vld [vmem:[#allocation2 + $0x139] sm:$0xff] }
 0x5e3   : > { %4857 = vrot.lane.b32.xlu0 %v16723_v61, %s18466_s25  ;;  %v3806_v61 = vld [vmem:[#allocation2 + $0x123] sm:$0xff] }
 0x5e4   : > { %v4084_v60 = vpop.permute.xlu1 %4083 }
 0x5e5   : > { %4155 = vst.msk [vmem:[#allocation3 + $0xc8] sm:$0xff] %vm18814_vm0, %v4084_v60  ;;  %v3507_v30 = vpop.permute.xlu0 %3506  ;;  %vm18819_vm0 = vcmask 203968  }
 0x5e6   : > { %v12767_v23 = vpop.f32.mrb[16].mxu1  ;;  %3577 = vst.msk [vmem:[#allocation3 + $0xd0] sm:$0xff] %vm18815_vm2, %v3507_v30  ;;  %4091 = vrot.lane.b32.xlu1 %v16763_v33, %s18464_s22  ;;  %vm5585_vm2 = vcmp.ge.s32.totalorder %v5318_v37, %v14790_v2  ;;  %v4579_v30 = vld [vmem:[#allocation2 + $0x13a] sm:$0xff] }
 0x5e7   : > { %v6100_v52 = vadd.f32 %v12767_v23, %v16789_v11  ;;  %v6094_v10 = vpop.f32.mrb[17].mxu1  ;;  %3514 = vrot.lane.b32.xlu0 %v3420_v6, %s18558_s12 }
 0x5e8   : > { %v6095_v27 = vadd.f32 %v16789_v11, %v6094_v10  ;;  %v4852_v43 = vpop.permute.xlu1 %4851 }
 0x5e9   : > { %v6174_v12 = vmax.f32 %v6100_v52, 0.0  ;;  %4925 = vst.msk [vmem:[#allocation3 + $0xb8] sm:$0xff] %vm18816_vm5, %v4852_v43  ;;  %v4275_v35 = vpop.permute.xlu0 %4274  ;;  %vm5618_vm5 = vcmp.lt.s32.totalorder %v5318_v37, %v14792_v28  ;;  %v4578_v52 = vld [vmem:[#allocation2 + $0x132] sm:$0xff] }
 0x5ea   : > { %v6173_v22 = vmax.f32 %v6095_v27, 0.0  ;;  %4347 = vst.msk [vmem:[#allocation3 + $0xc0] sm:$0xff] %vm4322_vm4, %v4275_v35  ;;  %4859 = vrot.lane.b32.xlu1 %v16742_v18, %s18466_s25  ;;  %v3999_v18 = vld [vmem:[#allocation2 + $0x124] sm:$0xff]  ;;  %v4772_v27 = vld [vmem:[#allocation2 + $0x13b] sm:$0xff]  ;;  %v4771_v43 = vld [vmem:[#allocation2 + $0x133] sm:$0xff] }
 0x5eb   : > { %6190 = vst.msk [vmem:[#allocation4 + $0x88] sm:$0xff] %vm18817_vm14, %v6174_v12  ;;  %4282 = vrot.lane.b32.xlu0 %v3227_v14, %s18560_s19  ;;  %vm5650_vm14 = vmand %vm5585_vm2, %vm5618_vm5  ;;  %vm5586_vm2 = vcmp.ge.s32.totalorder %v5325_v54, %v14790_v2  ;;  %vm5619_vm5 = vcmp.lt.s32.totalorder %v5325_v54, %v14792_v28  ;;  %v6478_v35 = vld [vmem:[%s18380_s4 + $0x58] sm:$0xff] }
 0x5ec   : > { %6189 = vst.msk [vmem:[#allocation4 + $0x80] sm:$0xff] %vm18818_vm10, %v6173_v22  ;;  %v1973_v25 = vpop.permute.xlu1 %1972  ;;  %vm18820_vm10 = vcmask 138368   ;;  %v6477_v22 = vld [vmem:[%s18380_s4 + $0x50] sm:$0xff] }
 0x5ed   : > { %2038 = vst.msk [vmem:[#allocation3 + $0xf8] sm:$0xff] %vm18813_vm6, %v1973_v25  ;;  %v5043_v45 = vpop.permute.xlu0 %5042  ;;  %vm18821_vm6 = vcmask 146568   ;;  %v4965_v25 = vld [vmem:[#allocation2 + $0x13c] sm:$0xff] }
 0x5ee   : > { %5117 = vst.msk [vmem:[#allocation3 + $0xb0] sm:$0xff] %vm18819_vm0, %v5043_v45  ;;  %3516 = vrot.lane.b32.xlu1 %v3421_v31, %s18558_s12  ;;  %v4964_v45 = vld [vmem:[#allocation2 + $0x134] sm:$0xff] }
 0x5ef   : > { %5050 = vrot.lane.b32.xlu0 %v16750_v21, %s18547_s17 }
 0x5f0   : > { %v2741_v51 = vpop.permute.xlu1 %2740 }
 0x5f1   : > { %2808 = vst.msk [vmem:[#allocation3 + $0xe8] sm:$0xff] %vm2778_vm12, %v2741_v51  ;;  %v2164_v8 = vpop.permute.xlu0 %2163 }
 0x5f2   : > { %2230 = vst.msk [vmem:[#allocation3 + $0xf0] sm:$0xff] %vm2199_vm9, %v2164_v8  ;;  %4284 = vrot.lane.b32.xlu1 %v3228_v56, %s18560_s19  ;;  %v4193_v56 = vld [vmem:[#allocation2 + $0x138] sm:$0xff] }
 0x5f3   : > { %3707 = vrot.lane.b32.xlu0 %v3613_v3, %s18557_s29 }
 0x5f4   : > { %v3509_v32 = vpop.permute.xlu1 %3508 }
 0x5f5   : > { %3578 = vst.msk [vmem:[#allocation3 + $0xd8] sm:$0xff] %vm18820_vm10, %v3509_v32  ;;  %v2932_v62 = vpop.permute.xlu0 %2931  ;;  %v5940_v46 = vld [vmem:[#allocation3 + $0xb0] sm:$0xff]  ;;  %vm5651_vm10 = vmand %vm5586_vm2, %vm5619_vm5  ;;  %vm18826_vm2 = vcmask 187568   ;;  %v5152_v32 = vadd.s32 192, %v14781_v19 }
 0x5f6   : > { %3000 = vst.msk [vmem:[#allocation3 + $0xe0] sm:$0xff] %vm2971_vm13, %v2932_v62  ;;  %5052 = vrot.lane.b32.xlu1 %v16763_v33, %s18547_s17  ;;  %v5956_v5 = vsel %vm5650_vm14, %v5940_v46, 0.0  ;;  %vm18822_vm14 = vcmask 89168   ;;  %v4192_v33 = vld [vmem:[#allocation2 + $0x130] sm:$0xff] }
 0x5f7   : > { %4475 = vrot.lane.b32.xlu0 %v3420_v6, %s18559_s13  ;;  %12774 = vmatprep.mubr.msk.f32.mxu1 %vm5703_vm3, %v5956_v5  ;;  %vm18827_vm5 = vmmov %vm18822_vm14  ;;  %v5332_v5 = vand.u32 15, %v5152_v32 }
 0x5f8   : > { %v4277_v55 = vpop.permute.xlu1 %4276 }
 0x5f9   : > { %4348 = vst.msk [vmem:[#allocation3 + $0xc8] sm:$0xff] %vm4322_vm4, %v4277_v55  ;;  %v3700_v1 = vpop.permute.xlu0 %3699 }
 0x5fa   : > { %3770 = vst.msk [vmem:[#allocation3 + $0xd0] sm:$0xff] %vm18821_vm6, %v3700_v1  ;;  %3900 = vrot.lane.b32.xlu1 %v3806_v61, %s18534_s30  ;;  %vm18823_vm6 = vcmask 121968  }
 0x5fb   : > { %3709 = vrot.lane.b32.xlu0 %v3614_v36, %s18557_s29  ;;  %s12434_s29 = sshll.u32 %s19080_s23, 4 }
 0x5fc   : > { %v5045_v16 = vpop.permute.xlu1 %5044  ;;  %s319_s20 = scalar_lea.vmem %s19081_s8, %s12434_s29 }
 0x5fd   : > { %5118 = vst.msk [vmem:[#allocation3 + $0xb8] sm:$0xff] %vm18819_vm0, %v5045_v16  ;;  %v4468_v44 = vpop.permute.xlu0 %4467  ;;  %vm18825_vm0 = vcmask 146568  }
 0x5fe   : > { %4540 = vst.msk [vmem:[#allocation3 + $0xc0] sm:$0xff] %vm4515_vm8, %v4468_v44  ;;  %4668 = vrot.lane.b32.xlu1 %v3613_v3, %s18504_s24 }
 0x5ff   : > { %4477 = vrot.lane.b32.xlu0 %v3421_v31, %s18559_s13  ;;  %v13209_v31 = vpack.c.bf16 %v6478_v35, %v6477_v22  ;;  %v16918_v35 = vand.u32 7, %v15165_v20 }
 0x600   : > { %v2357_v17 = vpop.permute.xlu1 %2356 }
 0x601   : > { %2423 = vst.msk [vmem:[#allocation3 + $0xf0] sm:$0xff] %vm18822_vm14, %v2357_v17  ;;  %v2166_v47 = vpop.permute.xlu0 %2165  ;;  %vm18828_vm14 = vmmov %vm18823_vm6  ;;  %13210 = vmatprep.subr.bf16.mxu1 %v13209_v31  ;;  %v5153_v17 = vadd.s32 200, %v14781_v19 }
 0x602   : > { %2231 = vst.msk [vmem:[#allocation3 + $0xf8] sm:$0xff] %vm2199_vm9, %v2166_v47  ;;  %4093 = vrot.lane.b32.xlu1 %v3999_v18, %s18464_s22  ;;  %vm18824_vm9 = vcmask 154768   ;;  %13212 = vmatpush3.bf16.msra.mxu1 %v13209_v31 }
 0x603   : > { %3902 = vrot.lane.b32.xlu0 %v3807_v58, %s18534_s30 }
 0x604   : > { %v3125_v21 = vpop.permute.xlu1 %3124  ;;  %v5941_v49 = vld [vmem:[#allocation3 + $0xb8] sm:$0xff] }
 0x605   : > { %3193 = vst.msk [vmem:[#allocation3 + $0xe0] sm:$0xff] %vm18823_vm6, %v3125_v21  ;;  %v2934_v57 = vpop.permute.xlu0 %2933  ;;  %v5957_v7 = vsel %vm5651_vm10, %v5941_v49, 0.0  ;;  %vm18829_vm10 = vcmask 162968   ;;  %vm18830_vm6 = vmmov %vm18824_vm9 }
 0x606   : > { %3001 = vst.msk [vmem:[#allocation3 + $0xe8] sm:$0xff] %vm2971_vm13, %v2934_v57  ;;  %12775 = vmatmul.mubr.msk.f32.gmra.mrb[22].mxu1 %vm5703_vm3, %v5957_v7  ;;  %4861 = vrot.lane.b32.xlu1 %v3806_v61, %s18466_s25 }
 0x607   : > { %4670 = vrot.lane.b32.xlu0 %v3614_v36, %s18504_s24 }
 0x608   : > { %v3893_v50 = vpop.permute.xlu1 %3892 }
 0x609   : > { %3963 = vst.msk [vmem:[#allocation3 + $0xd0] sm:$0xff] %vm18824_vm9, %v3893_v50  ;;  %v3702_v48 = vpop.permute.xlu0 %3701  ;;  %vm18831_vm9 = vcmask 195768   ;;  %v5339_v50 = vand.u32 15, %v5153_v17 }
 0x60a   : > { %3771 = vst.msk [vmem:[#allocation3 + $0xd8] sm:$0xff] %vm18825_vm0, %v3702_v48  ;;  %4286 = vrot.lane.b32.xlu1 %v4192_v33, %s18560_s19  ;;  %vm18832_vm0 = vmmov %vm18826_vm2 }
 0x60b   : > { %4095 = vrot.lane.b32.xlu0 %v4000_v9, %s18464_s22  ;;  %s19079_s22 = sld [smem:[#allocation11_spill]] }
 0x60c   : > { %v4661_v14 = vpop.permute.xlu1 %4660 }
 0x60d   : > { %4733 = vst.msk [vmem:[#allocation3 + $0xc0] sm:$0xff] %vm18826_vm2, %v4661_v14  ;;  %v4470_v29 = vpop.permute.xlu0 %4469  ;;  %vm18833_vm2 = vcmask 138368  }
 0x60e   : > { %4541 = vst.msk [vmem:[#allocation3 + $0xc8] sm:$0xff] %vm4515_vm8, %v4470_v29  ;;  %5054 = vrot.lane.b32.xlu1 %v3999_v18, %s18547_s17 }
 0x60f   : > { %4863 = vrot.lane.b32.xlu0 %v3807_v58, %s18466_s25 }
 0x610   : > { %v2550_v42 = vpop.permute.xlu1 %2549 }
 0x611   : > { %2616 = vst.msk [vmem:[#allocation3 + $0xf0] sm:$0xff] %vm2585_vm11, %v2550_v42  ;;  %v2359_v38 = vpop.permute.xlu0 %2358  ;;  %v6267_v42 = vld [vmem:[#allocation4 + $0x80] ss:$2 sm:$0xff] }
 0x612   : > { %2424 = vst.msk [vmem:[#allocation3 + $0xf8] sm:$0xff] %vm18827_vm5, %v2359_v38  ;;  %4479 = vrot.lane.b32.xlu1 %v4385_v63, %s18559_s13  ;;  %vm18834_vm5 = vmmov %vm18829_vm10 }
 0x613   : > { %4288 = vrot.lane.b32.xlu0 %v4193_v56, %s18560_s19  ;;  %v6269_v56 = vld [vmem:[#allocation4 + $0x81] ss:$2 sm:$0xff] }
 0x614   : > { %v3318_v60 = vpop.permute.xlu1 %3317 }
 0x615   : > { %3386 = vst.msk [vmem:[#allocation3 + $0xe0] sm:$0xff] %vm3357_vm15, %v3318_v60  ;;  %v3127_v6 = vpop.permute.xlu0 %3126 }
 0x616   : > { %3194 = vst.msk [vmem:[#allocation3 + $0xe8] sm:$0xff] %vm18828_vm14, %v3127_v6  ;;  %4481 = vrot.lane.b32.xlu1 %v4386_v13, %s18559_s13  ;;  %vm18836_vm14 = vmmov %vm18831_vm9 }
 0x617   : > { %5056 = vrot.lane.b32.xlu0 %v4000_v9, %s18547_s17 }
 0x618   : > { %v4086_v23 = vpop.permute.xlu1 %4085 }
 0x619   : > { %4156 = vst.msk [vmem:[#allocation3 + $0xd0] sm:$0xff] %vm18829_vm10, %v4086_v23  ;;  %v3895_v10 = vpop.permute.xlu0 %3894  ;;  %vm5587_vm10 = vcmp.ge.s32.totalorder %v5332_v5, %v14790_v2 }
 0x61a   : > { %3964 = vst.msk [vmem:[#allocation3 + $0xd8] sm:$0xff] %vm18830_vm6, %v3895_v10  ;;  %4674 = vrot.lane.b32.xlu1 %v4579_v30, %s18504_s24  ;;  %vm5620_vm6 = vcmp.lt.s32.totalorder %v5332_v5, %v14792_v28 }
 0x61b   : > { %4672 = vrot.lane.b32.xlu0 %v4578_v52, %s18504_s24  ;;  %v6274_v52 = vmax.f32 %v6267_v42, %v6269_v56 }
 0x61c   : > { %v4854_v12 = vpop.permute.xlu1 %4853 }
 0x61d   : > { %4926 = vst.msk [vmem:[#allocation3 + $0xc0] sm:$0xff] %vm18831_vm9, %v4854_v12  ;;  %v4663_v24 = vpop.permute.xlu0 %4662  ;;  %vm5652_vm9 = vmand %vm5587_vm10, %vm5620_vm6  ;;  %vm5621_vm10 = vcmp.lt.s32.totalorder %v5339_v50, %v14792_v28 }
 0x61e   : > { %4734 = vst.msk [vmem:[#allocation3 + $0xc8] sm:$0xff] %vm18832_vm0, %v4663_v24  ;;  %4867 = vrot.lane.b32.xlu1 %v4772_v27, %s18466_s25  ;;  %vm18837_vm0 = vcmask 146568  }
 0x61f   : > { %4865 = vrot.lane.b32.xlu0 %v4771_v43, %s18466_s25  ;;  %vm18843_vm6 = vmmov %vm18837_vm0 }
 0x620   : > { %v2743_v37 = vpop.permute.xlu1 %2742 }
 0x621   : > { %2809 = vst.msk [vmem:[#allocation3 + $0xf0] sm:$0xff] %vm2778_vm12, %v2743_v37  ;;  %v2552_v51 = vpop.permute.xlu0 %2551 }
 0x622   : > { %2617 = vst.msk [vmem:[#allocation3 + $0xf8] sm:$0xff] %vm2585_vm11, %v2552_v51  ;;  %5060 = vrot.lane.b32.xlu1 %v4965_v25, %s18547_s17  ;;  %vm18835_vm11 = vcmask 203968  }
 0x623   : > { %5058 = vrot.lane.b32.xlu0 %v4964_v45, %s18547_s17 }
 0x624   : > { %v3511_v3 = vpop.permute.xlu1 %3510 }
 0x625   : > { %3579 = vst.msk [vmem:[#allocation3 + $0xe0] sm:$0xff] %vm18833_vm2, %v3511_v3  ;;  %v3320_v8 = vpop.permute.xlu0 %3319 }
 0x626   : > { %3387 = vst.msk [vmem:[#allocation3 + $0xe8] sm:$0xff] %vm3357_vm15, %v3320_v8 }
 0x628   : > { %v4279_v62 = vpop.permute.xlu1 %4278 }
 0x629   : > { %4349 = vst.msk [vmem:[#allocation3 + $0xd0] sm:$0xff] %vm4322_vm4, %v4279_v62  ;;  %v4088_v46 = vpop.permute.xlu0 %4087  ;;  %v5154_v62 = vadd.s32 208, %v14781_v19 }
 0x62a   : > { %4157 = vst.msk [vmem:[#allocation3 + $0xd8] sm:$0xff] %vm18834_vm5, %v4088_v46  ;;  %vm18839_vm5 = vmmov %vm18835_vm11 }
 0x62c   : > { %v5047_v61 = vpop.permute.xlu1 %5046 }
 0x62d   : > { %5119 = vst.msk [vmem:[#allocation3 + $0xc0] sm:$0xff] %vm18835_vm11, %v5047_v61  ;;  %v4856_v26 = vpop.permute.xlu0 %4855  ;;  %v5346_v61 = vand.u32 15, %v5154_v62 }
 0x62e   : > { %4927 = vst.msk [vmem:[#allocation3 + $0xc8] sm:$0xff] %vm18836_vm14, %v4856_v26  ;;  %vm16901_vm14 = vcmp.ge.s32.totalorder %v5339_v50, %v14790_v2 }
 0x630   : > { %v2936_v55 = vpop.permute.xlu1 %2935 }
 0x631   : > { %3002 = vst.msk [vmem:[#allocation3 + $0xf0] sm:$0xff] %vm2971_vm13, %v2936_v55  ;;  %v2745_v36 = vpop.permute.xlu0 %2744  ;;  %v5155_v55 = vadd.s32 216, %v14781_v19 }
 0x632   : > { %2810 = vst.msk [vmem:[#allocation3 + $0xf8] sm:$0xff] %vm2778_vm12, %v2745_v36  ;;  %vm18838_vm12 = vcmask 130048  }
 0x633   : > { %vm18840_vm11 = vmmov %vm18838_vm12 }
 0x634   : > { %v3704_v1 = vpop.permute.xlu1 %3703  ;;  %v5942_v54 = vld [vmem:[#allocation3 + $0xc0] sm:$0xff] }
 0x635   : > { %3772 = vst.msk [vmem:[#allocation3 + $0xe0] sm:$0xff] %vm18837_vm0, %v3704_v1  ;;  %v3513_v16 = vpop.permute.xlu0 %3512  ;;  %v5958_v44 = vsel %vm5652_vm9, %v5942_v54, 0.0  ;;  %vm18844_vm9 = vcmask 121968   ;;  %vm18845_vm0 = vcmask 154768   ;;  %v5353_v54 = vand.u32 15, %v5155_v55 }
 0x636   : > { %3580 = vst.msk [vmem:[#allocation3 + $0xe8] sm:$0xff] %vm18833_vm2, %v3513_v16  ;;  %12777 = vmatprep.mubr.msk.f32.mxu1 %vm5703_vm3, %v5958_v44  ;;  %vm18846_vm2 = vmmov %vm18844_vm9 }
 0x638   : > { %v4472_v18 = vpop.permute.xlu1 %4471 }
 0x639   : > { %4542 = vst.msk [vmem:[#allocation3 + $0xd0] sm:$0xff] %vm4515_vm8, %v4472_v18  ;;  %v4281_v58 = vpop.permute.xlu0 %4280 }
 0x63a   : > { %v12770_v47 = vpop.f32.mrb[18].mxu1  ;;  %4350 = vst.msk [vmem:[#allocation3 + $0xd8] sm:$0xff] %vm4322_vm4, %v4281_v58 }
 0x63b   : > { %v6110_v21 = vadd.f32 %v12770_v47, %v16789_v11  ;;  %v6104_v49 = vpop.f32.mrb[19].mxu1 }
 0x63c   : > { %v6105_v57 = vadd.f32 %v16789_v11, %v6104_v49  ;;  %v2938_v33 = vpop.permute.xlu1 %2937 }
 0x63d   : > { %v6176_v7 = vmax.f32 %v6110_v21, 0.0  ;;  %3003 = vst.msk [vmem:[#allocation3 + $0xf8] sm:$0xff] %vm2971_vm13, %v2938_v33  ;;  %v5049_v48 = vpop.permute.xlu0 %5048  ;;  %vm5653_vm13 = vmand %vm16901_vm14, %vm5621_vm10  ;;  %vm18851_vm10 = vcmask 162968  }
 0x63e   : > { %v6175_v9 = vmax.f32 %v6105_v57, 0.0  ;;  %5120 = vst.msk [vmem:[#allocation3 + $0xc8] sm:$0xff] %vm18839_vm5, %v5049_v48  ;;  %vm18848_vm5 = vmmov %vm18840_vm11 }
 0x63f   : > { %6192 = vst.msk [vmem:[#allocation4 + $0x98] sm:$0xff] %vm18838_vm12, %v6176_v7  ;;  %vm18847_vm12 = vcmask 187568  }
 0x640   : > { %6191 = vst.msk [vmem:[#allocation4 + $0x90] sm:$0xff] %vm18840_vm11, %v6175_v9  ;;  %v3706_v14 = vpop.permute.xlu1 %3705  ;;  %vm18849_vm11 = vmmov %vm18845_vm0 }
 0x641   : > { %3773 = vst.msk [vmem:[#allocation3 + $0xe8] sm:$0xff] %vm18843_vm6, %v3706_v14  ;;  %v3129_v63 = vpop.permute.xlu0 %3128  ;;  %vm18850_vm14 = vmmov %vm18847_vm12  ;;  %vm7206_vm6 = vcmp.ge.s32.totalorder %v16918_v35, 1  ;;  %v5156_v14 = vadd.s32 224, %v14781_v19 }
 0x642   : > { %3195 = vst.msk [vmem:[#allocation3 + $0xf0] sm:$0xff] %vm18844_vm9, %v3129_v63  ;;  %vm18852_vm9 = vmmov %vm18848_vm5 }
 0x643   : > { %v5360_v42 = vand.u32 15, %v5156_v14 }
 0x644   : > { %v4474_v38 = vpop.permute.xlu1 %4473 }
 0x645   : > { %4543 = vst.msk [vmem:[#allocation3 + $0xd8] sm:$0xff] %vm4515_vm8, %v4474_v38  ;;  %v3897_v13 = vpop.permute.xlu0 %3896  ;;  %v5943_v60 = vld [vmem:[#allocation3 + $0xc8] sm:$0xff] }
 0x646   : > { %3965 = vst.msk [vmem:[#allocation3 + $0xe0] sm:$0xff] %vm18845_vm0, %v3897_v13  ;;  %v5959_v23 = vsel %vm5653_vm13, %v5943_v60, 0.0  ;;  %vm18853_vm13 = vcmask 195768   ;;  %vm18854_vm0 = vmmov %vm18851_vm10  ;;  %v5157_v60 = vadd.s32 232, %v14781_v19 }
 0x647   : > { %v6271_v6 = vld [vmem:[#allocation4 + $0x90] ss:$2 sm:$0xff]  ;;  %v6273_v30 = vld [vmem:[#allocation4 + $0x91] ss:$2 sm:$0xff]  ;;  %12778 = vmatmul.mubr.msk.f32.gmra.mrb[24].mxu1 %vm5703_vm3, %v5959_v23 }
 0x648   : > { %v6275_v10 = vmax.f32 %v6271_v6, %v6273_v30  ;;  %v3131_v27 = vpop.permute.xlu1 %3130 }
 0x649   : > { %3196 = vst.msk [vmem:[#allocation3 + $0xf8] sm:$0xff] %vm18846_vm2, %v3131_v27  ;;  %v4665_v43 = vpop.permute.xlu0 %4664  ;;  %vm18855_vm2 = vcmask 138368  }
 0x64a   : > { %v6276_v12 = vmax.f32 %v6274_v52, %v6275_v10  ;;  %4735 = vst.msk [vmem:[#allocation3 + $0xd0] sm:$0xff] %vm18847_vm12, %v4665_v43  ;;  %vm18856_vm12 = vmmov %vm18853_vm13  ;;  %v5367_v52 = vand.u32 15, %v5157_v60  ;;  %v17061_v43 = vand.u32 7, %v15348_v34 }
 0x64c   : > { %6277 = vst.msk [vmem:[#allocation5 + $0x32] sm:$0xff] %vm18848_vm5, %v6276_v12  ;;  %v3899_v24 = vpop.permute.xlu1 %3898  ;;  %vm18858_vm5 = vcmask 203968  }
 0x64d   : > { %3966 = vst.msk [vmem:[#allocation3 + $0xe8] sm:$0xff] %vm18849_vm11, %v3899_v24  ;;  %v3322_v22 = vpop.permute.xlu0 %3321  ;;  %vm5589_vm11 = vcmp.ge.s32.totalorder %v5346_v61, %v14790_v2  ;;  %v6753_v24 = vld [vmem:[%s18380_s4 + $0xa0] sm:$0xff] }
 0x64e   : > { %3388 = vst.msk [vmem:[#allocation3 + $0xf0] sm:$0xff] %vm3357_vm15, %v3322_v22 }
 0x650   : > { %v4667_v31 = vpop.permute.xlu1 %4666 }
 0x651   : > { %4736 = vst.msk [vmem:[#allocation3 + $0xd8] sm:$0xff] %vm18850_vm14, %v4667_v31  ;;  %v4090_v25 = vpop.permute.xlu0 %4089  ;;  %vm5622_vm14 = vcmp.lt.s32.totalorder %v5346_v61, %v14792_v28 }
 0x652   : > { %4158 = vst.msk [vmem:[#allocation3 + $0xe0] sm:$0xff] %vm18851_vm10, %v4090_v25  ;;  %vm18859_vm10 = vcmask 146568  }
 0x653   : > { %v16924_v37 = vld [vmem:[#allocation5 + $0x31] sm:$0xff] }
 0x654   : > { %v7564_v45 = vsel %vm7206_vm6, %v16924_v37, 0.0  ;;  %v3324_v51 = vpop.permute.xlu1 %3323 }
 0x655   : > { %12911 = vmatprep.mubr.msk.f32.mxu0 %vm18852_vm9, %v7564_v45  ;;  %3389 = vst.msk [vmem:[#allocation3 + $0xf8] sm:$0xff] %vm3357_vm15, %v3324_v51  ;;  %v4858_v20 = vpop.permute.xlu0 %4857  ;;  %vm18857_vm15 = vmmov %vm18855_vm2  ;;  %v5159_v51 = vadd.s32 248, %v14781_v19 }
 0x656   : > { %4928 = vst.msk [vmem:[#allocation3 + $0xd0] sm:$0xff] %vm18853_vm13, %v4858_v20  ;;  %vm5654_vm9 = vmand %vm5589_vm11, %vm5622_vm14  ;;  %vm18863_vm11 = vcmask 187568   ;;  %vm18864_vm14 = vcmask 162968  }
 0x657   : > { %vm18860_vm13 = vmmov %vm18858_vm5 }
 0x658   : > { %v4092_v3 = vpop.permute.xlu1 %4091 }
 0x659   : > { %4159 = vst.msk [vmem:[#allocation3 + $0xe8] sm:$0xff] %vm18854_vm0, %v4092_v3  ;;  %v3515_v8 = vpop.permute.xlu0 %3514  ;;  %vm5590_vm0 = vcmp.ge.s32.totalorder %v5353_v54, %v14790_v2 }
 0x65a   : > { %3581 = vst.msk [vmem:[#allocation3 + $0xf0] sm:$0xff] %vm18855_vm2, %v3515_v8  ;;  %vm5623_vm2 = vcmp.lt.s32.totalorder %v5353_v54, %v14792_v28  ;;  %v5158_v8 = vadd.s32 240, %v14781_v19  ;;  %v17002_v54 = vld [vmem:[#allocation5 + $0x8] sm:$0xff] }
 0x65c   : > { %v4860_v32 = vpop.permute.xlu1 %4859 }
 0x65d   : > { %4929 = vst.msk [vmem:[#allocation3 + $0xd8] sm:$0xff] %vm18856_vm12, %v4860_v32  ;;  %v4283_v46 = vpop.permute.xlu0 %4282  ;;  %vm18861_vm12 = vcmask 154768  }
 0x65e   : > { %4351 = vst.msk [vmem:[#allocation3 + $0xe0] sm:$0xff] %vm4322_vm4, %v4283_v46 }
 0x660   : > { %v3517_v5 = vpop.permute.xlu1 %3516 }
 0x661   : > { %3582 = vst.msk [vmem:[#allocation3 + $0xf8] sm:$0xff] %vm18857_vm15, %v3517_v5  ;;  %v5051_v26 = vpop.permute.xlu0 %5050  ;;  %vm18862_vm15 = vmmov %vm18859_vm10 }
 0x662   : > { %5121 = vst.msk [vmem:[#allocation3 + $0xd0] sm:$0xff] %vm18858_vm5, %v5051_v26  ;;  %vm5655_vm5 = vmand %vm5590_vm0, %vm5623_vm2  ;;  %vm18869_vm2 = vcmask 203968   ;;  %v5381_v26 = vand.u32 15, %v5159_v51 }
 0x663   : > { %vm18868_vm0 = vmmov %vm18864_vm14 }
 0x664   : > { %v4285_v36 = vpop.permute.xlu1 %4284 }
 0x665   : > { %4352 = vst.msk [vmem:[#allocation3 + $0xe8] sm:$0xff] %vm4322_vm4, %v4285_v36  ;;  %v3708_v1 = vpop.permute.xlu0 %3707  ;;  %v5374_v36 = vand.u32 15, %v5158_v8 }
 0x666   : > { %3774 = vst.msk [vmem:[#allocation3 + $0xf0] sm:$0xff] %vm18859_vm10, %v3708_v1  ;;  %vm18865_vm10 = vmmov %vm18861_vm12 }
 0x668   : > { %v5053_v16 = vpop.permute.xlu1 %5052 }
 0x669   : > { %5122 = vst.msk [vmem:[#allocation3 + $0xd8] sm:$0xff] %vm18860_vm13, %v5053_v16  ;;  %v4476_v44 = vpop.permute.xlu0 %4475  ;;  %v5944_v18 = vld [vmem:[#allocation3 + $0xd0] sm:$0xff]  ;;  %vm18867_vm13 = vmmov %vm18863_vm11 }
 0x66a   : > { %4544 = vst.msk [vmem:[#allocation3 + $0xe0] sm:$0xff] %vm4515_vm8, %v4476_v44  ;;  %v5960_v17 = vsel %vm5654_vm9, %v5944_v18, 0.0  ;;  %vm18866_vm9 = vcmask 195768  }
 0x66b   : > { %12780 = vmatprep.mubr.msk.f32.mxu1 %vm5703_vm3, %v5960_v17 }
 0x66c   : > { %v3901_v58 = vpop.permute.xlu1 %3900 }
 0x66d   : > { %v3710_v47 = vpop.permute.xlu0 %3709  ;;  %3967 = vst.msk [vmem:[#allocation3 + $0xf0] sm:$0xff] %vm18861_vm12, %v3901_v58  ;;  %vm18870_vm12 = vmmov %vm18866_vm9 }
 0x66e   : > { %3775 = vst.msk [vmem:[#allocation3 + $0xf8] sm:$0xff] %vm18862_vm15, %v3710_v47  ;;  %vm5591_vm15 = vcmp.ge.s32.totalorder %v5360_v42, %v14790_v2 }
 0x670   : > { %v4669_v21 = vpop.permute.xlu1 %4668  ;;  %v5945_v49 = vld [vmem:[#allocation3 + $0xd8] sm:$0xff] }
 0x671   : > { %v4478_v57 = vpop.permute.xlu0 %4477  ;;  %4737 = vst.msk [vmem:[#allocation3 + $0xe0] sm:$0xff] %vm18863_vm11, %v4669_v21  ;;  %v5961_v7 = vsel %vm5655_vm5, %v5945_v49, 0.0  ;;  %vm5624_vm5 = vcmp.lt.s32.totalorder %v5360_v42, %v14792_v28  ;;  %v17024_v49 = vld [vmem:[#allocation5 + $0x20] sm:$0xff] }
 0x672   : > { %4545 = vst.msk [vmem:[#allocation3 + $0xe8] sm:$0xff] %vm4515_vm8, %v4478_v57  ;;  %12781 = vmatmul.mubr.msk.f32.gmra.mrb[26].mxu1 %vm5703_vm3, %v5961_v7  ;;  %vm5656_vm11 = vmand %vm5591_vm15, %vm5624_vm5  ;;  %v17027_v57 = vld [vmem:[#allocation5 + $0x28] sm:$0xff]  ;;  %v17030_v7 = vand.u32 7, %v15212_v59 }
 0x674   : > { %v4094_v33 = vpop.permute.xlu1 %4093 }
 0x675   : > { %v3903_v50 = vpop.permute.xlu0 %3902  ;;  %4160 = vst.msk [vmem:[#allocation3 + $0xf0] sm:$0xff] %vm18864_vm14, %v4094_v33  ;;  %vm18871_vm14 = vmmov %vm18869_vm2 }
 0x676   : > { %3968 = vst.msk [vmem:[#allocation3 + $0xf8] sm:$0xff] %vm18865_vm10, %v3903_v50  ;;  %vm16972_vm10 = vcmp.ge.s32.totalorder %v5367_v52, %v14790_v2  ;;  %vm18882_vm5 = vmmov %vm18871_vm14 }
 0x678   : > { %v4862_v9 = vpop.permute.xlu1 %4861 }
 0x679   : > { %v4671_v48 = vpop.permute.xlu0 %4670  ;;  %4930 = vst.msk [vmem:[#allocation3 + $0xe0] sm:$0xff] %vm18866_vm9, %v4862_v9  ;;  %vm18876_vm9 = vmmov %vm18867_vm13  ;;  %v17041_v9 = vld [vmem:[#allocation5 + $0x30] sm:$0xff] }
 0x67a   : > { %4738 = vst.msk [vmem:[#allocation3 + $0xe8] sm:$0xff] %vm18867_vm13, %v4671_v48 }
 0x67c   : > { %v4287_v29 = vpop.permute.xlu1 %4286 }
 0x67d   : > { %v4096_v63 = vpop.permute.xlu0 %4095  ;;  %4353 = vst.msk [vmem:[#allocation3 + $0xf0] sm:$0xff] %vm4322_vm4, %v4287_v29 }
 0x67e   : > { %4161 = vst.msk [vmem:[#allocation3 + $0xf8] sm:$0xff] %vm18868_vm0, %v4096_v63  ;;  %vm18878_vm0 = vmmov %vm18870_vm12 }
 0x680   : > { %v5055_v56 = vpop.permute.xlu1 %5054 }
 0x681   : > { %v4864_v38 = vpop.permute.xlu0 %4863  ;;  %5123 = vst.msk [vmem:[#allocation3 + $0xe0] sm:$0xff] %vm18869_vm2, %v5055_v56  ;;  %vm18879_vm2 = vmmov %vm18878_vm0 }
 0x682   : > { %4931 = vst.msk [vmem:[#allocation3 + $0xe8] sm:$0xff] %vm18870_vm12, %v4864_v38  ;;  %vm18880_vm12 = vcmask 130048   ;;  %v6466_v38 = vld [vmem:[%s18380_s4] sm:$0xff] }
 0x683   : > { %vm18881_vm15 = vmmov %vm18880_vm12 }
 0x684   : > { %v4480_v13 = vpop.permute.xlu1 %4479 }
 0x685   : > { %v4289_v6 = vpop.permute.xlu0 %4288  ;;  %4546 = vst.msk [vmem:[#allocation3 + $0xf0] sm:$0xff] %vm4515_vm8, %v4480_v13  ;;  %v6467_v13 = vld [vmem:[%s18380_s4 + $0x8] sm:$0xff] }
 0x686   : > { %4354 = vst.msk [vmem:[#allocation3 + $0xf8] sm:$0xff] %vm4322_vm4, %v4289_v6  ;;  %vm16977_vm4 = vcmp.lt.s32.totalorder %v5367_v52, %v14792_v28  ;;  %v13213_v60 = vpack.c.bf16 %v6467_v13, %v6466_v38 }
 0x687   : > { %vm5657_vm13 = vmand %vm16972_vm10, %vm16977_vm4  ;;  %vm5627_vm10 = vcmp.lt.s32.totalorder %v5381_v26, %v14792_v28  ;;  %vm5593_vm4 = vcmp.ge.s32.totalorder %v5374_v36, %v14790_v2 }
 0x688   : > { %v4482_v30 = vpop.permute.xlu1 %4481  ;;  %v5946_v23 = vld [vmem:[#allocation3 + $0xe0] sm:$0xff]  ;;  %13214 = vmatprep.subr.bf16.mxu1 %v13213_v60 }
 0x689   : > { %v5057_v10 = vpop.permute.xlu0 %5056  ;;  %4547 = vst.msk [vmem:[#allocation3 + $0xf8] sm:$0xff] %vm4515_vm8, %v4482_v30  ;;  %v5962_v27 = vsel %vm5656_vm11, %v5946_v23, 0.0  ;;  %vm18877_vm8 = vmmov %vm18876_vm9 }
 0x68a   : > { %5124 = vst.msk [vmem:[#allocation3 + $0xe8] sm:$0xff] %vm18871_vm14, %v5057_v10  ;;  %12783 = vmatprep.mubr.msk.f32.mxu1 %vm5703_vm3, %v5962_v27  ;;  %vm18883_vm11 = vmmov %vm18882_vm5  ;;  %vm5594_vm14 = vcmp.ge.s32.totalorder %v5381_v26, %v14790_v2  ;;  %v17011_v2 = vld [vmem:[#allocation5 + $0x10] sm:$0xff] }
 0x68c   : > { %v4675_v12 = vpop.permute.xlu1 %4674 }
 0x68d   : > { %v4673_v22 = vpop.permute.xlu0 %4672  ;;  %4740 = vst.msk [vmem:[#allocation3 + $0xf8] sm:$0xff] %vm18876_vm9, %v4675_v12  ;;  %vm5626_vm9 = vcmp.lt.s32.totalorder %v5374_v36, %v14792_v28  ;;  %v17014_v28 = vld [vmem:[#allocation5 + $0x18] sm:$0xff] }
 0x68e   : > { %4739 = vst.msk [vmem:[#allocation3 + $0xf0] sm:$0xff] %vm18877_vm8, %v4673_v22  ;;  %v12773_v31 = vpop.f32.mrb[20].mxu1  ;;  %vm5659_vm8 = vmand %vm5594_vm14, %vm5627_vm10  ;;  %vm6414_vm14 = vcmp.ge.s32.totalorder %v16918_v35, 2  ;;  %v6754_v22 = vld [vmem:[%s18380_s4 + $0xa8] sm:$0xff] }
 0x68f   : > { %v6120_v25 = vadd.f32 %v12773_v31, %v16789_v11  ;;  %v6114_v45 = vpop.f32.mrb[21].mxu1  ;;  %v6473_v50 = vsel %vm6414_vm14, %v17027_v57, 0.0  ;;  %v17069_v31 = vpack.c.bf16 %v6754_v22, %v6753_v24 }
 0x690   : > { %v6115_v20 = vadd.f32 %v16789_v11, %v6114_v45  ;;  %v4868_v3 = vpop.permute.xlu1 %4867 }
 0x691   : > { %v6178_v32 = vmax.f32 %v6120_v25, 0.0  ;;  %v4866_v62 = vpop.permute.xlu0 %4865  ;;  %4933 = vst.msk [vmem:[#allocation3 + $0xf8] sm:$0xff] %vm18878_vm0, %v4868_v3  ;;  %v5947_v46 = vld [vmem:[#allocation3 + $0xe8] sm:$0xff]  ;;  %vm18449_vm0 = vcmp.ge.s32.totalorder %v15305_v53, 2  ;;  %v7724_v3 = vld [vmem:[%s18380_s4 + $0x108] sm:$0xff] }
 0x692   : > { %v6177_v5 = vmax.f32 %v6115_v20, 0.0  ;;  %4932 = vst.msk [vmem:[#allocation3 + $0xf0] sm:$0xff] %vm18879_vm2, %v4866_v62  ;;  %v5963_v61 = vsel %vm5657_vm13, %v5947_v46, 0.0  ;;  %vm5658_vm13 = vmand %vm5593_vm4, %vm5626_vm9  ;;  %v6469_v58 = vsel %vm18449_vm0, %v17002_v54, 0.0  ;;  %vm6411_vm2 = vcmp.ge.s32.totalorder %v15590_v4, 2  ;;  %v7723_v20 = vld [vmem:[%s18380_s4 + $0x100] sm:$0xff] }
 0x693   : > { %6194 = vst.msk [vmem:[#allocation4 + $0xa8] sm:$0xff] %vm18880_vm12, %v6178_v32  ;;  %12784 = vmatmul.mubr.msk.f32.gmra.mrb[28].mxu1 %vm5703_vm3, %v5963_v61  ;;  %v6470_v47 = vsel %vm6411_vm2, %v17011_v2, 0.0  ;;  %vm18450_vm9 = vcmp.ge.s32.totalorder %v17030_v7, 2  ;;  %v13241_v8 = vpack.c.bf16 %v7724_v3, %v7723_v20  ;;  %v7878_v32 = vld [vmem:[%s18380_s4 + $0x150] sm:$0xff]  ;;  %v7879_v62 = vld [vmem:[%s18380_s4 + $0x158] sm:$0xff] }
 0x694   : > { %6193 = vst.msk [vmem:[#allocation4 + $0xa0] sm:$0xff] %vm18881_vm15, %v6177_v5  ;;  %v5061_v55 = vpop.permute.xlu1 %5060  ;;  %vm6412_vm15 = vcmp.ge.s32.totalorder %v15936_v40, 2  ;;  %v6474_v59 = vsel %vm18450_vm9, %v17041_v9, 0.0  ;;  %v17098_v46 = vpack.c.bf16 %v7879_v62, %v7878_v32  ;;  %v6463_v20 = vsel %vm18450_vm9, %v17027_v57, 0.0  ;;  %v7063_v32 = vld [vmem:[%s18380_s4 + $0x140] sm:$0xff]  ;;  %v7064_v62 = vld [vmem:[%s18380_s4 + $0x148] sm:$0xff] }
 0x695   : > { %v5059_v1 = vpop.permute.xlu0 %5058  ;;  %5126 = vst.msk [vmem:[#allocation3 + $0xf8] sm:$0xff] %vm18882_vm5, %v5061_v55  ;;  %vm18884_vm5 = vmmov %vm18880_vm12  ;;  %v6471_v21 = vsel %vm6412_vm15, %v17014_v28, 0.0  ;;  %13242 = vmatprep.subr.bf16.mxu0 %v13241_v8 }
 0x696   : > { %5125 = vst.msk [vmem:[#allocation3 + $0xf0] sm:$0xff] %vm18883_vm11, %v5059_v1  ;;  %vm6413_vm11 = vcmp.ge.s32.totalorder %v16324_v15, 2  ;;  %13244 = vmatpush3.bf16.msra.mxu0 %v13241_v8 }
 0x697   : > { %v6472_v33 = vsel %vm6413_vm11, %v17024_v49, 0.0  ;;  %13246 = vmatprep.subr.bf16.mxu0 %v17098_v46 }
 0x69b   : > { %v6279_v6 = vld [vmem:[#allocation4 + $0xa0] ss:$2 sm:$0xff]  ;;  %v6281_v30 = vld [vmem:[#allocation4 + $0xa1] ss:$2 sm:$0xff] }
 0x69c   : > { %v5949_v16 = vld [vmem:[#allocation3 + $0xf8] sm:$0xff]  ;;  %v6286_v10 = vmax.f32 %v6279_v6, %v6281_v30  ;;  %v6908_v6 = vld [vmem:[%s18380_s4 + $0xf0] sm:$0xff]  ;;  %v6909_v30 = vld [vmem:[%s18380_s4 + $0xf8] sm:$0xff] }
 0x69d   : > { %v5948_v44 = vld [vmem:[#allocation3 + $0xf0] sm:$0xff]  ;;  %v5965_v18 = vsel %vm5659_vm8, %v5949_v16, 0.0 }
 0x69e   : > { %v5964_v17 = vsel %vm5658_vm13, %v5948_v44, 0.0 }
 0x69f   : > { %12786 = vmatprep.mubr.msk.f32.mxu1 %vm5703_vm3, %v5964_v17 }
 0x6a0   : > { %12787 = vmatmul.mubr.msk.f32.gmra.mrb[30].mxu1 %vm5703_vm3, %v5965_v18  ;;  %vm18885_vm3 = vmmov %vm18884_vm5 }
 0x6a1   : > { %12793 = vmatprep.mubr.msk.f32.mxu1 %vm18880_vm12, %v6469_v58  ;;  %vm18886_vm10 = vmmov %vm18885_vm3 }
 0x6a2   : > { %vm18887_vm4 = vmmov %vm18885_vm3 }
 0x6a3   : > { %vm18888_vm8 = vmmov %vm18885_vm3 }
 0x6a4   : > { %12794 = vmatmul.mubr.msk.f32.vlgmr.msra.gmra.mrb[32].mxu1 %vm18884_vm5, %v6470_v47  ;;  %vm18889_vm13 = vmmov %vm18885_vm3 }
 0x6a5   : > { %12796 = vmatprep.mubr.msk.f32.mxu1 %vm18885_vm3, %v6471_v21  ;;  %vm18890_vm12 = vmmov %vm18885_vm3  ;;  %13216 = vmatpush3.bf16.msra.mxu1 %v13213_v60 }
 0x6a6   : > { %vm18891_vm5 = vmmov %vm18885_vm3  ;;  %13218 = vmatprep.subr.bf16.mxu1 %v17069_v31  ;;  %vm6416_vm3 = vcmp.ge.s32.totalorder %v17061_v43, 2 }
 0x6a7   : > { %v6464_v3 = vsel %vm6416_vm3, %v17041_v9, 0.0 }
 0x6a8   : > { %12797 = vmatmul.mubr.msk.f32.gmra.mrb[34].mxu1 %vm18886_vm10, %v6472_v33  ;;  %vm18448_vm10 = vcmp.ge.s32.totalorder %v17030_v7, 1 }
 0x6a9   : > { %12799 = vmatprep.mubr.msk.f32.mxu1 %vm18887_vm4, %v6473_v50 }
 0x6ac   : > { %12800 = vmatmul.mubr.msk.f32.gmra.mrb[36].mxu1 %vm18888_vm8, %v6474_v59  ;;  %vm18892_vm8 = vmmov %vm18887_vm4 }
 0x6d9   : > { %v12776_v48 = vpop.f32.mrb[22].mxu1 }
 0x6da   : > { %v6130_v14 = vadd.f32 %v12776_v48, %v16789_v11  ;;  %v6124_v29 = vpop.f32.mrb[23].mxu1 }
 0x6db   : > { %v6125_v63 = vadd.f32 %v16789_v11, %v6124_v29 }
 0x6dc   : > { %v6180_v42 = vmax.f32 %v6130_v14, 0.0 }
 0x6dd   : > { %v6179_v56 = vmax.f32 %v6125_v63, 0.0  ;;  %v17112_v63 = vand.u32 7, %v15416_v41 }
 0x6de   : > { %6196 = vst.msk [vmem:[#allocation4 + $0xb8] sm:$0xff] %vm18889_vm13, %v6180_v42  ;;  %vm18893_vm13 = vmmov %vm18887_vm4  ;;  %v6434_v42 = vld [vmem:[#allocation5] sm:$0xff] }
 0x6df   : > { %6195 = vst.msk [vmem:[#allocation4 + $0xb0] sm:$0xff] %vm18890_vm12, %v6179_v56  ;;  %vm18894_vm12 = vmmov %vm18887_vm4  ;;  %v6458_v13 = vsel %vm18449_vm0, %v6434_v42, 0.0  ;;  %v17209_v42 = vld [vmem:[#allocation5 + $0x19] sm:$0xff] }
 0x6e6   : > { %v6283_v23 = vld [vmem:[#allocation4 + $0xb0] ss:$2 sm:$0xff]  ;;  %v6285_v52 = vld [vmem:[#allocation4 + $0xb1] ss:$2 sm:$0xff] }
 0x6e7   : > { %v6287_v27 = vmax.f32 %v6283_v23, %v6285_v52  ;;  %v6459_v23 = vsel %vm6411_vm2, %v17002_v54, 0.0  ;;  %v13221_v52 = vpack.c.bf16 %v6909_v30, %v6908_v6  ;;  %v6461_v54 = vsel %vm6413_vm11, %v17014_v28, 0.0  ;;  %v17222_v30 = vld [vmem:[#allocation5 + $0x21] sm:$0xff] }
 0x6e9   : > { %v6288_v12 = vmax.f32 %v6286_v10, %v6287_v27  ;;  %v6460_v10 = vsel %vm6412_vm15, %v17011_v2, 0.0 }
 0x6eb   : > { %6289 = vst.msk [vmem:[#allocation5 + $0x3a] sm:$0xff] %vm18891_vm5, %v6288_v12  ;;  %vm6217_vm5 = vcmask 125952  }
 0x6ec   : > { %6218 = vst.msk [vmem:[#allocation5 + $0x60] sm:$0xf] %vm6217_vm5, %v13681_v0  ;;  %vm18447_vm5 = vcmp.ge.s32.totalorder %v17061_v43, 1 }
 0x6f2   : > { %v17073_v25 = vld [vmem:[#allocation5 + $0x38] sm:$0xff] }
 0x6f3   : > { %v17076_v34 = vld [vmem:[#allocation5 + $0x39] sm:$0xff]  ;;  %v6475_v45 = vsel %vm6416_vm3, %v17073_v25, 0.0 }
 0x6f4   : > { %v7565_v51 = vsel %vm18448_vm10, %v17076_v34, 0.0  ;;  %12802 = vmatprep.mubr.msk.f32.mxu1 %vm18887_vm4, %v6475_v45  ;;  %vm18900_vm10 = vmmov %vm18887_vm4  ;;  %v6462_v45 = vsel %vm6414_vm14, %v17024_v49, 0.0 }
 0x6f5   : > { %12912 = vmatmul.mubr.msk.f32.gmra.mrb[4].mxu0 %vm18892_vm8, %v7565_v51  ;;  %vm18895_vm8 = vmmov %vm18887_vm4 }
 0x71a   : > { %v12779_v5 = vpop.f32.mrb[24].mxu1 }
 0x71b   : > { %v6140_v61 = vadd.f32 %v12779_v5, %v16789_v11  ;;  %v6134_v26 = vpop.f32.mrb[25].mxu1  ;;  %v6745_v5 = vsel %vm18449_vm0, %v17011_v2, 0.0 }
 0x71c   : > { %v6135_v55 = vadd.f32 %v16789_v11, %v6134_v26 }
 0x71d   : > { %v6182_v36 = vmax.f32 %v6140_v61, 0.0  ;;  %v13225_v61 = vpack.c.bf16 %v7064_v62, %v7063_v32  ;;  %v7719_v32 = vsel %vm7206_vm6, %v17076_v34, 0.0 }
 0x71e   : > { %v6181_v1 = vmax.f32 %v6135_v55, 0.0  ;;  %v6746_v55 = vsel %vm6411_vm2, %v17014_v28, 0.0 }
 0x71f   : > { %6198 = vst.msk [vmem:[#allocation4 + $0xc8] sm:$0xff] %vm18893_vm13, %v6182_v36  ;;  %vm18896_vm13 = vmmov %vm18887_vm4 }
 0x720   : > { %6197 = vst.msk [vmem:[#allocation4 + $0xc0] sm:$0xff] %vm18894_vm12, %v6181_v1  ;;  %vm6417_vm12 = vcmp.ge.s32.totalorder %v17112_v63, 2 }
 0x721   : > { %v6465_v8 = vsel %vm6417_vm12, %v17073_v25, 0.0 }
 0x727   : > { %v6291_v21 = vld [vmem:[#allocation4 + $0xc0] ss:$2 sm:$0xff]  ;;  %v6293_v33 = vld [vmem:[#allocation4 + $0xc1] ss:$2 sm:$0xff] }
 0x728   : > { %v6298_v48 = vmax.f32 %v6291_v21, %v6293_v33 }
 0x745   : > { %v12782_v16 = vpop.f32.mrb[26].mxu1 }
 0x746   : > { %v6150_v44 = vadd.f32 %v12782_v16, %v16789_v11  ;;  %v6144_v18 = vpop.f32.mrb[27].mxu1  ;;  %v6747_v16 = vsel %vm6412_vm15, %v17024_v49, 0.0 }
 0x747   : > { %v6145_v17 = vadd.f32 %v16789_v11, %v6144_v18 }
 0x748   : > { %v6184_v58 = vmax.f32 %v6150_v44, 0.0 }
 0x749   : > { %v6183_v47 = vmax.f32 %v6145_v17, 0.0  ;;  %v6748_v17 = vsel %vm6413_vm11, %v17027_v57, 0.0 }
 0x74a   : > { %6200 = vst.msk [vmem:[#allocation4 + $0xd8] sm:$0xff] %vm18887_vm4, %v6184_v58  ;;  %v6749_v58 = vsel %vm6414_vm14, %v17041_v9, 0.0 }
 0x74b   : > { %6199 = vst.msk [vmem:[#allocation4 + $0xd0] sm:$0xff] %vm18895_vm8, %v6183_v47  ;;  %vm18897_vm8 = vmmov %vm18887_vm4 }
 0x752   : > { %v6295_v50 = vld [vmem:[#allocation4 + $0xd0] ss:$2 sm:$0xff]  ;;  %v6297_v59 = vld [vmem:[#allocation4 + $0xd1] ss:$2 sm:$0xff] }
 0x753   : > { %v6299_v14 = vmax.f32 %v6295_v50, %v6297_v59 }
 0x755   : > { %v6300_v29 = vmax.f32 %v6298_v48, %v6299_v14 }
 0x757   : > { %6301 = vst.msk [vmem:[#allocation5 + $0x42] sm:$0xff] %vm18896_vm13, %v6300_v29  ;;  %vm18898_vm13 = vmmov %vm18887_vm4 }
 0x75e   : > { %v17115_v56 = vld [vmem:[#allocation5 + $0x40] sm:$0xff] }
 0x75f   : > { %v17118_v38 = vld [vmem:[#allocation5 + $0x41] sm:$0xff]  ;;  %v6476_v60 = vsel %vm6417_vm12, %v17115_v56, 0.0  ;;  %v6751_v47 = vsel %vm6416_vm3, %v17115_v56, 0.0  ;;  %v6905_v62 = vsel %vm18450_vm9, %v17115_v56, 0.0 }
 0x760   : > { %v7566_v41 = vsel %vm18447_vm5, %v17118_v38, 0.0  ;;  %12803 = vmatmul.mubr.msk.f32.gmra.mrb[38].mxu1 %vm18887_vm4, %v6476_v60  ;;  %vm18899_vm5 = vmmov %vm18887_vm4 }
 0x761   : > { %12914 = vmatprep.mubr.msk.f32.mxu0 %vm18897_vm8, %v7566_v41  ;;  %12809 = vmatprep.mubr.msk.f32.mxu1 %vm18898_vm13, %v6458_v13  ;;  %vm18903_vm8 = vmmov %vm18887_vm4 }
 0x762   : > { %vm18904_vm13 = vmmov %vm18887_vm4 }
 0x764   : > { %12810 = vmatmul.mubr.msk.f32.vlgmr.msra.gmra.mrb[32].mxu1 %vm18899_vm5, %v6459_v23  ;;  %vm18901_vm5 = vmmov %vm18887_vm4  ;;  %v8025_v23 = vld [vmem:[%s18380_s4 + $0x20] sm:$0xff] }
 0x765   : > { %12812 = vmatprep.mubr.msk.f32.mxu1 %vm18900_vm10, %v6460_v10  ;;  %13220 = vmatpush3.bf16.msra.mxu1 %v17069_v31  ;;  %vm18902_vm10 = vmmov %vm18887_vm4 }
 0x766   : > { %v12785_v27 = vpop.f32.mrb[28].mxu1  ;;  %13222 = vmatprep.subr.bf16.mxu1 %v13221_v52 }
 0x767   : > { %v6160_v12 = vadd.f32 %v12785_v27, %v16789_v11  ;;  %v6154_v24 = vpop.f32.mrb[29].mxu1  ;;  %v8026_v27 = vld [vmem:[%s18380_s4 + $0x28] sm:$0xff] }
 0x768   : > { %v6155_v22 = vadd.f32 %v16789_v11, %v6154_v24  ;;  %12813 = vmatmul.mubr.msk.f32.gmra.mrb[34].mxu1 %vm18901_vm5, %v6461_v54  ;;  %vm18905_vm5 = vmmov %vm18887_vm4  ;;  %v7259_v24 = vld [vmem:[%s18380_s4 + $0x18] sm:$0xff]  ;;  %v6901_v54 = vsel %vm6411_vm2, %v17024_v49, 0.0 }
 0x769   : > { %v6186_v51 = vmax.f32 %v6160_v12, 0.0  ;;  %12815 = vmatprep.mubr.msk.f32.mxu1 %vm18902_vm10, %v6462_v45  ;;  %vm18906_vm10 = vmmov %vm18887_vm4  ;;  %v7258_v12 = vld [vmem:[%s18380_s4 + $0x10] sm:$0xff]  ;;  %v13249_v45 = vpack.c.bf16 %v8026_v27, %v8025_v23  ;;  %v8320_v27 = vld [vmem:[%s18380_s4 + $0xc8] sm:$0xff] }
 0x76a   : > { %v6185_v31 = vmax.f32 %v6155_v22, 0.0  ;;  %v8017_v23 = vld [vmem:[#allocation5 + $0x2] sm:$0xff] }
 0x76b   : > { %6202 = vst.msk [vmem:[#allocation4 + $0xe8] sm:$0xff] %vm18887_vm4, %v6186_v51  ;;  %v13229_v51 = vpack.c.bf16 %v7259_v24, %v7258_v12  ;;  %v8018_v24 = vld [vmem:[#allocation5 + $0xa] sm:$0xff] }
 0x76c   : > { %6201 = vst.msk [vmem:[#allocation4 + $0xe0] sm:$0xff] %vm18903_vm8, %v6185_v31  ;;  %12816 = vmatmul.mubr.msk.f32.gmra.mrb[36].mxu1 %vm18904_vm13, %v6463_v20  ;;  %vm18907_vm8 = vmmov %vm18887_vm4  ;;  %v6902_v31 = vsel %vm6412_vm15, %v17027_v57, 0.0 }
 0x76d   : > { %12818 = vmatprep.mubr.msk.f32.mxu1 %vm18905_vm5, %v6464_v3  ;;  %vm18908_vm13 = vmmov %vm18887_vm4  ;;  %v6903_v3 = vsel %vm6413_vm11, %v17041_v9, 0.0 }
 0x76e   : > { %vm18909_vm5 = vmmov %vm18887_vm4 }
 0x770   : > { %12819 = vmatmul.mubr.msk.f32.gmra.mrb[38].mxu1 %vm18906_vm10, %v6465_v8  ;;  %vm18910_vm10 = vmmov %vm18887_vm4  ;;  %v7718_v8 = vsel %vm7205_vm7, %v16924_v37, 0.0 }
 0x771   : > { %12825 = vmatprep.mubr.msk.f32.mxu1 %vm18887_vm4, %v6745_v5 }
 0x773   : > { %v12788_v26 = vpop.f32.mrb[30].mxu1  ;;  %v6303_v21 = vld [vmem:[#allocation4 + $0xe0] ss:$2 sm:$0xff]  ;;  %v6305_v33 = vld [vmem:[#allocation4 + $0xe1] ss:$2 sm:$0xff] }
 0x774   : > { %v6170_v36 = vadd.f32 %v12788_v26, %v16789_v11  ;;  %v6164_v1 = vpop.f32.mrb[31].mxu1  ;;  %12826 = vmatmul.mubr.msk.f32.vlgmr.msra.gmra.mrb[32].mxu1 %vm18907_vm8, %v6746_v55  ;;  %vm18911_vm8 = vmmov %vm18887_vm4  ;;  %v6310_v48 = vmax.f32 %v6303_v21, %v6305_v33  ;;  %v7058_v21 = vsel %vm6413_vm11, %v17073_v25, 0.0  ;;  %v7873_v33 = vsel %vm7205_vm7, %v17076_v34, 0.0 }
 0x775   : > { %v6165_v44 = vadd.f32 %v16789_v11, %v6164_v1  ;;  %12828 = vmatprep.mubr.msk.f32.mxu1 %vm18908_vm13, %v6747_v16  ;;  %13224 = vmatpush3.bf16.msra.mxu1 %v13221_v52  ;;  %v6750_v11 = vsel %vm18450_vm9, %v17073_v25, 0.0  ;;  %vm18912_vm13 = vmmov %vm18887_vm4  ;;  %v6900_v52 = vsel %vm18449_vm0, %v17014_v28, 0.0  ;;  %v17246_v28 = vld [vmem:[#allocation5 + $0x29] sm:$0xff] }
 0x776   : > { %v6188_v2 = vmax.f32 %v6170_v36, 0.0  ;;  %13226 = vmatprep.subr.bf16.mxu1 %v13225_v61  ;;  %v7717_v20 = vsel %vm7204_vm1, %v17246_v28, 0.0 }
 0x777   : > { %v6187_v18 = vmax.f32 %v6165_v44, 0.0 }
 0x778   : > { %6204 = vst.msk [vmem:[#allocation4 + $0xf8] sm:$0xff] %vm18909_vm5, %v6188_v2  ;;  %12829 = vmatmul.mubr.msk.f32.gmra.mrb[34].mxu1 %vm18910_vm10, %v6748_v17  ;;  %vm18913_vm5 = vmmov %vm18887_vm4  ;;  %v8173_v17 = vld [vmem:[%s18380_s4 + $0x78] sm:$0xff] }
 0x779   : > { %6203 = vst.msk [vmem:[#allocation4 + $0xf0] sm:$0xff] %vm18887_vm4, %v6187_v18  ;;  %12831 = vmatprep.mubr.msk.f32.mxu1 %vm18911_vm8, %v6749_v58  ;;  %vm18914_vm10 = vmmov %vm18887_vm4  ;;  %vm7209_vm4 = vcmp.ge.s32.totalorder %v17112_v63, 1  ;;  %v8172_v18 = vld [vmem:[%s18380_s4 + $0x70] sm:$0xff] }
 0x77a   : > { %vm18915_vm8 = vmmov %vm18913_vm5 }
 0x77c   : > { %12832 = vmatmul.mubr.msk.f32.gmra.mrb[36].mxu1 %vm18912_vm13, %v6750_v11  ;;  %vm18916_vm13 = vmmov %vm18913_vm5  ;;  %v13253_v11 = vpack.c.bf16 %v8173_v17, %v8172_v18  ;;  %v8809_v18 = vld [vmem:[%s18380_s4 + $0x38] sm:$0xff] }
 0x77d   : > { %12834 = vmatprep.mubr.msk.f32.mxu1 %vm18913_vm5, %v6751_v47  ;;  %vm18917_vm5 = vcmp.ge.s32.totalorder %v15305_v53, 1  ;;  %v7057_v47 = vsel %vm6412_vm15, %v17041_v9, 0.0  ;;  %v7059_v9 = vsel %vm6414_vm14, %v17115_v56, 0.0 }
 0x77e   : > { %v7715_v10 = vsel %vm18917_vm5, %v17209_v42, 0.0  ;;  %vm18920_vm5 = vmmov %vm18915_vm8 }
 0x77f   : > { %vm18921_vm0 = vmmov %vm18920_vm5 }
 0x780   : > { %v6307_v50 = vld [vmem:[#allocation4 + $0xf0] ss:$2 sm:$0xff]  ;;  %v6309_v59 = vld [vmem:[#allocation4 + $0xf1] ss:$2 sm:$0xff]  ;;  %vm18931_vm9 = vmmov %vm18921_vm0 }
 0x781   : > { %v6311_v14 = vmax.f32 %v6307_v50, %v6309_v59  ;;  %vm18941_vm15 = vmmov %vm18921_vm0  ;;  %v7874_v50 = vsel %vm7206_vm6, %v17118_v38, 0.0  ;;  %v7869_v59 = vld [vmem:[#allocation5 + $0x59] sm:$0xff] }
 0x782   : > { %vm18943_vm11 = vmmov %vm18921_vm0 }
 0x783   : > { %v6312_v29 = vmax.f32 %v6310_v48, %v6311_v14 }
 0x785   : > { %6313 = vst.msk [vmem:[#allocation5 + $0x4a] sm:$0xff] %vm18914_vm10, %v6312_v29  ;;  %vm18918_vm10 = vmmov %vm18915_vm8  ;;  %v7226_v29 = vld [vmem:[#allocation5 + $0x1] sm:$0xff] }
 0x78c   : > { %v17211_v13 = vld [vmem:[#allocation5 + $0x48] sm:$0xff]  ;;  %v6899_v55 = vld [vmem:[#allocation5 + $0x50] sm:$0xff] }
 0x78d   : > { %v17214_v60 = vld [vmem:[#allocation5 + $0x49] sm:$0xff]  ;;  %v6752_v41 = vsel %vm6417_vm12, %v17211_v13, 0.0  ;;  %v7714_v36 = vld [vmem:[#allocation5 + $0x51] sm:$0xff]  ;;  %v6907_v1 = vsel %vm6417_vm12, %v6899_v55, 0.0  ;;  %v7061_v56 = vsel %vm6416_vm3, %v6899_v55, 0.0 }
 0x78e   : > { %v7567_v6 = vsel %vm7209_vm4, %v17214_v60, 0.0  ;;  %12835 = vmatmul.mubr.msk.f32.gmra.mrb[38].mxu1 %vm18915_vm8, %v6752_v41  ;;  %v7722_v16 = vsel %vm7209_vm4, %v7714_v36, 0.0 }
 0x78f   : > { %12915 = vmatmul.mubr.msk.f32.gmra.mrb[6].mxu0 %vm18916_vm13, %v7567_v6  ;;  %12841 = vmatprep.mubr.msk.f32.mxu1 %vm18918_vm10, %v6900_v52  ;;  %vm18919_vm13 = vcmp.ge.s32.totalorder %v15590_v4, 1  ;;  %vm18922_vm10 = vmmov %vm18921_vm0  ;;  %v7227_v52 = vld [vmem:[#allocation5 + $0x9] sm:$0xff] }
 0x790   : > { %12921 = vmatprep.mubr.msk.f32.mxu0 %vm18915_vm8, %v7715_v10  ;;  %v7716_v22 = vsel %vm18919_vm13, %v17222_v30, 0.0  ;;  %vm18923_vm8 = vmmov %vm18921_vm0  ;;  %v8319_v10 = vld [vmem:[%s18380_s4 + $0xc0] sm:$0xff] }
 0x791   : > { %vm18924_vm13 = vmmov %vm18921_vm0 }
 0x792   : > { %12842 = vmatmul.mubr.msk.f32.vlgmr.msra.gmra.mrb[32].mxu1 %vm18920_vm5, %v6901_v54  ;;  %vm18925_vm5 = vmmov %vm18921_vm0  ;;  %v7228_v54 = vld [vmem:[#allocation5 + $0x11] sm:$0xff] }
 0x793   : > { %12922 = vmatmul.mubr.msk.f32.vlgmr.msra.gmra.mrb[0].mxu0 %vm18921_vm0, %v7716_v22  ;;  %12844 = vmatprep.mubr.msk.f32.mxu1 %vm18922_vm10, %v6902_v31  ;;  %vm18926_vm10 = vmmov %vm18921_vm0  ;;  %v13257_v22 = vpack.c.bf16 %v8320_v27, %v8319_v10  ;;  %v7253_v31 = vsel %vm7205_vm7, %v17209_v42, 0.0  ;;  %vm18965_vm7 = vcmp.ge.s32.totalorder %v17030_v7, 1  ;;  %v17405_v42 = vld [vmem:[#allocation5 + $0x2a] sm:$0xff]  ;;  %v17554_v27 = vld [vmem:[#allocation5 + $0x3b] sm:$0xff] }
 0x794   : > { %13248 = vmatpush3.bf16.msra.mxu0 %v17098_v46  ;;  %12924 = vmatprep.mubr.msk.f32.mxu0 %vm18923_vm8, %v7717_v20  ;;  %v6904_v46 = vsel %vm6414_vm14, %v17073_v25, 0.0  ;;  %vm18927_vm8 = vcmp.ge.s32.totalorder %v17030_v7, 1  ;;  %v7054_v25 = vld [vmem:[#allocation5 + $0x58] sm:$0xff] }
 0x795   : > { %13228 = vmatpush3.bf16.msra.mxu1 %v13225_v61  ;;  %13250 = vmatprep.subr.bf16.mxu0 %v13249_v45  ;;  %v7720_v5 = vsel %vm18927_vm8, %v17118_v38, 0.0  ;;  %v6906_v61 = vsel %vm6416_vm3, %v17211_v13, 0.0  ;;  %vm18932_vm8 = vmmov %vm18921_vm0  ;;  %v8020_v20 = vld [vmem:[#allocation5 + $0x1a] sm:$0xff] }
 0x796   : > { %13230 = vmatprep.subr.bf16.mxu1 %v13229_v51  ;;  %12845 = vmatmul.mubr.msk.f32.gmra.mrb[34].mxu1 %vm18921_vm0, %v6903_v3  ;;  %v7254_v3 = vsel %vm7206_vm6, %v17222_v30, 0.0 }
 0x797   : > { %12925 = vmatmul.mubr.msk.f32.gmra.mrb[2].mxu0 %vm18924_vm13, %v7718_v8  ;;  %12847 = vmatprep.mubr.msk.f32.mxu1 %vm18925_vm5, %v6904_v46  ;;  %vm18928_vm13 = vmmov %vm18921_vm0  ;;  %vm18929_vm5 = vcmp.ge.s32.totalorder %v17061_v43, 1  ;;  %v17397_v8 = vld [vmem:[#allocation5 + $0x22] sm:$0xff]  ;;  %v17413_v46 = vld [vmem:[#allocation5 + $0x32] sm:$0xff] }
 0x798   : > { %12927 = vmatprep.mubr.msk.f32.mxu0 %vm18926_vm10, %v7719_v32  ;;  %v7721_v26 = vsel %vm18929_vm5, %v17214_v60, 0.0  ;;  %vm18930_vm10 = vmmov %vm18921_vm0  ;;  %vm18934_vm5 = vcmp.ge.s32.totalorder %v15305_v53, 1  ;;  %v7257_v32 = vsel %vm7209_vm4, %v17076_v34, 0.0 }
 0x799   : > { %v7870_v2 = vsel %vm18934_vm5, %v17222_v30, 0.0  ;;  %vm18939_vm5 = vmmov %vm18921_vm0 }
 0x79a   : > { %12848 = vmatmul.mubr.msk.f32.gmra.mrb[36].mxu1 %vm18921_vm0, %v6905_v62  ;;  %v8024_v62 = vld [vmem:[#allocation5 + $0x3a] sm:$0xff] }
 0x79b   : > { %12928 = vmatmul.mubr.msk.f32.gmra.mrb[4].mxu0 %vm18928_vm13, %v7720_v5  ;;  %12850 = vmatprep.mubr.msk.f32.mxu1 %vm18930_vm10, %v6906_v61  ;;  %vm18933_vm13 = vcmp.ge.s32.totalorder %v15305_v53, 2  ;;  %vm18936_vm10 = vmmov %vm18921_vm0  ;;  %v8466_v5 = vld [vmem:[%s18380_s4 + $0x110] sm:$0xff]  ;;  %v8467_v61 = vld [vmem:[%s18380_s4 + $0x118] sm:$0xff] }
 0x79c   : > { %12930 = vmatprep.mubr.msk.f32.mxu0 %vm18931_vm9, %v7721_v26  ;;  %v7055_v44 = vsel %vm18933_vm13, %v17024_v49, 0.0  ;;  %vm18935_vm9 = vmmov %vm18921_vm0  ;;  %v7056_v49 = vsel %vm6411_vm2, %v17027_v57, 0.0  ;;  %v7872_v57 = vsel %vm7204_vm1, %v16924_v37, 0.0  ;;  %v7409_v26 = vsel %vm7206_vm6, %v17246_v28, 0.0 }
 0x79d   : > { %vm18938_vm13 = vmmov %vm18921_vm0  ;;  %v13261_v55 = vpack.c.bf16 %v8467_v61, %v8466_v5 }
 0x79e   : > { %12851 = vmatmul.mubr.msk.f32.gmra.mrb[38].mxu1 %vm18932_vm8, %v6907_v1  ;;  %vm18937_vm8 = vcmp.ge.s32.totalorder %v15590_v4, 1  ;;  %vm18940_vm2 = vmmov %vm18921_vm0 }
 0x79f   : > { %12931 = vmatmul.mubr.msk.f32.gmra.mrb[6].mxu0 %vm18921_vm0, %v7722_v16  ;;  %12857 = vmatprep.mubr.msk.f32.mxu1 %vm18935_vm9, %v7055_v44  ;;  %v7871_v58 = vsel %vm18937_vm8, %v17246_v28, 0.0  ;;  %vm18942_vm9 = vmmov %vm18921_vm0  ;;  %vm18945_vm8 = vcmp.ge.s32.totalorder %v17030_v7, 2  ;;  %v8318_v44 = vld [vmem:[#allocation5 + $0x4a] sm:$0xff] }
 0x7a0   : > { %12937 = vmatprep.mubr.msk.f32.mxu0 %vm18936_vm10, %v7870_v2  ;;  %vm18944_vm10 = vmmov %vm18921_vm0  ;;  %v7060_v48 = vsel %vm18945_vm8, %v17211_v13, 0.0  ;;  %v7062_v13 = vsel %vm6417_vm12, %v7054_v25, 0.0  ;;  %vm18956_vm8 = vcmp.ge.s32.totalorder %v15590_v4, 1  ;;  %v8808_v2 = vld [vmem:[%s18380_s4 + $0x30] sm:$0xff] }
 0x7a1   : > { %vm18947_vm14 = vmmov %vm18940_vm2  ;;  %v7251_v12 = vsel %vm18956_vm8, %v7227_v52, 0.0  ;;  %v13269_v17 = vpack.c.bf16 %v8809_v18, %v8808_v2  ;;  %v8777_v25 = vld [vmem:[#allocation5 + $0xb] sm:$0xff] }
 0x7a2   : > { %12858 = vmatmul.mubr.msk.f32.vlgmr.msra.gmra.mrb[32].mxu1 %vm18921_vm0, %v7056_v49  ;;  %vm18946_vm0 = vcmp.ge.s32.totalorder %v17030_v7, 1  ;;  %vm18953_vm3 = vmmov %vm18940_vm2  ;;  %v8465_v49 = vld [vmem:[#allocation5 + $0x52] sm:$0xff] }
 0x7a3   : > { %12938 = vmatmul.mubr.msk.f32.vlgmr.msra.gmra.mrb[0].mxu0 %vm18938_vm13, %v7871_v58  ;;  %12860 = vmatprep.mubr.msk.f32.mxu1 %vm18939_vm5, %v7057_v47  ;;  %v7875_v14 = vsel %vm18946_vm0, %v17214_v60, 0.0  ;;  %vm18948_vm13 = vmmov %vm18940_vm2  ;;  %vm18949_vm5 = vcmp.ge.s32.totalorder %v17061_v43, 1  ;;  %v7877_v60 = vsel %vm7209_vm4, %v7869_v59, 0.0  ;;  %v8963_v58 = vld [vmem:[%s18380_s4 + $0x80] sm:$0xff] }
 0x7a4   : > { %13252 = vmatpush3.bf16.msra.mxu0 %v13249_v45  ;;  %12940 = vmatprep.mubr.msk.f32.mxu0 %vm18940_vm2, %v7872_v57  ;;  %v7876_v41 = vsel %vm18949_vm5, %v7714_v36, 0.0  ;;  %vm18954_vm12 = vmmov %vm18940_vm2  ;;  %v7252_v45 = vsel %vm7204_vm1, %v7228_v54, 0.0  ;;  %v8776_v57 = vld [vmem:[#allocation5 + $0x3] sm:$0xff]  ;;  %v8778_v59 = vld [vmem:[#allocation5 + $0x13] sm:$0xff] }
 0x7a5   : > { %13232 = vmatpush3.bf16.msra.mxu1 %v13229_v51  ;;  %13254 = vmatprep.subr.bf16.mxu0 %v13253_v11  ;;  %vm18957_vm0 = vmmov %vm18940_vm2  ;;  %v8019_v51 = vld [vmem:[#allocation5 + $0x12] sm:$0xff]  ;;  %v9274_v54 = vld [vmem:[%s18380_s4 + $0x128] sm:$0xff] }
 0x7a6   : > { %13437 = vmatprep.subr.bf16.mxu1 %v15302_v39  ;;  %12861 = vmatmul.mubr.msk.f32.gmra.mrb[34].mxu1 %vm18941_vm15, %v7058_v21  ;;  %vm18950_vm15 = vmmov %vm18940_vm2  ;;  %v8612_v21 = vld [vmem:[#allocation5 + $0x5a] sm:$0xff] }
 0x7a7   : > { %12941 = vmatmul.mubr.msk.f32.gmra.mrb[2].mxu0 %vm18942_vm9, %v7873_v33  ;;  %12863 = vmatprep.mubr.msk.f32.mxu1 %vm18943_vm11, %v7059_v9  ;;  %vm18951_vm9 = vcmp.ge.s32.totalorder %v15305_v53, 1  ;;  %vm18952_vm11 = vmmov %vm18940_vm2  ;;  %v9118_v9 = vld [vmem:[%s18380_s4 + $0xd0] sm:$0xff] }
 0x7a8   : > { %12943 = vmatprep.mubr.msk.f32.mxu0 %vm18944_vm10, %v7874_v50  ;;  %v7250_v6 = vsel %vm18951_vm9, %v7226_v29, 0.0  ;;  %vm18955_vm10 = vmmov %vm18940_vm2  ;;  %v9119_v50 = vld [vmem:[%s18380_s4 + $0xd8] sm:$0xff] }
 0x7a9   : > { %vm18960_vm5 = vmmov %vm18957_vm0 }
 0x7aa   : > { %12864 = vmatmul.mubr.msk.f32.gmra.mrb[36].mxu1 %vm18947_vm14, %v7060_v48  ;;  %vm18958_vm14 = vmmov %vm18957_vm0  ;;  %v13277_v48 = vpack.c.bf16 %v9119_v50, %v9118_v9  ;;  %v9779_v9 = vld [vmem:[%s18380_s4 + $0x98] sm:$0xff] }
 0x7ab   : > { %12944 = vmatmul.mubr.msk.f32.gmra.mrb[4].mxu0 %vm18948_vm13, %v7875_v14  ;;  %12866 = vmatprep.mubr.msk.f32.mxu1 %vm18940_vm2, %v7061_v56  ;;  %vm18959_vm13 = vmmov %vm18957_vm0  ;;  %v17526_v56 = vld [vmem:[#allocation5 + $0x1b] sm:$0xff] }
 0x7ac   : > { %12946 = vmatprep.mubr.msk.f32.mxu0 %vm18950_vm15, %v7876_v41  ;;  %vm18961_vm2 = vmmov %vm18957_vm0  ;;  %v17530_v41 = vld [vmem:[#allocation5 + $0x23] sm:$0xff] }
 0x7ad   : > { %vm18962_vm15 = vmmov %vm18957_vm0 }
 0x7ae   : > { %12867 = vmatmul.mubr.msk.f32.gmra.mrb[38].mxu1 %vm18952_vm11, %v7062_v13  ;;  %vm18963_vm1 = vmmov %vm18957_vm0 }
 0x7af   : > { %12947 = vmatmul.mubr.msk.f32.gmra.mrb[6].mxu0 %vm18953_vm3, %v7877_v60  ;;  %12873 = vmatprep.mubr.msk.f32.mxu1 %vm18954_vm12, %v7250_v6  ;;  %vm18964_vm9 = vmmov %vm18957_vm0  ;;  %vm18968_vm12 = vcmp.ge.s32.totalorder %v17061_v43, 1  ;;  %v17540_v6 = vld [vmem:[#allocation5 + $0x2b] sm:$0xff] }
 0x7b0   : > { %12953 = vmatprep.mubr.msk.f32.mxu0 %vm18955_vm10, %v8017_v23  ;;  %vm18966_vm11 = vmmov %vm18957_vm0  ;;  %v7256_v30 = vsel %vm18968_vm12, %v16924_v37, 0.0  ;;  %v17544_v23 = vld [vmem:[#allocation5 + $0x33] sm:$0xff] }
 0x7b1   : > { %vm18967_vm3 = vmmov %vm18957_vm0 }
 0x7b2   : > { %12874 = vmatmul.mubr.msk.f32.vlgmr.msra.gmra.mrb[32].mxu1 %vm18957_vm0, %v7251_v12  ;;  %vm18969_vm10 = vmmov %vm18957_vm0 }
 0x7b3   : > { %12954 = vmatmul.mubr.msk.f32.vlgmr.msra.gmra.mrb[0].mxu0 %vm18958_vm14, %v8018_v24  ;;  %12876 = vmatprep.mubr.msk.f32.mxu1 %vm18959_vm13, %v7252_v45  ;;  %vm18970_vm8 = vmmov %vm18957_vm0 }
 0x7b4   : > { %13256 = vmatpush3.bf16.msra.mxu0 %v13253_v11  ;;  %12956 = vmatprep.mubr.msk.f32.mxu0 %vm18960_vm5, %v8019_v51  ;;  %vm18971_vm14 = vmmov %vm18957_vm0  ;;  %v8964_v11 = vld [vmem:[%s18380_s4 + $0x88] sm:$0xff] }
 0x7b5   : > { %13438 = vmatpush3.bf16.msra.mxu1 %v15302_v39  ;;  %13258 = vmatprep.subr.bf16.mxu0 %v13257_v22  ;;  %v7255_v39 = vsel %vm18965_vm7, %v17246_v28, 0.0  ;;  %vm18972_vm13 = vmmov %vm18957_vm0  ;;  %v7412_v28 = vsel %vm7209_vm4, %v17118_v38, 0.0  ;;  %v8614_v38 = vld [vmem:[%s18380_s4 + $0x168] sm:$0xff]  ;;  %v13273_v47 = vpack.c.bf16 %v8964_v11, %v8963_v58  ;;  %v9264_v11 = vld [vmem:[#allocation5 + $0x53] sm:$0xff] }
 0x7b6   : > { %12877 = vmatmul.mubr.msk.f32.gmra.mrb[34].mxu1 %vm18961_vm2, %v7253_v31  ;;  %vm18973_vm5 = vmmov %vm18957_vm0 }
 0x7b7   : > { %12957 = vmatmul.mubr.msk.f32.gmra.mrb[2].mxu0 %vm18962_vm15, %v8020_v20  ;;  %12879 = vmatprep.mubr.msk.f32.mxu1 %vm18963_vm1, %v7254_v3  ;;  %vm18974_vm2 = vmmov %vm18965_vm7 }
 0x7b8   : > { %12959 = vmatprep.mubr.msk.f32.mxu0 %vm18964_vm9, %v17397_v8  ;;  %v7410_v36 = vsel %vm18974_vm2, %v16924_v37, 0.0  ;;  %vm18975_vm15 = vmmov %vm18957_vm0  ;;  %v8171_v37 = vld [vmem:[#allocation5 + $0x42] sm:$0xff] }
 0x7b9   : > { %vm18976_vm1 = vmmov %vm18957_vm0 }
 0x7ba   : > { %12880 = vmatmul.mubr.msk.f32.gmra.mrb[36].mxu1 %vm18966_vm11, %v7255_v39  ;;  %vm18977_vm9 = vmmov %vm18968_vm12 }
 0x7bb   : > { %12960 = vmatmul.mubr.msk.f32.gmra.mrb[4].mxu0 %vm18967_vm3, %v17405_v42  ;;  %12882 = vmatprep.mubr.msk.f32.mxu1 %vm18969_vm10, %v7256_v30  ;;  %v7411_v1 = vsel %vm18977_vm9, %v17076_v34, 0.0  ;;  %vm18978_vm7 = vmmov %vm18957_vm0  ;;  %v8613_v34 = vld [vmem:[%s18380_s4 + $0x160] sm:$0xff] }
 0x7bc   : > { %12962 = vmatprep.mubr.msk.f32.mxu0 %vm18970_vm8, %v17413_v46  ;;  %vm18979_vm6 = vmmov %vm18957_vm0  ;;  %v13265_v16 = vpack.c.bf16 %v8614_v38, %v8613_v34  ;;  %v9623_v38 = vld [vmem:[%s18380_s4 + $0x40] sm:$0xff] }
 0x7bd   : > { %vm18980_vm11 = vmmov %vm18957_vm0 }
 0x7be   : > { %12883 = vmatmul.mubr.msk.f32.gmra.mrb[38].mxu1 %vm18957_vm0, %v7257_v32  ;;  %vm18981_vm3 = vmmov %vm18957_vm0  ;;  %v9429_v32 = vld [vmem:[%s18380_s4 + $0x178] sm:$0xff] }
 0x7bf   : > { %12963 = vmatmul.mubr.msk.f32.gmra.mrb[6].mxu0 %vm18971_vm14, %v8024_v62  ;;  %12895 = vmatprep.mubr.msk.f32.mxu1 %vm18972_vm13, %v7409_v26  ;;  %vm18982_vm12 = vmmov %vm18957_vm0 }
 0x7c0   : > { %12969 = vmatprep.mubr.msk.f32.mxu0 %vm18973_vm5, %v8018_v24  ;;  %vm18983_vm10 = vmmov %vm18957_vm0  ;;  %v9273_v24 = vld [vmem:[%s18380_s4 + $0x120] sm:$0xff] }
 0x7c1   : > { %vm18984_vm8 = vmmov %vm18957_vm0  ;;  %v13281_v45 = vpack.c.bf16 %v9274_v54, %v9273_v24 }
 0x7c2   : > { %12896 = vmatmul.mubr.msk.f32.vlgmr.msra.gmra.mrb[36].mxu1 %vm18975_vm15, %v7410_v36  ;;  %vm18985_vm4 = vmmov %vm18957_vm0 }
 0x7c3   : > { %12970 = vmatmul.mubr.msk.f32.vlgmr.msra.gmra.mrb[0].mxu0 %vm18976_vm1, %v8019_v51  ;;  %12898 = vmatprep.mubr.msk.f32.mxu1 %vm18978_vm7, %v7411_v1  ;;  %vm18986_vm14 = vmmov %vm18957_vm0 }
 0x7c4   : > { %13260 = vmatpush3.bf16.msra.mxu0 %v13257_v22  ;;  %12972 = vmatprep.mubr.msk.f32.mxu0 %vm18979_vm6, %v8020_v20  ;;  %vm18987_vm13 = vmmov %vm18957_vm0 }
 0x7c5   : > { %13262 = vmatprep.subr.bf16.mxu0 %v13261_v55  ;;  %vm18988_vm5 = vmmov %vm18957_vm0 }
 0x7c6   : > { %12899 = vmatmul.mubr.msk.f32.gmra.mrb[38].mxu1 %vm18980_vm11, %v7412_v28  ;;  %vm18989_vm2 = vmmov %vm18957_vm0 }
 0x7c7   : > { %12973 = vmatmul.mubr.msk.f32.gmra.mrb[2].mxu0 %vm18981_vm3, %v17397_v8  ;;  %10500 = vmatprep.mubr.f32.mxu1 %v13681_v0  ;;  %vm18990_vm15 = vmmov %vm18957_vm0 }
 0x7c8   : > { %12975 = vmatprep.mubr.msk.f32.mxu0 %vm18982_vm12, %v17405_v42  ;;  %vm18991_vm1 = vmmov %vm18957_vm0 }
 0x7c9   : > { %vm18992_vm9 = vmmov %vm18957_vm0 }
 0x7ca   : > { %vm18993_vm7 = vmmov %vm18957_vm0 }
 0x7cb   : > { %12976 = vmatmul.mubr.msk.f32.gmra.mrb[4].mxu0 %vm18983_vm10, %v17413_v46  ;;  %vm18994_vm6 = vmmov %vm18957_vm0 }
 0x7cc   : > { %12978 = vmatprep.mubr.msk.f32.mxu0 %vm18984_vm8, %v8024_v62  ;;  %vm18995_vm11 = vmmov %vm18957_vm0 }
 0x7cd   : > { %vm18996_vm3 = vmmov %vm18957_vm0 }
 0x7ce   : > { %vm18997_vm12 = vmmov %vm18957_vm0 }
 0x7cf   : > { %12979 = vmatmul.mubr.msk.f32.gmra.mrb[6].mxu0 %vm18985_vm4, %v8171_v37  ;;  %vm18998_vm10 = vmmov %vm18957_vm0 }
 0x7d0   : > { %12985 = vmatprep.mubr.msk.f32.mxu0 %vm18957_vm0, %v8019_v51  ;;  %vm18999_vm8 = vmmov %vm18957_vm0 }
 0x7d1   : > { %vm19000_vm4 = vmmov %vm18957_vm0 }
 0x7d3   : > { %12986 = vmatmul.mubr.msk.f32.vlgmr.msra.gmra.mrb[0].mxu0 %vm18986_vm14, %v8020_v20  ;;  %vm19001_vm14 = vmmov %vm18957_vm0 }
 0x7d4   : > { %13264 = vmatpush3.bf16.msra.mxu0 %v13261_v55  ;;  %12988 = vmatprep.mubr.msk.f32.mxu0 %vm18987_vm13, %v17397_v8  ;;  %vm19002_vm13 = vmmov %vm18957_vm0 }
 0x7d5   : > { %13266 = vmatprep.subr.bf16.mxu0 %v13265_v16 }
 0x7d7   : > { %12989 = vmatmul.mubr.msk.f32.gmra.mrb[2].mxu0 %vm18988_vm5, %v17405_v42  ;;  %vm19003_vm5 = vmmov %vm18957_vm0 }
 0x7d8   : > { %12991 = vmatprep.mubr.msk.f32.mxu0 %vm18989_vm2, %v17413_v46  ;;  %vm19004_vm2 = vmmov %vm18957_vm0 }
 0x7db   : > { %12992 = vmatmul.mubr.msk.f32.gmra.mrb[4].mxu0 %vm18990_vm15, %v8024_v62  ;;  %vm19005_vm15 = vmmov %vm18957_vm0 }
 0x7dc   : > { %12994 = vmatprep.mubr.msk.f32.mxu0 %vm18991_vm1, %v8171_v37  ;;  %vm19006_vm1 = vmmov %vm18957_vm0 }
 0x7df   : > { %12995 = vmatmul.mubr.msk.f32.gmra.mrb[6].mxu0 %vm18992_vm9, %v8318_v44  ;;  %vm8760_vm9 = vcmp.lt.s32.totalorder %v15305_v53, 7 }
 0x7e0   : > { %13001 = vmatprep.mubr.msk.f32.mxu0 %vm18993_vm7, %v8020_v20  ;;  %v8800_v33 = vsel %vm8760_vm9, %v8776_v57, 0.0  ;;  %vm19007_vm7 = vmmov %vm18957_vm0  ;;  %v8955_v22 = vsel %vm8760_vm9, %v8777_v25, 0.0  ;;  %v9420_v50 = vsel %vm8760_vm9, %v17530_v41, 0.0 }
 0x7e3   : > { %13002 = vmatmul.mubr.msk.f32.vlgmr.msra.gmra.mrb[0].mxu0 %vm18994_vm6, %v17397_v8  ;;  %vm8761_vm6 = vcmp.lt.s32.totalorder %v15590_v4, 7 }
 0x7e4   : > { %13268 = vmatpush3.bf16.msra.mxu0 %v13265_v16  ;;  %13004 = vmatprep.mubr.msk.f32.mxu0 %vm18995_vm11, %v17405_v42  ;;  %vm19008_vm11 = vmmov %vm18957_vm0  ;;  %v8801_v14 = vsel %vm8761_vm6, %v8777_v25, 0.0  ;;  %v8956_v51 = vsel %vm8761_vm6, %v8778_v59, 0.0  ;;  %v9111_v61 = vsel %vm8761_vm6, %v17526_v56, 0.0  ;;  %v9624_v16 = vld [vmem:[%s18380_s4 + $0x48] sm:$0xff]  ;;  %v9266_v18 = vsel %vm8761_vm6, %v17530_v41, 0.0 }
 0x7e5   : > { %13270 = vmatprep.subr.bf16.mxu0 %v13269_v17  ;;  %v13289_v2 = vpack.c.bf16 %v9624_v16, %v9623_v38  ;;  %v10243_v16 = vld [vmem:[%s18380_s4 + $0x180] sm:$0xff] }
 0x7e7   : > { %13005 = vmatmul.mubr.msk.f32.gmra.mrb[2].mxu0 %vm18996_vm3, %v17413_v46  ;;  %vm8762_vm3 = vcmp.lt.s32.totalorder %v15936_v40, 7 }
 0x7e8   : > { %13007 = vmatprep.mubr.msk.f32.mxu0 %vm18997_vm12, %v8024_v62  ;;  %vm19009_vm12 = vmmov %vm18957_vm0  ;;  %v8802_v29 = vsel %vm8762_vm3, %v8778_v59, 0.0  ;;  %v8957_v31 = vsel %vm8762_vm3, %v17526_v56, 0.0  ;;  %v9112_v26 = vsel %vm8762_vm3, %v17530_v41, 0.0 }
 0x7eb   : > { %13008 = vmatmul.mubr.msk.f32.gmra.mrb[4].mxu0 %vm18998_vm10, %v8171_v37  ;;  %vm8763_vm10 = vcmp.lt.s32.totalorder %v16324_v15, 7 }
 0x7ec   : > { %13010 = vmatprep.mubr.msk.f32.mxu0 %vm18999_vm8, %v8318_v44  ;;  %vm19010_vm8 = vmmov %vm18957_vm0  ;;  %v8803_v13 = vsel %vm8763_vm10, %v17526_v56, 0.0  ;;  %v8958_v20 = vsel %vm8763_vm10, %v17530_v41, 0.0  ;;  %v9113_v55 = vsel %vm8763_vm10, %v17540_v6, 0.0 }
 0x7ef   : > { %13011 = vmatmul.mubr.msk.f32.gmra.mrb[6].mxu0 %vm19000_vm4, %v8465_v49  ;;  %vm8764_vm4 = vcmp.lt.s32.totalorder %v16918_v35, 7 }
 0x7f0   : > { %13017 = vmatprep.mubr.msk.f32.mxu0 %vm18957_vm0, %v17397_v8  ;;  %v8804_v60 = vsel %vm8764_vm4, %v17530_v41, 0.0  ;;  %v8959_v3 = vsel %vm8764_vm4, %v17540_v6, 0.0  ;;  %v9114_v36 = vsel %vm8764_vm4, %v17544_v23, 0.0  ;;  %v9269_v58 = vsel %vm8764_vm4, %v17554_v27, 0.0  ;;  %v9419_v41 = vld [vmem:[#allocation5 + $0x5b] sm:$0xff] }
 0x7f3   : > { %13018 = vmatmul.mubr.msk.f32.vlgmr.msra.gmra.mrb[0].mxu0 %vm19001_vm14, %v17405_v42  ;;  %vm8765_vm14 = vcmp.lt.s32.totalorder %v17030_v7, 7  ;;  %v8954_v42 = vld [vmem:[#allocation5 + $0x43] sm:$0xff] }
 0x7f4   : > { %13272 = vmatpush3.bf16.msra.mxu0 %v13269_v17  ;;  %13020 = vmatprep.mubr.msk.f32.mxu0 %vm19002_vm13, %v17413_v46  ;;  %vm19011_vm13 = vmmov %vm18957_vm0  ;;  %v8805_v52 = vsel %vm8765_vm14, %v17540_v6, 0.0  ;;  %v8960_v8 = vsel %vm8765_vm14, %v17544_v23, 0.0  ;;  %v9428_v46 = vld [vmem:[%s18380_s4 + $0x170] sm:$0xff]  ;;  %v9115_v1 = vsel %vm8765_vm14, %v17554_v27, 0.0  ;;  %v9267_v17 = vsel %vm8762_vm3, %v17540_v6, 0.0 }
 0x7f5   : > { %13274 = vmatprep.subr.bf16.mxu0 %v13273_v47  ;;  %v13285_v5 = vpack.c.bf16 %v9429_v32, %v9428_v46  ;;  %v10088_v32 = vld [vmem:[%s18380_s4 + $0x130] sm:$0xff] }
 0x7f7   : > { %13021 = vmatmul.mubr.msk.f32.gmra.mrb[2].mxu0 %vm19003_vm5, %v8024_v62  ;;  %vm8766_vm5 = vcmp.lt.s32.totalorder %v17061_v43, 7  ;;  %v9110_v62 = vsel %vm8760_vm9, %v8778_v59, 0.0  ;;  %v9421_v59 = vsel %vm8761_vm6, %v17540_v6, 0.0  ;;  %vm19040_vm6 = vmmov %vm18957_vm0 }
 0x7f8   : > { %13023 = vmatprep.mubr.msk.f32.mxu0 %vm19004_vm2, %v8171_v37  ;;  %vm19012_vm2 = vmmov %vm18957_vm0  ;;  %v8806_v10 = vsel %vm8766_vm5, %v17544_v23, 0.0  ;;  %v8961_v39 = vsel %vm8766_vm5, %v17554_v27, 0.0  ;;  %v9116_v28 = vsel %vm8766_vm5, %v8954_v42, 0.0  ;;  %v9109_v37 = vld [vmem:[#allocation5 + $0x4b] sm:$0xff] }
 0x7f9   : > { %v9271_v57 = vsel %vm8766_vm5, %v9109_v37, 0.0 }
 0x7fb   : > { %13024 = vmatmul.mubr.msk.f32.gmra.mrb[4].mxu0 %vm19005_vm15, %v8318_v44  ;;  %vm8767_vm15 = vcmp.lt.s32.totalorder %v17112_v63, 7  ;;  %v9265_v44 = vsel %vm8760_vm9, %v17526_v56, 0.0  ;;  %vm19039_vm9 = vmmov %vm18957_vm0  ;;  %v9426_v56 = vsel %vm8766_vm5, %v9264_v11, 0.0 }
 0x7fc   : > { %13026 = vmatprep.mubr.msk.f32.mxu0 %vm19006_vm1, %v8465_v49  ;;  %vm19013_vm1 = vmmov %vm18957_vm0  ;;  %v8807_v12 = vsel %vm8767_vm15, %v17554_v27, 0.0  ;;  %v8962_v30 = vsel %vm8767_vm15, %v8954_v42, 0.0  ;;  %v9117_v34 = vsel %vm8767_vm15, %v9109_v37, 0.0  ;;  %v9268_v49 = vsel %vm8763_vm10, %v17544_v23, 0.0 }
 0x7fd   : > { %v9427_v6 = vsel %vm8767_vm15, %v9419_v41, 0.0  ;;  %vm19043_vm5 = vmmov %vm18957_vm0 }
 0x7ff   : > { %13027 = vmatmul.mubr.msk.f32.gmra.mrb[6].mxu0 %vm19007_vm7, %v8612_v21  ;;  %vm19014_vm7 = vmmov %vm18957_vm0  ;;  %v9272_v21 = vsel %vm8767_vm15, %v9264_v11, 0.0  ;;  %vm9577_vm15 = vcmp.lt.s32.totalorder %v15936_v40, 6  ;;  %v10234_v40 = vld [vmem:[#allocation5 + $0x5c] sm:$0xff] }
 0x800   : > { %13033 = vmatprep.mubr.msk.f32.mxu0 %vm19008_vm11, %v8800_v33  ;;  %vm19015_vm11 = vmmov %vm18957_vm0  ;;  %v9778_v33 = vld [vmem:[%s18380_s4 + $0x90] sm:$0xff] }
 0x801   : > { %v13293_v25 = vpack.c.bf16 %v9779_v9, %v9778_v33 }
 0x803   : > { %13034 = vmatmul.mubr.msk.f32.vlgmr.msra.gmra.mrb[0].mxu0 %vm19009_vm12, %v8801_v14  ;;  %vm19016_vm12 = vmmov %vm18957_vm0  ;;  %v9423_v14 = vsel %vm8763_vm10, %v17554_v27, 0.0  ;;  %vm9575_vm10 = vcmp.lt.s32.totalorder %v15305_v53, 6  ;;  %v9592_v27 = vld [vmem:[#allocation5 + $0xc] sm:$0xff] }
 0x804   : > { %13276 = vmatpush3.bf16.msra.mxu0 %v13273_v47  ;;  %13036 = vmatprep.mubr.msk.f32.mxu0 %vm19010_vm8, %v8802_v29  ;;  %vm19017_vm8 = vmmov %vm18957_vm0  ;;  %v9270_v47 = vsel %vm8765_vm14, %v8954_v42, 0.0  ;;  %v9424_v29 = vsel %vm8764_vm4, %v8954_v42, 0.0 }
 0x805   : > { %13278 = vmatprep.subr.bf16.mxu0 %v13277_v48  ;;  %vm19042_vm4 = vmmov %vm18957_vm0 }
 0x807   : > { %13037 = vmatmul.mubr.msk.f32.gmra.mrb[2].mxu0 %vm18957_vm0, %v8803_v13  ;;  %v9425_v13 = vsel %vm8765_vm14, %v9109_v37, 0.0  ;;  %vm9576_vm14 = vcmp.lt.s32.totalorder %v15590_v4, 6 }
 0x808   : > { %13039 = vmatprep.mubr.msk.f32.mxu0 %vm19011_vm13, %v8804_v60  ;;  %vm19018_vm13 = vmmov %vm18957_vm0  ;;  %v9591_v60 = vld [vmem:[#allocation5 + $0x4] sm:$0xff]  ;;  %v9616_v54 = vsel %vm9576_vm14, %v9592_v27, 0.0 }
 0x80b   : > { %13040 = vmatmul.mubr.msk.f32.gmra.mrb[4].mxu0 %vm19012_vm2, %v8805_v52  ;;  %vm19019_vm2 = vmmov %vm18957_vm0  ;;  %v9933_v52 = vld [vmem:[%s18380_s4 + $0xe0] sm:$0xff] }
 0x80c   : > { %13042 = vmatprep.mubr.msk.f32.mxu0 %vm19013_vm1, %v8806_v10  ;;  %vm19020_vm1 = vmmov %vm18957_vm0  ;;  %v9934_v10 = vld [vmem:[%s18380_s4 + $0xe8] sm:$0xff] }
 0x80d   : > { %v13297_v24 = vpack.c.bf16 %v9934_v10, %v9933_v52 }
 0x80f   : > { %13043 = vmatmul.mubr.msk.f32.gmra.mrb[6].mxu0 %vm19014_vm7, %v8807_v12  ;;  %vm19021_vm7 = vmmov %vm18957_vm0  ;;  %v9593_v12 = vld [vmem:[#allocation5 + $0x14] sm:$0xff] }
 0x810   : > { %13049 = vmatprep.mubr.msk.f32.mxu0 %vm19015_vm11, %v8955_v22  ;;  %vm19022_vm11 = vmmov %vm18957_vm0  ;;  %v9617_v22 = vsel %vm9577_vm15, %v9593_v12, 0.0 }
 0x813   : > { %13050 = vmatmul.mubr.msk.f32.vlgmr.msra.gmra.mrb[0].mxu0 %vm19016_vm12, %v8956_v51  ;;  %vm19023_vm12 = vmmov %vm18957_vm0  ;;  %v17722_v51 = vld [vmem:[#allocation5 + $0x24] sm:$0xff] }
 0x814   : > { %13280 = vmatpush3.bf16.msra.mxu0 %v13277_v48  ;;  %13052 = vmatprep.mubr.msk.f32.mxu0 %vm19017_vm8, %v8957_v31  ;;  %vm19024_vm8 = vmmov %vm18957_vm0  ;;  %v9422_v48 = vsel %vm8762_vm3, %v17544_v23, 0.0  ;;  %v9615_v23 = vsel %vm9575_vm10, %v9591_v60, 0.0  ;;  %v10235_v52 = vsel %vm9575_vm10, %v17722_v51, 0.0 }
 0x815   : > { %13282 = vmatprep.subr.bf16.mxu0 %v13281_v45  ;;  %vm19041_vm3 = vmmov %vm18957_vm0 }
 0x817   : > { %13053 = vmatmul.mubr.msk.f32.gmra.mrb[2].mxu0 %vm18957_vm0, %v8958_v20 }
 0x818   : > { %13055 = vmatprep.mubr.msk.f32.mxu0 %vm19018_vm13, %v8959_v3  ;;  %vm19025_vm13 = vmmov %vm18957_vm0  ;;  %v17732_v3 = vld [vmem:[#allocation5 + $0x2c] sm:$0xff] }
 0x819   : > { %v10236_v10 = vsel %vm9576_vm14, %v17732_v3, 0.0 }
 0x81b   : > { %13056 = vmatmul.mubr.msk.f32.gmra.mrb[4].mxu0 %vm19019_vm2, %v8960_v8  ;;  %vm19026_vm2 = vmmov %vm18957_vm0  ;;  %v17736_v8 = vld [vmem:[#allocation5 + $0x34] sm:$0xff] }
 0x81c   : > { %13058 = vmatprep.mubr.msk.f32.mxu0 %vm19020_vm1, %v8961_v39  ;;  %vm19027_vm1 = vmmov %vm18957_vm0 }
 0x81f   : > { %13059 = vmatmul.mubr.msk.f32.gmra.mrb[6].mxu0 %vm19021_vm7, %v8962_v30  ;;  %vm19028_vm7 = vmmov %vm18957_vm0  ;;  %v17746_v30 = vld [vmem:[#allocation5 + $0x3c] sm:$0xff] }
 0x820   : > { %13065 = vmatprep.mubr.msk.f32.mxu0 %vm19022_vm11, %v9110_v62  ;;  %vm19029_vm11 = vmmov %vm18957_vm0  ;;  %v10089_v62 = vld [vmem:[%s18380_s4 + $0x138] sm:$0xff] }
 0x823   : > { %13066 = vmatmul.mubr.msk.f32.vlgmr.msra.gmra.mrb[0].mxu0 %vm19023_vm12, %v9111_v61  ;;  %vm19030_vm12 = vmmov %vm18957_vm0  ;;  %v13301_v61 = vpack.c.bf16 %v10089_v62, %v10088_v32  ;;  %v10527_v32 = vld [vmem:[%s18382_s6 + $0x48] sm:$0xff]  ;;  %v10529_v62 = vld [vmem:[%s18382_s6 + $0x58] sm:$0xff] }
 0x824   : > { %13284 = vmatpush3.bf16.msra.mxu0 %v13281_v45  ;;  %13068 = vmatprep.mubr.msk.f32.mxu0 %vm19024_vm8, %v9112_v26  ;;  %vm19031_vm8 = vmmov %vm18957_vm0  ;;  %v17718_v45 = vld [vmem:[#allocation5 + $0x1c] sm:$0xff]  ;;  %v9771_v26 = vsel %vm9576_vm14, %v9593_v12, 0.0 }
 0x825   : > { %13286 = vmatprep.subr.bf16.mxu0 %v13285_v5  ;;  %v10080_v9 = vsel %vm9575_vm10, %v17718_v45, 0.0 }
 0x827   : > { %13069 = vmatmul.mubr.msk.f32.gmra.mrb[2].mxu0 %vm18957_vm0, %v9113_v55  ;;  %v9772_v55 = vsel %vm9577_vm15, %v17718_v45, 0.0 }
 0x828   : > { %13071 = vmatprep.mubr.msk.f32.mxu0 %vm19025_vm13, %v9114_v36  ;;  %vm19032_vm13 = vmmov %vm18957_vm0 }
 0x82b   : > { %13072 = vmatmul.mubr.msk.f32.gmra.mrb[4].mxu0 %vm19026_vm2, %v9115_v1  ;;  %vm19033_vm2 = vmmov %vm18957_vm0 }
 0x82c   : > { %13074 = vmatprep.mubr.msk.f32.mxu0 %vm19027_vm1, %v9116_v28  ;;  %vm19034_vm1 = vmmov %vm18957_vm0 }
 0x82f   : > { %13075 = vmatmul.mubr.msk.f32.gmra.mrb[6].mxu0 %vm19028_vm7, %v9117_v34  ;;  %vm19035_vm7 = vmmov %vm18957_vm0  ;;  %v9769_v34 = vld [vmem:[#allocation5 + $0x44] sm:$0xff] }
 0x830   : > { %13081 = vmatprep.mubr.msk.f32.mxu0 %vm19029_vm11, %v9265_v44  ;;  %vm19036_vm11 = vmmov %vm18957_vm0  ;;  %v10244_v44 = vld [vmem:[%s18380_s4 + $0x188] sm:$0xff] }
 0x833   : > { %13082 = vmatmul.mubr.msk.f32.vlgmr.msra.gmra.mrb[0].mxu0 %vm19030_vm12, %v9266_v18  ;;  %vm19037_vm12 = vmmov %vm18957_vm0  ;;  %v13305_v18 = vpack.c.bf16 %v10244_v44, %v10243_v16 }
 0x834   : > { %13288 = vmatpush3.bf16.msra.mxu0 %v13285_v5  ;;  %13084 = vmatprep.mubr.msk.f32.mxu0 %vm19031_vm8, %v9267_v17  ;;  %vm19038_vm8 = vmmov %vm18957_vm0  ;;  %v9770_v5 = vsel %vm9575_vm10, %v9592_v27, 0.0  ;;  %v9926_v17 = vsel %vm9576_vm14, %v17718_v45, 0.0  ;;  %v10237_v27 = vsel %vm9577_vm15, %v17736_v8, 0.0 }
 0x835   : > { %13290 = vmatprep.subr.bf16.mxu0 %v13289_v2 }
 0x837   : > { %13085 = vmatmul.mubr.msk.f32.gmra.mrb[2].mxu0 %vm18957_vm0, %v9268_v49  ;;  %v9927_v49 = vsel %vm9577_vm15, %v17722_v51, 0.0 }
 0x838   : > { %13087 = vmatprep.mubr.msk.f32.mxu0 %vm19032_vm13, %v9269_v58  ;;  %vm19044_vm13 = vmmov %vm18957_vm0 }
 0x83b   : > { %13088 = vmatmul.mubr.msk.f32.gmra.mrb[4].mxu0 %vm19033_vm2, %v9270_v47  ;;  %vm9578_vm2 = vcmp.lt.s32.totalorder %v16324_v15, 6 }
 0x83c   : > { %13090 = vmatprep.mubr.msk.f32.mxu0 %vm19034_vm1, %v9271_v57  ;;  %vm19045_vm1 = vmmov %vm18957_vm0  ;;  %v9618_v31 = vsel %vm9578_vm2, %v17718_v45, 0.0  ;;  %v9773_v36 = vsel %vm9578_vm2, %v17722_v51, 0.0  ;;  %v9928_v58 = vsel %vm9578_vm2, %v17732_v3, 0.0  ;;  %v10238_v53 = vsel %vm9578_vm2, %v17746_v30, 0.0 }
 0x83f   : > { %13091 = vmatmul.mubr.msk.f32.gmra.mrb[6].mxu0 %vm19035_vm7, %v9272_v21  ;;  %vm9579_vm7 = vcmp.lt.s32.totalorder %v16918_v35, 6  ;;  %v9924_v21 = vld [vmem:[#allocation5 + $0x4c] sm:$0xff]  ;;  %v10426_v35 = vld [vmem:[%s18382_s6 + $0x8] sm:$0xff] }
 0x840   : > { %13097 = vmatprep.mubr.msk.f32.mxu0 %vm19036_vm11, %v9420_v50  ;;  %vm19046_vm11 = vmmov %vm18957_vm0  ;;  %v9619_v20 = vsel %vm9579_vm7, %v17722_v51, 0.0  ;;  %v9774_v1 = vsel %vm9579_vm7, %v17732_v3, 0.0  ;;  %v9929_v11 = vsel %vm9579_vm7, %v17736_v8, 0.0  ;;  %v10081_v50 = vsel %vm9576_vm14, %v17722_v51, 0.0 }
 0x841   : > { %v10239_v4 = vsel %vm9579_vm7, %v9769_v34, 0.0  ;;  %vm19075_vm14 = vmmov %vm18957_vm0 }
 0x843   : > { %13098 = vmatmul.mubr.msk.f32.vlgmr.msra.gmra.mrb[0].mxu0 %vm19037_vm12, %v9421_v59  ;;  %vm9580_vm12 = vcmp.lt.s32.totalorder %v17030_v7, 6 }
 0x844   : > { %13292 = vmatpush3.bf16.msra.mxu0 %v13289_v2  ;;  %13100 = vmatprep.mubr.msk.f32.mxu0 %vm19038_vm8, %v9422_v48  ;;  %vm19047_vm8 = vmmov %vm18957_vm0  ;;  %v9620_v39 = vsel %vm9580_vm12, %v17732_v3, 0.0  ;;  %v9775_v28 = vsel %vm9580_vm12, %v17736_v8, 0.0  ;;  %v9925_v2 = vsel %vm9575_vm10, %v9593_v12, 0.0  ;;  %v9930_v47 = vsel %vm9580_vm12, %v17746_v30, 0.0 }
 0x845   : > { %13294 = vmatprep.subr.bf16.mxu0 %v13293_v25  ;;  %v10083_v48 = vsel %vm9578_vm2, %v17736_v8, 0.0  ;;  %vm19074_vm10 = vmmov %vm18957_vm0  ;;  %v10240_v45 = vsel %vm9580_vm12, %v9924_v21, 0.0 }
 0x846   : > { %vm19077_vm2 = vmmov %vm18957_vm0 }
 0x847   : > { %13101 = vmatmul.mubr.msk.f32.gmra.mrb[2].mxu0 %vm19039_vm9, %v9423_v14  ;;  %vm9581_vm9 = vcmp.lt.s32.totalorder %v17061_v43, 6  ;;  %v10428_v43 = vld [vmem:[%s18382_s6 + $0x18] sm:$0xff] }
 0x848   : > { %13103 = vmatprep.mubr.msk.f32.mxu0 %vm19040_vm6, %v9424_v29  ;;  %vm19048_vm6 = vmmov %vm18957_vm0  ;;  %v9621_v42 = vsel %vm9581_vm9, %v17736_v8, 0.0  ;;  %v9776_v37 = vsel %vm9581_vm9, %v17746_v30, 0.0  ;;  %v9931_v57 = vsel %vm9581_vm9, %v9769_v34, 0.0  ;;  %v10084_v29 = vsel %vm9579_vm7, %v17746_v30, 0.0  ;;  %v10432_v8 = vld [vmem:[%s18382_s6 + $0x38] sm:$0xff] }
 0x849   : > { %v13309_v7 = vpack.c.bf16 %v10428_v43, %v10426_v35  ;;  %vm10405_vm7 = vcmask 261120   ;;  %v10532_v35 = vld [vmem:[%s18382_s6 + $0x70] sm:$0xff]  ;;  %v10628_v43 = vld [vmem:[%s18382_s6 + $0x88] sm:$0xff] }
 0x84b   : > { %13104 = vmatmul.mubr.msk.f32.gmra.mrb[4].mxu0 %vm19041_vm3, %v9425_v13  ;;  %vm9582_vm3 = vcmp.lt.s32.totalorder %v17112_v63, 6  ;;  %v10085_v13 = vsel %vm9580_vm12, %v9769_v34, 0.0  ;;  %v10427_v63 = vld [vmem:[%s18382_s6 + $0x10] sm:$0xff]  ;;  %13310 = vmatprep.subr.bf16.mxu1 %v13309_v7  ;;  %v10630_v7 = vld [vmem:[%s18382_s6 + $0x98] sm:$0xff] }
 0x84c   : > { %13106 = vmatprep.mubr.msk.f32.mxu0 %vm18957_vm0, %v9426_v56  ;;  %v9622_v46 = vsel %vm9582_vm3, %v17746_v30, 0.0  ;;  %v9777_v38 = vsel %vm9582_vm3, %v9769_v34, 0.0  ;;  %v9932_v33 = vsel %vm9582_vm3, %v9924_v21, 0.0  ;;  %v10079_v56 = vld [vmem:[#allocation5 + $0x54] sm:$0xff]  ;;  %v10242_v15 = vsel %vm9582_vm3, %v10234_v40, 0.0  ;;  %v10431_v30 = vld [vmem:[%s18382_s6 + $0x30] sm:$0xff] }
 0x84f   : > { %13107 = vmatmul.mubr.msk.f32.gmra.mrb[6].mxu0 %vm19042_vm4, %v9427_v6  ;;  %vm19049_vm4 = vmmov %vm18957_vm0  ;;  %v10086_v6 = vsel %vm9581_vm9, %v9924_v21, 0.0 }
 0x850   : > { %13113 = vmatprep.mubr.msk.f32.mxu0 %vm19043_vm5, %v9615_v23  ;;  %vm19050_vm5 = vmmov %vm18957_vm0  ;;  %v10087_v23 = vsel %vm9582_vm3, %v10079_v56, 0.0 }
 0x853   : > { %13114 = vmatmul.mubr.msk.f32.vlgmr.msra.gmra.mrb[0].mxu0 %vm19044_vm13, %v9616_v54  ;;  %vm19051_vm13 = vmmov %vm18957_vm0  ;;  %v10241_v54 = vsel %vm9581_vm9, %v10079_v56, 0.0  ;;  %vm19083_vm9 = vcmask 7168  }
 0x854   : > { %13296 = vmatpush3.bf16.msra.mxu0 %v13293_v25  ;;  %13116 = vmatprep.mubr.msk.f32.mxu0 %vm19045_vm1, %v9617_v22  ;;  %vm19052_vm1 = vmmov %vm18957_vm0  ;;  %v10082_v25 = vsel %vm9577_vm15, %v17732_v3, 0.0  ;;  %v10430_v3 = vld [vmem:[%s18382_s6 + $0x28] sm:$0xff] }
 0x855   : > { %13298 = vmatprep.subr.bf16.mxu0 %v13297_v24  ;;  %vm19076_vm15 = vmmov %vm18957_vm0 }
 0x857   : > { %13117 = vmatmul.mubr.msk.f32.gmra.mrb[2].mxu0 %vm19046_vm11, %v9618_v31  ;;  %vm19053_vm11 = vmmov %vm18957_vm0  ;;  %v10425_v31 = vld [vmem:[%s18382_s6] sm:$0xff] }
 0x858   : > { %13119 = vmatprep.mubr.msk.f32.mxu0 %vm19047_vm8, %v9619_v20  ;;  %vm19054_vm8 = vmmov %vm18957_vm0  ;;  %v13311_v20 = vpack.c.bf16 %v10427_v63, %v10425_v31  ;;  %v13325_v63 = vpack.c.bf16 %v10630_v7, %v10628_v43  ;;  %v11042_v43 = vld [vmem:[%s18382_s6 + $0x180] sm:$0xff]  ;;  %v11044_v7 = vld [vmem:[%s18382_s6 + $0x190] sm:$0xff] }
 0x85a   : > { %13312 = vmatpush1.bf16.msra.mxu1 %v13311_v20  ;;  %v10627_v20 = vld [vmem:[%s18382_s6 + $0x80] sm:$0xff] }
 0x85b   : > { %13120 = vmatmul.mubr.msk.f32.gmra.mrb[4].mxu0 %vm19048_vm6, %v9620_v39  ;;  %vm19055_vm6 = vmmov %vm18957_vm0  ;;  %v13313_v39 = vpack.c.bf16 %v10432_v8, %v10430_v3  ;;  %v10629_v3 = vld [vmem:[%s18382_s6 + $0x90] sm:$0xff]  ;;  %v10632_v8 = vld [vmem:[%s18382_s6 + $0xa8] sm:$0xff] }
 0x85c   : > { %13122 = vmatprep.mubr.msk.f32.mxu0 %vm18957_vm0, %v9621_v42  ;;  %v10429_v42 = vld [vmem:[%s18382_s6 + $0x20] sm:$0xff] }
 0x85d   : > { %13314 = vmatprep.subr.bf16.mxu1 %v13313_v39  ;;  %v10634_v39 = vld [vmem:[%s18382_s6 + $0xb8] sm:$0xff] }
 0x85f   : > { %13123 = vmatmul.mubr.msk.f32.gmra.mrb[6].mxu0 %vm19049_vm4, %v9622_v46  ;;  %vm19056_vm4 = vmmov %vm18957_vm0  ;;  %v13315_v46 = vpack.c.bf16 %v10431_v30, %v10429_v42  ;;  %v13327_v42 = vpack.c.bf16 %v10629_v3, %v10627_v20  ;;  %v13359_v20 = vpack.c.bf16 %v11044_v7, %v11042_v43 }
 0x860   : > { %13129 = vmatprep.mubr.msk.f32.mxu0 %vm19050_vm5, %v9770_v5  ;;  %vm19057_vm5 = vmmov %vm18957_vm0  ;;  %v13317_v5 = vpack.c.bf16 %v10529_v62, %v10527_v32  ;;  %v10631_v32 = vld [vmem:[%s18382_s6 + $0xa0] sm:$0xff]  ;;  %v10633_v62 = vld [vmem:[%s18382_s6 + $0xb0] sm:$0xff] }
 0x861   : > { %13316 = vmatpush1.bf16.msra.mxu1 %v13315_v46  ;;  %v13329_v46 = vpack.c.bf16 %v10634_v39, %v10632_v8  ;;  %v11046_v39 = vld [vmem:[%s18382_s6 + $0x1a0] sm:$0xff] }
 0x862   : > { %13318 = vmatprep.subr.bf16.mxu1 %v13317_v5  ;;  %v10729_v5 = vld [vmem:[%s18382_s6 + $0xc8] sm:$0xff] }
 0x863   : > { %13130 = vmatmul.mubr.msk.f32.vlgmr.msra.gmra.mrb[0].mxu0 %vm19051_vm13, %v9771_v26  ;;  %vm19058_vm13 = vmmov %vm18957_vm0  ;;  %v12414_v26 = vld [vmem:[%s18381_s5] ss:$0 sm:$0xff] }
 0x864   : > { %13300 = vmatpush3.bf16.msra.mxu0 %v13297_v24  ;;  %13132 = vmatprep.mubr.msk.f32.mxu0 %vm19052_vm1, %v9772_v55  ;;  %vm19059_vm1 = vmmov %vm18957_vm0 }
 0x865   : > { %13302 = vmatprep.subr.bf16.mxu0 %v13301_v61 }
 0x867   : > { %13133 = vmatmul.mubr.msk.f32.gmra.mrb[2].mxu0 %vm19053_vm11, %v9773_v36  ;;  %vm19060_vm11 = vmmov %vm18957_vm0 }
 0x868   : > { %13135 = vmatprep.mubr.msk.f32.mxu0 %vm19054_vm8, %v9774_v1  ;;  %vm19061_vm8 = vmmov %vm18957_vm0 }
 0x86b   : > { %13136 = vmatmul.mubr.msk.f32.gmra.mrb[4].mxu0 %vm19055_vm6, %v9775_v28  ;;  %vm19062_vm6 = vmmov %vm18957_vm0 }
 0x86c   : > { %13138 = vmatprep.mubr.msk.f32.mxu0 %vm18957_vm0, %v9776_v37 }
 0x86f   : > { %13139 = vmatmul.mubr.msk.f32.gmra.mrb[6].mxu0 %vm19056_vm4, %v9777_v38  ;;  %vm19063_vm4 = vmmov %vm18957_vm0 }
 0x870   : > { %13145 = vmatprep.mubr.msk.f32.mxu0 %vm19057_vm5, %v9925_v2  ;;  %vm19064_vm5 = vmmov %vm18957_vm0 }
 0x873   : > { %13146 = vmatmul.mubr.msk.f32.vlgmr.msra.gmra.mrb[0].mxu0 %vm19058_vm13, %v9926_v17  ;;  %vm19065_vm13 = vmmov %vm18957_vm0 }
 0x874   : > { %13304 = vmatpush3.bf16.msra.mxu0 %v13301_v61  ;;  %13148 = vmatprep.mubr.msk.f32.mxu0 %vm19059_vm1, %v9927_v49  ;;  %vm19066_vm1 = vmmov %vm18957_vm0 }
 0x875   : > { %13306 = vmatprep.subr.bf16.mxu0 %v13305_v18 }
 0x877   : > { %13149 = vmatmul.mubr.msk.f32.gmra.mrb[2].mxu0 %vm19060_vm11, %v9928_v58  ;;  %vm19067_vm11 = vmmov %vm18957_vm0 }
 0x878   : > { %13151 = vmatprep.mubr.msk.f32.mxu0 %vm19061_vm8, %v9929_v11  ;;  %vm19068_vm8 = vmmov %vm18957_vm0 }
 0x87b   : > { %13152 = vmatmul.mubr.msk.f32.gmra.mrb[4].mxu0 %vm19062_vm6, %v9930_v47  ;;  %vm19069_vm6 = vmmov %vm18957_vm0 }
 0x87c   : > { %13154 = vmatprep.mubr.msk.f32.mxu0 %vm18957_vm0, %v9931_v57 }
 0x87f   : > { %13155 = vmatmul.mubr.msk.f32.gmra.mrb[6].mxu0 %vm19063_vm4, %v9932_v33  ;;  %vm19070_vm4 = vmmov %vm18957_vm0 }
 0x880   : > { %13161 = vmatprep.mubr.msk.f32.mxu0 %vm19064_vm5, %v10080_v9  ;;  %vm19071_vm5 = vmmov %vm18957_vm0 }
 0x883   : > { %13162 = vmatmul.mubr.msk.f32.vlgmr.msra.gmra.mrb[0].mxu0 %vm19065_vm13, %v10081_v50  ;;  %vm19072_vm13 = vmmov %vm18957_vm0 }
 0x884   : > { %13308 = vmatpush3.bf16.msra.mxu0 %v13305_v18  ;;  %13164 = vmatprep.mubr.msk.f32.mxu0 %vm19066_vm1, %v10082_v25  ;;  %vm19073_vm1 = vmmov %vm18957_vm0 }
 0x885   : > { %v12875_v59 = vpop.f32.mrb[32].mxu1 }
 0x886   : > { %v7350_v14 = vpop.f32.mrb[33].mxu1 }
 0x887   : > { %13165 = vmatmul.mubr.msk.f32.gmra.mrb[2].mxu0 %vm19067_vm11, %v10083_v48  ;;  %vm19078_vm11 = vmmov %vm18957_vm0 }
 0x888   : > { %13167 = vmatprep.mubr.msk.f32.mxu0 %vm19068_vm8, %v10084_v29 }
 0x889   : > { %v12878_v41 = vpop.f32.mrb[34].mxu1 }
 0x88a   : > { %v7360_v60 = vpop.f32.mrb[35].mxu1 }
 0x88b   : > { %13168 = vmatmul.mubr.msk.f32.gmra.mrb[4].mxu0 %vm19069_vm6, %v10085_v13  ;;  %v10526_v13 = vld [vmem:[%s18382_s6 + $0x40] sm:$0xff] }
 0x88c   : > { %13170 = vmatprep.mubr.msk.f32.mxu0 %vm18957_vm0, %v10086_v6 }
 0x88f   : > { %13171 = vmatmul.mubr.msk.f32.gmra.mrb[6].mxu0 %vm19070_vm4, %v10087_v23 }
 0x890   : > { %13177 = vmatprep.mubr.msk.f32.mxu0 %vm19071_vm5, %v10235_v52 }
 0x893   : > { %13178 = vmatmul.mubr.msk.f32.vlgmr.msra.gmra.mrb[0].mxu0 %vm19072_vm13, %v10236_v10 }
 0x894   : > { %13180 = vmatprep.mubr.msk.f32.mxu0 %vm19073_vm1, %v10237_v27 }
 0x895   : > { %v12897_v12 = vpop.f32.mrb[36].mxu1 }
 0x896   : > { %v7525_v24 = vpop.f32.mrb[37].mxu1 }
 0x897   : > { %13181 = vmatmul.mubr.msk.f32.gmra.mrb[2].mxu0 %vm19074_vm10, %v10238_v53  ;;  %v10531_v53 = vld [vmem:[%s18382_s6 + $0x68] sm:$0xff] }
 0x898   : > { %13183 = vmatprep.mubr.msk.f32.mxu0 %vm19075_vm14, %v10239_v4 }
 0x899   : > { %v12900_v22 = vpop.f32.mrb[38].mxu1 }
 0x89a   : > { %v7535_v51 = vpop.f32.mrb[39].mxu1 }
 0x89b   : > { %13184 = vmatmul.mubr.msk.f32.gmra.mrb[4].mxu0 %vm19076_vm15, %v10240_v45 }
 0x89c   : > { %13186 = vmatprep.mubr.msk.f32.mxu0 %vm19077_vm2, %v10241_v54 }
 0x89f   : > { %13187 = vmatmul.mubr.msk.f32.gmra.mrb[6].mxu0 %vm19078_vm11, %v10242_v15  ;;  %v10530_v15 = vld [vmem:[%s18382_s6 + $0x60] sm:$0xff] }
 0x8a0   : > { %v13323_v31 = vpack.c.bf16 %v10532_v35, %v10530_v15 }
 0x966   : > { %v13179_v61 = vpop.f32.mrb[0].mxu0 }
 0x967   : > { %v13439_v55 = vadd.f32 %v13179_v61, %v12875_v59  ;;  %v10335_v36 = vpop.f32.mrb[1].mxu0  ;;  %v10731_v61 = vld [vmem:[%s18382_s6 + $0xd8] sm:$0xff] }
 0x968   : > { %v13440_v1 = vadd.f32 %v10335_v36, %v7350_v14  ;;  %v10728_v36 = vld [vmem:[%s18382_s6 + $0xc0] sm:$0xff] }
 0x969   : > { %v10390_v28 = vadd.f32 %v13439_v55, %v12414_v26  ;;  %v13333_v55 = vpack.c.bf16 %v10731_v61, %v10729_v5  ;;  %v11143_v5 = vld [vmem:[%s18382_s6 + $0x1c0] sm:$0xff]  ;;  %v11145_v61 = vld [vmem:[%s18382_s6 + $0x1d0] sm:$0xff] }
 0x96a   : > { %v10389_v37 = vadd.f32 %v13440_v1, %v12414_v26  ;;  %v13182_v34 = vpop.f32.mrb[2].mxu0  ;;  %v10730_v1 = vld [vmem:[%s18382_s6 + $0xd0] sm:$0xff] }
 0x96b   : > { %v10398_v38 = vmax.f32 %v10390_v28, 0.0  ;;  %v13441_v16 = vadd.f32 %v13182_v34, %v12878_v41  ;;  %v10345_v44 = vpop.f32.mrb[3].mxu0  ;;  %v10733_v28 = vld [vmem:[%s18382_s6 + $0xe8] sm:$0xff]  ;;  %v13335_v34 = vpack.c.bf16 %v10730_v1, %v10728_v36  ;;  %v13367_v36 = vpack.c.bf16 %v11145_v61, %v11143_v5 }
 0x96c   : > { %v10397_v2 = vmax.f32 %v10389_v37, 0.0  ;;  %v13442_v18 = vadd.f32 %v10345_v44, %v7360_v60  ;;  %v10528_v60 = vld [vmem:[%s18382_s6 + $0x50] sm:$0xff]  ;;  %v10735_v37 = vld [vmem:[%s18382_s6 + $0xf8] sm:$0xff]  ;;  %v10732_v44 = vld [vmem:[%s18382_s6 + $0xe0] sm:$0xff] }
 0x96d   : > { %10407 = vst.msk [vmem:[#allocation6 + $0x8] sm:$0xff] %vm10405_vm7, %v10398_v38  ;;  %v10392_v17 = vadd.f32 %v13441_v16, %v12414_v26  ;;  %v13337_v16 = vpack.c.bf16 %v10735_v37, %v10733_v28  ;;  %v11147_v37 = vld [vmem:[%s18382_s6 + $0x1e0] sm:$0xff] }
 0x96e   : > { %10406 = vst.msk [vmem:[#allocation6] sm:$0xff] %vm10405_vm7, %v10397_v2  ;;  %v10391_v49 = vadd.f32 %v13442_v18, %v12414_v26  ;;  %v13185_v58 = vpop.f32.mrb[4].mxu0  ;;  %v10734_v2 = vld [vmem:[%s18382_s6 + $0xf0] sm:$0xff]  ;;  %v10841_v18 = vld [vmem:[%s18382_s6 + $0x108] sm:$0xff] }
 0x96f   : > { %v10400_v11 = vmax.f32 %v10392_v17, 0.0  ;;  %v13443_v47 = vadd.f32 %v13185_v58, %v12897_v12  ;;  %v10355_v57 = vpop.f32.mrb[5].mxu0  ;;  %v10843_v17 = vld [vmem:[%s18382_s6 + $0x118] sm:$0xff] }
 0x970   : > { %v10399_v21 = vmax.f32 %v10391_v49, 0.0  ;;  %v13444_v33 = vadd.f32 %v10355_v57, %v7525_v24  ;;  %v10533_v24 = vld [vmem:[%s18382_s6 + $0x78] sm:$0xff]  ;;  %v13339_v49 = vpack.c.bf16 %v10734_v2, %v10732_v44  ;;  %v13341_v58 = vpack.c.bf16 %v10843_v17, %v10841_v18  ;;  %v10845_v57 = vld [vmem:[%s18382_s6 + $0x128] sm:$0xff]  ;;  %v11255_v18 = vld [vmem:[%s18382_s6 + $0x200] sm:$0xff] }
 0x971   : > { %10409 = vst.msk [vmem:[#allocation6 + $0x18] sm:$0xff] %vm10405_vm7, %v10400_v11  ;;  %v10394_v9 = vadd.f32 %v13443_v47, %v12414_v26  ;;  %v10840_v11 = vld [vmem:[%s18382_s6 + $0x100] sm:$0xff]  ;;  %v10842_v47 = vld [vmem:[%s18382_s6 + $0x110] sm:$0xff] }
 0x972   : > { %10408 = vst.msk [vmem:[#allocation6 + $0x10] sm:$0xff] %vm10405_vm7, %v10399_v21  ;;  %v10393_v50 = vadd.f32 %v13444_v33, %v12414_v26  ;;  %v13188_v25 = vpop.f32.mrb[6].mxu0  ;;  %v10847_v21 = vld [vmem:[%s18382_s6 + $0x138] sm:$0xff]  ;;  %v13343_v33 = vpack.c.bf16 %v10842_v47, %v10840_v11  ;;  %v11257_v17 = vld [vmem:[%s18382_s6 + $0x210] sm:$0xff]  ;;  %v11259_v47 = vld [vmem:[%s18382_s6 + $0x220] sm:$0xff] }
 0x973   : > { %v10402_v59 = vmax.f32 %v10394_v9, 0.0  ;;  %v13445_v48 = vadd.f32 %v13188_v25, %v12900_v22  ;;  %v10365_v14 = vpop.f32.mrb[7].mxu0  ;;  %v13319_v22 = vpack.c.bf16 %v10528_v60, %v10526_v13  ;;  %v10844_v9 = vld [vmem:[%s18382_s6 + $0x120] sm:$0xff]  ;;  %v13375_v11 = vpack.c.bf16 %v11257_v17, %v11255_v18 }
 0x974   : > { %v10401_v29 = vmax.f32 %v10393_v50, 0.0  ;;  %v13446_v56 = vadd.f32 %v10365_v14, %v7535_v51  ;;  %v10419_v41 = vld [vmem:[#allocation6 + $0x8] ss:$2 sm:$0xf]  ;;  %v13321_v51 = vpack.c.bf16 %v10533_v24, %v10531_v53  ;;  %v10846_v50 = vld [vmem:[%s18382_s6 + $0x130] sm:$0xff]  ;;  %v11674_v17 = vld [vmem:[%s18382_s6 + $0x320] sm:$0xff] }
 0x975   : > { %10411 = vst.msk [vmem:[#allocation6 + $0x28] sm:$0xff] %vm10405_vm7, %v10402_v59  ;;  %v10396_v6 = vadd.f32 %v13445_v48, %v12414_v26  ;;  %v10415_v23 = vld [vmem:[#allocation6] ss:$2 sm:$0xf]  ;;  %v13345_v48 = vpack.c.bf16 %v10847_v21, %v10845_v57  ;;  %v13347_v60 = vpack.c.bf16 %v10846_v50, %v10844_v9  ;;  %v10948_v53 = vld [vmem:[%s18382_s6 + $0x178] sm:$0xff] }
 0x976   : > { %v10417_v52 = vld [vmem:[#allocation6 + $0x1] ss:$2 sm:$0xf]  ;;  %10410 = vst.msk [vmem:[#allocation6 + $0x20] sm:$0xff] %vm10405_vm7, %v10401_v29  ;;  %v10395_v10 = vadd.f32 %v13446_v56, %v12414_v26  ;;  %v13331_v26 = vpack.c.bf16 %v10633_v62, %v10631_v32  ;;  %v10942_v29 = vld [vmem:[%s18382_s6 + $0x148] sm:$0xff]  ;;  %v10944_v56 = vld [vmem:[%s18382_s6 + $0x158] sm:$0xff] }
 0x977   : > { %v10421_v27 = vld [vmem:[#allocation6 + $0x9] ss:$2 sm:$0xf]  ;;  %v10422_v12 = vmax.f32 %v10415_v23, %v10417_v52  ;;  %v10404_v4 = vmax.f32 %v10396_v6, 0.0  ;;  %v13349_v52 = vpack.c.bf16 %v10944_v56, %v10942_v29  ;;  %v11261_v57 = vld [vmem:[%s18382_s6 + $0x230] sm:$0xff] }
 0x978   : > { %v10423_v54 = vmax.f32 %v10419_v41, %v10421_v27  ;;  %v10403_v40 = vmax.f32 %v10395_v10, 0.0  ;;  %v10834_v25 = vld [vmem:[#allocation6 + $0x18] ss:$2 sm:$0xf]  ;;  %v10941_v10 = vld [vmem:[%s18382_s6 + $0x140] sm:$0xff]  ;;  %v10943_v27 = vld [vmem:[%s18382_s6 + $0x150] sm:$0xff]  ;;  %v13379_v29 = vpack.c.bf16 %v11261_v57, %v11259_v47 }
 0x979   : > { %10413 = vst.msk [vmem:[#allocation6 + $0x38] sm:$0xff] %vm10405_vm7, %v10404_v4  ;;  %v10830_v14 = vld [vmem:[#allocation6 + $0x10] ss:$2 sm:$0xf]  ;;  %v13351_v24 = vpack.c.bf16 %v10943_v27, %v10941_v10 }
 0x97a   : > { %v17932_v45 = vmax.f32 %v10422_v12, %v10423_v54  ;;  %10412 = vst.msk [vmem:[#allocation6 + $0x30] sm:$0xff] %vm10405_vm7, %v10403_v40  ;;  %v10832_v41 = vld [vmem:[#allocation6 + $0x11] ss:$2 sm:$0xf]  ;;  %v10946_v12 = vld [vmem:[%s18382_s6 + $0x168] sm:$0xff] }
 0x97b   : > { %v10836_v13 = vld [vmem:[#allocation6 + $0x19] ss:$2 sm:$0xf]  ;;  %v10837_v6 = vmax.f32 %v10830_v14, %v10832_v41  ;;  %v13353_v54 = vpack.c.bf16 %v10948_v53, %v10946_v12  ;;  %v10945_v40 = vld [vmem:[%s18382_s6 + $0x160] sm:$0xff] }
 0x97c   : > { %12415 = vmatmul.mubr.msk.f32.vlgmr.msra.gmra.mrb[40].mxu1 %vm10405_vm7, %v17932_v45  ;;  %v10534_v30 = vrot.slane %v17932_v45, 1  ;;  %v10635_v38 = vrot.slane %v17932_v45, 2  ;;  %v10736_v59 = vrot.slane %v17932_v45, 3  ;;  %v10838_v23 = vmax.f32 %v10834_v25, %v10836_v13  ;;  %v11043_v45 = vld [vmem:[%s18382_s6 + $0x188] sm:$0xff]  ;;  %v11360_v53 = vld [vmem:[%s18382_s6 + $0x260] sm:$0xff] }
 0x97d   : > { %13320 = vmatpush1.bf16.msra.mxu1 %v13319_v22  ;;  %10601 = vmatprep.mubr.f32.mxu1 %v13681_v0  ;;  %v10947_v22 = vld [vmem:[%s18382_s6 + $0x170] sm:$0xff]  ;;  %v11249_v21 = vld [vmem:[#allocation6 + $0x28] ss:$2 sm:$0xf]  ;;  %v11357_v25 = vld [vmem:[%s18382_s6 + $0x248] sm:$0xff] }
 0x97e   : > { %13322 = vmatprep.subr.bf16.mxu1 %v13321_v51  ;;  %v18043_v4 = vmax.f32 %v10837_v6, %v10838_v23  ;;  %v11045_v51 = vld [vmem:[%s18382_s6 + $0x198] sm:$0xff]  ;;  %v13355_v15 = vpack.c.bf16 %v10947_v22, %v10945_v40  ;;  %v11247_v14 = vld [vmem:[#allocation6 + $0x21] ss:$2 sm:$0xf]  ;;  %v11361_v23 = vld [vmem:[%s18382_s6 + $0x268] sm:$0xff] }
 0x97f   : > { %v13357_v35 = vpack.c.bf16 %v11045_v51, %v11043_v45  ;;  %v11251_v50 = vld [vmem:[#allocation6 + $0x29] ss:$2 sm:$0xf]  ;;  %v11358_v6 = vld [vmem:[%s18382_s6 + $0x250] sm:$0xff]  ;;  %v11457_v45 = vld [vmem:[%s18382_s6 + $0x280] sm:$0xff] }
 0x980   : > { %v10949_v3 = vrot.slane %v18043_v4, 1  ;;  %v11050_v1 = vrot.slane %v18043_v4, 2  ;;  %v11253_v41 = vmax.f32 %v11249_v21, %v11251_v50  ;;  %v11459_v51 = vld [vmem:[%s18382_s6 + $0x290] sm:$0xff]  ;;  %v11666_v57 = vld [vmem:[#allocation6 + $0x39] ss:$2 sm:$0xf] }
 0x981   : > { %13324 = vmatpush1.bf16.msra.mxu1 %v13323_v31  ;;  %v11047_v31 = vld [vmem:[%s18382_s6 + $0x1a8] sm:$0xff]  ;;  %v13391_v43 = vpack.c.bf16 %v11459_v51, %v11457_v45  ;;  %v11662_v50 = vld [vmem:[#allocation6 + $0x31] ss:$2 sm:$0xf] }
 0x982   : > { %13326 = vmatprep.subr.bf16.mxu1 %v13325_v63  ;;  %v11049_v63 = vld [vmem:[%s18382_s6 + $0x1b8] sm:$0xff]  ;;  %v11772_v21 = vld [vmem:[%s18382_s6 + $0x348] sm:$0xff] }
 0x983   : > { %v13361_v8 = vpack.c.bf16 %v11049_v63, %v11047_v31  ;;  %v11461_v63 = vld [vmem:[%s18382_s6 + $0x2a0] sm:$0xff] }
 0x984   : > { %12416 = vmatmul.mubr.msk.f32.vlgmr.msra.gmra.mrb[42].mxu1 %vm10405_vm7, %v10534_v30  ;;  %v11144_v30 = vld [vmem:[%s18382_s6 + $0x1c8] sm:$0xff] }
 0x985   : > { %13328 = vmatpush1.bf16.msra.mxu1 %v13327_v42  ;;  %10702 = vmatprep.mubr.f32.mxu1 %v13681_v0  ;;  %v11048_v42 = vld [vmem:[%s18382_s6 + $0x1b0] sm:$0xff] }
 0x986   : > { %13330 = vmatprep.subr.bf16.mxu1 %v13329_v46  ;;  %v11146_v46 = vld [vmem:[%s18382_s6 + $0x1d8] sm:$0xff]  ;;  %v13363_v32 = vpack.c.bf16 %v11048_v42, %v11046_v39 }
 0x987   : > { %v13365_v62 = vpack.c.bf16 %v11146_v46, %v11144_v30  ;;  %v11558_v30 = vld [vmem:[%s18382_s6 + $0x2c0] sm:$0xff]  ;;  %v11560_v46 = vld [vmem:[%s18382_s6 + $0x2d0] sm:$0xff] }
 0x988   : > { %v13399_v5 = vpack.c.bf16 %v11560_v46, %v11558_v30 }
 0x989   : > { %13332 = vmatpush1.bf16.msra.mxu1 %v13331_v26  ;;  %v11148_v26 = vld [vmem:[%s18382_s6 + $0x1e8] sm:$0xff] }
 0x98a   : > { %13334 = vmatprep.subr.bf16.mxu1 %v13333_v55  ;;  %v11150_v55 = vld [vmem:[%s18382_s6 + $0x1f8] sm:$0xff] }
 0x98b   : > { %v13369_v28 = vpack.c.bf16 %v11150_v55, %v11148_v26  ;;  %v11562_v55 = vld [vmem:[%s18382_s6 + $0x2e0] sm:$0xff] }
 0x98c   : > { %12417 = vmatmul.mubr.msk.f32.vlgmr.msra.gmra.mrb[44].mxu1 %vm10405_vm7, %v10635_v38  ;;  %v11256_v38 = vld [vmem:[%s18382_s6 + $0x208] sm:$0xff] }
 0x98d   : > { %13336 = vmatpush1.bf16.msra.mxu1 %v13335_v34  ;;  %10803 = vmatprep.mubr.f32.mxu1 %v13681_v0  ;;  %v11149_v34 = vld [vmem:[%s18382_s6 + $0x1f0] sm:$0xff] }
 0x98e   : > { %13338 = vmatprep.subr.bf16.mxu1 %v13337_v16  ;;  %v11258_v16 = vld [vmem:[%s18382_s6 + $0x218] sm:$0xff]  ;;  %v13371_v44 = vpack.c.bf16 %v11149_v34, %v11147_v37 }
 0x98f   : > { %v13373_v2 = vpack.c.bf16 %v11258_v16, %v11256_v38  ;;  %v11670_v38 = vld [vmem:[%s18382_s6 + $0x300] sm:$0xff]  ;;  %v11672_v16 = vld [vmem:[%s18382_s6 + $0x310] sm:$0xff] }
 0x990   : > { %v13407_v18 = vpack.c.bf16 %v11672_v16, %v11670_v38 }
 0x991   : > { %13340 = vmatpush1.bf16.msra.mxu1 %v13339_v49  ;;  %v11260_v49 = vld [vmem:[%s18382_s6 + $0x228] sm:$0xff] }
 0x992   : > { %13342 = vmatprep.subr.bf16.mxu1 %v13341_v58  ;;  %v11262_v58 = vld [vmem:[%s18382_s6 + $0x238] sm:$0xff] }
 0x993   : > { %v13377_v9 = vpack.c.bf16 %v11262_v58, %v11260_v49  ;;  %v11676_v49 = vld [vmem:[%s18382_s6 + $0x330] sm:$0xff]  ;;  %v11664_v58 = vld [vmem:[#allocation6 + $0x38] ss:$2 sm:$0xf] }
 0x994   : > { %12418 = vmatmul.mubr.msk.f32.vlgmr.msra.gmra.mrb[46].mxu1 %vm10405_vm7, %v10736_v59  ;;  %v11359_v59 = vld [vmem:[%s18382_s6 + $0x258] sm:$0xff] }
 0x995   : > { %13344 = vmatpush1.bf16.msra.mxu1 %v13343_v33  ;;  %10915 = vmatprep.mubr.f32.mxu1 %v13681_v0  ;;  %v11151_v33 = vrot.slane %v18043_v4, 3  ;;  %v13381_v13 = vpack.c.bf16 %v11359_v59, %v11357_v25  ;;  %v13411_v25 = vpack.c.bf16 %v11676_v49, %v11674_v17  ;;  %v10414_v17 = vld [vmem:[%s19079_s22] sm:$0x3] }
 0x996   : > { %13346 = vmatprep.subr.bf16.mxu1 %v13345_v48  ;;  %v11245_v48 = vld [vmem:[#allocation6 + $0x20] ss:$2 sm:$0xf] }
 0x997   : > { %v11252_v56 = vmax.f32 %v11245_v48, %v11247_v14  ;;  %v11668_v48 = vmax.f32 %v11664_v58, %v11666_v57 }
 0x999   : > { %13348 = vmatpush1.bf16.msra.mxu1 %v13347_v60  ;;  %v11356_v60 = vld [vmem:[%s18382_s6 + $0x240] sm:$0xff]  ;;  %v18153_v27 = vmax.f32 %v11252_v56, %v11253_v41  ;;  %v11773_v56 = vld [vmem:[%s18382_s6 + $0x350] sm:$0xff]  ;;  %v11776_v41 = vld [vmem:[%s18382_s6 + $0x368] sm:$0xff] }
 0x99a   : > { %13350 = vmatprep.subr.bf16.mxu1 %v13349_v52  ;;  %v11363_v52 = vld [vmem:[%s18382_s6 + $0x278] sm:$0xff]  ;;  %v13383_v10 = vpack.c.bf16 %v11358_v6, %v11356_v60 }
 0x99b   : > { %v13385_v12 = vpack.c.bf16 %v11363_v52, %v11361_v23  ;;  %v11364_v7 = vrot.slane %v18153_v27, 1  ;;  %v11465_v61 = vrot.slane %v18153_v27, 2  ;;  %v11775_v52 = vld [vmem:[%s18382_s6 + $0x360] sm:$0xff] }
 0x99c   : > { %12419 = vmatmul.mubr.msk.f32.vlgmr.msra.gmra.mrb[48].mxu1 %vm10405_vm7, %v18043_v4  ;;  %v11458_v4 = vld [vmem:[%s18382_s6 + $0x288] sm:$0xff] }
 0x99d   : > { %13352 = vmatpush1.bf16.msra.mxu1 %v13351_v24  ;;  %11016 = vmatprep.mubr.f32.mxu1 %v13681_v0  ;;  %v11362_v24 = vld [vmem:[%s18382_s6 + $0x270] sm:$0xff] }
 0x99e   : > { %13354 = vmatprep.subr.bf16.mxu1 %v13353_v54  ;;  %v11460_v54 = vld [vmem:[%s18382_s6 + $0x298] sm:$0xff]  ;;  %v13387_v40 = vpack.c.bf16 %v11362_v24, %v11360_v53 }
 0x99f   : > { %v13389_v22 = vpack.c.bf16 %v11460_v54, %v11458_v4  ;;  %v11872_v4 = vld [vmem:[%s18382_s6 + $0x380] sm:$0xff]  ;;  %v11874_v54 = vld [vmem:[%s18382_s6 + $0x390] sm:$0xff] }
 0x9a0   : > { %v13423_v45 = vpack.c.bf16 %v11874_v54, %v11872_v4 }
 0x9a1   : > { %13356 = vmatpush1.bf16.msra.mxu1 %v13355_v15  ;;  %v11462_v15 = vld [vmem:[%s18382_s6 + $0x2a8] sm:$0xff] }
 0x9a2   : > { %13358 = vmatprep.subr.bf16.mxu1 %v13357_v35  ;;  %v11464_v35 = vld [vmem:[%s18382_s6 + $0x2b8] sm:$0xff] }
 0x9a3   : > { %v13393_v31 = vpack.c.bf16 %v11464_v35, %v11462_v15  ;;  %v11876_v35 = vld [vmem:[%s18382_s6 + $0x3a0] sm:$0xff] }
 0x9a4   : > { %12420 = vmatmul.mubr.msk.f32.vlgmr.msra.gmra.mrb[50].mxu1 %vm10405_vm7, %v10949_v3  ;;  %v11559_v3 = vld [vmem:[%s18382_s6 + $0x2c8] sm:$0xff] }
 0x9a5   : > { %13360 = vmatpush1.bf16.msra.mxu1 %v13359_v20  ;;  %11117 = vmatprep.mubr.f32.mxu1 %v13681_v0  ;;  %v11463_v20 = vld [vmem:[%s18382_s6 + $0x2b0] sm:$0xff] }
 0x9a6   : > { %13362 = vmatprep.subr.bf16.mxu1 %v13361_v8  ;;  %v11561_v8 = vld [vmem:[%s18382_s6 + $0x2d8] sm:$0xff]  ;;  %v13395_v39 = vpack.c.bf16 %v11463_v20, %v11461_v63 }
 0x9a7   : > { %v13397_v42 = vpack.c.bf16 %v11561_v8, %v11559_v3  ;;  %v11973_v3 = vld [vmem:[%s18382_s6 + $0x3c0] sm:$0xff]  ;;  %v11975_v8 = vld [vmem:[%s18382_s6 + $0x3d0] sm:$0xff] }
 0x9a8   : > { %v13431_v30 = vpack.c.bf16 %v11975_v8, %v11973_v3 }
 0x9a9   : > { %13364 = vmatpush1.bf16.msra.mxu1 %v13363_v32  ;;  %v11563_v32 = vld [vmem:[%s18382_s6 + $0x2e8] sm:$0xff] }
 0x9aa   : > { %13366 = vmatprep.subr.bf16.mxu1 %v13365_v62  ;;  %v11565_v62 = vld [vmem:[%s18382_s6 + $0x2f8] sm:$0xff] }
 0x9ab   : > { %v13401_v26 = vpack.c.bf16 %v11565_v62, %v11563_v32  ;;  %v11977_v62 = vld [vmem:[%s18382_s6 + $0x3e0] sm:$0xff] }
 0x9ac   : > { %12421 = vmatmul.mubr.msk.f32.vlgmr.msra.gmra.mrb[52].mxu1 %vm10405_vm7, %v11050_v1  ;;  %v11671_v1 = vld [vmem:[%s18382_s6 + $0x308] sm:$0xff] }
 0x9ad   : > { %13368 = vmatpush1.bf16.msra.mxu1 %v13367_v36  ;;  %11218 = vmatprep.mubr.f32.mxu1 %v13681_v0  ;;  %v11564_v36 = vld [vmem:[%s18382_s6 + $0x2f0] sm:$0xff] }
 0x9ae   : > { %13370 = vmatprep.subr.bf16.mxu1 %v13369_v28  ;;  %v11673_v28 = vld [vmem:[%s18382_s6 + $0x318] sm:$0xff]  ;;  %v13403_v37 = vpack.c.bf16 %v11564_v36, %v11562_v55  ;;  %v13707_v55 = vmov 1966171168  }
 0x9af   : > { %v13405_v34 = vpack.c.bf16 %v11673_v28, %v11671_v1  ;;  %v10511_v36 = vunpack.c.l.s4 %v13707_v55 }
 0x9b1   : > { %13372 = vmatpush1.bf16.msra.mxu1 %v13371_v44  ;;  %v11675_v44 = vld [vmem:[%s18382_s6 + $0x328] sm:$0xff]  ;;  %v10512_v1 = vunpack.c.0.s8 %v10511_v36 }
 0x9b2   : > { %13374 = vmatprep.subr.bf16.mxu1 %v13373_v2  ;;  %v11677_v2 = vld [vmem:[%s18382_s6 + $0x338] sm:$0xff] }
 0x9b3   : > { %v13409_v47 = vpack.c.bf16 %v11677_v2, %v11675_v44  ;;  %v18325_v38 = vsub.s32 %v10512_v1, %v14781_v19 }
 0x9b4   : > { %12422 = vmatmul.mubr.msk.f32.vlgmr.msra.gmra.mrb[54].mxu1 %vm10405_vm7, %v11151_v33  ;;  %v11774_v33 = vld [vmem:[%s18382_s6 + $0x358] sm:$0xff] }
 0x9b5   : > { %13376 = vmatpush1.bf16.msra.mxu1 %v13375_v11  ;;  %11330 = vmatprep.mubr.f32.mxu1 %v13681_v0  ;;  %v11566_v11 = vrot.slane %v18153_v27, 3  ;;  %v13413_v14 = vpack.c.bf16 %v11774_v33, %v11772_v21 }
 0x9b6   : > { %13378 = vmatprep.subr.bf16.mxu1 %v13377_v9  ;;  %v11660_v9 = vld [vmem:[#allocation6 + $0x30] ss:$2 sm:$0xf] }
 0x9b7   : > { %v11667_v59 = vmax.f32 %v11660_v9, %v11662_v50 }
 0x9b9   : > { %13380 = vmatpush1.bf16.msra.mxu1 %v13379_v29  ;;  %v11771_v29 = vld [vmem:[%s18382_s6 + $0x340] sm:$0xff]  ;;  %v11669_v6 = vmax.f32 %v11667_v59, %v11668_v48 }
 0x9ba   : > { %13382 = vmatprep.subr.bf16.mxu1 %v13381_v13  ;;  %v11778_v13 = vld [vmem:[%s18382_s6 + $0x378] sm:$0xff]  ;;  %v13415_v60 = vpack.c.bf16 %v11773_v56, %v11771_v29 }
 0x9bb   : > { %v13417_v23 = vpack.c.bf16 %v11778_v13, %v11776_v41  ;;  %v11779_v51 = vrot.slane %v11669_v6, 1  ;;  %v11880_v46 = vrot.slane %v11669_v6, 2 }
 0x9bc   : > { %12423 = vmatmul.mubr.msk.f32.vlgmr.msra.gmra.mrb[56].mxu1 %vm10405_vm7, %v18153_v27  ;;  %v11873_v27 = vld [vmem:[%s18382_s6 + $0x388] sm:$0xff] }
 0x9bd   : > { %13384 = vmatpush1.bf16.msra.mxu1 %v13383_v10  ;;  %11431 = vmatprep.mubr.f32.mxu1 %v13681_v0  ;;  %v11777_v10 = vld [vmem:[%s18382_s6 + $0x370] sm:$0xff] }
 0x9be   : > { %13386 = vmatprep.subr.bf16.mxu1 %v13385_v12  ;;  %v11875_v12 = vld [vmem:[%s18382_s6 + $0x398] sm:$0xff]  ;;  %v13419_v53 = vpack.c.bf16 %v11777_v10, %v11775_v52 }
 0x9bf   : > { %v13421_v24 = vpack.c.bf16 %v11875_v12, %v11873_v27 }
 0x9c1   : > { %13388 = vmatpush1.bf16.msra.mxu1 %v13387_v40  ;;  %v11877_v40 = vld [vmem:[%s18382_s6 + $0x3a8] sm:$0xff] }
 0x9c2   : > { %13390 = vmatprep.subr.bf16.mxu1 %v13389_v22  ;;  %v11879_v22 = vld [vmem:[%s18382_s6 + $0x3b8] sm:$0xff] }
 0x9c3   : > { %v13425_v15 = vpack.c.bf16 %v11879_v22, %v11877_v40 }
 0x9c4   : > { %12424 = vmatmul.mubr.msk.f32.vlgmr.msra.gmra.mrb[58].mxu1 %vm10405_vm7, %v11364_v7  ;;  %v11974_v7 = vld [vmem:[%s18382_s6 + $0x3c8] sm:$0xff] }
 0x9c5   : > { %13392 = vmatpush1.bf16.msra.mxu1 %v13391_v43  ;;  %11532 = vmatprep.mubr.f32.mxu1 %v13681_v0  ;;  %v11878_v43 = vld [vmem:[%s18382_s6 + $0x3b0] sm:$0xff] }
 0x9c6   : > { %13394 = vmatprep.subr.bf16.mxu1 %v13393_v31  ;;  %v11976_v31 = vld [vmem:[%s18382_s6 + $0x3d8] sm:$0xff]  ;;  %v13427_v63 = vpack.c.bf16 %v11878_v43, %v11876_v35 }
 0x9c7   : > { %v13429_v20 = vpack.c.bf16 %v11976_v31, %v11974_v7 }
 0x9c9   : > { %13396 = vmatpush1.bf16.msra.mxu1 %v13395_v39  ;;  %v11978_v39 = vld [vmem:[%s18382_s6 + $0x3e8] sm:$0xff] }
 0x9ca   : > { %13398 = vmatprep.subr.bf16.mxu1 %v13397_v42  ;;  %v11980_v42 = vld [vmem:[%s18382_s6 + $0x3f8] sm:$0xff] }
 0x9cb   : > { %v13433_v32 = vpack.c.bf16 %v11980_v42, %v11978_v39 }
 0x9cc   : > { %12425 = vmatmul.mubr.msk.f32.vlgmr.msra.gmra.mrb[60].mxu1 %vm10405_vm7, %v11465_v61 }
 0x9cd   : > { %13400 = vmatpush1.bf16.msra.mxu1 %v13399_v5  ;;  %11633 = vmatprep.mubr.f32.mxu1 %v13681_v0  ;;  %v11979_v5 = vld [vmem:[%s18382_s6 + $0x3f0] sm:$0xff] }
 0x9ce   : > { %13402 = vmatprep.subr.bf16.mxu1 %v13401_v26  ;;  %v13435_v61 = vpack.c.bf16 %v11979_v5, %v11977_v62  ;;  %v11981_v26 = vrot.slane %v11669_v6, 3 }
 0x9d1   : > { %13404 = vmatpush1.bf16.msra.mxu1 %v13403_v37 }
 0x9d2   : > { %13406 = vmatprep.subr.bf16.mxu1 %v13405_v34 }
 0x9d4   : > { %12426 = vmatmul.mubr.msk.f32.vlgmr.msra.gmra.mrb[62].mxu1 %vm10405_vm7, %v11566_v11 }
 0x9d5   : > { %13408 = vmatpush1.bf16.msra.mxu1 %v13407_v18  ;;  %11745 = vmatprep.mubr.f32.mxu1 %v13681_v0 }
 0x9d6   : > { %13410 = vmatprep.subr.bf16.mxu1 %v13409_v47 }
 0x9d9   : > { %13412 = vmatpush1.bf16.msra.mxu1 %v13411_v25 }
 0x9da   : > { %13414 = vmatprep.subr.bf16.mxu1 %v13413_v14 }
 0x9dc   : > { %12427 = vmatmul.mubr.msk.f32.vlgmr.msra.gmra.mrb[64].mxu1 %vm10405_vm7, %v11669_v6 }
 0x9dd   : > { %13416 = vmatpush1.bf16.msra.mxu1 %v13415_v60  ;;  %11846 = vmatprep.mubr.f32.mxu1 %v13681_v0 }
 0x9de   : > { %13418 = vmatprep.subr.bf16.mxu1 %v13417_v23 }
 0x9e1   : > { %13420 = vmatpush1.bf16.msra.mxu1 %v13419_v53 }
 0x9e2   : > { %13422 = vmatprep.subr.bf16.mxu1 %v13421_v24 }
 0x9e4   : > { %12428 = vmatmul.mubr.msk.f32.vlgmr.msra.gmra.mrb[66].mxu1 %vm10405_vm7, %v11779_v51 }
 0x9e5   : > { %13424 = vmatpush1.bf16.msra.mxu1 %v13423_v45  ;;  %11947 = vmatprep.mubr.f32.mxu1 %v13681_v0 }
 0x9e6   : > { %13426 = vmatprep.subr.bf16.mxu1 %v13425_v15 }
 0x9e9   : > { %13428 = vmatpush1.bf16.msra.mxu1 %v13427_v63 }
 0x9ea   : > { %13430 = vmatprep.subr.bf16.mxu1 %v13429_v20 }
 0x9ec   : > { %12429 = vmatmul.mubr.msk.f32.vlgmr.msra.gmra.mrb[68].mxu1 %vm10405_vm7, %v11880_v46 }
 0x9ed   : > { %13432 = vmatpush1.bf16.msra.mxu1 %v13431_v30  ;;  %12048 = vmatprep.mubr.f32.mxu1 %v13681_v0 }
 0x9ee   : > { %13434 = vmatprep.subr.bf16.mxu1 %v13433_v32 }
 0x9f1   : > { %13436 = vmatpush1.bf16.msra.mxu1 %v13435_v61 }
 0x9f4   : > { %12430 = vmatmul.mubr.msk.f32.vlgmr.msra.gmra.mrb[70].mxu1 %vm10405_vm7, %v11981_v26 }
 0xa4f   : > { %v10502_v28 = vpop.f32.mrb[40].mxu1 }
 0xa50   : > { %v10504_v37 = vpop.f32.mrb[41].mxu1 }
 0xa51   : > { %v10509_v34 = vcombine.low %v10502_v28, %v10504_v37 }
 0xa53   : > { %v10516_v16 = vrot.slane %v10509_v34, %v18325_v38 }
 0xa55   : > { %v10523_v0 = vrot.slane %v10516_v16, %v18325_v38 }
 0xa57   : > { %v10603_v44 = vpop.f32.mrb[42].mxu1  ;;  %v10525_v58 = vadd.f32 %v10523_v0, %v10414_v17 }
 0xa58   : > { %v10605_v2 = vpop.f32.mrb[43].mxu1 }
 0xa59   : > { %v10610_v18 = vcombine.low %v10603_v44, %v10605_v2 }
 0xa5b   : > { %v10617_v49 = vrot.slane %v10610_v18, %v18325_v38 }
 0xa5d   : > { %v10624_v11 = vrot.slane %v10617_v49, %v18325_v38 }
 0xa5f   : > { %v10626_v47 = vadd.f32 %v10624_v11, %v10525_v58  ;;  %v10704_v57 = vpop.f32.mrb[44].mxu1 }
 0xa60   : > { %v10706_v21 = vpop.f32.mrb[45].mxu1 }
 0xa61   : > { %v10711_v33 = vcombine.low %v10704_v57, %v10706_v21 }
 0xa63   : > { %v10718_v9 = vrot.slane %v10711_v33, %v18325_v38 }
 0xa65   : > { %v10725_v50 = vrot.slane %v10718_v9, %v18325_v38 }
 0xa67   : > { %v10727_v25 = vadd.f32 %v10725_v50, %v10626_v47  ;;  %v10805_v59 = vpop.f32.mrb[46].mxu1 }
 0xa68   : > { %v10807_v48 = vpop.f32.mrb[47].mxu1 }
 0xa69   : > { %v10812_v14 = vcombine.low %v10805_v59, %v10807_v48 }
 0xa6b   : > { %v10819_v29 = vrot.slane %v10812_v14, %v18325_v38 }
 0xa6d   : > { %v10826_v56 = vrot.slane %v10819_v29, %v18325_v38 }
 0xa6f   : > { %v10828_v41 = vadd.f32 %v10826_v56, %v10727_v25  ;;  %v10917_v13 = vpop.f32.mrb[48].mxu1 }
 0xa70   : > { %v10919_v60 = vpop.f32.mrb[49].mxu1 }
 0xa71   : > { %v10924_v6 = vcombine.low %v10917_v13, %v10919_v60 }
 0xa73   : > { %v10931_v23 = vrot.slane %v10924_v6, %v18325_v38 }
 0xa75   : > { %v10938_v52 = vrot.slane %v10931_v23, %v18325_v38 }
 0xa77   : > { %v10940_v10 = vadd.f32 %v10938_v52, %v10828_v41  ;;  %v11018_v27 = vpop.f32.mrb[50].mxu1 }
 0xa78   : > { %v11020_v12 = vpop.f32.mrb[51].mxu1 }
 0xa79   : > { %v11025_v53 = vcombine.low %v11018_v27, %v11020_v12 }
 0xa7b   : > { %v11032_v24 = vrot.slane %v11025_v53, %v18325_v38 }
 0xa7d   : > { %v11039_v4 = vrot.slane %v11032_v24, %v18325_v38  ;;  %v12079_v24 = vsub.s32 0, %v14781_v19 }
 0xa7f   : > { %v11041_v54 = vadd.f32 %v11039_v4, %v10940_v10  ;;  %v11119_v40 = vpop.f32.mrb[52].mxu1  ;;  %v12083_v4 = vsub.s32 1, %v14781_v19 }
 0xa80   : > { %v11121_v22 = vpop.f32.mrb[53].mxu1 }
 0xa81   : > { %v11126_v45 = vcombine.low %v11119_v40, %v11121_v22  ;;  %v12074_v40 = vld [vmem:[%s319_s20] sm:$0xff]  ;;  %v12075_v22 = vld [vmem:[%s319_s20 + $0x8] sm:$0xff] }
 0xa83   : > { %v11133_v51 = vrot.slane %v11126_v45, %v18325_v38 }
 0xa85   : > { %v11140_v15 = vrot.slane %v11133_v51, %v18325_v38 }
 0xa87   : > { %v11142_v35 = vadd.f32 %v11140_v15, %v11041_v54  ;;  %v11220_v43 = vpop.f32.mrb[54].mxu1 }
 0xa88   : > { %v11222_v7 = vpop.f32.mrb[55].mxu1 }
 0xa89   : > { %v11227_v31 = vcombine.low %v11220_v43, %v11222_v7 }
 0xa8b   : > { %v11234_v63 = vrot.slane %v11227_v31, %v18325_v38 }
 0xa8d   : > { %v11241_v20 = vrot.slane %v11234_v63, %v18325_v38 }
 0xa8f   : > { %v11243_v3 = vadd.f32 %v11241_v20, %v11142_v35  ;;  %v11332_v8 = vpop.f32.mrb[56].mxu1 }
 0xa90   : > { %v11334_v39 = vpop.f32.mrb[57].mxu1 }
 0xa91   : > { %v11339_v42 = vcombine.low %v11332_v8, %v11334_v39 }
 0xa93   : > { %v11346_v30 = vrot.slane %v11339_v42, %v18325_v38 }
 0xa95   : > { %v11353_v46 = vrot.slane %v11346_v30, %v18325_v38 }
 0xa97   : > { %v11355_v32 = vadd.f32 %v11353_v46, %v11243_v3  ;;  %v11433_v62 = vpop.f32.mrb[58].mxu1 }
 0xa98   : > { %v11435_v5 = vpop.f32.mrb[59].mxu1 }
 0xa99   : > { %v11440_v61 = vcombine.low %v11433_v62, %v11435_v5 }
 0xa9b   : > { %v11447_v26 = vrot.slane %v11440_v61, %v18325_v38 }
 0xa9d   : > { %v11454_v55 = vrot.slane %v11447_v26, %v18325_v38 }
 0xa9f   : > { %v11456_v36 = vadd.f32 %v11454_v55, %v11355_v32  ;;  %v11534_v1 = vpop.f32.mrb[60].mxu1 }
 0xaa0   : > { %v11536_v28 = vpop.f32.mrb[61].mxu1 }
 0xaa1   : > { %v11541_v37 = vcombine.low %v11534_v1, %v11536_v28 }
 0xaa3   : > { %v11548_v34 = vrot.slane %v11541_v37, %v18325_v38 }
 0xaa5   : > { %v11555_v16 = vrot.slane %v11548_v34, %v18325_v38 }
 0xaa7   : > { %v11557_v44 = vadd.f32 %v11555_v16, %v11456_v36  ;;  %v11635_v2 = vpop.f32.mrb[62].mxu1 }
 0xaa8   : > { %v11637_v0 = vpop.f32.mrb[63].mxu1 }
 0xaa9   : > { %v11642_v18 = vcombine.low %v11635_v2, %v11637_v0 }
 0xaab   : > { %v11649_v17 = vrot.slane %v11642_v18, %v18325_v38 }
 0xaad   : > { %v11656_v49 = vrot.slane %v11649_v17, %v18325_v38 }
 0xaaf   : > { %v11658_v58 = vadd.f32 %v11656_v49, %v11557_v44  ;;  %v11747_v11 = vpop.f32.mrb[64].mxu1 }
 0xab0   : > { %v11749_v47 = vpop.f32.mrb[65].mxu1 }
 0xab1   : > { %v11754_v57 = vcombine.low %v11747_v11, %v11749_v47 }
 0xab3   : > { %v11761_v21 = vrot.slane %v11754_v57, %v18325_v38 }
 0xab5   : > { %v11768_v33 = vrot.slane %v11761_v21, %v18325_v38 }
 0xab7   : > { %v11770_v9 = vadd.f32 %v11768_v33, %v11658_v58  ;;  %v11848_v50 = vpop.f32.mrb[66].mxu1 }
 0xab8   : > { %v11850_v25 = vpop.f32.mrb[67].mxu1 }
 0xab9   : > { %v11855_v59 = vcombine.low %v11848_v50, %v11850_v25 }
 0xabb   : > { %v11862_v48 = vrot.slane %v11855_v59, %v18325_v38 }
 0xabd   : > { %v11869_v14 = vrot.slane %v11862_v48, %v18325_v38 }
 0xabf   : > { %v11871_v29 = vadd.f32 %v11869_v14, %v11770_v9  ;;  %v11949_v56 = vpop.f32.mrb[68].mxu1 }
 0xac0   : > { %v11951_v41 = vpop.f32.mrb[69].mxu1 }
 0xac1   : > { %v11956_v13 = vcombine.low %v11949_v56, %v11951_v41 }
 0xac3   : > { %v11963_v60 = vrot.slane %v11956_v13, %v18325_v38 }
 0xac5   : > { %v11970_v6 = vrot.slane %v11963_v60, %v18325_v38 }
 0xac7   : > { %v11972_v23 = vadd.f32 %v11970_v6, %v11871_v29  ;;  %v12050_v52 = vpop.f32.mrb[70].mxu1 }
 0xac8   : > { %v12052_v10 = vpop.f32.mrb[71].mxu1 }
 0xac9   : > { %v12057_v27 = vcombine.low %v12050_v52, %v12052_v10 }
 0xacb   : > { %v12064_v12 = vrot.slane %v12057_v27, %v18325_v38 }
 0xacd   : > { %v12071_v53 = vrot.slane %v12064_v12, %v18325_v38 }
 0xacf   : > { %v12073_v54 = vadd.f32 %v12071_v53, %v11972_v23 }
 0xad1   : > { %v12080_v45 = vrot.slane %v12073_v54, %v12079_v24  ;;  %v12084_v51 = vrot.slane %v12073_v54, %v12083_v4 }
 0xad3   : > { %v12087_v15 = vmul.f32 %v12080_v45, %v12074_v40  ;;  %v12088_v35 = vmul.f32 %v12084_v51, %v12075_v22 }
 0xad5   : > { %v12089_v43 = vadd.f32 %v12088_v35, %v12087_v15 }
 0xad7   : > { %12090 = vadd.xlane.f32.xlu0 %v12089_v43 }
 0xb64   : > { %v12091_v7 = vpop.xlane.xlu0 %12090 }
 0xb65   : > { %v12092_v38 = vand.u32 2147483647, %v12091_v7  ;;  %vm12096_vm12 = vcmp.ge.f32.partialorder %v12091_v7, 0.0 }
 0xb67   : > { %v12093_v31 = vsub.f32 0.0, %v12092_v38 }
 0xb69   : > { %v12094_v63 = vmul.f32 1.442695, %v12093_v31 }
 0xb6b   : > { %13668 = vpow2.f32 %v12094_v63 }
 0xb75   : > { %v13669_v20 = vpop.eup %13668 }
 0xb76   : > { %v12097_v3 = vadd.f32 1.0, %v13669_v20 }
 0xb78   : > { %13670 = vrcp.f32 %v12097_v3 }
 0xb82   : > { %v13671_v19 = vpop.eup %13670 }
 0xb83   : > { %v12100_v8 = vmul.f32 %v13671_v19, %v13669_v20 }
 0xb85   : > { %v12101_v39 = vsel %vm12096_vm12, %v13671_v19, %v12100_v8 }
 0xb86   : > { %12102 = vst.msk [vmem:[%s323_s7] sm:$0xff] %vm19083_vm9, %v12101_v39 }
 0xb87 PF: > { %s19084_s11 = sld [smem:[#allocation7_spill]] }
 0xb8d   : > { %s18_s27 = sadd.s32 1, %s19084_s11  }
 0xb8e   : > { %p15_p4 = scmp.ge.s32.totalorder %s18_s27, 4  }
 0xb90   :  { %17 = sbr.rel (!%p15_p4) target bundleno = 5 (0x5), region = 131 }

</bundles_post_ra>
